<compile_context>
chip_gen: v7x
topology: tpu7x:2x2x1
jax: 0.10.0
libtpu: 0.0.40
codegen_flags: <defaults>
</compile_context>

<pallas_src>
from functools import partial

import numpy as np
import jax
import jax.numpy as jnp
from jax.experimental import pallas as pl
from jax.experimental.pallas import tpu as pltpu


BLOCK_ORDER = ("block1", "block3", "block4", "block5")


def block_configs(in_channels):
    """(cin, cout, kernel, stride) per conv, grouped by block (all + ReLU)."""
    return {
        "block1": [
            (in_channels, 16, 3, 1), (16, 16, 3, 1), (16, 32, 3, 2),
            (32, 32, 3, 1), (32, 32, 3, 1), (32, 64, 3, 2),
            (64, 64, 3, 1), (64, 64, 3, 1),
        ],
        "block3": [(64, 128, 3, 2), (128, 128, 3, 1), (128, 128, 3, 1)],
        "block4": [(128, 256, 5, 2), (256, 256, 3, 1), (256, 256, 3, 1)],
        "block5": [(256, 512, 5, 2), (512, 512, 3, 1), (512, 512, 3, 1),
                   (512, 512, 3, 1)],
    }


# ----------------------------- weight packing ----------------------------- #

def build_plan(params, in_channels, height, width):
    """Static per-layer metadata plus packed device inputs.

    Each conv becomes one fused row-Toeplitz matrix of shape
    (K_eff*W*Cin, Wo*Cout):
        T[(t*W + wi)*Cin + ci, ox*Cout + co] = Wgt[ky_t, kx, ci, co]
    with wi = s*ox + kx - pad (only real input columns kept), so the kx taps,
    input channels, column stride AND the surviving tap rows ky_t are all in
    the MXU contraction.  Tap rows that only ever see zero padding are
    dropped (K_eff <= K).  All T's with the same output width are row-
    concatenated into one bf16 HBM buffer; all biases into one f32 row.
    """
    cfgs = []
    t_groups = {}          # out-cols -> list of f32 (rows, cols) pieces
    bias_parts = []
    bias_off = 0
    h, w = height, width
    all_cfgs = block_configs(in_channels)
    for bname in BLOCK_ORDER:
        layers = all_cfgs[bname]
        for li, ((cin, cout, k, s), (wgt, bias)) in enumerate(
                zip(layers, params[bname])):
            p = (k - 1) // 2
            hp, wp = h + 2 * p, w + 2 * p
            ho = (hp - k) // s + 1
            wo = (wp - k) // s + 1
            keep_ky = tuple(
                ky for ky in range(k)
                if any(p <= s * oy + ky < p + h for oy in range(ho)))
            if s == 2 and ho > 1:
                assert hp % 2 == 0  # row-phase-split layout relies on this

            wnp = np.asarray(wgt, np.float32)             # (k, k, cin, cout)
            T = np.zeros((len(keep_ky), w, cin, wo, cout), np.float32)
            for t, ky in enumerate(keep_ky):
                for ox in range(wo):
                    for kx in range(k):
                        wi = s * ox + kx - p              # real input column
                        if 0 <= wi < w:
                            T[t, wi, :, ox, :] = wnp[ky, kx]
            rows, cols = len(keep_ky) * w * cin, wo * cout
            grp = t_groups.setdefault(cols, [])
            row_off = sum(piece.shape[0] for piece in grp)
            grp.append(T.reshape(rows, cols))
            bias_parts.append(np.tile(np.asarray(bias, np.float32), wo)[None, :])

            cfgs.append(dict(cin=cin, cout=cout, k=k, s=s, p=p, h=h, w=w,
                             hp=hp, ho=ho, wo=wo, keep_ky=keep_ky,
                             rows=rows, cols=cols, row_off=row_off,
                             bias_off=bias_off,
                             last_of_block=(li == len(layers) - 1)))
            bias_off += cols
            h, w = ho, wo

    widths = sorted(t_groups)
    for c in cfgs:
        c["grp"] = widths.index(c["cols"])
    t_bufs = tuple(jnp.asarray(np.concatenate(t_groups[cw], axis=0),
                               jnp.bfloat16) for cw in widths)
    max_rows = tuple(max(piece.shape[0] for piece in t_groups[cw])
                     for cw in widths)
    bias_all = jnp.asarray(np.concatenate(bias_parts, axis=1), jnp.float32)
    return cfgs, widths, max_rows, t_bufs, bias_all


# ------------------------------ Pallas kernel ------------------------------ #

def _encoder_kernel(*refs, cfgs, n_widths, n_out):
    """All 18 Conv2d+ReLU layers.  Activations flow as (N, H, W*C) f32 values;
    layer i+1's weights are DMA'd HBM->VMEM while layer i's matmul runs."""
    n_layers = len(cfgs)
    x_ref = refs[0]
    bias_ref = refs[1]
    t_hbm = refs[2:2 + n_widths]
    out_refs = refs[2 + n_widths:2 + n_widths + n_out]
    scratch = refs[2 + n_widths + n_out:]
    wbufs = scratch[:n_widths]
    sem = scratch[n_widths]

    N = x_ref.shape[0]

    def weight_copy(i, slot):
        c = cfgs[i]
        return pltpu.make_async_copy(
            t_hbm[c["grp"]].at[c["row_off"]:c["row_off"] + c["rows"], :],
            wbufs[c["grp"]].at[slot, 0:c["rows"], :],
            sem.at[slot])

    # Prime the pipeline with layer 0's weights.
    copies = [None] * n_layers
    copies[0] = weight_copy(0, 0)
    copies[0].start()

    x = x_ref[...]                                        # (N, H, W*Cin) f32
    out_i = 0
    for i, c in enumerate(cfgs):
        slot = i % 2
        copies[i].wait()
        if i + 1 < n_layers:                              # prefetch next layer
            copies[i + 1] = weight_copy(i + 1, (i + 1) % 2)
            copies[i + 1].start()

        h, wc = c["h"], c["w"] * c["cin"]
        s, p, hp = c["s"], c["p"], c["hp"]
        ho, wo, cout = c["ho"], c["wo"], c["cout"]
        keep = c["keep_ky"]

        # ---- fused LHS: (N*Ho, K_eff*W*Cin), tap-row blocks along K -------
        if ho == 1:
            # Every surviving tap row is a real input row: read it directly.
            lhs = jnp.concatenate([x[:, ky - p, :] for ky in keep], axis=-1)
        elif s == 1:
            zp = jnp.zeros((N, p, wc), jnp.float32)
            xpad = jnp.concatenate([zp, x, zp], axis=1)   # (N, Hp, W*Cin)
            lhs = jnp.concatenate(
                [xpad[:, ky:ky + ho, :] for ky in keep],
                axis=-1).reshape(N * ho, len(keep) * wc)
        else:
            # stride 2: phase-split padded rows (even padded rows first, then
            # odd) so each tap row becomes one contiguous window.  Built as a
            # register value -- no scratch buffer, no masked per-row stores.
            hh = hp // 2
            zrow = jnp.zeros((N, 1, wc), jnp.float32)
            rows = [None] * hp
            for r in range(hp):
                pos = (r % 2) * hh + r // 2
                rows[pos] = (x[:, r - p:r - p + 1, :]
                             if p <= r < p + h else zrow)
            xsplit = jnp.concatenate(rows, axis=1)        # (N, Hp, W*Cin)
            wins = []
            for ky in keep:
                base = (ky % 2) * hh + ky // 2
                wins.append(xsplit[:, base:base + ho, :])
            lhs = jnp.concatenate(wins, axis=-1).reshape(N * ho, len(keep) * wc)

        # ---- one MXU matmul per layer: bf16 x bf16 -> f32 accumulate ------
        T = wbufs[c["grp"]][slot, 0:c["rows"], :]         # (K_eff*W*Cin, Wo*Cout)
        acc = jnp.dot(lhs.astype(jnp.bfloat16), T,
                      preferred_element_type=jnp.float32)
        b = bias_ref[:, c["bias_off"]:c["bias_off"] + c["cols"]]   # (1, Wo*Cout)
        y = jnp.maximum(acc + b, 0.0)                     # bias + ReLU (f32)
        x = y.reshape(N, ho, wo * cout)                   # next layer's input

        if c["last_of_block"]:
            out_refs[out_i][...] = x
            out_i += 1


# ------------------------------ public wrapper ----------------------------- #

def cnn18_encoder_forward(x_nchw, params):
    """Matches CNN18Encoder.forward: returns [block1, block3, block4, block5]
    feature maps, each NCHW (f32)."""
    # TODO(synk): for repeated calls, hoist build_plan / packed device arrays
    # out of the hot path so weights are packed & uploaded once, not per call.
    N, Cin, H, W = x_nchw.shape
    cfgs, widths, max_rows, t_bufs, bias_all = build_plan(params, Cin, H, W)

    out_shapes, out_meta = [], []
    for c in cfgs:
        if c["last_of_block"]:
            out_shapes.append(jax.ShapeDtypeStruct(
                (N, c["ho"], c["wo"] * c["cout"]), jnp.float32))
            out_meta.append((c["ho"], c["wo"], c["cout"]))

    # NCHW -> NHWC -> row-flattened (N, H, W*Cin): the lane-dense activation
    # layout used through the whole fused network.
    x_rows = jnp.transpose(x_nchw, (0, 2, 3, 1)).reshape(N, H, W * Cin)

    vmem = pl.BlockSpec(memory_space=pltpu.MemorySpace.VMEM)
    hbm = pl.BlockSpec(memory_space=pl.ANY)   # weights stay in HBM, streamed
    kernel = partial(_encoder_kernel, cfgs=cfgs, n_widths=len(widths),
                     n_out=len(out_shapes))

    scratch_shapes = [pltpu.VMEM((2, mr, cw), jnp.bfloat16)     # 2-slot weight buffers
                      for mr, cw in zip(max_rows, widths)]
    scratch_shapes.append(pltpu.SemaphoreType.DMA((2,)))

    outs = pl.pallas_call(
        kernel,
        out_shape=tuple(out_shapes),
        in_specs=[vmem, vmem] + [hbm] * len(t_bufs),
        out_specs=tuple(vmem for _ in out_shapes),
        scratch_shapes=scratch_shapes,
        compiler_params=pltpu.CompilerParams(
            vmem_limit_bytes=32 * 1024 * 1024),   # streamed weights: 32 MiB is ample
    )(x_rows, bias_all, *t_bufs)

    feats = []
    for o, (ho, wo, cout) in zip(outs, out_meta):
        feats.append(jnp.transpose(o.reshape(N, ho, wo, cout), (0, 3, 1, 2)))
    return feats


# --------------------------- reference & params ---------------------------- #

def init_params(key, in_channels):
    """Deterministic synthetic init.  Kaiming-uniform weights keep activation
    magnitudes O(1) across the 18 layers; bias like PyTorch's default."""
    params = {}
    for bname, layers in block_configs(in_channels).items():
        lst = []
        for (cin, cout, k, _s) in layers:
            key, kw, kb = jax.random.split(key, 3)
            fan_in = float(cin * k * k)
            wb = (6.0 / fan_in) ** 0.5
            bb = 1.0 / fan_in ** 0.5
            wgt = jax.random.uniform(kw, (k, k, cin, cout), jnp.float32, -wb, wb)
            bias = jax.random.uniform(kb, (cout,), jnp.float32, -bb, bb)
            lst.append((wgt, bias))
        params[bname] = lst
    return params


def reference_forward(x_nchw, params, in_channels, emulate_bf16=True):
    """Plain-XLA reference.  With emulate_bf16=True it applies the same bf16
    rounding to weights and layer inputs as the kernel (f32 accumulation on
    both sides), so a tight tolerance validates the packing/indexing."""
    if emulate_bf16:
        cast = lambda a: a.astype(jnp.bfloat16).astype(jnp.float32)
    else:
        cast = lambda a: a
    x = jnp.transpose(x_nchw, (0, 2, 3, 1))
    feats = []
    for bname in BLOCK_ORDER:
        for (cin, cout, k, s), (wgt, bias) in zip(
                block_configs(in_channels)[bname], params[bname]):
            p = (k - 1) // 2
            x = jax.lax.conv_general_dilated(
                cast(x), cast(wgt), window_strides=(s, s),
                padding=[(p, p), (p, p)],
                dimension_numbers=("NHWC", "HWIO", "NHWC"),
                precision=jax.lax.Precision.HIGHEST)
            x = jnp.maximum(x + bias[None, None, None, :], 0.0)
        feats.append(jnp.transpose(x, (0, 3, 1, 2)))
    return feats


# ----------------------------------- main ----------------------------------- #

if __name__ == "__main__":
    key = jax.random.PRNGKey(0)
    k_data, k_params = jax.random.split(key)

    batch, in_channels, spatial = 2, 4, 16
    x = jax.random.normal(k_data, (batch, in_channels, spatial, spatial),
                          jnp.float32)
    params = init_params(k_params, in_channels)

    feats = jax.block_until_ready(cnn18_encoder_forward(x, params))

    # Expected (NCHW): (2,64,4,4), (2,128,2,2), (2,256,1,1), (2,512,1,1)
    assert feats[0].shape == (batch, 64, 4, 4)
    assert feats[1].shape == (batch, 128, 2, 2)
    assert feats[2].shape == (batch, 256, 1, 1)
    assert feats[3].shape == (batch, 512, 1, 1)

    # Tight numerical check against a reference that applies identical bf16
    # rounding (kernel and reference both accumulate in f32), so this catches
    # packing / indexing bugs rather than the intended precision trade-off.
    ref = jax.block_until_ready(
        reference_forward(x, params, in_channels, emulate_bf16=True))
    for f, r in zip(feats, ref):
        np.testing.assert_allclose(np.asarray(f), np.asarray(r),
                                   rtol=5e-3, atol=5e-3)

    print("KERNEL_OK")
</pallas_src>

<mosaic_0001>
module attributes {stable_mosaic.version = 11 : i64} {
  func.func @_encoder_kernel(%arg0: memref<2x16x64xf32, #tpu.memory_space<vmem>>, %arg1: memref<1x5632xf32, #tpu.memory_space<vmem>>, %arg2: memref<8896x256xbf16, #tpu.memory_space<any>>, %arg3: memref<1792x512xbf16, #tpu.memory_space<any>>, %arg4: memref<2x4x256xf32, #tpu.memory_space<vmem>>, %arg5: memref<2x2x256xf32, #tpu.memory_space<vmem>>, %arg6: memref<2x1x256xf32, #tpu.memory_space<vmem>>, %arg7: memref<2x1x512xf32, #tpu.memory_space<vmem>>, %arg8: memref<2x768x256xbf16, #tpu.memory_space<vmem>>, %arg9: memref<2x512x512xbf16, #tpu.memory_space<vmem>>, %arg10: memref<2x!tpu.dma_semaphore, #tpu.memory_space<semaphore_mem>>) attributes {dimension_semantics = [], scalar_prefetch = 0 : i64, scratch_operands = 3 : i64, tpu.core_type = #tpu.core_type<tc>} {
    %c0_i32 = arith.constant 0 : i32
    %c0_i32_0 = arith.constant 0 : i32
    %c0_i32_1 = arith.constant 0 : i32
    %c0_i32_2 = arith.constant 0 : i32
    %0 = tpu.memref_slice %arg2[%c0_i32_1, %c0_i32_2] : memref<8896x256xbf16, #tpu.memory_space<any>> -> memref<192x256xbf16, #tpu.memory_space<any>>
    %c0_i32_3 = arith.constant 0 : i32
    %c0_i32_4 = arith.constant 0 : i32
    %1 = tpu.memref_slice %arg8[%c0_i32, %c0_i32_3, %c0_i32_4] : memref<2x768x256xbf16, #tpu.memory_space<vmem>> -> memref<1x192x256xbf16, #tpu.memory_space<vmem>>
    %2 = tpu.memref_squeeze %1 : memref<1x192x256xbf16, #tpu.memory_space<vmem>> -> memref<192x256xbf16, #tpu.memory_space<vmem>>
    %3 = tpu.memref_slice %arg10[%c0_i32_0] : memref<2x!tpu.dma_semaphore, #tpu.memory_space<semaphore_mem>> -> memref<1x!tpu.dma_semaphore, #tpu.memory_space<semaphore_mem>>
    %4 = tpu.memref_squeeze %3 : memref<1x!tpu.dma_semaphore, #tpu.memory_space<semaphore_mem>> -> memref<!tpu.dma_semaphore, #tpu.memory_space<semaphore_mem>>
    tpu.enqueue_dma source(%0 : memref<192x256xbf16, #tpu.memory_space<any>>) target(%2 : memref<192x256xbf16, #tpu.memory_space<vmem>>) target_semaphore(%4 : memref<!tpu.dma_semaphore, #tpu.memory_space<semaphore_mem>>)
    %c0 = arith.constant 0 : index
    %c0_5 = arith.constant 0 : index
    %c0_6 = arith.constant 0 : index
    %5 = vector.load %arg0[%c0, %c0_5, %c0_6] : memref<2x16x64xf32, #tpu.memory_space<vmem>>, vector<2x16x64xf32>
    %c0_i32_7 = arith.constant 0 : i32
    %c0_i32_8 = arith.constant 0 : i32
    %c0_i32_9 = arith.constant 0 : i32
    %c0_i32_10 = arith.constant 0 : i32
    %6 = tpu.memref_slice %arg2[%c0_i32_9, %c0_i32_10] : memref<8896x256xbf16, #tpu.memory_space<any>> -> memref<192x256xbf16, #tpu.memory_space<any>>
    %c0_i32_11 = arith.constant 0 : i32
    %c0_i32_12 = arith.constant 0 : i32
    %7 = tpu.memref_slice %arg8[%c0_i32_7, %c0_i32_11, %c0_i32_12] : memref<2x768x256xbf16, #tpu.memory_space<vmem>> -> memref<1x192x256xbf16, #tpu.memory_space<vmem>>
    %8 = tpu.memref_squeeze %7 : memref<1x192x256xbf16, #tpu.memory_space<vmem>> -> memref<192x256xbf16, #tpu.memory_space<vmem>>
    %9 = tpu.memref_slice %arg10[%c0_i32_8] : memref<2x!tpu.dma_semaphore, #tpu.memory_space<semaphore_mem>> -> memref<1x!tpu.dma_semaphore, #tpu.memory_space<semaphore_mem>>
    %10 = tpu.memref_squeeze %9 : memref<1x!tpu.dma_semaphore, #tpu.memory_space<semaphore_mem>> -> memref<!tpu.dma_semaphore, #tpu.memory_space<semaphore_mem>>
    tpu.wait_dma2 semaphore(%10 : memref<!tpu.dma_semaphore, #tpu.memory_space<semaphore_mem>>) src(%6 : memref<192x256xbf16, #tpu.memory_space<any>>) dst(%8 : memref<192x256xbf16, #tpu.memory_space<vmem>>)
    %c1_i32 = arith.constant 1 : i32
    %c1_i32_13 = arith.constant 1 : i32
    %c192_i32 = arith.constant 192 : i32
    %c0_i32_14 = arith.constant 0 : i32
    %11 = tpu.memref_slice %arg2[%c192_i32, %c0_i32_14] : memref<8896x256xbf16, #tpu.memory_space<any>> -> memref<768x256xbf16, #tpu.memory_space<any>>
    %c0_i32_15 = arith.constant 0 : i32
    %c0_i32_16 = arith.constant 0 : i32
    %12 = tpu.memref_slice %arg8[%c1_i32, %c0_i32_15, %c0_i32_16] : memref<2x768x256xbf16, #tpu.memory_space<vmem>> -> memref<1x768x256xbf16, #tpu.memory_space<vmem>>
    %13 = tpu.memref_squeeze %12 : memref<1x768x256xbf16, #tpu.memory_space<vmem>> -> memref<768x256xbf16, #tpu.memory_space<vmem>>
    %14 = tpu.memref_slice %arg10[%c1_i32_13] : memref<2x!tpu.dma_semaphore, #tpu.memory_space<semaphore_mem>> -> memref<1x!tpu.dma_semaphore, #tpu.memory_space<semaphore_mem>>
    %15 = tpu.memref_squeeze %14 : memref<1x!tpu.dma_semaphore, #tpu.memory_space<semaphore_mem>> -> memref<!tpu.dma_semaphore, #tpu.memory_space<semaphore_mem>>
    tpu.enqueue_dma source(%11 : memref<768x256xbf16, #tpu.memory_space<any>>) target(%13 : memref<768x256xbf16, #tpu.memory_space<vmem>>) target_semaphore(%15 : memref<!tpu.dma_semaphore, #tpu.memory_space<semaphore_mem>>)
    %cst = arith.constant 0.000000e+00 : f32
    %16 = vector.broadcast %cst : f32 to vector<2x1x64xf32>
    %17 = tpu.concatenate %16, %5, %16 in 1 : vector<2x1x64xf32>, vector<2x16x64xf32>, vector<2x1x64xf32> -> vector<2x18x64xf32>
    %18 = vector.extract_strided_slice %17 {offsets = [0, 0, 0], sizes = [2, 16, 64], strides = [1, 1, 1]} : vector<2x18x64xf32> to vector<2x16x64xf32>
    %19 = vector.extract_strided_slice %17 {offsets = [0, 1, 0], sizes = [2, 16, 64], strides = [1, 1, 1]} : vector<2x18x64xf32> to vector<2x16x64xf32>
    %20 = vector.extract_strided_slice %17 {offsets = [0, 2, 0], sizes = [2, 16, 64], strides = [1, 1, 1]} : vector<2x18x64xf32> to vector<2x16x64xf32>
    %21 = tpu.concatenate %18, %19, %20 in 2 : vector<2x16x64xf32>, vector<2x16x64xf32>, vector<2x16x64xf32> -> vector<2x16x192xf32>
    %22 = vector.shape_cast %21 : vector<2x16x192xf32> to vector<32x192xf32>
    %c0_17 = arith.constant 0 : index
    %c0_18 = arith.constant 0 : index
    %c0_19 = arith.constant 0 : index
    %23 = vector.load %arg8[%c0_17, %c0_18, %c0_19] : memref<2x768x256xbf16, #tpu.memory_space<vmem>>, vector<1x192x256xbf16>
    %24 = vector.shape_cast %23 : vector<1x192x256xbf16> to vector<192x256xbf16>
    %25 = arith.truncf %22 : vector<32x192xf32> to vector<32x192xbf16>
    %cst_20 = arith.constant dense<0.000000e+00> : vector<32x256xf32>
    %26 = tpu.matmul %25, %24, %cst_20 {dimension_numbers = #tpu.dot_dimension_numbers<[1], [0], [0], [1], [0, 0, 1, 1], [], []>} : vector<32x192xbf16>, vector<192x256xbf16>, vector<32x256xf32> -> vector<32x256xf32>
    %c0_21 = arith.constant 0 : index
    %c0_22 = arith.constant 0 : index
    %27 = vector.load %arg1[%c0_21, %c0_22] : memref<1x5632xf32, #tpu.memory_space<vmem>>, vector<1x256xf32>
    %28 = vector.broadcast %27 : vector<1x256xf32> to vector<32x256xf32>
    %29 = arith.addf %26, %28 : vector<32x256xf32>
    %cst_23 = arith.constant 0.000000e+00 : f32
    %30 = vector.broadcast %cst_23 : f32 to vector<32x256xf32>
    %31 = arith.maximumf %29, %30 : vector<32x256xf32>
    %32 = vector.shape_cast %31 : vector<32x256xf32> to vector<2x16x256xf32>
    %c1_i32_24 = arith.constant 1 : i32
    %c1_i32_25 = arith.constant 1 : i32
    %c192_i32_26 = arith.constant 192 : i32
    %c0_i32_27 = arith.constant 0 : i32
    %33 = tpu.memref_slice %arg2[%c192_i32_26, %c0_i32_27] : memref<8896x256xbf16, #tpu.memory_space<any>> -> memref<768x256xbf16, #tpu.memory_space<any>>
    %c0_i32_28 = arith.constant 0 : i32
    %c0_i32_29 = arith.constant 0 : i32
    %34 = tpu.memref_slice %arg8[%c1_i32_24, %c0_i32_28, %c0_i32_29] : memref<2x768x256xbf16, #tpu.memory_space<vmem>> -> memref<1x768x256xbf16, #tpu.memory_space<vmem>>
    %35 = tpu.memref_squeeze %34 : memref<1x768x256xbf16, #tpu.memory_space<vmem>> -> memref<768x256xbf16, #tpu.memory_space<vmem>>
    %36 = tpu.memref_slice %arg10[%c1_i32_25] : memref<2x!tpu.dma_semaphore, #tpu.memory_space<semaphore_mem>> -> memref<1x!tpu.dma_semaphore, #tpu.memory_space<semaphore_mem>>
    %37 = tpu.memref_squeeze %36 : memref<1x!tpu.dma_semaphore, #tpu.memory_space<semaphore_mem>> -> memref<!tpu.dma_semaphore, #tpu.memory_space<semaphore_mem>>
    tpu.wait_dma2 semaphore(%37 : memref<!tpu.dma_semaphore, #tpu.memory_space<semaphore_mem>>) src(%33 : memref<768x256xbf16, #tpu.memory_space<any>>) dst(%35 : memref<768x256xbf16, #tpu.memory_space<vmem>>)
    %c0_i32_30 = arith.constant 0 : i32
    %c0_i32_31 = arith.constant 0 : i32
    %c960_i32 = arith.constant 960 : i32
    %c0_i32_32 = arith.constant 0 : i32
    %38 = tpu.memref_slice %arg2[%c960_i32, %c0_i32_32] : memref<8896x256xbf16, #tpu.memory_space<any>> -> memref<768x256xbf16, #tpu.memory_space<any>>
    %c0_i32_33 = arith.constant 0 : i32
    %c0_i32_34 = arith.constant 0 : i32
    %39 = tpu.memref_slice %arg8[%c0_i32_30, %c0_i32_33, %c0_i32_34] : memref<2x768x256xbf16, #tpu.memory_space<vmem>> -> memref<1x768x256xbf16, #tpu.memory_space<vmem>>
    %40 = tpu.memref_squeeze %39 : memref<1x768x256xbf16, #tpu.memory_space<vmem>> -> memref<768x256xbf16, #tpu.memory_space<vmem>>
    %41 = tpu.memref_slice %arg10[%c0_i32_31] : memref<2x!tpu.dma_semaphore, #tpu.memory_space<semaphore_mem>> -> memref<1x!tpu.dma_semaphore, #tpu.memory_space<semaphore_mem>>
    %42 = tpu.memref_squeeze %41 : memref<1x!tpu.dma_semaphore, #tpu.memory_space<semaphore_mem>> -> memref<!tpu.dma_semaphore, #tpu.memory_space<semaphore_mem>>
    tpu.enqueue_dma source(%38 : memref<768x256xbf16, #tpu.memory_space<any>>) target(%40 : memref<768x256xbf16, #tpu.memory_space<vmem>>) target_semaphore(%42 : memref<!tpu.dma_semaphore, #tpu.memory_space<semaphore_mem>>)
    %cst_35 = arith.constant 0.000000e+00 : f32
    %43 = vector.broadcast %cst_35 : f32 to vector<2x1x256xf32>
    %44 = tpu.concatenate %43, %32, %43 in 1 : vector<2x1x256xf32>, vector<2x16x256xf32>, vector<2x1x256xf32> -> vector<2x18x256xf32>
    %45 = vector.extract_strided_slice %44 {offsets = [0, 0, 0], sizes = [2, 16, 256], strides = [1, 1, 1]} : vector<2x18x256xf32> to vector<2x16x256xf32>
    %46 = vector.extract_strided_slice %44 {offsets = [0, 1, 0], sizes = [2, 16, 256], strides = [1, 1, 1]} : vector<2x18x256xf32> to vector<2x16x256xf32>
    %47 = vector.extract_strided_slice %44 {offsets = [0, 2, 0], sizes = [2, 16, 256], strides = [1, 1, 1]} : vector<2x18x256xf32> to vector<2x16x256xf32>
    %48 = tpu.concatenate %45, %46, %47 in 2 : vector<2x16x256xf32>, vector<2x16x256xf32>, vector<2x16x256xf32> -> vector<2x16x768xf32>
    %49 = vector.shape_cast %48 : vector<2x16x768xf32> to vector<32x768xf32>
    %c1 = arith.constant 1 : index
    %c0_36 = arith.constant 0 : index
    %c0_37 = arith.constant 0 : index
    %50 = vector.load %arg8[%c1, %c0_36, %c0_37] : memref<2x768x256xbf16, #tpu.memory_space<vmem>>, vector<1x768x256xbf16>
    %51 = vector.shape_cast %50 : vector<1x768x256xbf16> to vector<768x256xbf16>
    %52 = arith.truncf %49 : vector<32x768xf32> to vector<32x768xbf16>
    %cst_38 = arith.constant dense<0.000000e+00> : vector<32x256xf32>
    %53 = tpu.matmul %52, %51, %cst_38 {dimension_numbers = #tpu.dot_dimension_numbers<[1], [0], [0], [1], [0, 0, 1, 1], [], []>} : vector<32x768xbf16>, vector<768x256xbf16>, vector<32x256xf32> -> vector<32x256xf32>
    %c0_39 = arith.constant 0 : index
    %c256 = arith.constant 256 : index
    %54 = vector.load %arg1[%c0_39, %c256] : memref<1x5632xf32, #tpu.memory_space<vmem>>, vector<1x256xf32>
    %55 = vector.broadcast %54 : vector<1x256xf32> to vector<32x256xf32>
    %56 = arith.addf %53, %55 : vector<32x256xf32>
    %cst_40 = arith.constant 0.000000e+00 : f32
    %57 = vector.broadcast %cst_40 : f32 to vector<32x256xf32>
    %58 = arith.maximumf %56, %57 : vector<32x256xf32>
    %59 = vector.shape_cast %58 : vector<32x256xf32> to vector<2x16x256xf32>
    %c0_i32_41 = arith.constant 0 : i32
    %c0_i32_42 = arith.constant 0 : i32
    %c960_i32_43 = arith.constant 960 : i32
    %c0_i32_44 = arith.constant 0 : i32
    %60 = tpu.memref_slice %arg2[%c960_i32_43, %c0_i32_44] : memref<8896x256xbf16, #tpu.memory_space<any>> -> memref<768x256xbf16, #tpu.memory_space<any>>
    %c0_i32_45 = arith.constant 0 : i32
    %c0_i32_46 = arith.constant 0 : i32
    %61 = tpu.memref_slice %arg8[%c0_i32_41, %c0_i32_45, %c0_i32_46] : memref<2x768x256xbf16, #tpu.memory_space<vmem>> -> memref<1x768x256xbf16, #tpu.memory_space<vmem>>
    %62 = tpu.memref_squeeze %61 : memref<1x768x256xbf16, #tpu.memory_space<vmem>> -> memref<768x256xbf16, #tpu.memory_space<vmem>>
    %63 = tpu.memref_slice %arg10[%c0_i32_42] : memref<2x!tpu.dma_semaphore, #tpu.memory_space<semaphore_mem>> -> memref<1x!tpu.dma_semaphore, #tpu.memory_space<semaphore_mem>>
    %64 = tpu.memref_squeeze %63 : memref<1x!tpu.dma_semaphore, #tpu.memory_space<semaphore_mem>> -> memref<!tpu.dma_semaphore, #tpu.memory_space<semaphore_mem>>
    tpu.wait_dma2 semaphore(%64 : memref<!tpu.dma_semaphore, #tpu.memory_space<semaphore_mem>>) src(%60 : memref<768x256xbf16, #tpu.memory_space<any>>) dst(%62 : memref<768x256xbf16, #tpu.memory_space<vmem>>)
    %c1_i32_47 = arith.constant 1 : i32
    %c1_i32_48 = arith.constant 1 : i32
    %c1728_i32 = arith.constant 1728 : i32
    %c0_i32_49 = arith.constant 0 : i32
    %65 = tpu.memref_slice %arg2[%c1728_i32, %c0_i32_49] : memref<8896x256xbf16, #tpu.memory_space<any>> -> memref<768x256xbf16, #tpu.memory_space<any>>
    %c0_i32_50 = arith.constant 0 : i32
    %c0_i32_51 = arith.constant 0 : i32
    %66 = tpu.memref_slice %arg8[%c1_i32_47, %c0_i32_50, %c0_i32_51] : memref<2x768x256xbf16, #tpu.memory_space<vmem>> -> memref<1x768x256xbf16, #tpu.memory_space<vmem>>
    %67 = tpu.memref_squeeze %66 : memref<1x768x256xbf16, #tpu.memory_space<vmem>> -> memref<768x256xbf16, #tpu.memory_space<vmem>>
    %68 = tpu.memref_slice %arg10[%c1_i32_48] : memref<2x!tpu.dma_semaphore, #tpu.memory_space<semaphore_mem>> -> memref<1x!tpu.dma_semaphore, #tpu.memory_space<semaphore_mem>>
    %69 = tpu.memref_squeeze %68 : memref<1x!tpu.dma_semaphore, #tpu.memory_space<semaphore_mem>> -> memref<!tpu.dma_semaphore, #tpu.memory_space<semaphore_mem>>
    tpu.enqueue_dma source(%65 : memref<768x256xbf16, #tpu.memory_space<any>>) target(%67 : memref<768x256xbf16, #tpu.memory_space<vmem>>) target_semaphore(%69 : memref<!tpu.dma_semaphore, #tpu.memory_space<semaphore_mem>>)
    %cst_52 = arith.constant 0.000000e+00 : f32
    %70 = vector.broadcast %cst_52 : f32 to vector<2x1x256xf32>
    %71 = vector.extract_strided_slice %59 {offsets = [0, 0, 0], sizes = [2, 1, 256], strides = [1, 1, 1]} : vector<2x16x256xf32> to vector<2x1x256xf32>
    %72 = vector.extract_strided_slice %59 {offsets = [0, 1, 0], sizes = [2, 1, 256], strides = [1, 1, 1]} : vector<2x16x256xf32> to vector<2x1x256xf32>
    %73 = vector.extract_strided_slice %59 {offsets = [0, 2, 0], sizes = [2, 1, 256], strides = [1, 1, 1]} : vector<2x16x256xf32> to vector<2x1x256xf32>
    %74 = vector.extract_strided_slice %59 {offsets = [0, 3, 0], sizes = [2, 1, 256], strides = [1, 1, 1]} : vector<2x16x256xf32> to vector<2x1x256xf32>
    %75 = vector.extract_strided_slice %59 {offsets = [0, 4, 0], sizes = [2, 1, 256], strides = [1, 1, 1]} : vector<2x16x256xf32> to vector<2x1x256xf32>
    %76 = vector.extract_strided_slice %59 {offsets = [0, 5, 0], sizes = [2, 1, 256], strides = [1, 1, 1]} : vector<2x16x256xf32> to vector<2x1x256xf32>
    %77 = vector.extract_strided_slice %59 {offsets = [0, 6, 0], sizes = [2, 1, 256], strides = [1, 1, 1]} : vector<2x16x256xf32> to vector<2x1x256xf32>
    %78 = vector.extract_strided_slice %59 {offsets = [0, 7, 0], sizes = [2, 1, 256], strides = [1, 1, 1]} : vector<2x16x256xf32> to vector<2x1x256xf32>
    %79 = vector.extract_strided_slice %59 {offsets = [0, 8, 0], sizes = [2, 1, 256], strides = [1, 1, 1]} : vector<2x16x256xf32> to vector<2x1x256xf32>
    %80 = vector.extract_strided_slice %59 {offsets = [0, 9, 0], sizes = [2, 1, 256], strides = [1, 1, 1]} : vector<2x16x256xf32> to vector<2x1x256xf32>
    %81 = vector.extract_strided_slice %59 {offsets = [0, 10, 0], sizes = [2, 1, 256], strides = [1, 1, 1]} : vector<2x16x256xf32> to vector<2x1x256xf32>
    %82 = vector.extract_strided_slice %59 {offsets = [0, 11, 0], sizes = [2, 1, 256], strides = [1, 1, 1]} : vector<2x16x256xf32> to vector<2x1x256xf32>
    %83 = vector.extract_strided_slice %59 {offsets = [0, 12, 0], sizes = [2, 1, 256], strides = [1, 1, 1]} : vector<2x16x256xf32> to vector<2x1x256xf32>
    %84 = vector.extract_strided_slice %59 {offsets = [0, 13, 0], sizes = [2, 1, 256], strides = [1, 1, 1]} : vector<2x16x256xf32> to vector<2x1x256xf32>
    %85 = vector.extract_strided_slice %59 {offsets = [0, 14, 0], sizes = [2, 1, 256], strides = [1, 1, 1]} : vector<2x16x256xf32> to vector<2x1x256xf32>
    %86 = vector.extract_strided_slice %59 {offsets = [0, 15, 0], sizes = [2, 1, 256], strides = [1, 1, 1]} : vector<2x16x256xf32> to vector<2x1x256xf32>
    %87 = tpu.concatenate %70, %72, %74, %76, %78, %80, %82, %84, %86, %71, %73, %75, %77, %79, %81, %83 in 1 : vector<2x1x256xf32>, vector<2x1x256xf32>, vector<2x1x256xf32>, vector<2x1x256xf32>, vector<2x1x256xf32>, vector<2x1x256xf32>, vector<2x1x256xf32>, vector<2x1x256xf32>, vector<2x1x256xf32>, vector<2x1x256xf32>, vector<2x1x256xf32>, vector<2x1x256xf32>, vector<2x1x256xf32>, vector<2x1x256xf32>, vector<2x1x256xf32>, vector<2x1x256xf32> -> vector<2x16x256xf32>
    %88 = tpu.concatenate %85, %70 in 1 : vector<2x1x256xf32>, vector<2x1x256xf32> -> vector<2x2x256xf32>
    %89 = tpu.concatenate %87, %88 in 1 : vector<2x16x256xf32>, vector<2x2x256xf32> -> vector<2x18x256xf32>
    %90 = vector.extract_strided_slice %89 {offsets = [0, 0, 0], sizes = [2, 8, 256], strides = [1, 1, 1]} : vector<2x18x256xf32> to vector<2x8x256xf32>
    %91 = vector.extract_strided_slice %89 {offsets = [0, 9, 0], sizes = [2, 8, 256], strides = [1, 1, 1]} : vector<2x18x256xf32> to vector<2x8x256xf32>
    %92 = vector.extract_strided_slice %89 {offsets = [0, 1, 0], sizes = [2, 8, 256], strides = [1, 1, 1]} : vector<2x18x256xf32> to vector<2x8x256xf32>
    %93 = tpu.concatenate %90, %91, %92 in 2 : vector<2x8x256xf32>, vector<2x8x256xf32>, vector<2x8x256xf32> -> vector<2x8x768xf32>
    %94 = vector.shape_cast %93 : vector<2x8x768xf32> to vector<16x768xf32>
    %c0_53 = arith.constant 0 : index
    %c0_54 = arith.constant 0 : index
    %c0_55 = arith.constant 0 : index
    %95 = vector.load %arg8[%c0_53, %c0_54, %c0_55] : memref<2x768x256xbf16, #tpu.memory_space<vmem>>, vector<1x768x256xbf16>
    %96 = vector.shape_cast %95 : vector<1x768x256xbf16> to vector<768x256xbf16>
    %97 = arith.truncf %94 : vector<16x768xf32> to vector<16x768xbf16>
    %cst_56 = arith.constant dense<0.000000e+00> : vector<16x256xf32>
    %98 = tpu.matmul %97, %96, %cst_56 {dimension_numbers = #tpu.dot_dimension_numbers<[1], [0], [0], [1], [0, 0, 1, 1], [], []>} : vector<16x768xbf16>, vector<768x256xbf16>, vector<16x256xf32> -> vector<16x256xf32>
    %c0_57 = arith.constant 0 : index
    %c512 = arith.constant 512 : index
    %99 = vector.load %arg1[%c0_57, %c512] : memref<1x5632xf32, #tpu.memory_space<vmem>>, vector<1x256xf32>
    %100 = vector.broadcast %99 : vector<1x256xf32> to vector<16x256xf32>
    %101 = arith.addf %98, %100 : vector<16x256xf32>
    %cst_58 = arith.constant 0.000000e+00 : f32
    %102 = vector.broadcast %cst_58 : f32 to vector<16x256xf32>
    %103 = arith.maximumf %101, %102 : vector<16x256xf32>
    %104 = vector.shape_cast %103 : vector<16x256xf32> to vector<2x8x256xf32>
    %c1_i32_59 = arith.constant 1 : i32
    %c1_i32_60 = arith.constant 1 : i32
    %c1728_i32_61 = arith.constant 1728 : i32
    %c0_i32_62 = arith.constant 0 : i32
    %105 = tpu.memref_slice %arg2[%c1728_i32_61, %c0_i32_62] : memref<8896x256xbf16, #tpu.memory_space<any>> -> memref<768x256xbf16, #tpu.memory_space<any>>
    %c0_i32_63 = arith.constant 0 : i32
    %c0_i32_64 = arith.constant 0 : i32
    %106 = tpu.memref_slice %arg8[%c1_i32_59, %c0_i32_63, %c0_i32_64] : memref<2x768x256xbf16, #tpu.memory_space<vmem>> -> memref<1x768x256xbf16, #tpu.memory_space<vmem>>
    %107 = tpu.memref_squeeze %106 : memref<1x768x256xbf16, #tpu.memory_space<vmem>> -> memref<768x256xbf16, #tpu.memory_space<vmem>>
    %108 = tpu.memref_slice %arg10[%c1_i32_60] : memref<2x!tpu.dma_semaphore, #tpu.memory_space<semaphore_mem>> -> memref<1x!tpu.dma_semaphore, #tpu.memory_space<semaphore_mem>>
    %109 = tpu.memref_squeeze %108 : memref<1x!tpu.dma_semaphore, #tpu.memory_space<semaphore_mem>> -> memref<!tpu.dma_semaphore, #tpu.memory_space<semaphore_mem>>
    tpu.wait_dma2 semaphore(%109 : memref<!tpu.dma_semaphore, #tpu.memory_space<semaphore_mem>>) src(%105 : memref<768x256xbf16, #tpu.memory_space<any>>) dst(%107 : memref<768x256xbf16, #tpu.memory_space<vmem>>)
    %c0_i32_65 = arith.constant 0 : i32
    %c0_i32_66 = arith.constant 0 : i32
    %c2496_i32 = arith.constant 2496 : i32
    %c0_i32_67 = arith.constant 0 : i32
    %110 = tpu.memref_slice %arg2[%c2496_i32, %c0_i32_67] : memref<8896x256xbf16, #tpu.memory_space<any>> -> memref<768x256xbf16, #tpu.memory_space<any>>
    %c0_i32_68 = arith.constant 0 : i32
    %c0_i32_69 = arith.constant 0 : i32
    %111 = tpu.memref_slice %arg8[%c0_i32_65, %c0_i32_68, %c0_i32_69] : memref<2x768x256xbf16, #tpu.memory_space<vmem>> -> memref<1x768x256xbf16, #tpu.memory_space<vmem>>
    %112 = tpu.memref_squeeze %111 : memref<1x768x256xbf16, #tpu.memory_space<vmem>> -> memref<768x256xbf16, #tpu.memory_space<vmem>>
    %113 = tpu.memref_slice %arg10[%c0_i32_66] : memref<2x!tpu.dma_semaphore, #tpu.memory_space<semaphore_mem>> -> memref<1x!tpu.dma_semaphore, #tpu.memory_space<semaphore_mem>>
    %114 = tpu.memref_squeeze %113 : memref<1x!tpu.dma_semaphore, #tpu.memory_space<semaphore_mem>> -> memref<!tpu.dma_semaphore, #tpu.memory_space<semaphore_mem>>
    tpu.enqueue_dma source(%110 : memref<768x256xbf16, #tpu.memory_space<any>>) target(%112 : memref<768x256xbf16, #tpu.memory_space<vmem>>) target_semaphore(%114 : memref<!tpu.dma_semaphore, #tpu.memory_space<semaphore_mem>>)
    %cst_70 = arith.constant 0.000000e+00 : f32
    %115 = vector.broadcast %cst_70 : f32 to vector<2x1x256xf32>
    %116 = tpu.concatenate %115, %104, %115 in 1 : vector<2x1x256xf32>, vector<2x8x256xf32>, vector<2x1x256xf32> -> vector<2x10x256xf32>
    %117 = vector.extract_strided_slice %116 {offsets = [0, 0, 0], sizes = [2, 8, 256], strides = [1, 1, 1]} : vector<2x10x256xf32> to vector<2x8x256xf32>
    %118 = vector.extract_strided_slice %116 {offsets = [0, 1, 0], sizes = [2, 8, 256], strides = [1, 1, 1]} : vector<2x10x256xf32> to vector<2x8x256xf32>
    %119 = vector.extract_strided_slice %116 {offsets = [0, 2, 0], sizes = [2, 8, 256], strides = [1, 1, 1]} : vector<2x10x256xf32> to vector<2x8x256xf32>
    %120 = tpu.concatenate %117, %118, %119 in 2 : vector<2x8x256xf32>, vector<2x8x256xf32>, vector<2x8x256xf32> -> vector<2x8x768xf32>
    %121 = vector.shape_cast %120 : vector<2x8x768xf32> to vector<16x768xf32>
    %c1_71 = arith.constant 1 : index
    %c0_72 = arith.constant 0 : index
    %c0_73 = arith.constant 0 : index
    %122 = vector.load %arg8[%c1_71, %c0_72, %c0_73] : memref<2x768x256xbf16, #tpu.memory_space<vmem>>, vector<1x768x256xbf16>
    %123 = vector.shape_cast %122 : vector<1x768x256xbf16> to vector<768x256xbf16>
    %124 = arith.truncf %121 : vector<16x768xf32> to vector<16x768xbf16>
    %cst_74 = arith.constant dense<0.000000e+00> : vector<16x256xf32>
    %125 = tpu.matmul %124, %123, %cst_74 {dimension_numbers = #tpu.dot_dimension_numbers<[1], [0], [0], [1], [0, 0, 1, 1], [], []>} : vector<16x768xbf16>, vector<768x256xbf16>, vector<16x256xf32> -> vector<16x256xf32>
    %c0_75 = arith.constant 0 : index
    %c768 = arith.constant 768 : index
    %126 = vector.load %arg1[%c0_75, %c768] : memref<1x5632xf32, #tpu.memory_space<vmem>>, vector<1x256xf32>
    %127 = vector.broadcast %126 : vector<1x256xf32> to vector<16x256xf32>
    %128 = arith.addf %125, %127 : vector<16x256xf32>
    %cst_76 = arith.constant 0.000000e+00 : f32
    %129 = vector.broadcast %cst_76 : f32 to vector<16x256xf32>
    %130 = arith.maximumf %128, %129 : vector<16x256xf32>
    %131 = vector.shape_cast %130 : vector<16x256xf32> to vector<2x8x256xf32>
    %c0_i32_77 = arith.constant 0 : i32
    %c0_i32_78 = arith.constant 0 : i32
    %c2496_i32_79 = arith.constant 2496 : i32
    %c0_i32_80 = arith.constant 0 : i32
    %132 = tpu.memref_slice %arg2[%c2496_i32_79, %c0_i32_80] : memref<8896x256xbf16, #tpu.memory_space<any>> -> memref<768x256xbf16, #tpu.memory_space<any>>
    %c0_i32_81 = arith.constant 0 : i32
    %c0_i32_82 = arith.constant 0 : i32
    %133 = tpu.memref_slice %arg8[%c0_i32_77, %c0_i32_81, %c0_i32_82] : memref<2x768x256xbf16, #tpu.memory_space<vmem>> -> memref<1x768x256xbf16, #tpu.memory_space<vmem>>
    %134 = tpu.memref_squeeze %133 : memref<1x768x256xbf16, #tpu.memory_space<vmem>> -> memref<768x256xbf16, #tpu.memory_space<vmem>>
    %135 = tpu.memref_slice %arg10[%c0_i32_78] : memref<2x!tpu.dma_semaphore, #tpu.memory_space<semaphore_mem>> -> memref<1x!tpu.dma_semaphore, #tpu.memory_space<semaphore_mem>>
    %136 = tpu.memref_squeeze %135 : memref<1x!tpu.dma_semaphore, #tpu.memory_space<semaphore_mem>> -> memref<!tpu.dma_semaphore, #tpu.memory_space<semaphore_mem>>
    tpu.wait_dma2 semaphore(%136 : memref<!tpu.dma_semaphore, #tpu.memory_space<semaphore_mem>>) src(%132 : memref<768x256xbf16, #tpu.memory_space<any>>) dst(%134 : memref<768x256xbf16, #tpu.memory_space<vmem>>)
    %c1_i32_83 = arith.constant 1 : i32
    %c1_i32_84 = arith.constant 1 : i32
    %c3264_i32 = arith.constant 3264 : i32
    %c0_i32_85 = arith.constant 0 : i32
    %137 = tpu.memref_slice %arg2[%c3264_i32, %c0_i32_85] : memref<8896x256xbf16, #tpu.memory_space<any>> -> memref<768x256xbf16, #tpu.memory_space<any>>
    %c0_i32_86 = arith.constant 0 : i32
    %c0_i32_87 = arith.constant 0 : i32
    %138 = tpu.memref_slice %arg8[%c1_i32_83, %c0_i32_86, %c0_i32_87] : memref<2x768x256xbf16, #tpu.memory_space<vmem>> -> memref<1x768x256xbf16, #tpu.memory_space<vmem>>
    %139 = tpu.memref_squeeze %138 : memref<1x768x256xbf16, #tpu.memory_space<vmem>> -> memref<768x256xbf16, #tpu.memory_space<vmem>>
    %140 = tpu.memref_slice %arg10[%c1_i32_84] : memref<2x!tpu.dma_semaphore, #tpu.memory_space<semaphore_mem>> -> memref<1x!tpu.dma_semaphore, #tpu.memory_space<semaphore_mem>>
    %141 = tpu.memref_squeeze %140 : memref<1x!tpu.dma_semaphore, #tpu.memory_space<semaphore_mem>> -> memref<!tpu.dma_semaphore, #tpu.memory_space<semaphore_mem>>
    tpu.enqueue_dma source(%137 : memref<768x256xbf16, #tpu.memory_space<any>>) target(%139 : memref<768x256xbf16, #tpu.memory_space<vmem>>) target_semaphore(%141 : memref<!tpu.dma_semaphore, #tpu.memory_space<semaphore_mem>>)
    %cst_88 = arith.constant 0.000000e+00 : f32
    %142 = vector.broadcast %cst_88 : f32 to vector<2x1x256xf32>
    %143 = tpu.concatenate %142, %131, %142 in 1 : vector<2x1x256xf32>, vector<2x8x256xf32>, vector<2x1x256xf32> -> vector<2x10x256xf32>
    %144 = vector.extract_strided_slice %143 {offsets = [0, 0, 0], sizes = [2, 8, 256], strides = [1, 1, 1]} : vector<2x10x256xf32> to vector<2x8x256xf32>
    %145 = vector.extract_strided_slice %143 {offsets = [0, 1, 0], sizes = [2, 8, 256], strides = [1, 1, 1]} : vector<2x10x256xf32> to vector<2x8x256xf32>
    %146 = vector.extract_strided_slice %143 {offsets = [0, 2, 0], sizes = [2, 8, 256], strides = [1, 1, 1]} : vector<2x10x256xf32> to vector<2x8x256xf32>
    %147 = tpu.concatenate %144, %145, %146 in 2 : vector<2x8x256xf32>, vector<2x8x256xf32>, vector<2x8x256xf32> -> vector<2x8x768xf32>
    %148 = vector.shape_cast %147 : vector<2x8x768xf32> to vector<16x768xf32>
    %c0_89 = arith.constant 0 : index
    %c0_90 = arith.constant 0 : index
    %c0_91 = arith.constant 0 : index
    %149 = vector.load %arg8[%c0_89, %c0_90, %c0_91] : memref<2x768x256xbf16, #tpu.memory_space<vmem>>, vector<1x768x256xbf16>
    %150 = vector.shape_cast %149 : vector<1x768x256xbf16> to vector<768x256xbf16>
    %151 = arith.truncf %148 : vector<16x768xf32> to vector<16x768xbf16>
    %cst_92 = arith.constant dense<0.000000e+00> : vector<16x256xf32>
    %152 = tpu.matmul %151, %150, %cst_92 {dimension_numbers = #tpu.dot_dimension_numbers<[1], [0], [0], [1], [0, 0, 1, 1], [], []>} : vector<16x768xbf16>, vector<768x256xbf16>, vector<16x256xf32> -> vector<16x256xf32>
    %c0_93 = arith.constant 0 : index
    %c1024 = arith.constant 1024 : index
    %153 = vector.load %arg1[%c0_93, %c1024] : memref<1x5632xf32, #tpu.memory_space<vmem>>, vector<1x256xf32>
    %154 = vector.broadcast %153 : vector<1x256xf32> to vector<16x256xf32>
    %155 = arith.addf %152, %154 : vector<16x256xf32>
    %cst_94 = arith.constant 0.000000e+00 : f32
    %156 = vector.broadcast %cst_94 : f32 to vector<16x256xf32>
    %157 = arith.maximumf %155, %156 : vector<16x256xf32>
    %158 = vector.shape_cast %157 : vector<16x256xf32> to vector<2x8x256xf32>
    %c1_i32_95 = arith.constant 1 : i32
    %c1_i32_96 = arith.constant 1 : i32
    %c3264_i32_97 = arith.constant 3264 : i32
    %c0_i32_98 = arith.constant 0 : i32
    %159 = tpu.memref_slice %arg2[%c3264_i32_97, %c0_i32_98] : memref<8896x256xbf16, #tpu.memory_space<any>> -> memref<768x256xbf16, #tpu.memory_space<any>>
    %c0_i32_99 = arith.constant 0 : i32
    %c0_i32_100 = arith.constant 0 : i32
    %160 = tpu.memref_slice %arg8[%c1_i32_95, %c0_i32_99, %c0_i32_100] : memref<2x768x256xbf16, #tpu.memory_space<vmem>> -> memref<1x768x256xbf16, #tpu.memory_space<vmem>>
    %161 = tpu.memref_squeeze %160 : memref<1x768x256xbf16, #tpu.memory_space<vmem>> -> memref<768x256xbf16, #tpu.memory_space<vmem>>
    %162 = tpu.memref_slice %arg10[%c1_i32_96] : memref<2x!tpu.dma_semaphore, #tpu.memory_space<semaphore_mem>> -> memref<1x!tpu.dma_semaphore, #tpu.memory_space<semaphore_mem>>
    %163 = tpu.memref_squeeze %162 : memref<1x!tpu.dma_semaphore, #tpu.memory_space<semaphore_mem>> -> memref<!tpu.dma_semaphore, #tpu.memory_space<semaphore_mem>>
    tpu.wait_dma2 semaphore(%163 : memref<!tpu.dma_semaphore, #tpu.memory_space<semaphore_mem>>) src(%159 : memref<768x256xbf16, #tpu.memory_space<any>>) dst(%161 : memref<768x256xbf16, #tpu.memory_space<vmem>>)
    %c0_i32_101 = arith.constant 0 : i32
    %c0_i32_102 = arith.constant 0 : i32
    %c4032_i32 = arith.constant 4032 : i32
    %c0_i32_103 = arith.constant 0 : i32
    %164 = tpu.memref_slice %arg2[%c4032_i32, %c0_i32_103] : memref<8896x256xbf16, #tpu.memory_space<any>> -> memref<768x256xbf16, #tpu.memory_space<any>>
    %c0_i32_104 = arith.constant 0 : i32
    %c0_i32_105 = arith.constant 0 : i32
    %165 = tpu.memref_slice %arg8[%c0_i32_101, %c0_i32_104, %c0_i32_105] : memref<2x768x256xbf16, #tpu.memory_space<vmem>> -> memref<1x768x256xbf16, #tpu.memory_space<vmem>>
    %166 = tpu.memref_squeeze %165 : memref<1x768x256xbf16, #tpu.memory_space<vmem>> -> memref<768x256xbf16, #tpu.memory_space<vmem>>
    %167 = tpu.memref_slice %arg10[%c0_i32_102] : memref<2x!tpu.dma_semaphore, #tpu.memory_space<semaphore_mem>> -> memref<1x!tpu.dma_semaphore, #tpu.memory_space<semaphore_mem>>
    %168 = tpu.memref_squeeze %167 : memref<1x!tpu.dma_semaphore, #tpu.memory_space<semaphore_mem>> -> memref<!tpu.dma_semaphore, #tpu.memory_space<semaphore_mem>>
    tpu.enqueue_dma source(%164 : memref<768x256xbf16, #tpu.memory_space<any>>) target(%166 : memref<768x256xbf16, #tpu.memory_space<vmem>>) target_semaphore(%168 : memref<!tpu.dma_semaphore, #tpu.memory_space<semaphore_mem>>)
    %cst_106 = arith.constant 0.000000e+00 : f32
    %169 = vector.broadcast %cst_106 : f32 to vector<2x1x256xf32>
    %170 = vector.extract_strided_slice %158 {offsets = [0, 0, 0], sizes = [2, 1, 256], strides = [1, 1, 1]} : vector<2x8x256xf32> to vector<2x1x256xf32>
    %171 = vector.extract_strided_slice %158 {offsets = [0, 1, 0], sizes = [2, 1, 256], strides = [1, 1, 1]} : vector<2x8x256xf32> to vector<2x1x256xf32>
    %172 = vector.extract_strided_slice %158 {offsets = [0, 2, 0], sizes = [2, 1, 256], strides = [1, 1, 1]} : vector<2x8x256xf32> to vector<2x1x256xf32>
    %173 = vector.extract_strided_slice %158 {offsets = [0, 3, 0], sizes = [2, 1, 256], strides = [1, 1, 1]} : vector<2x8x256xf32> to vector<2x1x256xf32>
    %174 = vector.extract_strided_slice %158 {offsets = [0, 4, 0], sizes = [2, 1, 256], strides = [1, 1, 1]} : vector<2x8x256xf32> to vector<2x1x256xf32>
    %175 = vector.extract_strided_slice %158 {offsets = [0, 5, 0], sizes = [2, 1, 256], strides = [1, 1, 1]} : vector<2x8x256xf32> to vector<2x1x256xf32>
    %176 = vector.extract_strided_slice %158 {offsets = [0, 6, 0], sizes = [2, 1, 256], strides = [1, 1, 1]} : vector<2x8x256xf32> to vector<2x1x256xf32>
    %177 = vector.extract_strided_slice %158 {offsets = [0, 7, 0], sizes = [2, 1, 256], strides = [1, 1, 1]} : vector<2x8x256xf32> to vector<2x1x256xf32>
    %178 = tpu.concatenate %169, %171, %173, %175, %177, %170, %172, %174, %176, %169 in 1 : vector<2x1x256xf32>, vector<2x1x256xf32>, vector<2x1x256xf32>, vector<2x1x256xf32>, vector<2x1x256xf32>, vector<2x1x256xf32>, vector<2x1x256xf32>, vector<2x1x256xf32>, vector<2x1x256xf32>, vector<2x1x256xf32> -> vector<2x10x256xf32>
    %179 = vector.extract_strided_slice %178 {offsets = [0, 0, 0], sizes = [2, 4, 256], strides = [1, 1, 1]} : vector<2x10x256xf32> to vector<2x4x256xf32>
    %180 = vector.extract_strided_slice %178 {offsets = [0, 5, 0], sizes = [2, 4, 256], strides = [1, 1, 1]} : vector<2x10x256xf32> to vector<2x4x256xf32>
    %181 = vector.extract_strided_slice %178 {offsets = [0, 1, 0], sizes = [2, 4, 256], strides = [1, 1, 1]} : vector<2x10x256xf32> to vector<2x4x256xf32>
    %182 = tpu.concatenate %179, %180, %181 in 2 : vector<2x4x256xf32>, vector<2x4x256xf32>, vector<2x4x256xf32> -> vector<2x4x768xf32>
    %183 = vector.shape_cast %182 : vector<2x4x768xf32> to vector<8x768xf32>
    %c1_107 = arith.constant 1 : index
    %c0_108 = arith.constant 0 : index
    %c0_109 = arith.constant 0 : index
    %184 = vector.load %arg8[%c1_107, %c0_108, %c0_109] : memref<2x768x256xbf16, #tpu.memory_space<vmem>>, vector<1x768x256xbf16>
    %185 = vector.shape_cast %184 : vector<1x768x256xbf16> to vector<768x256xbf16>
    %186 = arith.truncf %183 : vector<8x768xf32> to vector<8x768xbf16>
    %cst_110 = arith.constant dense<0.000000e+00> : vector<8x256xf32>
    %187 = tpu.matmul %186, %185, %cst_110 {dimension_numbers = #tpu.dot_dimension_numbers<[1], [0], [0], [1], [0, 0, 1, 1], [], []>} : vector<8x768xbf16>, vector<768x256xbf16>, vector<8x256xf32> -> vector<8x256xf32>
    %c0_111 = arith.constant 0 : index
    %c1280 = arith.constant 1280 : index
    %188 = vector.load %arg1[%c0_111, %c1280] : memref<1x5632xf32, #tpu.memory_space<vmem>>, vector<1x256xf32>
    %189 = vector.broadcast %188 : vector<1x256xf32> to vector<8x256xf32>
    %190 = arith.addf %187, %189 : vector<8x256xf32>
    %cst_112 = arith.constant 0.000000e+00 : f32
    %191 = vector.broadcast %cst_112 : f32 to vector<8x256xf32>
    %192 = arith.maximumf %190, %191 : vector<8x256xf32>
    %193 = vector.shape_cast %192 : vector<8x256xf32> to vector<2x4x256xf32>
    %c0_i32_113 = arith.constant 0 : i32
    %c0_i32_114 = arith.constant 0 : i32
    %c4032_i32_115 = arith.constant 4032 : i32
    %c0_i32_116 = arith.constant 0 : i32
    %194 = tpu.memref_slice %arg2[%c4032_i32_115, %c0_i32_116] : memref<8896x256xbf16, #tpu.memory_space<any>> -> memref<768x256xbf16, #tpu.memory_space<any>>
    %c0_i32_117 = arith.constant 0 : i32
    %c0_i32_118 = arith.constant 0 : i32
    %195 = tpu.memref_slice %arg8[%c0_i32_113, %c0_i32_117, %c0_i32_118] : memref<2x768x256xbf16, #tpu.memory_space<vmem>> -> memref<1x768x256xbf16, #tpu.memory_space<vmem>>
    %196 = tpu.memref_squeeze %195 : memref<1x768x256xbf16, #tpu.memory_space<vmem>> -> memref<768x256xbf16, #tpu.memory_space<vmem>>
    %197 = tpu.memref_slice %arg10[%c0_i32_114] : memref<2x!tpu.dma_semaphore, #tpu.memory_space<semaphore_mem>> -> memref<1x!tpu.dma_semaphore, #tpu.memory_space<semaphore_mem>>
    %198 = tpu.memref_squeeze %197 : memref<1x!tpu.dma_semaphore, #tpu.memory_space<semaphore_mem>> -> memref<!tpu.dma_semaphore, #tpu.memory_space<semaphore_mem>>
    tpu.wait_dma2 semaphore(%198 : memref<!tpu.dma_semaphore, #tpu.memory_space<semaphore_mem>>) src(%194 : memref<768x256xbf16, #tpu.memory_space<any>>) dst(%196 : memref<768x256xbf16, #tpu.memory_space<vmem>>)
    %c1_i32_119 = arith.constant 1 : i32
    %c1_i32_120 = arith.constant 1 : i32
    %c4800_i32 = arith.constant 4800 : i32
    %c0_i32_121 = arith.constant 0 : i32
    %199 = tpu.memref_slice %arg2[%c4800_i32, %c0_i32_121] : memref<8896x256xbf16, #tpu.memory_space<any>> -> memref<768x256xbf16, #tpu.memory_space<any>>
    %c0_i32_122 = arith.constant 0 : i32
    %c0_i32_123 = arith.constant 0 : i32
    %200 = tpu.memref_slice %arg8[%c1_i32_119, %c0_i32_122, %c0_i32_123] : memref<2x768x256xbf16, #tpu.memory_space<vmem>> -> memref<1x768x256xbf16, #tpu.memory_space<vmem>>
    %201 = tpu.memref_squeeze %200 : memref<1x768x256xbf16, #tpu.memory_space<vmem>> -> memref<768x256xbf16, #tpu.memory_space<vmem>>
    %202 = tpu.memref_slice %arg10[%c1_i32_120] : memref<2x!tpu.dma_semaphore, #tpu.memory_space<semaphore_mem>> -> memref<1x!tpu.dma_semaphore, #tpu.memory_space<semaphore_mem>>
    %203 = tpu.memref_squeeze %202 : memref<1x!tpu.dma_semaphore, #tpu.memory_space<semaphore_mem>> -> memref<!tpu.dma_semaphore, #tpu.memory_space<semaphore_mem>>
    tpu.enqueue_dma source(%199 : memref<768x256xbf16, #tpu.memory_space<any>>) target(%201 : memref<768x256xbf16, #tpu.memory_space<vmem>>) target_semaphore(%203 : memref<!tpu.dma_semaphore, #tpu.memory_space<semaphore_mem>>)
    %cst_124 = arith.constant 0.000000e+00 : f32
    %204 = vector.broadcast %cst_124 : f32 to vector<2x1x256xf32>
    %205 = tpu.concatenate %204, %193, %204 in 1 : vector<2x1x256xf32>, vector<2x4x256xf32>, vector<2x1x256xf32> -> vector<2x6x256xf32>
    %206 = vector.extract_strided_slice %205 {offsets = [0, 0, 0], sizes = [2, 4, 256], strides = [1, 1, 1]} : vector<2x6x256xf32> to vector<2x4x256xf32>
    %207 = vector.extract_strided_slice %205 {offsets = [0, 1, 0], sizes = [2, 4, 256], strides = [1, 1, 1]} : vector<2x6x256xf32> to vector<2x4x256xf32>
    %208 = vector.extract_strided_slice %205 {offsets = [0, 2, 0], sizes = [2, 4, 256], strides = [1, 1, 1]} : vector<2x6x256xf32> to vector<2x4x256xf32>
    %209 = tpu.concatenate %206, %207, %208 in 2 : vector<2x4x256xf32>, vector<2x4x256xf32>, vector<2x4x256xf32> -> vector<2x4x768xf32>
    %210 = vector.shape_cast %209 : vector<2x4x768xf32> to vector<8x768xf32>
    %c0_125 = arith.constant 0 : index
    %c0_126 = arith.constant 0 : index
    %c0_127 = arith.constant 0 : index
    %211 = vector.load %arg8[%c0_125, %c0_126, %c0_127] : memref<2x768x256xbf16, #tpu.memory_space<vmem>>, vector<1x768x256xbf16>
    %212 = vector.shape_cast %211 : vector<1x768x256xbf16> to vector<768x256xbf16>
    %213 = arith.truncf %210 : vector<8x768xf32> to vector<8x768xbf16>
    %cst_128 = arith.constant dense<0.000000e+00> : vector<8x256xf32>
    %214 = tpu.matmul %213, %212, %cst_128 {dimension_numbers = #tpu.dot_dimension_numbers<[1], [0], [0], [1], [0, 0, 1, 1], [], []>} : vector<8x768xbf16>, vector<768x256xbf16>, vector<8x256xf32> -> vector<8x256xf32>
    %c0_129 = arith.constant 0 : index
    %c1536 = arith.constant 1536 : index
    %215 = vector.load %arg1[%c0_129, %c1536] : memref<1x5632xf32, #tpu.memory_space<vmem>>, vector<1x256xf32>
    %216 = vector.broadcast %215 : vector<1x256xf32> to vector<8x256xf32>
    %217 = arith.addf %214, %216 : vector<8x256xf32>
    %cst_130 = arith.constant 0.000000e+00 : f32
    %218 = vector.broadcast %cst_130 : f32 to vector<8x256xf32>
    %219 = arith.maximumf %217, %218 : vector<8x256xf32>
    %220 = vector.shape_cast %219 : vector<8x256xf32> to vector<2x4x256xf32>
    %c1_i32_131 = arith.constant 1 : i32
    %c1_i32_132 = arith.constant 1 : i32
    %c4800_i32_133 = arith.constant 4800 : i32
    %c0_i32_134 = arith.constant 0 : i32
    %221 = tpu.memref_slice %arg2[%c4800_i32_133, %c0_i32_134] : memref<8896x256xbf16, #tpu.memory_space<any>> -> memref<768x256xbf16, #tpu.memory_space<any>>
    %c0_i32_135 = arith.constant 0 : i32
    %c0_i32_136 = arith.constant 0 : i32
    %222 = tpu.memref_slice %arg8[%c1_i32_131, %c0_i32_135, %c0_i32_136] : memref<2x768x256xbf16, #tpu.memory_space<vmem>> -> memref<1x768x256xbf16, #tpu.memory_space<vmem>>
    %223 = tpu.memref_squeeze %222 : memref<1x768x256xbf16, #tpu.memory_space<vmem>> -> memref<768x256xbf16, #tpu.memory_space<vmem>>
    %224 = tpu.memref_slice %arg10[%c1_i32_132] : memref<2x!tpu.dma_semaphore, #tpu.memory_space<semaphore_mem>> -> memref<1x!tpu.dma_semaphore, #tpu.memory_space<semaphore_mem>>
    %225 = tpu.memref_squeeze %224 : memref<1x!tpu.dma_semaphore, #tpu.memory_space<semaphore_mem>> -> memref<!tpu.dma_semaphore, #tpu.memory_space<semaphore_mem>>
    tpu.wait_dma2 semaphore(%225 : memref<!tpu.dma_semaphore, #tpu.memory_space<semaphore_mem>>) src(%221 : memref<768x256xbf16, #tpu.memory_space<any>>) dst(%223 : memref<768x256xbf16, #tpu.memory_space<vmem>>)
    %c0_i32_137 = arith.constant 0 : i32
    %c0_i32_138 = arith.constant 0 : i32
    %c5568_i32 = arith.constant 5568 : i32
    %c0_i32_139 = arith.constant 0 : i32
    %226 = tpu.memref_slice %arg2[%c5568_i32, %c0_i32_139] : memref<8896x256xbf16, #tpu.memory_space<any>> -> memref<768x256xbf16, #tpu.memory_space<any>>
    %c0_i32_140 = arith.constant 0 : i32
    %c0_i32_141 = arith.constant 0 : i32
    %227 = tpu.memref_slice %arg8[%c0_i32_137, %c0_i32_140, %c0_i32_141] : memref<2x768x256xbf16, #tpu.memory_space<vmem>> -> memref<1x768x256xbf16, #tpu.memory_space<vmem>>
    %228 = tpu.memref_squeeze %227 : memref<1x768x256xbf16, #tpu.memory_space<vmem>> -> memref<768x256xbf16, #tpu.memory_space<vmem>>
    %229 = tpu.memref_slice %arg10[%c0_i32_138] : memref<2x!tpu.dma_semaphore, #tpu.memory_space<semaphore_mem>> -> memref<1x!tpu.dma_semaphore, #tpu.memory_space<semaphore_mem>>
    %230 = tpu.memref_squeeze %229 : memref<1x!tpu.dma_semaphore, #tpu.memory_space<semaphore_mem>> -> memref<!tpu.dma_semaphore, #tpu.memory_space<semaphore_mem>>
    tpu.enqueue_dma source(%226 : memref<768x256xbf16, #tpu.memory_space<any>>) target(%228 : memref<768x256xbf16, #tpu.memory_space<vmem>>) target_semaphore(%230 : memref<!tpu.dma_semaphore, #tpu.memory_space<semaphore_mem>>)
    %cst_142 = arith.constant 0.000000e+00 : f32
    %231 = vector.broadcast %cst_142 : f32 to vector<2x1x256xf32>
    %232 = tpu.concatenate %231, %220, %231 in 1 : vector<2x1x256xf32>, vector<2x4x256xf32>, vector<2x1x256xf32> -> vector<2x6x256xf32>
    %233 = vector.extract_strided_slice %232 {offsets = [0, 0, 0], sizes = [2, 4, 256], strides = [1, 1, 1]} : vector<2x6x256xf32> to vector<2x4x256xf32>
    %234 = vector.extract_strided_slice %232 {offsets = [0, 1, 0], sizes = [2, 4, 256], strides = [1, 1, 1]} : vector<2x6x256xf32> to vector<2x4x256xf32>
    %235 = vector.extract_strided_slice %232 {offsets = [0, 2, 0], sizes = [2, 4, 256], strides = [1, 1, 1]} : vector<2x6x256xf32> to vector<2x4x256xf32>
    %236 = tpu.concatenate %233, %234, %235 in 2 : vector<2x4x256xf32>, vector<2x4x256xf32>, vector<2x4x256xf32> -> vector<2x4x768xf32>
    %237 = vector.shape_cast %236 : vector<2x4x768xf32> to vector<8x768xf32>
    %c1_143 = arith.constant 1 : index
    %c0_144 = arith.constant 0 : index
    %c0_145 = arith.constant 0 : index
    %238 = vector.load %arg8[%c1_143, %c0_144, %c0_145] : memref<2x768x256xbf16, #tpu.memory_space<vmem>>, vector<1x768x256xbf16>
    %239 = vector.shape_cast %238 : vector<1x768x256xbf16> to vector<768x256xbf16>
    %240 = arith.truncf %237 : vector<8x768xf32> to vector<8x768xbf16>
    %cst_146 = arith.constant dense<0.000000e+00> : vector<8x256xf32>
    %241 = tpu.matmul %240, %239, %cst_146 {dimension_numbers = #tpu.dot_dimension_numbers<[1], [0], [0], [1], [0, 0, 1, 1], [], []>} : vector<8x768xbf16>, vector<768x256xbf16>, vector<8x256xf32> -> vector<8x256xf32>
    %c0_147 = arith.constant 0 : index
    %c1792 = arith.constant 1792 : index
    %242 = vector.load %arg1[%c0_147, %c1792] : memref<1x5632xf32, #tpu.memory_space<vmem>>, vector<1x256xf32>
    %243 = vector.broadcast %242 : vector<1x256xf32> to vector<8x256xf32>
    %244 = arith.addf %241, %243 : vector<8x256xf32>
    %cst_148 = arith.constant 0.000000e+00 : f32
    %245 = vector.broadcast %cst_148 : f32 to vector<8x256xf32>
    %246 = arith.maximumf %244, %245 : vector<8x256xf32>
    %247 = vector.shape_cast %246 : vector<8x256xf32> to vector<2x4x256xf32>
    %c0_149 = arith.constant 0 : index
    %c0_150 = arith.constant 0 : index
    %c0_151 = arith.constant 0 : index
    %248 = vector.load %arg4[%c0_149, %c0_150, %c0_151] : memref<2x4x256xf32, #tpu.memory_space<vmem>>, vector<2x4x256xf32>
    tpu.vector_store %arg4[%c0_149, %c0_150, %c0_151], %247 {strides = array<i32>} : memref<2x4x256xf32, #tpu.memory_space<vmem>>, vector<2x4x256xf32>,
    %c0_i32_152 = arith.constant 0 : i32
    %c0_i32_153 = arith.constant 0 : i32
    %c5568_i32_154 = arith.constant 5568 : i32
    %c0_i32_155 = arith.constant 0 : i32
    %249 = tpu.memref_slice %arg2[%c5568_i32_154, %c0_i32_155] : memref<8896x256xbf16, #tpu.memory_space<any>> -> memref<768x256xbf16, #tpu.memory_space<any>>
    %c0_i32_156 = arith.constant 0 : i32
    %c0_i32_157 = arith.constant 0 : i32
    %250 = tpu.memref_slice %arg8[%c0_i32_152, %c0_i32_156, %c0_i32_157] : memref<2x768x256xbf16, #tpu.memory_space<vmem>> -> memref<1x768x256xbf16, #tpu.memory_space<vmem>>
    %251 = tpu.memref_squeeze %250 : memref<1x768x256xbf16, #tpu.memory_space<vmem>> -> memref<768x256xbf16, #tpu.memory_space<vmem>>
    %252 = tpu.memref_slice %arg10[%c0_i32_153] : memref<2x!tpu.dma_semaphore, #tpu.memory_space<semaphore_mem>> -> memref<1x!tpu.dma_semaphore, #tpu.memory_space<semaphore_mem>>
    %253 = tpu.memref_squeeze %252 : memref<1x!tpu.dma_semaphore, #tpu.memory_space<semaphore_mem>> -> memref<!tpu.dma_semaphore, #tpu.memory_space<semaphore_mem>>
    tpu.wait_dma2 semaphore(%253 : memref<!tpu.dma_semaphore, #tpu.memory_space<semaphore_mem>>) src(%249 : memref<768x256xbf16, #tpu.memory_space<any>>) dst(%251 : memref<768x256xbf16, #tpu.memory_space<vmem>>)
    %c1_i32_158 = arith.constant 1 : i32
    %c1_i32_159 = arith.constant 1 : i32
    %c6336_i32 = arith.constant 6336 : i32
    %c0_i32_160 = arith.constant 0 : i32
    %254 = tpu.memref_slice %arg2[%c6336_i32, %c0_i32_160] : memref<8896x256xbf16, #tpu.memory_space<any>> -> memref<768x256xbf16, #tpu.memory_space<any>>
    %c0_i32_161 = arith.constant 0 : i32
    %c0_i32_162 = arith.constant 0 : i32
    %255 = tpu.memref_slice %arg8[%c1_i32_158, %c0_i32_161, %c0_i32_162] : memref<2x768x256xbf16, #tpu.memory_space<vmem>> -> memref<1x768x256xbf16, #tpu.memory_space<vmem>>
    %256 = tpu.memref_squeeze %255 : memref<1x768x256xbf16, #tpu.memory_space<vmem>> -> memref<768x256xbf16, #tpu.memory_space<vmem>>
    %257 = tpu.memref_slice %arg10[%c1_i32_159] : memref<2x!tpu.dma_semaphore, #tpu.memory_space<semaphore_mem>> -> memref<1x!tpu.dma_semaphore, #tpu.memory_space<semaphore_mem>>
    %258 = tpu.memref_squeeze %257 : memref<1x!tpu.dma_semaphore, #tpu.memory_space<semaphore_mem>> -> memref<!tpu.dma_semaphore, #tpu.memory_space<semaphore_mem>>
    tpu.enqueue_dma source(%254 : memref<768x256xbf16, #tpu.memory_space<any>>) target(%256 : memref<768x256xbf16, #tpu.memory_space<vmem>>) target_semaphore(%258 : memref<!tpu.dma_semaphore, #tpu.memory_space<semaphore_mem>>)
    %cst_163 = arith.constant 0.000000e+00 : f32
    %259 = vector.broadcast %cst_163 : f32 to vector<2x1x256xf32>
    %260 = vector.extract_strided_slice %247 {offsets = [0, 0, 0], sizes = [2, 1, 256], strides = [1, 1, 1]} : vector<2x4x256xf32> to vector<2x1x256xf32>
    %261 = vector.extract_strided_slice %247 {offsets = [0, 1, 0], sizes = [2, 1, 256], strides = [1, 1, 1]} : vector<2x4x256xf32> to vector<2x1x256xf32>
    %262 = vector.extract_strided_slice %247 {offsets = [0, 2, 0], sizes = [2, 1, 256], strides = [1, 1, 1]} : vector<2x4x256xf32> to vector<2x1x256xf32>
    %263 = vector.extract_strided_slice %247 {offsets = [0, 3, 0], sizes = [2, 1, 256], strides = [1, 1, 1]} : vector<2x4x256xf32> to vector<2x1x256xf32>
    %264 = tpu.concatenate %259, %261, %263, %260, %262, %259 in 1 : vector<2x1x256xf32>, vector<2x1x256xf32>, vector<2x1x256xf32>, vector<2x1x256xf32>, vector<2x1x256xf32>, vector<2x1x256xf32> -> vector<2x6x256xf32>
    %265 = vector.extract_strided_slice %264 {offsets = [0, 0, 0], sizes = [2, 2, 256], strides = [1, 1, 1]} : vector<2x6x256xf32> to vector<2x2x256xf32>
    %266 = vector.extract_strided_slice %264 {offsets = [0, 3, 0], sizes = [2, 2, 256], strides = [1, 1, 1]} : vector<2x6x256xf32> to vector<2x2x256xf32>
    %267 = vector.extract_strided_slice %264 {offsets = [0, 1, 0], sizes = [2, 2, 256], strides = [1, 1, 1]} : vector<2x6x256xf32> to vector<2x2x256xf32>
    %268 = tpu.concatenate %265, %266, %267 in 2 : vector<2x2x256xf32>, vector<2x2x256xf32>, vector<2x2x256xf32> -> vector<2x2x768xf32>
    %269 = vector.shape_cast %268 : vector<2x2x768xf32> to vector<4x768xf32>
    %c0_164 = arith.constant 0 : index
    %c0_165 = arith.constant 0 : index
    %c0_166 = arith.constant 0 : index
    %270 = vector.load %arg8[%c0_164, %c0_165, %c0_166] : memref<2x768x256xbf16, #tpu.memory_space<vmem>>, vector<1x768x256xbf16>
    %271 = vector.shape_cast %270 : vector<1x768x256xbf16> to vector<768x256xbf16>
    %272 = arith.truncf %269 : vector<4x768xf32> to vector<4x768xbf16>
    %cst_167 = arith.constant dense<0.000000e+00> : vector<4x256xf32>
    %273 = tpu.matmul %272, %271, %cst_167 {dimension_numbers = #tpu.dot_dimension_numbers<[1], [0], [0], [1], [0, 0, 1, 1], [], []>} : vector<4x768xbf16>, vector<768x256xbf16>, vector<4x256xf32> -> vector<4x256xf32>
    %c0_168 = arith.constant 0 : index
    %c2048 = arith.constant 2048 : index
    %274 = vector.load %arg1[%c0_168, %c2048] : memref<1x5632xf32, #tpu.memory_space<vmem>>, vector<1x256xf32>
    %275 = vector.broadcast %274 : vector<1x256xf32> to vector<4x256xf32>
    %276 = arith.addf %273, %275 : vector<4x256xf32>
    %cst_169 = arith.constant 0.000000e+00 : f32
    %277 = vector.broadcast %cst_169 : f32 to vector<4x256xf32>
    %278 = arith.maximumf %276, %277 : vector<4x256xf32>
    %279 = vector.shape_cast %278 : vector<4x256xf32> to vector<2x2x256xf32>
    %c1_i32_170 = arith.constant 1 : i32
    %c1_i32_171 = arith.constant 1 : i32
    %c6336_i32_172 = arith.constant 6336 : i32
    %c0_i32_173 = arith.constant 0 : i32
    %280 = tpu.memref_slice %arg2[%c6336_i32_172, %c0_i32_173] : memref<8896x256xbf16, #tpu.memory_space<any>> -> memref<768x256xbf16, #tpu.memory_space<any>>
    %c0_i32_174 = arith.constant 0 : i32
    %c0_i32_175 = arith.constant 0 : i32
    %281 = tpu.memref_slice %arg8[%c1_i32_170, %c0_i32_174, %c0_i32_175] : memref<2x768x256xbf16, #tpu.memory_space<vmem>> -> memref<1x768x256xbf16, #tpu.memory_space<vmem>>
    %282 = tpu.memref_squeeze %281 : memref<1x768x256xbf16, #tpu.memory_space<vmem>> -> memref<768x256xbf16, #tpu.memory_space<vmem>>
    %283 = tpu.memref_slice %arg10[%c1_i32_171] : memref<2x!tpu.dma_semaphore, #tpu.memory_space<semaphore_mem>> -> memref<1x!tpu.dma_semaphore, #tpu.memory_space<semaphore_mem>>
    %284 = tpu.memref_squeeze %283 : memref<1x!tpu.dma_semaphore, #tpu.memory_space<semaphore_mem>> -> memref<!tpu.dma_semaphore, #tpu.memory_space<semaphore_mem>>
    tpu.wait_dma2 semaphore(%284 : memref<!tpu.dma_semaphore, #tpu.memory_space<semaphore_mem>>) src(%280 : memref<768x256xbf16, #tpu.memory_space<any>>) dst(%282 : memref<768x256xbf16, #tpu.memory_space<vmem>>)
    %c0_i32_176 = arith.constant 0 : i32
    %c0_i32_177 = arith.constant 0 : i32
    %c7104_i32 = arith.constant 7104 : i32
    %c0_i32_178 = arith.constant 0 : i32
    %285 = tpu.memref_slice %arg2[%c7104_i32, %c0_i32_178] : memref<8896x256xbf16, #tpu.memory_space<any>> -> memref<768x256xbf16, #tpu.memory_space<any>>
    %c0_i32_179 = arith.constant 0 : i32
    %c0_i32_180 = arith.constant 0 : i32
    %286 = tpu.memref_slice %arg8[%c0_i32_176, %c0_i32_179, %c0_i32_180] : memref<2x768x256xbf16, #tpu.memory_space<vmem>> -> memref<1x768x256xbf16, #tpu.memory_space<vmem>>
    %287 = tpu.memref_squeeze %286 : memref<1x768x256xbf16, #tpu.memory_space<vmem>> -> memref<768x256xbf16, #tpu.memory_space<vmem>>
    %288 = tpu.memref_slice %arg10[%c0_i32_177] : memref<2x!tpu.dma_semaphore, #tpu.memory_space<semaphore_mem>> -> memref<1x!tpu.dma_semaphore, #tpu.memory_space<semaphore_mem>>
    %289 = tpu.memref_squeeze %288 : memref<1x!tpu.dma_semaphore, #tpu.memory_space<semaphore_mem>> -> memref<!tpu.dma_semaphore, #tpu.memory_space<semaphore_mem>>
    tpu.enqueue_dma source(%285 : memref<768x256xbf16, #tpu.memory_space<any>>) target(%287 : memref<768x256xbf16, #tpu.memory_space<vmem>>) target_semaphore(%289 : memref<!tpu.dma_semaphore, #tpu.memory_space<semaphore_mem>>)
    %cst_181 = arith.constant 0.000000e+00 : f32
    %290 = vector.broadcast %cst_181 : f32 to vector<2x1x256xf32>
    %291 = tpu.concatenate %290, %279, %290 in 1 : vector<2x1x256xf32>, vector<2x2x256xf32>, vector<2x1x256xf32> -> vector<2x4x256xf32>
    %292 = vector.extract_strided_slice %291 {offsets = [0, 0, 0], sizes = [2, 2, 256], strides = [1, 1, 1]} : vector<2x4x256xf32> to vector<2x2x256xf32>
    %293 = vector.extract_strided_slice %291 {offsets = [0, 1, 0], sizes = [2, 2, 256], strides = [1, 1, 1]} : vector<2x4x256xf32> to vector<2x2x256xf32>
    %294 = vector.extract_strided_slice %291 {offsets = [0, 2, 0], sizes = [2, 2, 256], strides = [1, 1, 1]} : vector<2x4x256xf32> to vector<2x2x256xf32>
    %295 = tpu.concatenate %292, %293, %294 in 2 : vector<2x2x256xf32>, vector<2x2x256xf32>, vector<2x2x256xf32> -> vector<2x2x768xf32>
    %296 = vector.shape_cast %295 : vector<2x2x768xf32> to vector<4x768xf32>
    %c1_182 = arith.constant 1 : index
    %c0_183 = arith.constant 0 : index
    %c0_184 = arith.constant 0 : index
    %297 = vector.load %arg8[%c1_182, %c0_183, %c0_184] : memref<2x768x256xbf16, #tpu.memory_space<vmem>>, vector<1x768x256xbf16>
    %298 = vector.shape_cast %297 : vector<1x768x256xbf16> to vector<768x256xbf16>
    %299 = arith.truncf %296 : vector<4x768xf32> to vector<4x768xbf16>
    %cst_185 = arith.constant dense<0.000000e+00> : vector<4x256xf32>
    %300 = tpu.matmul %299, %298, %cst_185 {dimension_numbers = #tpu.dot_dimension_numbers<[1], [0], [0], [1], [0, 0, 1, 1], [], []>} : vector<4x768xbf16>, vector<768x256xbf16>, vector<4x256xf32> -> vector<4x256xf32>
    %c0_186 = arith.constant 0 : index
    %c2304 = arith.constant 2304 : index
    %301 = vector.load %arg1[%c0_186, %c2304] : memref<1x5632xf32, #tpu.memory_space<vmem>>, vector<1x256xf32>
    %302 = vector.broadcast %301 : vector<1x256xf32> to vector<4x256xf32>
    %303 = arith.addf %300, %302 : vector<4x256xf32>
    %cst_187 = arith.constant 0.000000e+00 : f32
    %304 = vector.broadcast %cst_187 : f32 to vector<4x256xf32>
    %305 = arith.maximumf %303, %304 : vector<4x256xf32>
    %306 = vector.shape_cast %305 : vector<4x256xf32> to vector<2x2x256xf32>
    %c0_i32_188 = arith.constant 0 : i32
    %c0_i32_189 = arith.constant 0 : i32
    %c7104_i32_190 = arith.constant 7104 : i32
    %c0_i32_191 = arith.constant 0 : i32
    %307 = tpu.memref_slice %arg2[%c7104_i32_190, %c0_i32_191] : memref<8896x256xbf16, #tpu.memory_space<any>> -> memref<768x256xbf16, #tpu.memory_space<any>>
    %c0_i32_192 = arith.constant 0 : i32
    %c0_i32_193 = arith.constant 0 : i32
    %308 = tpu.memref_slice %arg8[%c0_i32_188, %c0_i32_192, %c0_i32_193] : memref<2x768x256xbf16, #tpu.memory_space<vmem>> -> memref<1x768x256xbf16, #tpu.memory_space<vmem>>
    %309 = tpu.memref_squeeze %308 : memref<1x768x256xbf16, #tpu.memory_space<vmem>> -> memref<768x256xbf16, #tpu.memory_space<vmem>>
    %310 = tpu.memref_slice %arg10[%c0_i32_189] : memref<2x!tpu.dma_semaphore, #tpu.memory_space<semaphore_mem>> -> memref<1x!tpu.dma_semaphore, #tpu.memory_space<semaphore_mem>>
    %311 = tpu.memref_squeeze %310 : memref<1x!tpu.dma_semaphore, #tpu.memory_space<semaphore_mem>> -> memref<!tpu.dma_semaphore, #tpu.memory_space<semaphore_mem>>
    tpu.wait_dma2 semaphore(%311 : memref<!tpu.dma_semaphore, #tpu.memory_space<semaphore_mem>>) src(%307 : memref<768x256xbf16, #tpu.memory_space<any>>) dst(%309 : memref<768x256xbf16, #tpu.memory_space<vmem>>)
    %c1_i32_194 = arith.constant 1 : i32
    %c1_i32_195 = arith.constant 1 : i32
    %c7872_i32 = arith.constant 7872 : i32
    %c0_i32_196 = arith.constant 0 : i32
    %312 = tpu.memref_slice %arg2[%c7872_i32, %c0_i32_196] : memref<8896x256xbf16, #tpu.memory_space<any>> -> memref<512x256xbf16, #tpu.memory_space<any>>
    %c0_i32_197 = arith.constant 0 : i32
    %c0_i32_198 = arith.constant 0 : i32
    %313 = tpu.memref_slice %arg8[%c1_i32_194, %c0_i32_197, %c0_i32_198] : memref<2x768x256xbf16, #tpu.memory_space<vmem>> -> memref<1x512x256xbf16, #tpu.memory_space<vmem>>
    %314 = tpu.memref_squeeze %313 : memref<1x512x256xbf16, #tpu.memory_space<vmem>> -> memref<512x256xbf16, #tpu.memory_space<vmem>>
    %315 = tpu.memref_slice %arg10[%c1_i32_195] : memref<2x!tpu.dma_semaphore, #tpu.memory_space<semaphore_mem>> -> memref<1x!tpu.dma_semaphore, #tpu.memory_space<semaphore_mem>>
    %316 = tpu.memref_squeeze %315 : memref<1x!tpu.dma_semaphore, #tpu.memory_space<semaphore_mem>> -> memref<!tpu.dma_semaphore, #tpu.memory_space<semaphore_mem>>
    tpu.enqueue_dma source(%312 : memref<512x256xbf16, #tpu.memory_space<any>>) target(%314 : memref<512x256xbf16, #tpu.memory_space<vmem>>) target_semaphore(%316 : memref<!tpu.dma_semaphore, #tpu.memory_space<semaphore_mem>>)
    %cst_199 = arith.constant 0.000000e+00 : f32
    %317 = vector.broadcast %cst_199 : f32 to vector<2x1x256xf32>
    %318 = tpu.concatenate %317, %306, %317 in 1 : vector<2x1x256xf32>, vector<2x2x256xf32>, vector<2x1x256xf32> -> vector<2x4x256xf32>
    %319 = vector.extract_strided_slice %318 {offsets = [0, 0, 0], sizes = [2, 2, 256], strides = [1, 1, 1]} : vector<2x4x256xf32> to vector<2x2x256xf32>
    %320 = vector.extract_strided_slice %318 {offsets = [0, 1, 0], sizes = [2, 2, 256], strides = [1, 1, 1]} : vector<2x4x256xf32> to vector<2x2x256xf32>
    %321 = vector.extract_strided_slice %318 {offsets = [0, 2, 0], sizes = [2, 2, 256], strides = [1, 1, 1]} : vector<2x4x256xf32> to vector<2x2x256xf32>
    %322 = tpu.concatenate %319, %320, %321 in 2 : vector<2x2x256xf32>, vector<2x2x256xf32>, vector<2x2x256xf32> -> vector<2x2x768xf32>
    %323 = vector.shape_cast %322 : vector<2x2x768xf32> to vector<4x768xf32>
    %c0_200 = arith.constant 0 : index
    %c0_201 = arith.constant 0 : index
    %c0_202 = arith.constant 0 : index
    %324 = vector.load %arg8[%c0_200, %c0_201, %c0_202] : memref<2x768x256xbf16, #tpu.memory_space<vmem>>, vector<1x768x256xbf16>
    %325 = vector.shape_cast %324 : vector<1x768x256xbf16> to vector<768x256xbf16>
    %326 = arith.truncf %323 : vector<4x768xf32> to vector<4x768xbf16>
    %cst_203 = arith.constant dense<0.000000e+00> : vector<4x256xf32>
    %327 = tpu.matmul %326, %325, %cst_203 {dimension_numbers = #tpu.dot_dimension_numbers<[1], [0], [0], [1], [0, 0, 1, 1], [], []>} : vector<4x768xbf16>, vector<768x256xbf16>, vector<4x256xf32> -> vector<4x256xf32>
    %c0_204 = arith.constant 0 : index
    %c2560 = arith.constant 2560 : index
    %328 = vector.load %arg1[%c0_204, %c2560] : memref<1x5632xf32, #tpu.memory_space<vmem>>, vector<1x256xf32>
    %329 = vector.broadcast %328 : vector<1x256xf32> to vector<4x256xf32>
    %330 = arith.addf %327, %329 : vector<4x256xf32>
    %cst_205 = arith.constant 0.000000e+00 : f32
    %331 = vector.broadcast %cst_205 : f32 to vector<4x256xf32>
    %332 = arith.maximumf %330, %331 : vector<4x256xf32>
    %333 = vector.shape_cast %332 : vector<4x256xf32> to vector<2x2x256xf32>
    %c0_206 = arith.constant 0 : index
    %c0_207 = arith.constant 0 : index
    %c0_208 = arith.constant 0 : index
    %334 = vector.load %arg5[%c0_206, %c0_207, %c0_208] : memref<2x2x256xf32, #tpu.memory_space<vmem>>, vector<2x2x256xf32>
    tpu.vector_store %arg5[%c0_206, %c0_207, %c0_208], %333 {strides = array<i32>} : memref<2x2x256xf32, #tpu.memory_space<vmem>>, vector<2x2x256xf32>,
    %c1_i32_209 = arith.constant 1 : i32
    %c1_i32_210 = arith.constant 1 : i32
    %c7872_i32_211 = arith.constant 7872 : i32
    %c0_i32_212 = arith.constant 0 : i32
    %335 = tpu.memref_slice %arg2[%c7872_i32_211, %c0_i32_212] : memref<8896x256xbf16, #tpu.memory_space<any>> -> memref<512x256xbf16, #tpu.memory_space<any>>
    %c0_i32_213 = arith.constant 0 : i32
    %c0_i32_214 = arith.constant 0 : i32
    %336 = tpu.memref_slice %arg8[%c1_i32_209, %c0_i32_213, %c0_i32_214] : memref<2x768x256xbf16, #tpu.memory_space<vmem>> -> memref<1x512x256xbf16, #tpu.memory_space<vmem>>
    %337 = tpu.memref_squeeze %336 : memref<1x512x256xbf16, #tpu.memory_space<vmem>> -> memref<512x256xbf16, #tpu.memory_space<vmem>>
    %338 = tpu.memref_slice %arg10[%c1_i32_210] : memref<2x!tpu.dma_semaphore, #tpu.memory_space<semaphore_mem>> -> memref<1x!tpu.dma_semaphore, #tpu.memory_space<semaphore_mem>>
    %339 = tpu.memref_squeeze %338 : memref<1x!tpu.dma_semaphore, #tpu.memory_space<semaphore_mem>> -> memref<!tpu.dma_semaphore, #tpu.memory_space<semaphore_mem>>
    tpu.wait_dma2 semaphore(%339 : memref<!tpu.dma_semaphore, #tpu.memory_space<semaphore_mem>>) src(%335 : memref<512x256xbf16, #tpu.memory_space<any>>) dst(%337 : memref<512x256xbf16, #tpu.memory_space<vmem>>)
    %c0_i32_215 = arith.constant 0 : i32
    %c0_i32_216 = arith.constant 0 : i32
    %c8384_i32 = arith.constant 8384 : i32
    %c0_i32_217 = arith.constant 0 : i32
    %340 = tpu.memref_slice %arg2[%c8384_i32, %c0_i32_217] : memref<8896x256xbf16, #tpu.memory_space<any>> -> memref<256x256xbf16, #tpu.memory_space<any>>
    %c0_i32_218 = arith.constant 0 : i32
    %c0_i32_219 = arith.constant 0 : i32
    %341 = tpu.memref_slice %arg8[%c0_i32_215, %c0_i32_218, %c0_i32_219] : memref<2x768x256xbf16, #tpu.memory_space<vmem>> -> memref<1x256x256xbf16, #tpu.memory_space<vmem>>
    %342 = tpu.memref_squeeze %341 : memref<1x256x256xbf16, #tpu.memory_space<vmem>> -> memref<256x256xbf16, #tpu.memory_space<vmem>>
    %343 = tpu.memref_slice %arg10[%c0_i32_216] : memref<2x!tpu.dma_semaphore, #tpu.memory_space<semaphore_mem>> -> memref<1x!tpu.dma_semaphore, #tpu.memory_space<semaphore_mem>>
    %344 = tpu.memref_squeeze %343 : memref<1x!tpu.dma_semaphore, #tpu.memory_space<semaphore_mem>> -> memref<!tpu.dma_semaphore, #tpu.memory_space<semaphore_mem>>
    tpu.enqueue_dma source(%340 : memref<256x256xbf16, #tpu.memory_space<any>>) target(%342 : memref<256x256xbf16, #tpu.memory_space<vmem>>) target_semaphore(%344 : memref<!tpu.dma_semaphore, #tpu.memory_space<semaphore_mem>>)
    %345 = vector.extract_strided_slice %333 {offsets = [0, 0, 0], sizes = [2, 1, 256], strides = [1, 1, 1]} : vector<2x2x256xf32> to vector<2x1x256xf32>
    %346 = vector.shape_cast %345 : vector<2x1x256xf32> to vector<2x256xf32>
    %347 = vector.extract_strided_slice %333 {offsets = [0, 1, 0], sizes = [2, 1, 256], strides = [1, 1, 1]} : vector<2x2x256xf32> to vector<2x1x256xf32>
    %348 = vector.shape_cast %347 : vector<2x1x256xf32> to vector<2x256xf32>
    %349 = tpu.concatenate %346, %348 in 1 : vector<2x256xf32>, vector<2x256xf32> -> vector<2x512xf32>
    %c1_220 = arith.constant 1 : index
    %c0_221 = arith.constant 0 : index
    %c0_222 = arith.constant 0 : index
    %350 = vector.load %arg8[%c1_220, %c0_221, %c0_222] : memref<2x768x256xbf16, #tpu.memory_space<vmem>>, vector<1x512x256xbf16>
    %351 = vector.shape_cast %350 : vector<1x512x256xbf16> to vector<512x256xbf16>
    %352 = arith.truncf %349 : vector<2x512xf32> to vector<2x512xbf16>
    %cst_223 = arith.constant dense<0.000000e+00> : vector<2x256xf32>
    %353 = tpu.matmul %352, %351, %cst_223 {dimension_numbers = #tpu.dot_dimension_numbers<[1], [0], [0], [1], [0, 0, 1, 1], [], []>} : vector<2x512xbf16>, vector<512x256xbf16>, vector<2x256xf32> -> vector<2x256xf32>
    %c0_224 = arith.constant 0 : index
    %c2816 = arith.constant 2816 : index
    %354 = vector.load %arg1[%c0_224, %c2816] : memref<1x5632xf32, #tpu.memory_space<vmem>>, vector<1x256xf32>
    %355 = vector.broadcast %354 : vector<1x256xf32> to vector<2x256xf32>
    %356 = arith.addf %353, %355 : vector<2x256xf32>
    %cst_225 = arith.constant 0.000000e+00 : f32
    %357 = vector.broadcast %cst_225 : f32 to vector<2x256xf32>
    %358 = arith.maximumf %356, %357 : vector<2x256xf32>
    %359 = vector.shape_cast %358 : vector<2x256xf32> to vector<2x1x256xf32>
    %c0_i32_226 = arith.constant 0 : i32
    %c0_i32_227 = arith.constant 0 : i32
    %c8384_i32_228 = arith.constant 8384 : i32
    %c0_i32_229 = arith.constant 0 : i32
    %360 = tpu.memref_slice %arg2[%c8384_i32_228, %c0_i32_229] : memref<8896x256xbf16, #tpu.memory_space<any>> -> memref<256x256xbf16, #tpu.memory_space<any>>
    %c0_i32_230 = arith.constant 0 : i32
    %c0_i32_231 = arith.constant 0 : i32
    %361 = tpu.memref_slice %arg8[%c0_i32_226, %c0_i32_230, %c0_i32_231] : memref<2x768x256xbf16, #tpu.memory_space<vmem>> -> memref<1x256x256xbf16, #tpu.memory_space<vmem>>
    %362 = tpu.memref_squeeze %361 : memref<1x256x256xbf16, #tpu.memory_space<vmem>> -> memref<256x256xbf16, #tpu.memory_space<vmem>>
    %363 = tpu.memref_slice %arg10[%c0_i32_227] : memref<2x!tpu.dma_semaphore, #tpu.memory_space<semaphore_mem>> -> memref<1x!tpu.dma_semaphore, #tpu.memory_space<semaphore_mem>>
    %364 = tpu.memref_squeeze %363 : memref<1x!tpu.dma_semaphore, #tpu.memory_space<semaphore_mem>> -> memref<!tpu.dma_semaphore, #tpu.memory_space<semaphore_mem>>
    tpu.wait_dma2 semaphore(%364 : memref<!tpu.dma_semaphore, #tpu.memory_space<semaphore_mem>>) src(%360 : memref<256x256xbf16, #tpu.memory_space<any>>) dst(%362 : memref<256x256xbf16, #tpu.memory_space<vmem>>)
    %c1_i32_232 = arith.constant 1 : i32
    %c1_i32_233 = arith.constant 1 : i32
    %c8640_i32 = arith.constant 8640 : i32
    %c0_i32_234 = arith.constant 0 : i32
    %365 = tpu.memref_slice %arg2[%c8640_i32, %c0_i32_234] : memref<8896x256xbf16, #tpu.memory_space<any>> -> memref<256x256xbf16, #tpu.memory_space<any>>
    %c0_i32_235 = arith.constant 0 : i32
    %c0_i32_236 = arith.constant 0 : i32
    %366 = tpu.memref_slice %arg8[%c1_i32_232, %c0_i32_235, %c0_i32_236] : memref<2x768x256xbf16, #tpu.memory_space<vmem>> -> memref<1x256x256xbf16, #tpu.memory_space<vmem>>
    %367 = tpu.memref_squeeze %366 : memref<1x256x256xbf16, #tpu.memory_space<vmem>> -> memref<256x256xbf16, #tpu.memory_space<vmem>>
    %368 = tpu.memref_slice %arg10[%c1_i32_233] : memref<2x!tpu.dma_semaphore, #tpu.memory_space<semaphore_mem>> -> memref<1x!tpu.dma_semaphore, #tpu.memory_space<semaphore_mem>>
    %369 = tpu.memref_squeeze %368 : memref<1x!tpu.dma_semaphore, #tpu.memory_space<semaphore_mem>> -> memref<!tpu.dma_semaphore, #tpu.memory_space<semaphore_mem>>
    tpu.enqueue_dma source(%365 : memref<256x256xbf16, #tpu.memory_space<any>>) target(%367 : memref<256x256xbf16, #tpu.memory_space<vmem>>) target_semaphore(%369 : memref<!tpu.dma_semaphore, #tpu.memory_space<semaphore_mem>>)
    %370 = vector.shape_cast %359 : vector<2x1x256xf32> to vector<2x256xf32>
    %c0_237 = arith.constant 0 : index
    %c0_238 = arith.constant 0 : index
    %c0_239 = arith.constant 0 : index
    %371 = vector.load %arg8[%c0_237, %c0_238, %c0_239] : memref<2x768x256xbf16, #tpu.memory_space<vmem>>, vector<1x256x256xbf16>
    %372 = vector.shape_cast %371 : vector<1x256x256xbf16> to vector<256x256xbf16>
    %373 = arith.truncf %370 : vector<2x256xf32> to vector<2x256xbf16>
    %cst_240 = arith.constant dense<0.000000e+00> : vector<2x256xf32>
    %374 = tpu.matmul %373, %372, %cst_240 {dimension_numbers = #tpu.dot_dimension_numbers<[1], [0], [0], [1], [0, 0, 1, 1], [], []>} : vector<2x256xbf16>, vector<256x256xbf16>, vector<2x256xf32> -> vector<2x256xf32>
    %c0_241 = arith.constant 0 : index
    %c3072 = arith.constant 3072 : index
    %375 = vector.load %arg1[%c0_241, %c3072] : memref<1x5632xf32, #tpu.memory_space<vmem>>, vector<1x256xf32>
    %376 = vector.broadcast %375 : vector<1x256xf32> to vector<2x256xf32>
    %377 = arith.addf %374, %376 : vector<2x256xf32>
    %cst_242 = arith.constant 0.000000e+00 : f32
    %378 = vector.broadcast %cst_242 : f32 to vector<2x256xf32>
    %379 = arith.maximumf %377, %378 : vector<2x256xf32>
    %380 = vector.shape_cast %379 : vector<2x256xf32> to vector<2x1x256xf32>
    %c1_i32_243 = arith.constant 1 : i32
    %c1_i32_244 = arith.constant 1 : i32
    %c8640_i32_245 = arith.constant 8640 : i32
    %c0_i32_246 = arith.constant 0 : i32
    %381 = tpu.memref_slice %arg2[%c8640_i32_245, %c0_i32_246] : memref<8896x256xbf16, #tpu.memory_space<any>> -> memref<256x256xbf16, #tpu.memory_space<any>>
    %c0_i32_247 = arith.constant 0 : i32
    %c0_i32_248 = arith.constant 0 : i32
    %382 = tpu.memref_slice %arg8[%c1_i32_243, %c0_i32_247, %c0_i32_248] : memref<2x768x256xbf16, #tpu.memory_space<vmem>> -> memref<1x256x256xbf16, #tpu.memory_space<vmem>>
    %383 = tpu.memref_squeeze %382 : memref<1x256x256xbf16, #tpu.memory_space<vmem>> -> memref<256x256xbf16, #tpu.memory_space<vmem>>
    %384 = tpu.memref_slice %arg10[%c1_i32_244] : memref<2x!tpu.dma_semaphore, #tpu.memory_space<semaphore_mem>> -> memref<1x!tpu.dma_semaphore, #tpu.memory_space<semaphore_mem>>
    %385 = tpu.memref_squeeze %384 : memref<1x!tpu.dma_semaphore, #tpu.memory_space<semaphore_mem>> -> memref<!tpu.dma_semaphore, #tpu.memory_space<semaphore_mem>>
    tpu.wait_dma2 semaphore(%385 : memref<!tpu.dma_semaphore, #tpu.memory_space<semaphore_mem>>) src(%381 : memref<256x256xbf16, #tpu.memory_space<any>>) dst(%383 : memref<256x256xbf16, #tpu.memory_space<vmem>>)
    %c0_i32_249 = arith.constant 0 : i32
    %c0_i32_250 = arith.constant 0 : i32
    %c0_i32_251 = arith.constant 0 : i32
    %c0_i32_252 = arith.constant 0 : i32
    %386 = tpu.memref_slice %arg3[%c0_i32_251, %c0_i32_252] : memref<1792x512xbf16, #tpu.memory_space<any>> -> memref<256x512xbf16, #tpu.memory_space<any>>
    %c0_i32_253 = arith.constant 0 : i32
    %c0_i32_254 = arith.constant 0 : i32
    %387 = tpu.memref_slice %arg9[%c0_i32_249, %c0_i32_253, %c0_i32_254] : memref<2x512x512xbf16, #tpu.memory_space<vmem>> -> memref<1x256x512xbf16, #tpu.memory_space<vmem>>
    %388 = tpu.memref_squeeze %387 : memref<1x256x512xbf16, #tpu.memory_space<vmem>> -> memref<256x512xbf16, #tpu.memory_space<vmem>>
    %389 = tpu.memref_slice %arg10[%c0_i32_250] : memref<2x!tpu.dma_semaphore, #tpu.memory_space<semaphore_mem>> -> memref<1x!tpu.dma_semaphore, #tpu.memory_space<semaphore_mem>>
    %390 = tpu.memref_squeeze %389 : memref<1x!tpu.dma_semaphore, #tpu.memory_space<semaphore_mem>> -> memref<!tpu.dma_semaphore, #tpu.memory_space<semaphore_mem>>
    tpu.enqueue_dma source(%386 : memref<256x512xbf16, #tpu.memory_space<any>>) target(%388 : memref<256x512xbf16, #tpu.memory_space<vmem>>) target_semaphore(%390 : memref<!tpu.dma_semaphore, #tpu.memory_space<semaphore_mem>>)
    %391 = vector.shape_cast %380 : vector<2x1x256xf32> to vector<2x256xf32>
    %c1_255 = arith.constant 1 : index
    %c0_256 = arith.constant 0 : index
    %c0_257 = arith.constant 0 : index
    %392 = vector.load %arg8[%c1_255, %c0_256, %c0_257] : memref<2x768x256xbf16, #tpu.memory_space<vmem>>, vector<1x256x256xbf16>
    %393 = vector.shape_cast %392 : vector<1x256x256xbf16> to vector<256x256xbf16>
    %394 = arith.truncf %391 : vector<2x256xf32> to vector<2x256xbf16>
    %cst_258 = arith.constant dense<0.000000e+00> : vector<2x256xf32>
    %395 = tpu.matmul %394, %393, %cst_258 {dimension_numbers = #tpu.dot_dimension_numbers<[1], [0], [0], [1], [0, 0, 1, 1], [], []>} : vector<2x256xbf16>, vector<256x256xbf16>, vector<2x256xf32> -> vector<2x256xf32>
    %c0_259 = arith.constant 0 : index
    %c3328 = arith.constant 3328 : index
    %396 = vector.load %arg1[%c0_259, %c3328] : memref<1x5632xf32, #tpu.memory_space<vmem>>, vector<1x256xf32>
    %397 = vector.broadcast %396 : vector<1x256xf32> to vector<2x256xf32>
    %398 = arith.addf %395, %397 : vector<2x256xf32>
    %cst_260 = arith.constant 0.000000e+00 : f32
    %399 = vector.broadcast %cst_260 : f32 to vector<2x256xf32>
    %400 = arith.maximumf %398, %399 : vector<2x256xf32>
    %401 = vector.shape_cast %400 : vector<2x256xf32> to vector<2x1x256xf32>
    %c0_261 = arith.constant 0 : index
    %c0_262 = arith.constant 0 : index
    %c0_263 = arith.constant 0 : index
    %402 = vector.load %arg6[%c0_261, %c0_262, %c0_263] : memref<2x1x256xf32, #tpu.memory_space<vmem>>, vector<2x1x256xf32>
    tpu.vector_store %arg6[%c0_261, %c0_262, %c0_263], %401 {strides = array<i32>} : memref<2x1x256xf32, #tpu.memory_space<vmem>>, vector<2x1x256xf32>,
    %c0_i32_264 = arith.constant 0 : i32
    %c0_i32_265 = arith.constant 0 : i32
    %c0_i32_266 = arith.constant 0 : i32
    %c0_i32_267 = arith.constant 0 : i32
    %403 = tpu.memref_slice %arg3[%c0_i32_266, %c0_i32_267] : memref<1792x512xbf16, #tpu.memory_space<any>> -> memref<256x512xbf16, #tpu.memory_space<any>>
    %c0_i32_268 = arith.constant 0 : i32
    %c0_i32_269 = arith.constant 0 : i32
    %404 = tpu.memref_slice %arg9[%c0_i32_264, %c0_i32_268, %c0_i32_269] : memref<2x512x512xbf16, #tpu.memory_space<vmem>> -> memref<1x256x512xbf16, #tpu.memory_space<vmem>>
    %405 = tpu.memref_squeeze %404 : memref<1x256x512xbf16, #tpu.memory_space<vmem>> -> memref<256x512xbf16, #tpu.memory_space<vmem>>
    %406 = tpu.memref_slice %arg10[%c0_i32_265] : memref<2x!tpu.dma_semaphore, #tpu.memory_space<semaphore_mem>> -> memref<1x!tpu.dma_semaphore, #tpu.memory_space<semaphore_mem>>
    %407 = tpu.memref_squeeze %406 : memref<1x!tpu.dma_semaphore, #tpu.memory_space<semaphore_mem>> -> memref<!tpu.dma_semaphore, #tpu.memory_space<semaphore_mem>>
    tpu.wait_dma2 semaphore(%407 : memref<!tpu.dma_semaphore, #tpu.memory_space<semaphore_mem>>) src(%403 : memref<256x512xbf16, #tpu.memory_space<any>>) dst(%405 : memref<256x512xbf16, #tpu.memory_space<vmem>>)
    %c1_i32_270 = arith.constant 1 : i32
    %c1_i32_271 = arith.constant 1 : i32
    %c256_i32 = arith.constant 256 : i32
    %c0_i32_272 = arith.constant 0 : i32
    %408 = tpu.memref_slice %arg3[%c256_i32, %c0_i32_272] : memref<1792x512xbf16, #tpu.memory_space<any>> -> memref<512x512xbf16, #tpu.memory_space<any>>
    %c0_i32_273 = arith.constant 0 : i32
    %c0_i32_274 = arith.constant 0 : i32
    %409 = tpu.memref_slice %arg9[%c1_i32_270, %c0_i32_273, %c0_i32_274] : memref<2x512x512xbf16, #tpu.memory_space<vmem>> -> memref<1x512x512xbf16, #tpu.memory_space<vmem>>
    %410 = tpu.memref_squeeze %409 : memref<1x512x512xbf16, #tpu.memory_space<vmem>> -> memref<512x512xbf16, #tpu.memory_space<vmem>>
    %411 = tpu.memref_slice %arg10[%c1_i32_271] : memref<2x!tpu.dma_semaphore, #tpu.memory_space<semaphore_mem>> -> memref<1x!tpu.dma_semaphore, #tpu.memory_space<semaphore_mem>>
    %412 = tpu.memref_squeeze %411 : memref<1x!tpu.dma_semaphore, #tpu.memory_space<semaphore_mem>> -> memref<!tpu.dma_semaphore, #tpu.memory_space<semaphore_mem>>
    tpu.enqueue_dma source(%408 : memref<512x512xbf16, #tpu.memory_space<any>>) target(%410 : memref<512x512xbf16, #tpu.memory_space<vmem>>) target_semaphore(%412 : memref<!tpu.dma_semaphore, #tpu.memory_space<semaphore_mem>>)
    %413 = vector.shape_cast %401 : vector<2x1x256xf32> to vector<2x256xf32>
    %c0_275 = arith.constant 0 : index
    %c0_276 = arith.constant 0 : index
    %c0_277 = arith.constant 0 : index
    %414 = vector.load %arg9[%c0_275, %c0_276, %c0_277] : memref<2x512x512xbf16, #tpu.memory_space<vmem>>, vector<1x256x512xbf16>
    %415 = vector.shape_cast %414 : vector<1x256x512xbf16> to vector<256x512xbf16>
    %416 = arith.truncf %413 : vector<2x256xf32> to vector<2x256xbf16>
    %cst_278 = arith.constant dense<0.000000e+00> : vector<2x512xf32>
    %417 = tpu.matmul %416, %415, %cst_278 {dimension_numbers = #tpu.dot_dimension_numbers<[1], [0], [0], [1], [0, 0, 1, 1], [], []>} : vector<2x256xbf16>, vector<256x512xbf16>, vector<2x512xf32> -> vector<2x512xf32>
    %c0_279 = arith.constant 0 : index
    %c3584 = arith.constant 3584 : index
    %418 = vector.load %arg1[%c0_279, %c3584] : memref<1x5632xf32, #tpu.memory_space<vmem>>, vector<1x512xf32>
    %419 = vector.broadcast %418 : vector<1x512xf32> to vector<2x512xf32>
    %420 = arith.addf %417, %419 : vector<2x512xf32>
    %cst_280 = arith.constant 0.000000e+00 : f32
    %421 = vector.broadcast %cst_280 : f32 to vector<2x512xf32>
    %422 = arith.maximumf %420, %421 : vector<2x512xf32>
    %423 = vector.shape_cast %422 : vector<2x512xf32> to vector<2x1x512xf32>
    %c1_i32_281 = arith.constant 1 : i32
    %c1_i32_282 = arith.constant 1 : i32
    %c256_i32_283 = arith.constant 256 : i32
    %c0_i32_284 = arith.constant 0 : i32
    %424 = tpu.memref_slice %arg3[%c256_i32_283, %c0_i32_284] : memref<1792x512xbf16, #tpu.memory_space<any>> -> memref<512x512xbf16, #tpu.memory_space<any>>
    %c0_i32_285 = arith.constant 0 : i32
    %c0_i32_286 = arith.constant 0 : i32
    %425 = tpu.memref_slice %arg9[%c1_i32_281, %c0_i32_285, %c0_i32_286] : memref<2x512x512xbf16, #tpu.memory_space<vmem>> -> memref<1x512x512xbf16, #tpu.memory_space<vmem>>
    %426 = tpu.memref_squeeze %425 : memref<1x512x512xbf16, #tpu.memory_space<vmem>> -> memref<512x512xbf16, #tpu.memory_space<vmem>>
    %427 = tpu.memref_slice %arg10[%c1_i32_282] : memref<2x!tpu.dma_semaphore, #tpu.memory_space<semaphore_mem>> -> memref<1x!tpu.dma_semaphore, #tpu.memory_space<semaphore_mem>>
    %428 = tpu.memref_squeeze %427 : memref<1x!tpu.dma_semaphore, #tpu.memory_space<semaphore_mem>> -> memref<!tpu.dma_semaphore, #tpu.memory_space<semaphore_mem>>
    tpu.wait_dma2 semaphore(%428 : memref<!tpu.dma_semaphore, #tpu.memory_space<semaphore_mem>>) src(%424 : memref<512x512xbf16, #tpu.memory_space<any>>) dst(%426 : memref<512x512xbf16, #tpu.memory_space<vmem>>)
    %c0_i32_287 = arith.constant 0 : i32
    %c0_i32_288 = arith.constant 0 : i32
    %c768_i32 = arith.constant 768 : i32
    %c0_i32_289 = arith.constant 0 : i32
    %429 = tpu.memref_slice %arg3[%c768_i32, %c0_i32_289] : memref<1792x512xbf16, #tpu.memory_space<any>> -> memref<512x512xbf16, #tpu.memory_space<any>>
    %c0_i32_290 = arith.constant 0 : i32
    %c0_i32_291 = arith.constant 0 : i32
    %430 = tpu.memref_slice %arg9[%c0_i32_287, %c0_i32_290, %c0_i32_291] : memref<2x512x512xbf16, #tpu.memory_space<vmem>> -> memref<1x512x512xbf16, #tpu.memory_space<vmem>>
    %431 = tpu.memref_squeeze %430 : memref<1x512x512xbf16, #tpu.memory_space<vmem>> -> memref<512x512xbf16, #tpu.memory_space<vmem>>
    %432 = tpu.memref_slice %arg10[%c0_i32_288] : memref<2x!tpu.dma_semaphore, #tpu.memory_space<semaphore_mem>> -> memref<1x!tpu.dma_semaphore, #tpu.memory_space<semaphore_mem>>
    %433 = tpu.memref_squeeze %432 : memref<1x!tpu.dma_semaphore, #tpu.memory_space<semaphore_mem>> -> memref<!tpu.dma_semaphore, #tpu.memory_space<semaphore_mem>>
    tpu.enqueue_dma source(%429 : memref<512x512xbf16, #tpu.memory_space<any>>) target(%431 : memref<512x512xbf16, #tpu.memory_space<vmem>>) target_semaphore(%433 : memref<!tpu.dma_semaphore, #tpu.memory_space<semaphore_mem>>)
    %434 = vector.shape_cast %423 : vector<2x1x512xf32> to vector<2x512xf32>
    %c1_292 = arith.constant 1 : index
    %c0_293 = arith.constant 0 : index
    %c0_294 = arith.constant 0 : index
    %435 = vector.load %arg9[%c1_292, %c0_293, %c0_294] : memref<2x512x512xbf16, #tpu.memory_space<vmem>>, vector<1x512x512xbf16>
    %436 = vector.shape_cast %435 : vector<1x512x512xbf16> to vector<512x512xbf16>
    %437 = arith.truncf %434 : vector<2x512xf32> to vector<2x512xbf16>
    %cst_295 = arith.constant dense<0.000000e+00> : vector<2x512xf32>
    %438 = tpu.matmul %437, %436, %cst_295 {dimension_numbers = #tpu.dot_dimension_numbers<[1], [0], [0], [1], [0, 0, 1, 1], [], []>} : vector<2x512xbf16>, vector<512x512xbf16>, vector<2x512xf32> -> vector<2x512xf32>
    %c0_296 = arith.constant 0 : index
    %c4096 = arith.constant 4096 : index
    %439 = vector.load %arg1[%c0_296, %c4096] : memref<1x5632xf32, #tpu.memory_space<vmem>>, vector<1x512xf32>
    %440 = vector.broadcast %439 : vector<1x512xf32> to vector<2x512xf32>
    %441 = arith.addf %438, %440 : vector<2x512xf32>
    %cst_297 = arith.constant 0.000000e+00 : f32
    %442 = vector.broadcast %cst_297 : f32 to vector<2x512xf32>
    %443 = arith.maximumf %441, %442 : vector<2x512xf32>
    %444 = vector.shape_cast %443 : vector<2x512xf32> to vector<2x1x512xf32>
    %c0_i32_298 = arith.constant 0 : i32
    %c0_i32_299 = arith.constant 0 : i32
    %c768_i32_300 = arith.constant 768 : i32
    %c0_i32_301 = arith.constant 0 : i32
    %445 = tpu.memref_slice %arg3[%c768_i32_300, %c0_i32_301] : memref<1792x512xbf16, #tpu.memory_space<any>> -> memref<512x512xbf16, #tpu.memory_space<any>>
    %c0_i32_302 = arith.constant 0 : i32
    %c0_i32_303 = arith.constant 0 : i32
    %446 = tpu.memref_slice %arg9[%c0_i32_298, %c0_i32_302, %c0_i32_303] : memref<2x512x512xbf16, #tpu.memory_space<vmem>> -> memref<1x512x512xbf16, #tpu.memory_space<vmem>>
    %447 = tpu.memref_squeeze %446 : memref<1x512x512xbf16, #tpu.memory_space<vmem>> -> memref<512x512xbf16, #tpu.memory_space<vmem>>
    %448 = tpu.memref_slice %arg10[%c0_i32_299] : memref<2x!tpu.dma_semaphore, #tpu.memory_space<semaphore_mem>> -> memref<1x!tpu.dma_semaphore, #tpu.memory_space<semaphore_mem>>
    %449 = tpu.memref_squeeze %448 : memref<1x!tpu.dma_semaphore, #tpu.memory_space<semaphore_mem>> -> memref<!tpu.dma_semaphore, #tpu.memory_space<semaphore_mem>>
    tpu.wait_dma2 semaphore(%449 : memref<!tpu.dma_semaphore, #tpu.memory_space<semaphore_mem>>) src(%445 : memref<512x512xbf16, #tpu.memory_space<any>>) dst(%447 : memref<512x512xbf16, #tpu.memory_space<vmem>>)
    %c1_i32_304 = arith.constant 1 : i32
    %c1_i32_305 = arith.constant 1 : i32
    %c1280_i32 = arith.constant 1280 : i32
    %c0_i32_306 = arith.constant 0 : i32
    %450 = tpu.memref_slice %arg3[%c1280_i32, %c0_i32_306] : memref<1792x512xbf16, #tpu.memory_space<any>> -> memref<512x512xbf16, #tpu.memory_space<any>>
    %c0_i32_307 = arith.constant 0 : i32
    %c0_i32_308 = arith.constant 0 : i32
    %451 = tpu.memref_slice %arg9[%c1_i32_304, %c0_i32_307, %c0_i32_308] : memref<2x512x512xbf16, #tpu.memory_space<vmem>> -> memref<1x512x512xbf16, #tpu.memory_space<vmem>>
    %452 = tpu.memref_squeeze %451 : memref<1x512x512xbf16, #tpu.memory_space<vmem>> -> memref<512x512xbf16, #tpu.memory_space<vmem>>
    %453 = tpu.memref_slice %arg10[%c1_i32_305] : memref<2x!tpu.dma_semaphore, #tpu.memory_space<semaphore_mem>> -> memref<1x!tpu.dma_semaphore, #tpu.memory_space<semaphore_mem>>
    %454 = tpu.memref_squeeze %453 : memref<1x!tpu.dma_semaphore, #tpu.memory_space<semaphore_mem>> -> memref<!tpu.dma_semaphore, #tpu.memory_space<semaphore_mem>>
    tpu.enqueue_dma source(%450 : memref<512x512xbf16, #tpu.memory_space<any>>) target(%452 : memref<512x512xbf16, #tpu.memory_space<vmem>>) target_semaphore(%454 : memref<!tpu.dma_semaphore, #tpu.memory_space<semaphore_mem>>)
    %455 = vector.shape_cast %444 : vector<2x1x512xf32> to vector<2x512xf32>
    %c0_309 = arith.constant 0 : index
    %c0_310 = arith.constant 0 : index
    %c0_311 = arith.constant 0 : index
    %456 = vector.load %arg9[%c0_309, %c0_310, %c0_311] : memref<2x512x512xbf16, #tpu.memory_space<vmem>>, vector<1x512x512xbf16>
    %457 = vector.shape_cast %456 : vector<1x512x512xbf16> to vector<512x512xbf16>
    %458 = arith.truncf %455 : vector<2x512xf32> to vector<2x512xbf16>
    %cst_312 = arith.constant dense<0.000000e+00> : vector<2x512xf32>
    %459 = tpu.matmul %458, %457, %cst_312 {dimension_numbers = #tpu.dot_dimension_numbers<[1], [0], [0], [1], [0, 0, 1, 1], [], []>} : vector<2x512xbf16>, vector<512x512xbf16>, vector<2x512xf32> -> vector<2x512xf32>
    %c0_313 = arith.constant 0 : index
    %c4608 = arith.constant 4608 : index
    %460 = vector.load %arg1[%c0_313, %c4608] : memref<1x5632xf32, #tpu.memory_space<vmem>>, vector<1x512xf32>
    %461 = vector.broadcast %460 : vector<1x512xf32> to vector<2x512xf32>
    %462 = arith.addf %459, %461 : vector<2x512xf32>
    %cst_314 = arith.constant 0.000000e+00 : f32
    %463 = vector.broadcast %cst_314 : f32 to vector<2x512xf32>
    %464 = arith.maximumf %462, %463 : vector<2x512xf32>
    %465 = vector.shape_cast %464 : vector<2x512xf32> to vector<2x1x512xf32>
    %c1_i32_315 = arith.constant 1 : i32
    %c1_i32_316 = arith.constant 1 : i32
    %c1280_i32_317 = arith.constant 1280 : i32
    %c0_i32_318 = arith.constant 0 : i32
    %466 = tpu.memref_slice %arg3[%c1280_i32_317, %c0_i32_318] : memref<1792x512xbf16, #tpu.memory_space<any>> -> memref<512x512xbf16, #tpu.memory_space<any>>
    %c0_i32_319 = arith.constant 0 : i32
    %c0_i32_320 = arith.constant 0 : i32
    %467 = tpu.memref_slice %arg9[%c1_i32_315, %c0_i32_319, %c0_i32_320] : memref<2x512x512xbf16, #tpu.memory_space<vmem>> -> memref<1x512x512xbf16, #tpu.memory_space<vmem>>
    %468 = tpu.memref_squeeze %467 : memref<1x512x512xbf16, #tpu.memory_space<vmem>> -> memref<512x512xbf16, #tpu.memory_space<vmem>>
    %469 = tpu.memref_slice %arg10[%c1_i32_316] : memref<2x!tpu.dma_semaphore, #tpu.memory_space<semaphore_mem>> -> memref<1x!tpu.dma_semaphore, #tpu.memory_space<semaphore_mem>>
    %470 = tpu.memref_squeeze %469 : memref<1x!tpu.dma_semaphore, #tpu.memory_space<semaphore_mem>> -> memref<!tpu.dma_semaphore, #tpu.memory_space<semaphore_mem>>
    tpu.wait_dma2 semaphore(%470 : memref<!tpu.dma_semaphore, #tpu.memory_space<semaphore_mem>>) src(%466 : memref<512x512xbf16, #tpu.memory_space<any>>) dst(%468 : memref<512x512xbf16, #tpu.memory_space<vmem>>)
    %471 = vector.shape_cast %465 : vector<2x1x512xf32> to vector<2x512xf32>
    %c1_321 = arith.constant 1 : index
    %c0_322 = arith.constant 0 : index
    %c0_323 = arith.constant 0 : index
    %472 = vector.load %arg9[%c1_321, %c0_322, %c0_323] : memref<2x512x512xbf16, #tpu.memory_space<vmem>>, vector<1x512x512xbf16>
    %473 = vector.shape_cast %472 : vector<1x512x512xbf16> to vector<512x512xbf16>
    %474 = arith.truncf %471 : vector<2x512xf32> to vector<2x512xbf16>
    %cst_324 = arith.constant dense<0.000000e+00> : vector<2x512xf32>
    %475 = tpu.matmul %474, %473, %cst_324 {dimension_numbers = #tpu.dot_dimension_numbers<[1], [0], [0], [1], [0, 0, 1, 1], [], []>} : vector<2x512xbf16>, vector<512x512xbf16>, vector<2x512xf32> -> vector<2x512xf32>
    %c0_325 = arith.constant 0 : index
    %c5120 = arith.constant 5120 : index
    %476 = vector.load %arg1[%c0_325, %c5120] : memref<1x5632xf32, #tpu.memory_space<vmem>>, vector<1x512xf32>
    %477 = vector.broadcast %476 : vector<1x512xf32> to vector<2x512xf32>
    %478 = arith.addf %475, %477 : vector<2x512xf32>
    %cst_326 = arith.constant 0.000000e+00 : f32
    %479 = vector.broadcast %cst_326 : f32 to vector<2x512xf32>
    %480 = arith.maximumf %478, %479 : vector<2x512xf32>
    %481 = vector.shape_cast %480 : vector<2x512xf32> to vector<2x1x512xf32>
    %c0_327 = arith.constant 0 : index
    %c0_328 = arith.constant 0 : index
    %c0_329 = arith.constant 0 : index
    %482 = vector.load %arg7[%c0_327, %c0_328, %c0_329] : memref<2x1x512xf32, #tpu.memory_space<vmem>>, vector<2x1x512xf32>
    tpu.vector_store %arg7[%c0_327, %c0_328, %c0_329], %481 {strides = array<i32>} : memref<2x1x512xf32, #tpu.memory_space<vmem>>, vector<2x1x512xf32>,
    return
  }
}

</mosaic_0001>

<bundles_post_ra>
// kernel: tpu_custom_call.1
= control target key start
LH: loop header
LB: loop body
LE: loop exit
PB: predicated region body
PF: predicated region fallthrough
CT: control target
= control target key end

     0   :  { %13 = vsyncpa [#allocation6], 0  ;;  %s8255_s0 = inlined_call_operand.hbm [shape: f32[2,16,64], index: 0, kind: input, shape index: {}]   ;;  %s8256_s1 = inlined_call_operand.hbm [shape: f32[1,5632], index: 1, kind: input, shape index: {}]   ;;  %s8257_s2 = inlined_call_operand.hbm [shape: bf16[8896,256], index: 2, kind: input, shape index: {}]   ;;  %s8258_s3 = inlined_call_operand.hbm [shape: bf16[1792,512], index: 3, kind: input, shape index: {}]   ;;  %s8259_s4 = inlined_call_operand.hbm [shape: f32[2,4,256], index: 4, kind: output, shape index: {0}]   ;;  %s8260_s5 = inlined_call_operand.hbm [shape: f32[2,2,256], index: 5, kind: output, shape index: {1}]   ;;  %s8261_s6 = inlined_call_operand.hbm [shape: f32[2,1,256], index: 6, kind: output, shape index: {2}]   ;;  %s8262_s7 = inlined_call_operand.hbm [shape: f32[2,1,512], index: 7, kind: output, shape index: {3}]  }
   0x1   :  { %14 = vsyncpa [#allocation9], 0 }
   0x2   :  { %15 = vsyncpa [#allocation7], 0 }
   0x3   :  { %16 = vsyncpa [#allocation12], 0 }
   0x4   :  { %17 = vsyncpa [#allocation15], 0  ;;  %s6670_s24 = smov [#allocation5]   ;;  %s6492_s28 = scalar_lea.hbm %s8255_s0, 512 }
   0x5   :  { %s23_s25 = sshll.u32 %s6670_s24, 4  ;;  %p6493_p0 = scmp.ne.s32.totalorder %s8255_s0, %s6492_s28  ;;  %s24_s25 = int_to_ptr.vmem [resolvable:$true] %s23_s25 }
   0x6   :  { %p6496_p1 = scmp.lt.u32.totalorder %s6492_s28, %s8255_s0 }
   0x8   :  { %p6498_p2 = pnand %p6496_p1, %p6493_p0 }
   0xa   :  { %6501 = shalt.err (!%p6498_p2)
}
   0xb   :  { %s6502_s10 = scalar_lea.vmem %s24_s25, 512  ;;  %p6507_p4 = scmp.lt.s32.totalorder %s24_s25, %s24_s25 }
   0xc   :  { %p6503_p3 = scmp.ne.s32.totalorder %s24_s25, %s6502_s10  ;;  %p6508_p5 = scmp.lt.s32.totalorder %s6502_s10, %s6502_s10 }
   0xe   :  { %p6509_p6 = por %p6508_p5, %p6507_p4 }
  0x10   :  { %p6510_p7 = pnand %p6509_p6, %p6503_p3 }
  0x12   :  { %6513 = shalt.err (!%p6510_p7)
}
  0x13   :  { %s6671_s11 = smov 128   ;;  %s6672_s12 = smov 8  }
  0x14   :  { %29 = dma.hbm_to_vmem [thread:$0]  %s8255_s0, 512, %s24_s25, [#allocation6], %s6671_s11, %s6671_s11, %s6672_s12  }
  0x15   :  { %s6673_s15 = smov [#allocation8]   ;;  %s6514_s19 = scalar_lea.hbm %s8256_s1, 704 }
  0x16   :  { %s36_s16 = sshll.u32 %s6673_s15, 4  ;;  %p6515_p8 = scmp.ne.s32.totalorder %s8256_s1, %s6514_s19  ;;  %s37_s16 = int_to_ptr.vmem [resolvable:$true] %s36_s16 }
  0x17   :  { %p6518_p9 = scmp.lt.u32.totalorder %s6514_s19, %s8256_s1 }
  0x19   :  { %p6520_p10 = pnand %p6518_p9, %p6515_p8 }
  0x1b   :  { %6523 = shalt.err (!%p6520_p10)
}
  0x1c   :  { %s6524_s24 = scalar_lea.vmem %s37_s16, 704  ;;  %p6529_p12 = scmp.lt.s32.totalorder %s37_s16, %s37_s16 }
  0x1d   :  { %p6525_p11 = scmp.ne.s32.totalorder %s37_s16, %s6524_s24  ;;  %p6530_p13 = scmp.lt.s32.totalorder %s6524_s24, %s6524_s24 }
  0x1f   :  { %p6531_p0 = por %p6530_p13, %p6529_p12 }
  0x21   :  { %p6532_p1 = pnand %p6531_p0, %p6525_p11 }
  0x23   :  { %6535 = shalt.err (!%p6532_p1)
}
  0x24   :  { %39 = dma.hbm_to_vmem [thread:$0]  %s8256_s1, 704, %s37_s16, [#allocation9]  }
  0x25   :  { %6624 = dma.done.wait [#allocation6], 512  }
  0x26   :  { %6625 = vsyncadd [#allocation6], 4294966784 }
  0x27   :  { %6626 = dma.done.wait [#allocation9], 704  }
  0x28   :  { %6627 = vsyncadd [#allocation9], 4294966592  ;;  %s51_s26 = sld [smem:[#allocation0]]   ;;  %s6674_s27 = smov 256   ;;  %vm131_vm0 = vcmask 1040384  }
  0x29   :  { %63 = sst [smem:[#allocation17]] %s6674_s27  ;;  %s6675_s28 = smov 2  }
  0x2a   :  { %65 = sst [smem:[#allocation17 + $0x1]] %s6674_s27  ;;  %s6676_s29 = smov 64  }
  0x2b   :  { %67 = sst [smem:[#allocation17 + $0x2]] %s6675_s28  ;;  %s6677_s30 = smov [#allocation2]  }
  0x2c   :  { %69 = sst [smem:[#allocation17 + $0x3]] %s6676_s29  ;;  %s59_s1 = sshll.u32 %s6677_s30, 4  ;;  %s6784_s1 = int_to_ptr.vmem [resolvable:$true] %s59_s1 }
  0x2d   :  { %71 = sst [smem:[#allocation17 + $0x4]] %s6671_s11  ;;  %s6678_s10 = smov 4  }
  0x2e   :  { %73 = sst [smem:[#allocation17 + $0x5]] %s6675_s28  ;;  %s6174_s8 = sshll.u32 %s51_s26, 26 }
  0x2f   :  { %75 = sst [smem:[#allocation17 + $0x6]] %s6671_s11  ;;  %s6787_s9 = sadd.s32 134217728, %s6174_s8 }
  0x30   :  { %77 = sst [smem:[#allocation17 + $0x7]] %s6676_s29  ;;  %s6679_s13 = smov [#allocation4]  }
  0x31   :  { %79 = sst [smem:[#allocation17 + $0x8]] %s6678_s10  ;;  %s6680_s14 = smov [#allocation16]  }
  0x32   :  { %81 = dma.general %s8257_s2, 3072, %s6784_s1, %s6679_s13, %s6680_s14, [#allocation17], %s6787_s9, 0  }
  0x33   :  { %v82_v0 = vld [vmem:[#allocation5] sm:$0xff]  ;;  %v83_v1 = vld [vmem:[#allocation5 + $0x8] sm:$0xff]  ;;  %v84_v2 = vld [vmem:[#allocation5 + $0x10] sm:$0xff] }
  0x34   :  { %v85_v3 = vld [vmem:[#allocation5 + $0x18] sm:$0xff]  ;;  %v132_v4 = vrot.slane %v82_v0, 7  ;;  %v133_v5 = vrot.slane %v83_v1, 7 }
  0x35   :  { %6628 = dma.done.wait [#allocation4], 3072 }
  0x36   :  { %6629 = vsyncadd [#allocation4], 4294964224  ;;  %vm152_vm1 = vcmask 1046528   ;;  %v135_v6 = vrot.slane %v84_v2, 7  ;;  %v136_v7 = vrot.slane %v85_v3, 7  ;;  %108 = sst [smem:[#allocation19]] %s6674_s27  ;;  %v6799_v8 = vsel %vm131_vm0, %v132_v4, %v133_v5 }
  0x37   :  { %v6802_v9 = vsel %vm131_vm0, 0.0, %v132_v4  ;;  %v146_v10 = vsel %vm131_vm0, %v133_v5, 0.0  ;;  %110 = sst [smem:[#allocation19 + $0x1]] %s6674_s27  ;;  %vm175_vm2 = vcmask 1045504   ;;  %v154_v12 = vrot.slane %v6799_v8, 1  ;;  %s6681_s17 = smov [#allocation2 + $0x300]  }
  0x38   :  { %v153_v11 = vrot.slane %v6802_v9, 1  ;;  %v156_v13 = vrot.slane %v146_v10, 1  ;;  %v6809_v14 = vsel %vm131_vm0, %v135_v6, %v136_v7  ;;  %112 = sst [smem:[#allocation19 + $0x2]] %s6675_s28  ;;  %s104_s18 = sshll.u32 %s6681_s17, 4  ;;  %v6813_v15 = vsel %vm131_vm0, 0.0, %v135_v6  ;;  %s6826_s18 = int_to_ptr.vmem [resolvable:$true] %s104_s18 }
  0x39   :  { %v147_v16 = vsel %vm131_vm0, %v136_v7, 0.0  ;;  %v159_v17 = vrot.slane %v6809_v14, 1  ;;  %v182_v18 = vrot.slane %v6809_v14, 2  ;;  %114 = sst [smem:[#allocation19 + $0x3]] %s6676_s29  ;;  %s90_s21 = scalar_lea.hbm %s8257_s2, 3072  ;;  %v158_v21 = vrot.slane %v6813_v15, 1 }
  0x3a   :  { %v155_v19 = vsel %vm152_vm1, %v153_v11, %v154_v12  ;;  %v157_v20 = vsel %vm152_vm1, %v154_v12, %v156_v13  ;;  %v161_v22 = vrot.slane %v147_v16, 1  ;;  %116 = sst [smem:[#allocation19 + $0x4]] %s6671_s11  ;;  %v181_v24 = vrot.slane %v6813_v15, 2  ;;  %s6682_s22 = smov [#allocation4 + $0x1]  }
  0x3b   :  { %v6482_v23 = vpack.i.bf16 %v157_v20, %v155_v19  ;;  %v184_v25 = vrot.slane %v147_v16, 2  ;;  %118 = sst [smem:[#allocation19 + $0x5]] %s6675_s28  ;;  %v176_v26 = vrot.slane %v6802_v9, 2  ;;  %v160_v27 = vsel %vm152_vm1, %v158_v21, %v159_v17  ;;  %s6683_s23 = smov [#allocation18]  }
  0x3c   :  { %v162_v28 = vsel %vm152_vm1, %v159_v17, %v161_v22  ;;  %120 = sst [smem:[#allocation19 + $0x6]] %s6671_s11  ;;  %v177_v29 = vrot.slane %v6799_v8, 2  ;;  %v179_v30 = vrot.slane %v146_v10, 2  ;;  %v6838_v32 = vsel %vm175_vm2, %v181_v24, %v182_v18 }
  0x3d   :  { %6483 = vrot.lane.b32.xlu0 %v6482_v23, %s6676_s29  ;;  %v6487_v31 = vpack.i.bf16 %v162_v28, %v160_v27  ;;  %122 = sst [smem:[#allocation19 + $0x7]] %s6676_s29  ;;  %v6841_v33 = vsel %vm175_vm2, %v182_v18, %v184_v25  ;;  %vm190_vm3 = vcmask 523264   ;;  %v225_v11 = vlaneseq }
  0x3e   :  { %124 = sst [smem:[#allocation19 + $0x8]] %s6678_s10  ;;  %v178_v34 = vsel %vm175_vm2, %v176_v26, %v177_v29  ;;  %v180_v35 = vsel %vm175_vm2, %v177_v29, %v179_v30  ;;  %v222_v36 = vpack.c.bf16 %v6841_v33, %v6838_v32 }
  0x3f   :  { %126 = dma.general %s90_s21, 12288, %s6826_s18, %s6682_s22, %s6683_s23, [#allocation19], %s6787_s9, 0   ;;  %v220_v37 = vpack.c.bf16 %v180_v35, %v178_v34 }
  0x40   :  { %v196_v38 = vld [vmem:[#allocation2 + $0x8] sm:$0xff]  ;;  %v195_v39 = vld [vmem:[#allocation2] sm:$0xff]  ;;  %v198_v40 = vld [vmem:[#allocation2 + $0x18] sm:$0xff] }
  0x41   :  { %6488 = vrot.lane.b32.xlu0 %v6487_v31, %s6676_s29  ;;  %6178 = vmatprep.mubr.msk.bf16.mxu0 %vm190_vm3, %v220_v37  ;;  %v197_v41 = vld [vmem:[#allocation2 + $0x10] sm:$0xff]  ;;  %v200_v42 = vld [vmem:[#allocation2 + $0x28] sm:$0xff]  ;;  %v199_v43 = vld [vmem:[#allocation2 + $0x20] sm:$0xff] }
  0x42   :  { %241 = vmatprep.subr.bf16.mxu0 %v196_v38  ;;  %v202_v44 = vld [vmem:[#allocation2 + $0x38] sm:$0xff]  ;;  %v201_v45 = vld [vmem:[#allocation2 + $0x30] sm:$0xff]  ;;  %v204_v46 = vld [vmem:[#allocation2 + $0x48] sm:$0xff] }
  0x43   :  { %242 = vmatpush1.bf16.msra.mxu0 %v195_v39  ;;  %v203_v47 = vld [vmem:[#allocation2 + $0x40] sm:$0xff]  ;;  %v206_v48 = vld [vmem:[#allocation2 + $0x58] sm:$0xff]  ;;  %v205_v49 = vld [vmem:[#allocation2 + $0x50] sm:$0xff] }
  0x44   :  { %243 = vmatprep.subr.bf16.mxu0 %v198_v40  ;;  %v208_v50 = vld [vmem:[#allocation2 + $0x68] sm:$0xff]  ;;  %v207_v51 = vld [vmem:[#allocation2 + $0x60] sm:$0xff]  ;;  %v210_v52 = vld [vmem:[#allocation2 + $0x78] sm:$0xff] }
  0x45   :  { %v209_v53 = vld [vmem:[#allocation2 + $0x70] sm:$0xff]  ;;  %v212_v54 = vld [vmem:[#allocation2 + $0x88] sm:$0xff]  ;;  %v211_v55 = vld [vmem:[#allocation2 + $0x80] sm:$0xff] }
  0x46   :  { %v214_v56 = vld [vmem:[#allocation2 + $0x98] sm:$0xff]  ;;  %v213_v57 = vld [vmem:[#allocation2 + $0x90] sm:$0xff]  ;;  %v216_v58 = vld [vmem:[#allocation2 + $0xa8] sm:$0xff] }
  0x47   :  { %244 = vmatpush1.bf16.msra.mxu0 %v197_v41  ;;  %v215_v59 = vld [vmem:[#allocation2 + $0xa0] sm:$0xff]  ;;  %v218_v60 = vld [vmem:[#allocation2 + $0xb8] sm:$0xff]  ;;  %v217_v61 = vld [vmem:[#allocation2 + $0xb0] sm:$0xff] }
  0x48   :  { %245 = vmatprep.subr.bf16.mxu0 %v200_v42  ;;  %v223_v13 = vld [vmem:[#allocation8] sm:$0x3] }
  0x4b   :  { %246 = vmatpush1.bf16.msra.mxu0 %v199_v43 }
  0x4c   :  { %247 = vmatprep.subr.bf16.mxu0 %v202_v44 }
  0x4f   :  { %248 = vmatpush1.bf16.msra.mxu0 %v201_v45 }
  0x50   :  { %249 = vmatprep.subr.bf16.mxu0 %v204_v46 }
  0x53   :  { %250 = vmatpush1.bf16.msra.mxu0 %v203_v47 }
  0x54   :  { %251 = vmatprep.subr.bf16.mxu0 %v206_v48 }
  0x57   :  { %252 = vmatpush1.bf16.msra.mxu0 %v205_v49 }
  0x58   :  { %253 = vmatprep.subr.bf16.mxu0 %v208_v50 }
  0x5b   :  { %254 = vmatpush1.bf16.msra.mxu0 %v207_v51 }
  0x5c   :  { %255 = vmatprep.subr.bf16.mxu0 %v210_v52 }
  0x5f   :  { %256 = vmatpush1.bf16.msra.mxu0 %v209_v53 }
  0x60   :  { %257 = vmatprep.subr.bf16.mxu0 %v212_v54 }
  0x63   :  { %258 = vmatpush1.bf16.msra.mxu0 %v211_v55 }
  0x64   :  { %259 = vmatprep.subr.bf16.mxu0 %v214_v56 }
  0x67   :  { %260 = vmatpush1.bf16.msra.mxu0 %v213_v57 }
  0x68   :  { %261 = vmatprep.subr.bf16.mxu0 %v216_v58 }
  0x6b   :  { %262 = vmatpush1.bf16.msra.mxu0 %v215_v59 }
  0x6c   :  { %263 = vmatprep.subr.bf16.mxu0 %v218_v60 }
  0x6f   :  { %264 = vmatpush1.bf16.msra.mxu0 %v217_v61 }
  0xaf   :  { %v6484_v62 = vpop.permute.xlu0 %6483 }
  0xb0   :  { %v6486_v63 = vunpack.i.h.bf16 %v6484_v62  ;;  %v6485_v0 = vunpack.i.l.bf16 %v6484_v62 }
  0xb2   :  { %v191_v1 = vsel %vm190_vm3, %v6802_v9, %v6485_v0  ;;  %v192_v2 = vsel %vm190_vm3, %v6799_v8, %v6486_v63  ;;  %v6870_v8 = vshrl.u32 %v225_v11, 7 }
  0xb3   :  { %v219_v3 = vpack.c.bf16 %v192_v2, %v191_v1  ;;  %v6489_v4 = vpop.permute.xlu0 %6488 }
  0xb4   :  { %v6491_v5 = vunpack.i.h.bf16 %v6489_v4  ;;  %v6490_v6 = vunpack.i.l.bf16 %v6489_v4  ;;  %v6873_v12 = vsub.s32 0, %v6870_v8  ;;  %v6876_v16 = vsub.s32 1, %v6870_v8 }
  0xb5   :  { %274 = vmatmul.mubr.bf16.vlgmr.msra.gmra.mrb[0].mxu0 %v219_v3 }
  0xb6   :  { %6179 = vmatprep.mubr.msk.bf16.mxu0 %vm190_vm3, %v222_v36  ;;  %v193_v7 = vsel %vm190_vm3, %v6813_v15, %v6490_v6  ;;  %v194_v10 = vsel %vm190_vm3, %v6809_v14, %v6491_v5  ;;  %v228_v17 = vrot.slane %v223_v13, %v6873_v12  ;;  %v232_v15 = vrot.slane %v223_v13, %v6876_v16 }
  0xb7   :  { %v221_v9 = vpack.c.bf16 %v194_v10, %v193_v7 }
  0xbd   :  { %284 = vmatmul.mubr.bf16.gmra.mrb[4].mxu0 %v221_v9 }
 0x188   :  { %v275_v18 = vpop.f32.mrb[0].mxu0 }
 0x189   :  { %v6880_v19 = vadd.f32 %v275_v18, %v228_v17  ;;  %v277_v14 = vpop.f32.mrb[1].mxu0 }
 0x18a   :  { %v278_v20 = vadd.f32 %v277_v14, %v232_v15  ;;  %v279_v21 = vpop.f32.mrb[2].mxu0 }
 0x18b   :  { %v294_v22 = vmax.f32 %v6880_v19, 0.0  ;;  %v6883_v23 = vadd.f32 %v279_v21, %v228_v17  ;;  %v281_v24 = vpop.f32.mrb[3].mxu0 }
 0x18c   :  { %v295_v25 = vmax.f32 %v278_v20, 0.0  ;;  %v282_v26 = vadd.f32 %v281_v24, %v232_v15 }
 0x18d   :  { %v296_v27 = vmax.f32 %v6883_v23, 0.0 }
 0x18e   :  { %v297_v28 = vmax.f32 %v282_v26, 0.0 }
 0x190   :  { %v285_v29 = vpop.f32.mrb[4].mxu0 }
 0x191   :  { %v6886_v30 = vadd.f32 %v285_v29, %v228_v17  ;;  %v287_v31 = vpop.f32.mrb[5].mxu0 }
 0x192   :  { %v6888_v32 = vadd.f32 %v287_v31, %v232_v15  ;;  %v289_v33 = vpop.f32.mrb[6].mxu0 }
 0x193   :  { %v298_v34 = vmax.f32 %v6886_v30, 0.0  ;;  %v6891_v35 = vadd.f32 %v289_v33, %v228_v17  ;;  %v291_v36 = vpop.f32.mrb[7].mxu0 }
 0x194   :  { %v299_v37 = vmax.f32 %v6888_v32, 0.0  ;;  %v6894_v38 = vadd.f32 %v291_v36, %v232_v15 }
 0x195   :  { %v300_v39 = vmax.f32 %v6891_v35, 0.0 }
 0x196   :  { %v301_v40 = vmax.f32 %v6894_v38, 0.0 }
 0x197   :  { %6630 = dma.done.wait [#allocation4 + $0x1], 12288 }
 0x198   :  { %6631 = vsyncadd [#allocation4 + $0x1], 4294955008  ;;  %v350_v41 = vrot.slane %v295_v25, 7  ;;  %v353_v42 = vrot.slane %v297_v28, 7  ;;  %322 = sst [smem:[#allocation21]] %s6674_s27  ;;  %vm6684_vm5 = vmmov 1  }
 0x199   :  { %vm6900_vm4 = vmneg %vm131_vm0  ;;  %324 = sst [smem:[#allocation21 + $0x1]] %s6674_s27  ;;  %s306_s30 = scalar_lea.hbm %s8257_s2, 15360  ;;  %v349_v28 = vrot.slane %v294_v22, 7  ;;  %v351_v29 = vrot.slane %v296_v27, 7  ;;  %v356_v33 = vrot.slane %v299_v37, 7  ;;  %v359_v36 = vrot.slane %v301_v40, 7 }
 0x19a   :  { %v6906_v44 = vsel %vm131_vm0, %v350_v41, %v353_v42  ;;  %vm6910_vm6 = vmpackc.low %vm6684_vm5, %vm6900_vm4  ;;  %326 = sst [smem:[#allocation21 + $0x2]] %s6675_s28  ;;  %s6685_s8 = smov [#allocation20]   ;;  %v6931_v47 = vsel %vm131_vm0, %v353_v42, 0.0  ;;  %v6935_v49 = vsel %vm131_vm0, 0.0, %v350_v41 }
 0x19b   :  { %v6184_v46 = vpack.c.bf16 %v6906_v44, %v350_v41  ;;  %328 = sst [smem:[#allocation21 + $0x3]] %s6676_s29  ;;  %v393_v48 = vrot.slane %v6906_v44, 1  ;;  %v392_v50 = vrot.slane %v6935_v49, 1  ;;  %v397_v51 = vrot.slane %v6931_v47, 1 }
 0x19c   :  { %330 = sst [smem:[#allocation21 + $0x4]] %s6671_s11  ;;  %v421_v42 = vrot.slane %v6906_v44, 2  ;;  %v6960_v19 = vsel %vm131_vm0, %v351_v29, 0.0  ;;  %v6965_v32 = vsel %vm131_vm0, %v356_v33, %v359_v36  ;;  %v6968_v37 = vsel %vm131_vm0, 0.0, %v349_v28 }
 0x19d   :  { %6185 = vmatprep.mubr.msk.bf16.mxu1 %vm6910_vm6, %v6184_v46  ;;  %332 = sst [smem:[#allocation21 + $0x5]] %s6675_s28  ;;  %v6940_v52 = vsel %vm152_vm1, %v392_v50, %v393_v48  ;;  %v6943_v53 = vsel %vm152_vm1, %v393_v48, %v397_v51  ;;  %v6957_v46 = vsel %vm131_vm0, %v349_v28, %v351_v29  ;;  %v423_v23 = vrot.slane %v6960_v19, 2 }
 0x19e   :  { %334 = sst [smem:[#allocation21 + $0x6]] %s6671_s11  ;;  %v544_v54 = vpack.c.bf16 %v6943_v53, %v6940_v52  ;;  %v418_v22 = vrot.slane %v6957_v46, 2  ;;  %v420_v38 = vrot.slane %v6935_v49, 2  ;;  %v425_v40 = vrot.slane %v6931_v47, 2 }
 0x19f   :  { %336 = sst [smem:[#allocation21 + $0x7]] %s6676_s29  ;;  %v355_v48 = vrot.slane %v298_v34, 7  ;;  %v357_v50 = vrot.slane %v300_v39, 7  ;;  %v417_v51 = vrot.slane %v6968_v37, 2  ;;  %v6192_v47 = vpack.c.bf16 %v6965_v32, %v356_v33 }
 0x1a0   :  { %338 = sst [smem:[#allocation21 + $0x8]] %s6678_s10  ;;  %v6991_v35 = vsel %vm175_vm2, %v418_v22, %v423_v23 }
 0x1a1   :  { %340 = dma.general %s306_s30, 12288, %s6784_s1, %s6679_s13, %s6685_s8, [#allocation21], %s6787_s9, 0   ;;  %v6988_v34 = vsel %vm175_vm2, %v417_v51, %v418_v22  ;;  %v390_v51 = vrot.slane %v6957_v46, 1 }
 0x1a2   :  { %v446_v55 = vld [vmem:[#allocation2 + $0x308] sm:$0xff]  ;;  %v445_v56 = vld [vmem:[#allocation2 + $0x300] sm:$0xff]  ;;  %v448_v57 = vld [vmem:[#allocation2 + $0x318] sm:$0xff]  ;;  %v545_v49 = vpack.c.bf16 %v6991_v35, %v6988_v34 }
 0x1a3   :  { %565 = vmatprep.subr.bf16.mxu1 %v446_v55  ;;  %v447_v58 = vld [vmem:[#allocation2 + $0x310] sm:$0xff]  ;;  %v450_v59 = vld [vmem:[#allocation2 + $0x328] sm:$0xff]  ;;  %v449_v60 = vld [vmem:[#allocation2 + $0x320] sm:$0xff]  ;;  %v6188_v55 = vpack.c.bf16 %v6957_v46, %v349_v28 }
 0x1a4   :  { %566 = vmatpush1.bf16.msra.mxu1 %v445_v56  ;;  %v452_v61 = vld [vmem:[#allocation2 + $0x338] sm:$0xff]  ;;  %v451_v62 = vld [vmem:[#allocation2 + $0x330] sm:$0xff]  ;;  %v454_v63 = vld [vmem:[#allocation2 + $0x348] sm:$0xff]  ;;  %v6979_v56 = vsel %vm175_vm2, %v420_v38, %v421_v42 }
 0x1a5   :  { %567 = vmatprep.subr.bf16.mxu1 %v448_v57  ;;  %v453_v0 = vld [vmem:[#allocation2 + $0x340] sm:$0xff]  ;;  %v456_v1 = vld [vmem:[#allocation2 + $0x358] sm:$0xff]  ;;  %v455_v2 = vld [vmem:[#allocation2 + $0x350] sm:$0xff]  ;;  %v6982_v57 = vsel %vm175_vm2, %v421_v42, %v425_v40 }
 0x1a6   :  { %v458_v3 = vld [vmem:[#allocation2 + $0x368] sm:$0xff]  ;;  %v457_v4 = vld [vmem:[#allocation2 + $0x360] sm:$0xff]  ;;  %v460_v5 = vld [vmem:[#allocation2 + $0x378] sm:$0xff]  ;;  %v546_v30 = vpack.c.bf16 %v6982_v57, %v6979_v56 }
 0x1a7   :  { %v459_v6 = vld [vmem:[#allocation2 + $0x370] sm:$0xff]  ;;  %v462_v7 = vld [vmem:[#allocation2 + $0x388] sm:$0xff]  ;;  %v461_v10 = vld [vmem:[#allocation2 + $0x380] sm:$0xff] }
 0x1a8   :  { %568 = vmatpush1.bf16.msra.mxu1 %v447_v58  ;;  %v464_v9 = vld [vmem:[#allocation2 + $0x398] sm:$0xff]  ;;  %v463_v13 = vld [vmem:[#allocation2 + $0x390] sm:$0xff]  ;;  %v466_v17 = vld [vmem:[#allocation2 + $0x3a8] sm:$0xff] }
 0x1a9   :  { %569 = vmatprep.subr.bf16.mxu1 %v450_v59  ;;  %v465_v15 = vld [vmem:[#allocation2 + $0x3a0] sm:$0xff]  ;;  %v468_v18 = vld [vmem:[#allocation2 + $0x3b8] sm:$0xff]  ;;  %v467_v14 = vld [vmem:[#allocation2 + $0x3b0] sm:$0xff]  ;;  %v6996_v59 = vsel %vm131_vm0, %v355_v48, %v357_v50 }
 0x1aa   :  { %v470_v20 = vld [vmem:[#allocation2 + $0x3c8] sm:$0xff]  ;;  %v469_v21 = vld [vmem:[#allocation2 + $0x3c0] sm:$0xff]  ;;  %v472_v24 = vld [vmem:[#allocation2 + $0x3d8] sm:$0xff] }
 0x1ab   :  { %v471_v25 = vld [vmem:[#allocation2 + $0x3d0] sm:$0xff]  ;;  %v474_v26 = vld [vmem:[#allocation2 + $0x3e8] sm:$0xff]  ;;  %v473_v31 = vld [vmem:[#allocation2 + $0x3e0] sm:$0xff] }
 0x1ac   :  { %570 = vmatpush1.bf16.msra.mxu1 %v449_v60  ;;  %v476_v41 = vld [vmem:[#allocation2 + $0x3f8] sm:$0xff]  ;;  %v475_v27 = vld [vmem:[#allocation2 + $0x3f0] sm:$0xff]  ;;  %v478_v44 = vld [vmem:[#allocation2 + $0x408] sm:$0xff]  ;;  %v6999_v60 = vsel %vm131_vm0, 0.0, %v356_v33 }
 0x1ad   :  { %571 = vmatprep.subr.bf16.mxu1 %v452_v61  ;;  %v477_v39 = vld [vmem:[#allocation2 + $0x400] sm:$0xff]  ;;  %v480_v58 = vld [vmem:[#allocation2 + $0x418] sm:$0xff]  ;;  %v7002_v61 = vsel %vm131_vm0, %v359_v36, 0.0  ;;  %v487_v29 = vld [vmem:[#allocation2 + $0x450] sm:$0xff] }
 0x1ae   :  { %v488_v28 = vld [vmem:[#allocation2 + $0x458] sm:$0xff]  ;;  %v489_v45 = vld [vmem:[#allocation2 + $0x460] sm:$0xff]  ;;  %v491_v36 = vld [vmem:[#allocation2 + $0x470] sm:$0xff] }
 0x1af   :  { %v492_v33 = vld [vmem:[#allocation2 + $0x478] sm:$0xff]  ;;  %v494_v52 = vld [vmem:[#allocation2 + $0x488] sm:$0xff]  ;;  %v493_v53 = vld [vmem:[#allocation2 + $0x480] sm:$0xff] }
 0x1b0   :  { %572 = vmatpush1.bf16.msra.mxu1 %v451_v62  ;;  %v7005_v62 = vsel %vm131_vm0, 0.0, %v355_v48  ;;  %v498_v42 = vld [vmem:[#allocation2 + $0x4a8] sm:$0xff]  ;;  %v497_v22 = vld [vmem:[#allocation2 + $0x4a0] sm:$0xff]  ;;  %v500_v23 = vld [vmem:[#allocation2 + $0x4b8] sm:$0xff] }
 0x1b1   :  { %573 = vmatprep.subr.bf16.mxu1 %v454_v63  ;;  %v7010_v63 = vsel %vm131_vm0, %v357_v50, 0.0  ;;  %v502_v38 = vld [vmem:[#allocation2 + $0x4c8] sm:$0xff]  ;;  %v501_v40 = vld [vmem:[#allocation2 + $0x4c0] sm:$0xff]  ;;  %v507_v46 = vld [vmem:[#allocation2 + $0x4f0] sm:$0xff] }
 0x1b2   :  { %v506_v50 = vld [vmem:[#allocation2 + $0x4e8] sm:$0xff]  ;;  %v525_v57 = vld [vmem:[#allocation2 + $0x580] sm:$0xff] }
 0x1b3   :  { %v526_v56 = vld [vmem:[#allocation2 + $0x588] sm:$0xff] }
 0x1b4   :  { %574 = vmatpush1.bf16.msra.mxu1 %v453_v0  ;;  %v430_v0 = vrot.slane %v6999_v60, 2 }
 0x1b5   :  { %575 = vmatprep.subr.bf16.mxu1 %v456_v1  ;;  %v431_v1 = vrot.slane %v6965_v32, 2 }
 0x1b8   :  { %576 = vmatpush1.bf16.msra.mxu1 %v455_v2  ;;  %v435_v2 = vrot.slane %v7002_v61, 2 }
 0x1b9   :  { %577 = vmatprep.subr.bf16.mxu1 %v458_v3  ;;  %v427_v3 = vrot.slane %v7005_v62, 2 }
 0x1bc   :  { %578 = vmatpush1.bf16.msra.mxu1 %v457_v4  ;;  %v428_v4 = vrot.slane %v6996_v59, 2 }
 0x1bd   :  { %579 = vmatprep.subr.bf16.mxu1 %v460_v5  ;;  %v433_v5 = vrot.slane %v7010_v63, 2 }
 0x1c0   :  { %580 = vmatpush1.bf16.msra.mxu1 %v459_v6  ;;  %v479_v6 = vld [vmem:[#allocation2 + $0x410] sm:$0xff] }
 0x1c1   :  { %581 = vmatprep.subr.bf16.mxu1 %v462_v7  ;;  %v7021_v7 = vsel %vm175_vm2, %v430_v0, %v431_v1  ;;  %v403_v0 = vrot.slane %v6965_v32, 1  ;;  %v399_v32 = vrot.slane %v7005_v62, 1  ;;  %v513_v62 = vld [vmem:[#allocation2 + $0x520] sm:$0xff] }
 0x1c4   :  { %582 = vmatpush1.bf16.msra.mxu1 %v461_v10  ;;  %v7024_v10 = vsel %vm175_vm2, %v431_v1, %v435_v2  ;;  %v407_v1 = vrot.slane %v7002_v61, 1  ;;  %v508_v2 = vld [vmem:[#allocation2 + $0x4f8] sm:$0xff]  ;;  %v400_v61 = vrot.slane %v6996_v59, 1 }
 0x1c5   :  { %583 = vmatprep.subr.bf16.mxu1 %v464_v9  ;;  %v482_v9 = vld [vmem:[#allocation2 + $0x428] sm:$0xff] }
 0x1c8   :  { %584 = vmatpush1.bf16.msra.mxu1 %v463_v13  ;;  %v552_v13 = vpack.c.bf16 %v7024_v10, %v7021_v7 }
 0x1c9   :  { %585 = vmatprep.subr.bf16.mxu1 %v466_v17  ;;  %v7029_v17 = vsel %vm175_vm2, %v427_v3, %v428_v4 }
 0x1cc   :  { %586 = vmatpush1.bf16.msra.mxu1 %v465_v15  ;;  %v7032_v15 = vsel %vm175_vm2, %v428_v4, %v433_v5  ;;  %v510_v5 = vld [vmem:[#allocation2 + $0x508] sm:$0xff] }
 0x1cd   :  { %587 = vmatprep.subr.bf16.mxu1 %v468_v18  ;;  %v6196_v18 = vpack.c.bf16 %v6996_v59, %v355_v48  ;;  %v503_v48 = vld [vmem:[#allocation2 + $0x4d0] sm:$0xff]  ;;  %v516_v59 = vld [vmem:[#allocation2 + $0x538] sm:$0xff] }
 0x1d0   :  { %588 = vmatpush1.bf16.msra.mxu1 %v467_v14  ;;  %v551_v14 = vpack.c.bf16 %v7032_v15, %v7029_v17 }
 0x1d1   :  { %589 = vmatprep.subr.bf16.mxu1 %v470_v20  ;;  %v481_v20 = vld [vmem:[#allocation2 + $0x420] sm:$0xff] }
 0x1d4   :  { %590 = vmatpush1.bf16.msra.mxu1 %v469_v21  ;;  %v484_v21 = vld [vmem:[#allocation2 + $0x438] sm:$0xff] }
 0x1d5   :  { %591 = vmatprep.subr.bf16.mxu1 %v472_v24  ;;  %v483_v24 = vld [vmem:[#allocation2 + $0x430] sm:$0xff] }
 0x1d8   :  { %592 = vmatpush1.bf16.msra.mxu1 %v471_v25  ;;  %v486_v25 = vld [vmem:[#allocation2 + $0x448] sm:$0xff] }
 0x1d9   :  { %593 = vmatprep.subr.bf16.mxu1 %v474_v26  ;;  %v485_v26 = vld [vmem:[#allocation2 + $0x440] sm:$0xff] }
 0x1dc   :  { %594 = vmatpush1.bf16.msra.mxu1 %v473_v31  ;;  %v490_v31 = vld [vmem:[#allocation2 + $0x468] sm:$0xff] }
 0x1dd   :  { %595 = vmatprep.subr.bf16.mxu1 %v476_v41  ;;  %v495_v41 = vld [vmem:[#allocation2 + $0x490] sm:$0xff] }
 0x1e0   :  { %596 = vmatpush1.bf16.msra.mxu1 %v475_v27  ;;  %v499_v27 = vld [vmem:[#allocation2 + $0x4b0] sm:$0xff] }
 0x1e1   :  { %618 = vmatprep.subr.bf16.mxu1 %v478_v44  ;;  %v504_v44 = vld [vmem:[#allocation2 + $0x4d8] sm:$0xff] }
 0x1e3   :  { %6189 = vmatmul.mubr.msk.bf16.vlgmr.msra.gmra.mrb[0].mxu1 %vm6910_vm6, %v6188_v55  ;;  %v395_v55 = vrot.slane %v6960_v19, 1 }
 0x1e4   :  { %619 = vmatpush1.bf16.msra.mxu1 %v477_v39  ;;  %6193 = vmatprep.mubr.msk.bf16.mxu1 %vm6910_vm6, %v6192_v47  ;;  %v389_v47 = vrot.slane %v6968_v37, 1  ;;  %v505_v39 = vld [vmem:[#allocation2 + $0x4e0] sm:$0xff]  ;;  %v408_v37 = vsel %vm152_vm1, %v403_v0, %v407_v1 }
 0x1e5   :  { %620 = vmatprep.subr.bf16.mxu1 %v480_v58  ;;  %v402_v58 = vrot.slane %v6999_v60, 1  ;;  %v396_v4 = vsel %vm152_vm1, %v390_v51, %v395_v55  ;;  %v540_v55 = vld [vmem:[#allocation2 + $0x5f8] sm:$0xff] }
 0x1e6   :  { %v391_v3 = vsel %vm152_vm1, %v389_v47, %v390_v51  ;;  %v537_v51 = vld [vmem:[#allocation2 + $0x5e0] sm:$0xff]  ;;  %v539_v47 = vld [vmem:[#allocation2 + $0x5f0] sm:$0xff] }
 0x1e7   :  { %v404_v19 = vsel %vm152_vm1, %v402_v58, %v403_v0 }
 0x1e8   :  { %621 = vmatpush1.bf16.msra.mxu1 %v479_v6  ;;  %v543_v6 = vpack.c.bf16 %v396_v4, %v391_v3  ;;  %v550_v60 = vpack.c.bf16 %v408_v37, %v404_v19 }
 0x1e9   :  { %622 = vmatprep.subr.bf16.mxu1 %v482_v9  ;;  %v405_v9 = vrot.slane %v7010_v63, 1  ;;  %v515_v63 = vld [vmem:[#allocation2 + $0x530] sm:$0xff] }
 0x1eb   :  { %6197 = vmatmul.mubr.msk.bf16.gmra.mrb[4].mxu1 %vm6910_vm6, %v6196_v18  ;;  %v509_v18 = vld [vmem:[#allocation2 + $0x500] sm:$0xff] }
 0x1ec   :  { %623 = vmatpush1.bf16.msra.mxu1 %v481_v20  ;;  %650 = vmatprep.mubr.bf16.mxu1 %v544_v54  ;;  %v496_v54 = vld [vmem:[#allocation2 + $0x498] sm:$0xff] }
 0x1ed   :  { %624 = vmatprep.subr.bf16.mxu1 %v484_v21  ;;  %v512_v20 = vld [vmem:[#allocation2 + $0x518] sm:$0xff]  ;;  %v401_v21 = vsel %vm152_vm1, %v399_v32, %v400_v61 }
 0x1f0   :  { %625 = vmatpush1.bf16.msra.mxu1 %v483_v24  ;;  %v406_v24 = vsel %vm152_vm1, %v400_v61, %v405_v9 }
 0x1f1   :  { %626 = vmatprep.subr.bf16.mxu1 %v486_v25  ;;  %v511_v25 = vld [vmem:[#allocation2 + $0x510] sm:$0xff] }
 0x1f4   :  { %627 = vmatpush1.bf16.msra.mxu1 %v485_v26  ;;  %v514_v26 = vld [vmem:[#allocation2 + $0x528] sm:$0xff] }
 0x1f5   :  { %628 = vmatprep.subr.bf16.mxu1 %v488_v28  ;;  %v549_v28 = vpack.c.bf16 %v406_v24, %v401_v21 }
 0x1f8   :  { %629 = vmatpush1.bf16.msra.mxu1 %v487_v29  ;;  %v518_v29 = vld [vmem:[#allocation2 + $0x548] sm:$0xff] }
 0x1f9   :  { %630 = vmatprep.subr.bf16.mxu1 %v490_v31  ;;  %v517_v31 = vld [vmem:[#allocation2 + $0x540] sm:$0xff] }
 0x1fc   :  { %631 = vmatpush1.bf16.msra.mxu1 %v489_v45  ;;  %v520_v45 = vld [vmem:[#allocation2 + $0x558] sm:$0xff] }
 0x1fd   :  { %632 = vmatprep.subr.bf16.mxu1 %v492_v33  ;;  %v519_v33 = vld [vmem:[#allocation2 + $0x550] sm:$0xff] }
 0x200   :  { %633 = vmatpush1.bf16.msra.mxu1 %v491_v36  ;;  %v522_v36 = vld [vmem:[#allocation2 + $0x568] sm:$0xff] }
 0x201   :  { %634 = vmatprep.subr.bf16.mxu1 %v494_v52  ;;  %v521_v52 = vld [vmem:[#allocation2 + $0x560] sm:$0xff] }
 0x204   :  { %635 = vmatpush1.bf16.msra.mxu1 %v493_v53  ;;  %v524_v53 = vld [vmem:[#allocation2 + $0x578] sm:$0xff] }
 0x205   :  { %636 = vmatprep.subr.bf16.mxu1 %v496_v54  ;;  %v523_v54 = vld [vmem:[#allocation2 + $0x570] sm:$0xff] }
 0x208   :  { %637 = vmatpush1.bf16.msra.mxu1 %v495_v41  ;;  %v527_v41 = vld [vmem:[#allocation2 + $0x590] sm:$0xff] }
 0x209   :  { %638 = vmatprep.subr.bf16.mxu1 %v498_v42  ;;  %v530_v42 = vld [vmem:[#allocation2 + $0x5a8] sm:$0xff] }
 0x20c   :  { %639 = vmatpush1.bf16.msra.mxu1 %v497_v22  ;;  %v529_v22 = vld [vmem:[#allocation2 + $0x5a0] sm:$0xff] }
 0x20d   :  { %640 = vmatprep.subr.bf16.mxu1 %v500_v23  ;;  %v532_v23 = vld [vmem:[#allocation2 + $0x5b8] sm:$0xff] }
 0x210   :  { %641 = vmatpush1.bf16.msra.mxu1 %v499_v27  ;;  %v531_v27 = vld [vmem:[#allocation2 + $0x5b0] sm:$0xff] }
 0x211   :  { %642 = vmatprep.subr.bf16.mxu1 %v502_v38  ;;  %v534_v38 = vld [vmem:[#allocation2 + $0x5c8] sm:$0xff] }
 0x214   :  { %643 = vmatpush1.bf16.msra.mxu1 %v501_v40  ;;  %v533_v40 = vld [vmem:[#allocation2 + $0x5c0] sm:$0xff] }
 0x215   :  { %644 = vmatprep.subr.bf16.mxu1 %v504_v44  ;;  %v536_v44 = vld [vmem:[#allocation2 + $0x5d8] sm:$0xff] }
 0x218   :  { %645 = vmatpush1.bf16.msra.mxu1 %v503_v48  ;;  %v535_v48 = vld [vmem:[#allocation2 + $0x5d0] sm:$0xff] }
 0x219   :  { %646 = vmatprep.subr.bf16.mxu1 %v506_v50  ;;  %v538_v50 = vld [vmem:[#allocation2 + $0x5e8] sm:$0xff] }
 0x21c   :  { %647 = vmatpush1.bf16.msra.mxu1 %v505_v39  ;;  %v553_v39 = vld [vmem:[#allocation8 + $0x2] sm:$0x3] }
 0x21d   :  { %648 = vmatprep.subr.bf16.mxu1 %v508_v2  ;;  %v558_v58 = vrot.slane %v553_v39, %v6873_v12  ;;  %v562_v0 = vrot.slane %v553_v39, %v6876_v16 }
 0x220   :  { %649 = vmatpush1.bf16.msra.mxu1 %v507_v46 }
 0x221   :  { %671 = vmatprep.subr.bf16.mxu1 %v510_v5 }
 0x223   :  { %651 = vmatmul.mubr.bf16.vlgmr.msra.gmra.mrb[0].mxu1 %v543_v6 }
 0x224   :  { %672 = vmatpush1.bf16.msra.mxu1 %v509_v18  ;;  %660 = vmatprep.mubr.bf16.mxu1 %v550_v60 }
 0x225   :  { %673 = vmatprep.subr.bf16.mxu1 %v512_v20 }
 0x228   :  { %674 = vmatpush1.bf16.msra.mxu1 %v511_v25 }
 0x229   :  { %675 = vmatprep.subr.bf16.mxu1 %v514_v26 }
 0x22b   :  { %661 = vmatmul.mubr.bf16.gmra.mrb[4].mxu1 %v549_v28 }
 0x22c   :  { %676 = vmatpush1.bf16.msra.mxu1 %v513_v62  ;;  %703 = vmatprep.mubr.bf16.mxu1 %v546_v30  ;;  %v528_v30 = vld [vmem:[#allocation2 + $0x598] sm:$0xff] }
 0x22d   :  { %677 = vmatprep.subr.bf16.mxu1 %v516_v59 }
 0x230   :  { %678 = vmatpush1.bf16.msra.mxu1 %v515_v63 }
 0x231   :  { %679 = vmatprep.subr.bf16.mxu1 %v518_v29 }
 0x234   :  { %680 = vmatpush1.bf16.msra.mxu1 %v517_v31 }
 0x235   :  { %681 = vmatprep.subr.bf16.mxu1 %v520_v45 }
 0x238   :  { %682 = vmatpush1.bf16.msra.mxu1 %v519_v33 }
 0x239   :  { %683 = vmatprep.subr.bf16.mxu1 %v522_v36 }
 0x23c   :  { %684 = vmatpush1.bf16.msra.mxu1 %v521_v52 }
 0x23d   :  { %685 = vmatprep.subr.bf16.mxu1 %v524_v53 }
 0x240   :  { %686 = vmatpush1.bf16.msra.mxu1 %v523_v54 }
 0x241   :  { %687 = vmatprep.subr.bf16.mxu1 %v526_v56 }
 0x244   :  { %688 = vmatpush1.bf16.msra.mxu1 %v525_v57 }
 0x245   :  { %689 = vmatprep.subr.bf16.mxu1 %v528_v30 }
 0x248   :  { %690 = vmatpush1.bf16.msra.mxu1 %v527_v41 }
 0x249   :  { %691 = vmatprep.subr.bf16.mxu1 %v530_v42 }
 0x24c   :  { %692 = vmatpush1.bf16.msra.mxu1 %v529_v22 }
 0x24d   :  { %693 = vmatprep.subr.bf16.mxu1 %v532_v23 }
 0x250   :  { %694 = vmatpush1.bf16.msra.mxu1 %v531_v27 }
 0x251   :  { %695 = vmatprep.subr.bf16.mxu1 %v534_v38 }
 0x254   :  { %696 = vmatpush1.bf16.msra.mxu1 %v533_v40 }
 0x255   :  { %697 = vmatprep.subr.bf16.mxu1 %v536_v44 }
 0x258   :  { %698 = vmatpush1.bf16.msra.mxu1 %v535_v48 }
 0x259   :  { %699 = vmatprep.subr.bf16.mxu1 %v538_v50 }
 0x25c   :  { %700 = vmatpush1.bf16.msra.mxu1 %v537_v51 }
 0x25d   :  { %701 = vmatprep.subr.bf16.mxu1 %v540_v55 }
 0x260   :  { %702 = vmatpush1.bf16.msra.mxu1 %v539_v47 }
 0x263   :  { %704 = vmatmul.mubr.bf16.vlgmr.msra.gmra.mrb[0].mxu1 %v545_v49 }
 0x264   :  { %713 = vmatprep.mubr.bf16.mxu1 %v552_v13 }
 0x26b   :  { %714 = vmatmul.mubr.bf16.gmra.mrb[4].mxu1 %v551_v14 }
 0x336   :  { %v705_v1 = vpop.f32.mrb[0].mxu1 }
 0x337   :  { %v6279_v2 = vadd.f32 %v705_v1, %v558_v58  ;;  %v707_v3 = vpop.f32.mrb[1].mxu1 }
 0x338   :  { %v6280_v4 = vadd.f32 %v707_v3, %v562_v0  ;;  %v709_v46 = vpop.f32.mrb[2].mxu1 }
 0x339   :  { %v7071_v34 = vmax.f32 %v6279_v2, 0.0  ;;  %v6281_v35 = vadd.f32 %v709_v46, %v558_v58  ;;  %v711_v49 = vpop.f32.mrb[3].mxu1 }
 0x33a   :  { %v7073_v7 = vmax.f32 %v6280_v4, 0.0  ;;  %v6282_v10 = vadd.f32 %v711_v49, %v562_v0 }
 0x33b   :  { %v7075_v13 = vmax.f32 %v6281_v35, 0.0 }
 0x33c   :  { %v7077_v17 = vmax.f32 %v6282_v10, 0.0 }
 0x33e   :  { %v715_v15 = vpop.f32.mrb[4].mxu1 }
 0x33f   :  { %v6283_v14 = vadd.f32 %v715_v15, %v558_v58  ;;  %v717_v19 = vpop.f32.mrb[5].mxu1 }
 0x340   :  { %v6284_v37 = vadd.f32 %v717_v19, %v562_v0  ;;  %v719_v5 = vpop.f32.mrb[6].mxu1 }
 0x341   :  { %v7079_v6 = vmax.f32 %v6283_v14, 0.0  ;;  %v6285_v60 = vadd.f32 %v719_v5, %v558_v58  ;;  %v721_v32 = vpop.f32.mrb[7].mxu1 }
 0x342   :  { %v729_v61 = vmax.f32 %v6284_v37, 0.0  ;;  %v6286_v9 = vadd.f32 %v721_v32, %v562_v0 }
 0x343   :  { %v7081_v18 = vmax.f32 %v6285_v60, 0.0 }
 0x344   :  { %v7083_v20 = vmax.f32 %v6286_v9, 0.0 }
 0x345   :  { %6632 = dma.done.wait [#allocation4], 12288 }
 0x346   :  { %6633 = vsyncadd [#allocation4], 4294955008  ;;  %v774_v21 = vrot.slane %v7073_v7, 1  ;;  %v776_v24 = vrot.slane %v729_v61, 1  ;;  %750 = sst [smem:[#allocation23]] %s6674_s27  ;;  %v782_v25 = vrot.slane %v7073_v7, 2 }
 0x347   :  { %v784_v26 = vrot.slane %v729_v61, 2  ;;  %v790_v28 = vrot.slane %v7073_v7, 3  ;;  %v792_v62 = vrot.slane %v729_v61, 3  ;;  %752 = sst [smem:[#allocation23 + $0x1]] %s6674_s27  ;;  %v802_v59 = vrot.slane %v7077_v17, 4  ;;  %s734_s16 = scalar_lea.hbm %s8257_s2, 27648 }
 0x348   :  { %v804_v63 = vrot.slane %v7083_v20, 4  ;;  %v810_v29 = vrot.slane %v7077_v17, 5  ;;  %v812_v31 = vrot.slane %v7083_v20, 5  ;;  %754 = sst [smem:[#allocation23 + $0x2]] %s6675_s28  ;;  %v818_v45 = vrot.slane %v7077_v17, 6  ;;  %s6686_s17 = smov [#allocation22]  }
 0x349   :  { %v820_v33 = vrot.slane %v7083_v20, 6  ;;  %v826_v36 = vrot.slane %v7077_v17, 7  ;;  %v828_v52 = vrot.slane %v7083_v20, 7  ;;  %756 = sst [smem:[#allocation23 + $0x3]] %s6676_s29  ;;  %v834_v53 = vrot.slane %v7073_v7, 7 }
 0x34a   :  { %v836_v54 = vrot.slane %v729_v61, 7  ;;  %v842_v56 = vrot.slane %v7077_v17, 3  ;;  %v844_v57 = vrot.slane %v7083_v20, 3  ;;  %758 = sst [smem:[#allocation23 + $0x4]] %s6671_s11  ;;  %v850_v30 = vsel %vm131_vm0, 0.0, %v7073_v7 }
 0x34b   :  { %v852_v41 = vsel %vm131_vm0, 0.0, %v729_v61  ;;  %vm853_vm7 = vcmask 1041408   ;;  %vm858_vm8 = vcmask 1042432   ;;  %760 = sst [smem:[#allocation23 + $0x5]] %s6675_s28  ;;  %vm863_vm9 = vcmask 1043456  }
 0x34c   :  { %v855_v42 = vsel %vm853_vm7, %v850_v30, %v774_v21  ;;  %v857_v22 = vsel %vm853_vm7, %v852_v41, %v776_v24  ;;  %vm868_vm10 = vcmask 1044480   ;;  %762 = sst [smem:[#allocation23 + $0x6]] %s6671_s11  ;;  %v882_v38 = vsel %vm131_vm0, %v826_v36, %v834_v53 }
 0x34d   :  { %v860_v23 = vsel %vm858_vm8, %v855_v42, %v782_v25  ;;  %v862_v27 = vsel %vm858_vm8, %v857_v22, %v784_v26  ;;  %v884_v40 = vsel %vm131_vm0, %v828_v52, %v836_v54  ;;  %764 = sst [smem:[#allocation23 + $0x7]] %s6676_s29  ;;  %v886_v50 = vsel %vm853_vm7, %v882_v38, %v7073_v7 }
 0x34e   :  { %v865_v44 = vsel %vm863_vm9, %v860_v23, %v790_v28  ;;  %v867_v48 = vsel %vm863_vm9, %v862_v27, %v792_v62  ;;  %v888_v51 = vsel %vm853_vm7, %v884_v40, %v729_v61  ;;  %766 = sst [smem:[#allocation23 + $0x8]] %s6678_s10  ;;  %v890_v39 = vsel %vm858_vm8, %v886_v50, %v774_v21 }
 0x34f   :  { %v870_v55 = vsel %vm868_vm10, %v865_v44, %v802_v59  ;;  %v872_v47 = vsel %vm868_vm10, %v867_v48, %v804_v63  ;;  %v892_v58 = vsel %vm858_vm8, %v888_v51, %v776_v24  ;;  %768 = dma.general %s734_s16, 12288, %s6826_s18, %s6682_s22, %s6686_s17, [#allocation23], %s6787_s9, 0   ;;  %v894_v2 = vsel %vm863_vm9, %v890_v39, %v782_v25 }
 0x350   :  { %v874_v0 = vsel %vm175_vm2, %v870_v55, %v810_v29  ;;  %v876_v1 = vsel %vm175_vm2, %v872_v47, %v812_v31  ;;  %v896_v3 = vsel %vm863_vm9, %v892_v58, %v784_v26  ;;  %v898_v35 = vsel %vm868_vm10, %v894_v2, %v842_v56  ;;  %v954_v62 = vld [vmem:[#allocation2 + $0x8] sm:$0xff]  ;;  %v955_v42 = vld [vmem:[#allocation2 + $0x10] sm:$0xff]  ;;  %v957_v2 = vld [vmem:[#allocation2 + $0x20] sm:$0xff] }
 0x351   :  { %v878_v4 = vsel %vm152_vm1, %v874_v0, %v818_v45  ;;  %v880_v46 = vsel %vm152_vm1, %v876_v1, %v820_v33  ;;  %v900_v49 = vsel %vm868_vm10, %v896_v3, %v844_v57  ;;  %v902_v7 = vsel %vm175_vm2, %v898_v35, %v802_v59  ;;  %v953_v59 = vld [vmem:[#allocation2] sm:$0xff]  ;;  %1067 = vmatprep.subr.bf16.mxu0 %v954_v62  ;;  %v958_v40 = vld [vmem:[#allocation2 + $0x28] sm:$0xff] }
 0x352   :  { %v904_v10 = vsel %vm175_vm2, %v900_v49, %v804_v63  ;;  %v910_v17 = vsel %vm131_vm0, %v818_v45, 0.0  ;;  %v912_v15 = vsel %vm131_vm0, %v820_v33, 0.0  ;;  %v906_v14 = vsel %vm152_vm1, %v902_v7, %v810_v29  ;;  %v956_v63 = vld [vmem:[#allocation2 + $0x18] sm:$0xff]  ;;  %1068 = vmatpush1.bf16.msra.mxu0 %v953_v59 }
 0x353   :  { %v908_v19 = vsel %vm152_vm1, %v904_v10, %v812_v31  ;;  %v925_v37 = vrot.slane %v910_v17, 1  ;;  %v931_v5 = vrot.slane %v912_v15, 1  ;;  %v924_v60 = vrot.slane %v906_v14, 1  ;;  %1069 = vmatprep.subr.bf16.mxu0 %v956_v63  ;;  %v960_v49 = vld [vmem:[#allocation2 + $0x38] sm:$0xff] }
 0x354   :  { %v930_v32 = vrot.slane %v908_v19, 1  ;;  %v943_v61 = vrot.slane %v878_v4, 1  ;;  %v947_v9 = vrot.slane %v880_v46, 1  ;;  %v1050_v20 = vpack.c.bf16 %v880_v46, %v878_v4 }
 0x355   :  { %v773_v21 = vrot.slane %v7071_v34, 1  ;;  %v775_v26 = vrot.slane %v7079_v6, 1  ;;  %v781_v28 = vrot.slane %v7071_v34, 2  ;;  %v783_v29 = vrot.slane %v7079_v6, 2 }
 0x356   :  { %v7148_v24 = vsel %vm152_vm1, %v943_v61, %v924_v60  ;;  %v7151_v25 = vsel %vm152_vm1, %v947_v9, %v930_v32  ;;  %1099 = vmatprep.mubr.bf16.mxu0 %v1050_v20  ;;  %v789_v31 = vrot.slane %v7071_v34, 3  ;;  %v791_v45 = vrot.slane %v7079_v6, 3  ;;  %1070 = vmatpush1.bf16.msra.mxu0 %v955_v42  ;;  %v959_v61 = vld [vmem:[#allocation2 + $0x30] sm:$0xff] }
 0x357   :  { %v7159_v33 = vsel %vm152_vm1, %v924_v60, %v925_v37  ;;  %v801_v36 = vrot.slane %v7075_v13, 4  ;;  %v803_v52 = vrot.slane %v7081_v18, 4  ;;  %v809_v53 = vrot.slane %v7075_v13, 5  ;;  %1071 = vmatprep.subr.bf16.mxu0 %v958_v40  ;;  %v968_v40 = vld [vmem:[#allocation2 + $0x78] sm:$0xff] }
 0x358   :  { %v7165_v54 = vsel %vm152_vm1, %v930_v32, %v931_v5  ;;  %v811_v56 = vrot.slane %v7081_v18, 5  ;;  %v825_v57 = vrot.slane %v7075_v13, 7  ;;  %v827_v30 = vrot.slane %v7081_v18, 7 }
 0x359   :  { %v1052_v41 = vpack.c.bf16 %v7165_v54, %v7159_v33  ;;  %v817_v22 = vrot.slane %v7075_v13, 6  ;;  %v819_v23 = vrot.slane %v7081_v18, 6  ;;  %v833_v27 = vrot.slane %v7071_v34, 7  ;;  %v998_v33 = vld [vmem:[#allocation2 + $0x168] sm:$0xff]  ;;  %v997_v54 = vld [vmem:[#allocation2 + $0x160] sm:$0xff] }
 0x35a   :  { %v835_v38 = vrot.slane %v7079_v6, 7  ;;  %v841_v44 = vrot.slane %v7075_v13, 3  ;;  %v843_v48 = vrot.slane %v7081_v18, 3  ;;  %v849_v50 = vsel %vm131_vm0, 0.0, %v7071_v34  ;;  %1072 = vmatpush1.bf16.msra.mxu0 %v957_v2  ;;  %v979_v2 = vld [vmem:[#allocation2 + $0xd0] sm:$0xff] }
 0x35b   :  { %v851_v51 = vsel %vm131_vm0, 0.0, %v7079_v6  ;;  %v854_v55 = vsel %vm853_vm7, %v849_v50, %v773_v21  ;;  %v881_v39 = vsel %vm131_vm0, %v825_v57, %v833_v27  ;;  %1073 = vmatprep.subr.bf16.mxu0 %v960_v49  ;;  %v966_v27 = vld [vmem:[#allocation2 + $0x68] sm:$0xff]  ;;  %v969_v50 = vld [vmem:[#allocation2 + $0x80] sm:$0xff] }
 0x35c   :  { %v856_v47 = vsel %vm853_vm7, %v851_v51, %v775_v26  ;;  %v883_v58 = vsel %vm131_vm0, %v827_v30, %v835_v38  ;;  %v859_v0 = vsel %vm858_vm8, %v854_v55, %v781_v28  ;;  %v885_v18 = vsel %vm853_vm7, %v881_v39, %v7071_v34  ;;  %v965_v38 = vld [vmem:[#allocation2 + $0x60] sm:$0xff]  ;;  %v972_v51 = vld [vmem:[#allocation2 + $0x98] sm:$0xff]  ;;  %v971_v55 = vld [vmem:[#allocation2 + $0x90] sm:$0xff] }
 0x35d   :  { %v861_v13 = vsel %vm858_vm8, %v856_v47, %v783_v29  ;;  %v887_v1 = vsel %vm853_vm7, %v883_v58, %v7079_v6  ;;  %v864_v3 = vsel %vm863_vm9, %v859_v0, %v789_v31  ;;  %v889_v46 = vsel %vm858_vm8, %v885_v18, %v773_v21  ;;  %v974_v47 = vld [vmem:[#allocation2 + $0xa8] sm:$0xff]  ;;  %v973_v39 = vld [vmem:[#allocation2 + $0xa0] sm:$0xff]  ;;  %v976_v58 = vld [vmem:[#allocation2 + $0xb8] sm:$0xff] }
 0x35e   :  { %v866_v4 = vsel %vm863_vm9, %v861_v13, %v791_v45  ;;  %v891_v35 = vsel %vm858_vm8, %v887_v1, %v775_v26  ;;  %v869_v7 = vsel %vm868_vm10, %v864_v3, %v801_v36  ;;  %v893_v34 = vsel %vm863_vm9, %v889_v46, %v781_v28  ;;  %v962_v28 = vld [vmem:[#allocation2 + $0x48] sm:$0xff]  ;;  %1074 = vmatpush1.bf16.msra.mxu0 %v959_v61  ;;  %v975_v0 = vld [vmem:[#allocation2 + $0xb0] sm:$0xff]  ;;  %v977_v18 = vld [vmem:[#allocation2 + $0xc0] sm:$0xff] }
 0x35f   :  { %v871_v10 = vsel %vm868_vm10, %v866_v4, %v803_v52  ;;  %v895_v17 = vsel %vm863_vm9, %v891_v35, %v783_v29  ;;  %v873_v6 = vsel %vm175_vm2, %v869_v7, %v809_v53  ;;  %v897_v14 = vsel %vm868_vm10, %v893_v34, %v841_v44  ;;  %1075 = vmatprep.subr.bf16.mxu0 %v962_v28  ;;  %v967_v44 = vld [vmem:[#allocation2 + $0x70] sm:$0xff]  ;;  %v978_v13 = vld [vmem:[#allocation2 + $0xc8] sm:$0xff]  ;;  %v980_v1 = vld [vmem:[#allocation2 + $0xd8] sm:$0xff] }
 0x360   :  { %v875_v15 = vsel %vm175_vm2, %v871_v10, %v811_v56  ;;  %v899_v19 = vsel %vm868_vm10, %v895_v17, %v843_v48  ;;  %v7205_v37 = vsel %vm152_vm1, %v873_v6, %v817_v22  ;;  %v901_v60 = vsel %vm175_vm2, %v897_v14, %v801_v36  ;;  %v970_v48 = vld [vmem:[#allocation2 + $0x88] sm:$0xff]  ;;  %v981_v4 = vld [vmem:[#allocation2 + $0xe0] sm:$0xff]  ;;  %v984_v46 = vld [vmem:[#allocation2 + $0xf8] sm:$0xff] }
 0x361   :  { %v7208_v5 = vsel %vm152_vm1, %v875_v15, %v819_v23  ;;  %v903_v32 = vsel %vm175_vm2, %v899_v19, %v803_v52  ;;  %v905_v9 = vsel %vm152_vm1, %v901_v60, %v809_v53  ;;  %v909_v21 = vsel %vm131_vm0, %v817_v22, 0.0  ;;  %v964_v22 = vld [vmem:[#allocation2 + $0x58] sm:$0xff]  ;;  %v982_v3 = vld [vmem:[#allocation2 + $0xe8] sm:$0xff]  ;;  %v983_v35 = vld [vmem:[#allocation2 + $0xf0] sm:$0xff] }
 0x362   :  { %v907_v20 = vsel %vm152_vm1, %v903_v32, %v811_v56  ;;  %v911_v26 = vsel %vm131_vm0, %v819_v23, 0.0  ;;  %v921_v62 = vrot.slane %v905_v9, 1  ;;  %v922_v59 = vrot.slane %v909_v21, 1  ;;  %v961_v56 = vld [vmem:[#allocation2 + $0x40] sm:$0xff]  ;;  %v963_v23 = vld [vmem:[#allocation2 + $0x50] sm:$0xff]  ;;  %v986_v49 = vld [vmem:[#allocation2 + $0x108] sm:$0xff] }
 0x363   :  { %v927_v63 = vrot.slane %v907_v20, 1  ;;  %v928_v29 = vrot.slane %v911_v26, 1  ;;  %v941_v31 = vrot.slane %v7205_v37, 1  ;;  %v945_v45 = vrot.slane %v7208_v5, 1  ;;  %1076 = vmatpush1.bf16.msra.mxu0 %v961_v56  ;;  %v985_v34 = vld [vmem:[#allocation2 + $0x100] sm:$0xff]  ;;  %v988_v17 = vld [vmem:[#allocation2 + $0x118] sm:$0xff] }
 0x364   :  { %v1049_v36 = vpack.c.bf16 %v7208_v5, %v7205_v37  ;;  %v7221_v52 = vsel %vm152_vm1, %v921_v62, %v922_v59  ;;  %1077 = vmatprep.subr.bf16.mxu0 %v964_v22  ;;  %v1054_v7 = vpack.c.bf16 %v7151_v25, %v7148_v24  ;;  %v987_v6 = vld [vmem:[#allocation2 + $0x110] sm:$0xff]  ;;  %v990_v15 = vld [vmem:[#allocation2 + $0x128] sm:$0xff]  ;;  %v989_v14 = vld [vmem:[#allocation2 + $0x120] sm:$0xff] }
 0x365   :  { %v7224_v53 = vsel %vm152_vm1, %v927_v63, %v928_v29  ;;  %v7227_v57 = vsel %vm152_vm1, %v941_v31, %v921_v62  ;;  %v7230_v30 = vsel %vm152_vm1, %v945_v45, %v927_v63  ;;  %v992_v19 = vld [vmem:[#allocation2 + $0x138] sm:$0xff]  ;;  %v991_v37 = vld [vmem:[#allocation2 + $0x130] sm:$0xff]  ;;  %v994_v5 = vld [vmem:[#allocation2 + $0x148] sm:$0xff] }
 0x366   :  { %v1051_v42 = vpack.c.bf16 %v7224_v53, %v7221_v52  ;;  %v1053_v10 = vpack.c.bf16 %v7230_v30, %v7227_v57  ;;  %v993_v60 = vld [vmem:[#allocation2 + $0x140] sm:$0xff]  ;;  %v996_v32 = vld [vmem:[#allocation2 + $0x158] sm:$0xff]  ;;  %v995_v61 = vld [vmem:[#allocation2 + $0x150] sm:$0xff] }
 0x367   :  { %1078 = vmatpush1.bf16.msra.mxu0 %v963_v23  ;;  %v999_v9 = vld [vmem:[#allocation2 + $0x170] sm:$0xff]  ;;  %v1002_v20 = vld [vmem:[#allocation2 + $0x188] sm:$0xff]  ;;  %v1001_v21 = vld [vmem:[#allocation2 + $0x180] sm:$0xff] }
 0x368   :  { %1079 = vmatprep.subr.bf16.mxu0 %v966_v27  ;;  %v1004_v26 = vld [vmem:[#allocation2 + $0x198] sm:$0xff]  ;;  %v1003_v28 = vld [vmem:[#allocation2 + $0x190] sm:$0xff]  ;;  %v1006_v62 = vld [vmem:[#allocation2 + $0x1a8] sm:$0xff] }
 0x369   :  { %v1005_v59 = vld [vmem:[#allocation2 + $0x1a0] sm:$0xff]  ;;  %v1008_v63 = vld [vmem:[#allocation2 + $0x1b8] sm:$0xff]  ;;  %v1007_v29 = vld [vmem:[#allocation2 + $0x1b0] sm:$0xff] }
 0x36a   :  { %v1010_v31 = vld [vmem:[#allocation2 + $0x1c8] sm:$0xff]  ;;  %v1009_v45 = vld [vmem:[#allocation2 + $0x1c0] sm:$0xff]  ;;  %v1011_v56 = vld [vmem:[#allocation2 + $0x1d0] sm:$0xff] }
 0x36b   :  { %1080 = vmatpush1.bf16.msra.mxu0 %v965_v38  ;;  %v1014_v22 = vld [vmem:[#allocation2 + $0x1e8] sm:$0xff]  ;;  %v1013_v23 = vld [vmem:[#allocation2 + $0x1e0] sm:$0xff]  ;;  %v1016_v27 = vld [vmem:[#allocation2 + $0x1f8] sm:$0xff] }
 0x36c   :  { %1081 = vmatprep.subr.bf16.mxu0 %v968_v40  ;;  %v1015_v38 = vld [vmem:[#allocation2 + $0x1f0] sm:$0xff]  ;;  %v1018_v40 = vld [vmem:[#allocation2 + $0x208] sm:$0xff]  ;;  %v1025_v52 = vld [vmem:[#allocation2 + $0x240] sm:$0xff] }
 0x36d   :  { %v1028_v53 = vld [vmem:[#allocation2 + $0x258] sm:$0xff]  ;;  %v1030_v24 = vld [vmem:[#allocation2 + $0x268] sm:$0xff]  ;;  %v1029_v25 = vld [vmem:[#allocation2 + $0x260] sm:$0xff] }
 0x36f   :  { %1082 = vmatpush1.bf16.msra.mxu0 %v967_v44  ;;  %v1017_v44 = vld [vmem:[#allocation2 + $0x200] sm:$0xff] }
 0x370   :  { %1083 = vmatprep.subr.bf16.mxu0 %v970_v48  ;;  %v1020_v48 = vld [vmem:[#allocation2 + $0x218] sm:$0xff] }
 0x373   :  { %1084 = vmatpush1.bf16.msra.mxu0 %v969_v50  ;;  %v1019_v50 = vld [vmem:[#allocation2 + $0x210] sm:$0xff] }
 0x374   :  { %1085 = vmatprep.subr.bf16.mxu0 %v972_v51  ;;  %v1022_v51 = vld [vmem:[#allocation2 + $0x228] sm:$0xff] }
 0x377   :  { %1086 = vmatpush1.bf16.msra.mxu0 %v971_v55  ;;  %v1021_v55 = vld [vmem:[#allocation2 + $0x220] sm:$0xff] }
 0x378   :  { %1087 = vmatprep.subr.bf16.mxu0 %v974_v47  ;;  %v1024_v47 = vld [vmem:[#allocation2 + $0x238] sm:$0xff] }
 0x37b   :  { %1088 = vmatpush1.bf16.msra.mxu0 %v973_v39  ;;  %v1023_v39 = vld [vmem:[#allocation2 + $0x230] sm:$0xff] }
 0x37c   :  { %1089 = vmatprep.subr.bf16.mxu0 %v976_v58  ;;  %v1026_v58 = vld [vmem:[#allocation2 + $0x248] sm:$0xff] }
 0x37f   :  { %1090 = vmatpush1.bf16.msra.mxu0 %v975_v0  ;;  %v1032_v0 = vld [vmem:[#allocation2 + $0x278] sm:$0xff] }
 0x380   :  { %1091 = vmatprep.subr.bf16.mxu0 %v978_v13  ;;  %v1031_v13 = vld [vmem:[#allocation2 + $0x270] sm:$0xff] }
 0x383   :  { %1092 = vmatpush1.bf16.msra.mxu0 %v977_v18  ;;  %v1034_v18 = vld [vmem:[#allocation2 + $0x288] sm:$0xff] }
 0x384   :  { %1093 = vmatprep.subr.bf16.mxu0 %v980_v1  ;;  %v1033_v1 = vld [vmem:[#allocation2 + $0x280] sm:$0xff] }
 0x387   :  { %1094 = vmatpush1.bf16.msra.mxu0 %v979_v2  ;;  %v1036_v2 = vld [vmem:[#allocation2 + $0x298] sm:$0xff] }
 0x388   :  { %1095 = vmatprep.subr.bf16.mxu0 %v982_v3  ;;  %v1035_v3 = vld [vmem:[#allocation2 + $0x290] sm:$0xff] }
 0x38b   :  { %1096 = vmatpush1.bf16.msra.mxu0 %v981_v4  ;;  %v1038_v4 = vld [vmem:[#allocation2 + $0x2a8] sm:$0xff] }
 0x38c   :  { %1097 = vmatprep.subr.bf16.mxu0 %v984_v46  ;;  %v1037_v46 = vld [vmem:[#allocation2 + $0x2a0] sm:$0xff] }
 0x38f   :  { %1098 = vmatpush1.bf16.msra.mxu0 %v983_v35  ;;  %v1040_v35 = vld [vmem:[#allocation2 + $0x2b8] sm:$0xff] }
 0x390   :  { %1110 = vmatprep.subr.bf16.mxu0 %v986_v49  ;;  %v1039_v49 = vld [vmem:[#allocation2 + $0x2b0] sm:$0xff] }
 0x392   :  { %1100 = vmatmul.mubr.bf16.vlgmr.msra.gmra.mrb[8].mxu0 %v1049_v36  ;;  %v1012_v36 = vld [vmem:[#allocation2 + $0x1d8] sm:$0xff] }
 0x393   :  { %1111 = vmatpush1.bf16.msra.mxu0 %v985_v34  ;;  %1142 = vmatprep.mubr.bf16.mxu0 %v1052_v41  ;;  %v1000_v41 = vld [vmem:[#allocation2 + $0x178] sm:$0xff]  ;;  %v1041_v34 = vld [vmem:[#allocation2 + $0x2c0] sm:$0xff] }
 0x394   :  { %1112 = vmatprep.subr.bf16.mxu0 %v988_v17  ;;  %v1044_v17 = vld [vmem:[#allocation2 + $0x2d8] sm:$0xff] }
 0x397   :  { %1113 = vmatpush1.bf16.msra.mxu0 %v987_v6  ;;  %v1043_v6 = vld [vmem:[#allocation2 + $0x2d0] sm:$0xff] }
 0x398   :  { %1114 = vmatprep.subr.bf16.mxu0 %v990_v15  ;;  %v1046_v15 = vld [vmem:[#allocation2 + $0x2e8] sm:$0xff] }
 0x39b   :  { %1115 = vmatpush1.bf16.msra.mxu0 %v989_v14  ;;  %v1045_v14 = vld [vmem:[#allocation2 + $0x2e0] sm:$0xff] }
 0x39c   :  { %1116 = vmatprep.subr.bf16.mxu0 %v992_v19  ;;  %v1048_v19 = vld [vmem:[#allocation2 + $0x2f8] sm:$0xff] }
 0x39f   :  { %1117 = vmatpush1.bf16.msra.mxu0 %v991_v37  ;;  %v1047_v37 = vld [vmem:[#allocation2 + $0x2f0] sm:$0xff] }
 0x3a0   :  { %1118 = vmatprep.subr.bf16.mxu0 %v994_v5  ;;  %v1055_v5 = vld [vmem:[#allocation8 + $0x4] sm:$0x3] }
 0x3a3   :  { %1119 = vmatpush1.bf16.msra.mxu0 %v993_v60  ;;  %v1060_v60 = vrot.slane %v1055_v5, %v6873_v12 }
 0x3a4   :  { %1120 = vmatprep.subr.bf16.mxu0 %v996_v32  ;;  %v1064_v32 = vrot.slane %v1055_v5, %v6876_v16 }
 0x3a7   :  { %1121 = vmatpush1.bf16.msra.mxu0 %v995_v61 }
 0x3a8   :  { %1122 = vmatprep.subr.bf16.mxu0 %v998_v33 }
 0x3ab   :  { %1123 = vmatpush1.bf16.msra.mxu0 %v997_v54 }
 0x3ac   :  { %1124 = vmatprep.subr.bf16.mxu0 %v1000_v41 }
 0x3af   :  { %1125 = vmatpush1.bf16.msra.mxu0 %v999_v9 }
 0x3b0   :  { %1126 = vmatprep.subr.bf16.mxu0 %v1002_v20 }
 0x3b3   :  { %1127 = vmatpush1.bf16.msra.mxu0 %v1001_v21 }
 0x3b4   :  { %1128 = vmatprep.subr.bf16.mxu0 %v1004_v26 }
 0x3b7   :  { %1129 = vmatpush1.bf16.msra.mxu0 %v1003_v28 }
 0x3b8   :  { %1130 = vmatprep.subr.bf16.mxu0 %v1006_v62 }
 0x3bb   :  { %1131 = vmatpush1.bf16.msra.mxu0 %v1005_v59 }
 0x3bc   :  { %1132 = vmatprep.subr.bf16.mxu0 %v1008_v63 }
 0x3bf   :  { %1133 = vmatpush1.bf16.msra.mxu0 %v1007_v29 }
 0x3c0   :  { %1134 = vmatprep.subr.bf16.mxu0 %v1010_v31 }
 0x3c3   :  { %1135 = vmatpush1.bf16.msra.mxu0 %v1009_v45 }
 0x3c4   :  { %1136 = vmatprep.subr.bf16.mxu0 %v1012_v36 }
 0x3c7   :  { %1137 = vmatpush1.bf16.msra.mxu0 %v1011_v56 }
 0x3c8   :  { %1138 = vmatprep.subr.bf16.mxu0 %v1014_v22 }
 0x3cb   :  { %1139 = vmatpush1.bf16.msra.mxu0 %v1013_v23 }
 0x3cc   :  { %1140 = vmatprep.subr.bf16.mxu0 %v1016_v27 }
 0x3cf   :  { %1141 = vmatpush1.bf16.msra.mxu0 %v1015_v38 }
 0x3d0   :  { %1153 = vmatprep.subr.bf16.mxu0 %v1018_v40 }
 0x3d2   :  { %1143 = vmatmul.mubr.bf16.vlgmr.msra.gmra.mrb[8].mxu0 %v1051_v42  ;;  %v1027_v42 = vld [vmem:[#allocation2 + $0x250] sm:$0xff] }
 0x3d3   :  { %1154 = vmatpush1.bf16.msra.mxu0 %v1017_v44  ;;  %1185 = vmatprep.mubr.bf16.mxu0 %v1054_v7  ;;  %v1042_v7 = vld [vmem:[#allocation2 + $0x2c8] sm:$0xff] }
 0x3d4   :  { %1155 = vmatprep.subr.bf16.mxu0 %v1020_v48 }
 0x3d7   :  { %1156 = vmatpush1.bf16.msra.mxu0 %v1019_v50 }
 0x3d8   :  { %1157 = vmatprep.subr.bf16.mxu0 %v1022_v51 }
 0x3db   :  { %1158 = vmatpush1.bf16.msra.mxu0 %v1021_v55 }
 0x3dc   :  { %1159 = vmatprep.subr.bf16.mxu0 %v1024_v47 }
 0x3df   :  { %1160 = vmatpush1.bf16.msra.mxu0 %v1023_v39 }
 0x3e0   :  { %1161 = vmatprep.subr.bf16.mxu0 %v1026_v58 }
 0x3e3   :  { %1162 = vmatpush1.bf16.msra.mxu0 %v1025_v52 }
 0x3e4   :  { %1163 = vmatprep.subr.bf16.mxu0 %v1028_v53 }
 0x3e7   :  { %1164 = vmatpush1.bf16.msra.mxu0 %v1027_v42 }
 0x3e8   :  { %1165 = vmatprep.subr.bf16.mxu0 %v1030_v24 }
 0x3eb   :  { %1166 = vmatpush1.bf16.msra.mxu0 %v1029_v25 }
 0x3ec   :  { %1167 = vmatprep.subr.bf16.mxu0 %v1032_v0 }
 0x3ef   :  { %1168 = vmatpush1.bf16.msra.mxu0 %v1031_v13 }
 0x3f0   :  { %1169 = vmatprep.subr.bf16.mxu0 %v1034_v18 }
 0x3f3   :  { %1170 = vmatpush1.bf16.msra.mxu0 %v1033_v1 }
 0x3f4   :  { %1171 = vmatprep.subr.bf16.mxu0 %v1036_v2 }
 0x3f7   :  { %1172 = vmatpush1.bf16.msra.mxu0 %v1035_v3 }
 0x3f8   :  { %1173 = vmatprep.subr.bf16.mxu0 %v1038_v4 }
 0x3fb   :  { %1174 = vmatpush1.bf16.msra.mxu0 %v1037_v46 }
 0x3fc   :  { %1175 = vmatprep.subr.bf16.mxu0 %v1040_v35 }
 0x3ff   :  { %1176 = vmatpush1.bf16.msra.mxu0 %v1039_v49 }
 0x400   :  { %1177 = vmatprep.subr.bf16.mxu0 %v1042_v7 }
 0x403   :  { %1178 = vmatpush1.bf16.msra.mxu0 %v1041_v34 }
 0x404   :  { %1179 = vmatprep.subr.bf16.mxu0 %v1044_v17 }
 0x407   :  { %1180 = vmatpush1.bf16.msra.mxu0 %v1043_v6 }
 0x408   :  { %1181 = vmatprep.subr.bf16.mxu0 %v1046_v15 }
 0x40b   :  { %1182 = vmatpush1.bf16.msra.mxu0 %v1045_v14 }
 0x40c   :  { %1183 = vmatprep.subr.bf16.mxu0 %v1048_v19 }
 0x40f   :  { %1184 = vmatpush1.bf16.msra.mxu0 %v1047_v37 }
 0x412   :  { %1186 = vmatmul.mubr.bf16.vlgmr.msra.gmra.mrb[8].mxu0 %v1053_v10 }
 0x4e5   :  { %v1187_v61 = vpop.f32.mrb[8].mxu0 }
 0x4e6   :  { %v7252_v33 = vadd.f32 %v1187_v61, %v1060_v60  ;;  %v1189_v54 = vpop.f32.mrb[9].mxu0 }
 0x4e7   :  { %v6288_v41 = vadd.f32 %v1189_v54, %v1064_v32  ;;  %v1191_v9 = vpop.f32.mrb[10].mxu0 }
 0x4e8   :  { %v1196_v20 = vmax.f32 %v7252_v33, 0.0  ;;  %v7255_v21 = vadd.f32 %v1191_v9, %v1060_v60  ;;  %v1193_v26 = vpop.f32.mrb[11].mxu0 }
 0x4e9   :  { %v1197_v28 = vmax.f32 %v6288_v41, 0.0  ;;  %v6290_v62 = vadd.f32 %v1193_v26, %v1064_v32 }
 0x4ea   :  { %v1198_v57 = vmax.f32 %v7255_v21, 0.0 }
 0x4eb   :  { %v1199_v30 = vmax.f32 %v6290_v62, 0.0 }
 0x4ec   :  { %6634 = dma.done.wait [#allocation4 + $0x1], 12288 }
 0x4ed   :  { %6635 = vsyncadd [#allocation4 + $0x1], 4294955008  ;;  %v1242_v10 = vrot.slane %v1197_v28, 7  ;;  %v1244_v59 = vrot.slane %v1199_v30, 7  ;;  %1218 = sst [smem:[#allocation25]] %s6674_s27  ;;  %s1202_s21 = scalar_lea.hbm %s8257_s2, 39936 }
 0x4ee   :  { %vm7262_vm11 = vmpackc.low %vm6900_vm4, %vm6900_vm4  ;;  %1220 = sst [smem:[#allocation25 + $0x1]] %s6674_s27  ;;  %s6687_s23 = smov [#allocation24]   ;;  %v1241_v60 = vrot.slane %v1196_v20, 7  ;;  %v1243_v32 = vrot.slane %v1198_v57, 7 }
 0x4ef   :  { %v6205_v29 = vpack.c.bf16 %v1244_v59, %v1242_v10  ;;  %1222 = sst [smem:[#allocation25 + $0x2]] %s6675_s28  ;;  %v7283_v43 = vsel %vm131_vm0, 0.0, %v1242_v10  ;;  %v7286_v31 = vsel %vm131_vm0, 0.0, %v1244_v59  ;;  %v7289_v45 = vsel %vm131_vm0, %v1242_v10, 0.0 }
 0x4f0   :  { %1224 = sst [smem:[#allocation25 + $0x3]] %s6676_s29  ;;  %v7292_v36 = vsel %vm131_vm0, %v1244_v59, 0.0  ;;  %v1268_v56 = vrot.slane %v7283_v43, 1  ;;  %v1269_v22 = vrot.slane %v7289_v45, 1  ;;  %v1274_v23 = vrot.slane %v7286_v31, 1 }
 0x4f1   :  { %6206 = vmatprep.mubr.msk.bf16.mxu1 %vm7262_vm11, %v6205_v29  ;;  %1226 = sst [smem:[#allocation25 + $0x4]] %s6671_s11  ;;  %v1275_v27 = vrot.slane %v7292_v36, 1  ;;  %v7311_v61 = vsel %vm131_vm0, 0.0, %v1241_v60  ;;  %v7314_v54 = vsel %vm131_vm0, 0.0, %v1243_v32  ;;  %v7317_v41 = vsel %vm131_vm0, %v1241_v60, 0.0 }
 0x4f2   :  { %1228 = sst [smem:[#allocation25 + $0x5]] %s6675_s28  ;;  %v7299_v38 = vsel %vm152_vm1, %v1268_v56, %v1269_v22  ;;  %v7320_v9 = vsel %vm131_vm0, %v1243_v32, 0.0  ;;  %v1284_v33 = vrot.slane %v7283_v43, 2  ;;  %v1285_v20 = vrot.slane %v7289_v45, 2 }
 0x4f3   :  { %1230 = sst [smem:[#allocation25 + $0x6]] %s6671_s11  ;;  %v7302_v40 = vsel %vm152_vm1, %v1274_v23, %v1275_v27  ;;  %v1290_v21 = vrot.slane %v7286_v31, 2  ;;  %v1291_v28 = vrot.slane %v7292_v36, 2  ;;  %v1281_v57 = vrot.slane %v7311_v61, 2 }
 0x4f4   :  { %1232 = sst [smem:[#allocation25 + $0x7]] %s6676_s29  ;;  %v1396_v44 = vpack.c.bf16 %v7302_v40, %v7299_v38  ;;  %v1282_v30 = vrot.slane %v7317_v41, 2  ;;  %v1287_v10 = vrot.slane %v7314_v54, 2  ;;  %v1288_v59 = vrot.slane %v7320_v9, 2 }
 0x4f5   :  { %1234 = sst [smem:[#allocation25 + $0x8]] %s6678_s10  ;;  %v6210_v29 = vpack.c.bf16 %v1243_v32, %v1241_v60  ;;  %v7331_v56 = vsel %vm175_vm2, %v1284_v33, %v1285_v20  ;;  %v7334_v43 = vsel %vm175_vm2, %v1290_v21, %v1291_v28 }
 0x4f6   :  { %1236 = dma.general %s1202_s21, 12288, %s6784_s1, %s6679_s13, %s6687_s23, [#allocation25], %s6787_s9, 0   ;;  %v1398_v31 = vpack.c.bf16 %v7334_v43, %v7331_v56  ;;  %v7339_v45 = vsel %vm175_vm2, %v1281_v57, %v1282_v30  ;;  %v7342_v36 = vsel %vm175_vm2, %v1287_v10, %v1288_v59 }
 0x4f7   :  { %v1298_v48 = vld [vmem:[#allocation2 + $0x308] sm:$0xff]  ;;  %v1297_v50 = vld [vmem:[#allocation2 + $0x300] sm:$0xff]  ;;  %v1300_v51 = vld [vmem:[#allocation2 + $0x318] sm:$0xff]  ;;  %v1397_v23 = vpack.c.bf16 %v7342_v36, %v7339_v45 }
 0x4f8   :  { %1411 = vmatprep.subr.bf16.mxu1 %v1298_v48  ;;  %v1299_v55 = vld [vmem:[#allocation2 + $0x310] sm:$0xff]  ;;  %v1302_v47 = vld [vmem:[#allocation2 + $0x328] sm:$0xff]  ;;  %v1301_v39 = vld [vmem:[#allocation2 + $0x320] sm:$0xff] }
 0x4f9   :  { %1412 = vmatpush1.bf16.msra.mxu1 %v1297_v50  ;;  %v1304_v58 = vld [vmem:[#allocation2 + $0x338] sm:$0xff]  ;;  %v1303_v52 = vld [vmem:[#allocation2 + $0x330] sm:$0xff]  ;;  %v1306_v53 = vld [vmem:[#allocation2 + $0x348] sm:$0xff] }
 0x4fa   :  { %1413 = vmatprep.subr.bf16.mxu1 %v1300_v51  ;;  %v1305_v42 = vld [vmem:[#allocation2 + $0x340] sm:$0xff]  ;;  %v1308_v24 = vld [vmem:[#allocation2 + $0x358] sm:$0xff]  ;;  %v1307_v25 = vld [vmem:[#allocation2 + $0x350] sm:$0xff] }
 0x4fb   :  { %v1310_v0 = vld [vmem:[#allocation2 + $0x368] sm:$0xff]  ;;  %v1309_v13 = vld [vmem:[#allocation2 + $0x360] sm:$0xff]  ;;  %v1312_v18 = vld [vmem:[#allocation2 + $0x378] sm:$0xff] }
 0x4fc   :  { %v1311_v1 = vld [vmem:[#allocation2 + $0x370] sm:$0xff]  ;;  %v1314_v2 = vld [vmem:[#allocation2 + $0x388] sm:$0xff]  ;;  %v1313_v3 = vld [vmem:[#allocation2 + $0x380] sm:$0xff] }
 0x4fd   :  { %1414 = vmatpush1.bf16.msra.mxu1 %v1299_v55  ;;  %v1316_v4 = vld [vmem:[#allocation2 + $0x398] sm:$0xff]  ;;  %v1315_v46 = vld [vmem:[#allocation2 + $0x390] sm:$0xff]  ;;  %v1318_v35 = vld [vmem:[#allocation2 + $0x3a8] sm:$0xff] }
 0x4fe   :  { %1415 = vmatprep.subr.bf16.mxu1 %v1302_v47  ;;  %v1317_v49 = vld [vmem:[#allocation2 + $0x3a0] sm:$0xff]  ;;  %v1320_v7 = vld [vmem:[#allocation2 + $0x3b8] sm:$0xff]  ;;  %v1319_v34 = vld [vmem:[#allocation2 + $0x3b0] sm:$0xff] }
 0x4ff   :  { %v1322_v17 = vld [vmem:[#allocation2 + $0x3c8] sm:$0xff]  ;;  %v1321_v6 = vld [vmem:[#allocation2 + $0x3c0] sm:$0xff]  ;;  %v1324_v15 = vld [vmem:[#allocation2 + $0x3d8] sm:$0xff] }
 0x500   :  { %v1323_v14 = vld [vmem:[#allocation2 + $0x3d0] sm:$0xff]  ;;  %v1326_v19 = vld [vmem:[#allocation2 + $0x3e8] sm:$0xff]  ;;  %v1325_v37 = vld [vmem:[#allocation2 + $0x3e0] sm:$0xff] }
 0x501   :  { %1416 = vmatpush1.bf16.msra.mxu1 %v1301_v39  ;;  %v1328_v5 = vld [vmem:[#allocation2 + $0x3f8] sm:$0xff]  ;;  %v1327_v26 = vld [vmem:[#allocation2 + $0x3f0] sm:$0xff]  ;;  %v1330_v62 = vld [vmem:[#allocation2 + $0x408] sm:$0xff] }
 0x502   :  { %1417 = vmatprep.subr.bf16.mxu1 %v1304_v58  ;;  %v1329_v22 = vld [vmem:[#allocation2 + $0x400] sm:$0xff]  ;;  %v1332_v27 = vld [vmem:[#allocation2 + $0x418] sm:$0xff]  ;;  %v1331_v48 = vld [vmem:[#allocation2 + $0x410] sm:$0xff] }
 0x503   :  { %v1334_v50 = vld [vmem:[#allocation2 + $0x428] sm:$0xff]  ;;  %v1333_v51 = vld [vmem:[#allocation2 + $0x420] sm:$0xff]  ;;  %v1336_v55 = vld [vmem:[#allocation2 + $0x438] sm:$0xff] }
 0x504   :  { %v1335_v47 = vld [vmem:[#allocation2 + $0x430] sm:$0xff]  ;;  %v1338_v39 = vld [vmem:[#allocation2 + $0x448] sm:$0xff]  ;;  %v1337_v58 = vld [vmem:[#allocation2 + $0x440] sm:$0xff] }
 0x505   :  { %1418 = vmatpush1.bf16.msra.mxu1 %v1303_v52  ;;  %v1340_v52 = vld [vmem:[#allocation2 + $0x458] sm:$0xff]  ;;  %v1342_v38 = vld [vmem:[#allocation2 + $0x468] sm:$0xff]  ;;  %v1341_v40 = vld [vmem:[#allocation2 + $0x460] sm:$0xff] }
 0x506   :  { %1419 = vmatprep.subr.bf16.mxu1 %v1306_v53  ;;  %v1339_v53 = vld [vmem:[#allocation2 + $0x450] sm:$0xff]  ;;  %v1362_v32 = vld [vmem:[#allocation2 + $0x508] sm:$0xff]  ;;  %v1365_v33 = vld [vmem:[#allocation2 + $0x520] sm:$0xff] }
 0x507   :  { %v1359_v60 = vld [vmem:[#allocation2 + $0x4f0] sm:$0xff]  ;;  %v1368_v20 = vld [vmem:[#allocation2 + $0x538] sm:$0xff]  ;;  %v1370_v28 = vld [vmem:[#allocation2 + $0x548] sm:$0xff] }
 0x508   :  { %v1367_v21 = vld [vmem:[#allocation2 + $0x530] sm:$0xff]  ;;  %v1372_v57 = vld [vmem:[#allocation2 + $0x558] sm:$0xff]  ;;  %v1374_v10 = vld [vmem:[#allocation2 + $0x568] sm:$0xff] }
 0x509   :  { %1420 = vmatpush1.bf16.msra.mxu1 %v1305_v42  ;;  %v1343_v42 = vld [vmem:[#allocation2 + $0x470] sm:$0xff]  ;;  %v1373_v59 = vld [vmem:[#allocation2 + $0x560] sm:$0xff]  ;;  %v1378_v43 = vld [vmem:[#allocation2 + $0x588] sm:$0xff] }
 0x50a   :  { %1421 = vmatprep.subr.bf16.mxu1 %v1308_v24  ;;  %v1346_v24 = vld [vmem:[#allocation2 + $0x488] sm:$0xff]  ;;  %v1371_v30 = vld [vmem:[#allocation2 + $0x550] sm:$0xff] }
 0x50b   :  { %v1375_v56 = vld [vmem:[#allocation2 + $0x570] sm:$0xff] }
 0x50d   :  { %1422 = vmatpush1.bf16.msra.mxu1 %v1307_v25  ;;  %v1345_v25 = vld [vmem:[#allocation2 + $0x480] sm:$0xff] }
 0x50e   :  { %1423 = vmatprep.subr.bf16.mxu1 %v1310_v0  ;;  %v1348_v0 = vld [vmem:[#allocation2 + $0x498] sm:$0xff] }
 0x511   :  { %1424 = vmatpush1.bf16.msra.mxu1 %v1309_v13  ;;  %v1347_v13 = vld [vmem:[#allocation2 + $0x490] sm:$0xff] }
 0x512   :  { %1425 = vmatprep.subr.bf16.mxu1 %v1312_v18  ;;  %v1350_v18 = vld [vmem:[#allocation2 + $0x4a8] sm:$0xff] }
 0x515   :  { %1426 = vmatpush1.bf16.msra.mxu1 %v1311_v1  ;;  %v1349_v1 = vld [vmem:[#allocation2 + $0x4a0] sm:$0xff] }
 0x516   :  { %1427 = vmatprep.subr.bf16.mxu1 %v1314_v2  ;;  %v1352_v2 = vld [vmem:[#allocation2 + $0x4b8] sm:$0xff] }
 0x519   :  { %1428 = vmatpush1.bf16.msra.mxu1 %v1313_v3  ;;  %v1351_v3 = vld [vmem:[#allocation2 + $0x4b0] sm:$0xff] }
 0x51a   :  { %1429 = vmatprep.subr.bf16.mxu1 %v1316_v4  ;;  %v1354_v4 = vld [vmem:[#allocation2 + $0x4c8] sm:$0xff] }
 0x51d   :  { %1430 = vmatpush1.bf16.msra.mxu1 %v1315_v46  ;;  %v1353_v46 = vld [vmem:[#allocation2 + $0x4c0] sm:$0xff] }
 0x51e   :  { %1431 = vmatprep.subr.bf16.mxu1 %v1318_v35  ;;  %v1356_v35 = vld [vmem:[#allocation2 + $0x4d8] sm:$0xff] }
 0x521   :  { %1432 = vmatpush1.bf16.msra.mxu1 %v1317_v49  ;;  %v1355_v49 = vld [vmem:[#allocation2 + $0x4d0] sm:$0xff] }
 0x522   :  { %1433 = vmatprep.subr.bf16.mxu1 %v1320_v7  ;;  %v1358_v7 = vld [vmem:[#allocation2 + $0x4e8] sm:$0xff] }
 0x525   :  { %1434 = vmatpush1.bf16.msra.mxu1 %v1319_v34  ;;  %v1265_v34 = vrot.slane %v7311_v61, 1  ;;  %v1361_v61 = vld [vmem:[#allocation2 + $0x500] sm:$0xff] }
 0x526   :  { %1435 = vmatprep.subr.bf16.mxu1 %v1322_v17  ;;  %v1266_v17 = vrot.slane %v7317_v41, 1  ;;  %v1364_v41 = vld [vmem:[#allocation2 + $0x518] sm:$0xff] }
 0x529   :  { %1436 = vmatpush1.bf16.msra.mxu1 %v1321_v6  ;;  %v1271_v6 = vrot.slane %v7314_v54, 1  ;;  %v1363_v54 = vld [vmem:[#allocation2 + $0x510] sm:$0xff] }
 0x52a   :  { %1437 = vmatprep.subr.bf16.mxu1 %v1324_v15  ;;  %v1272_v15 = vrot.slane %v7320_v9, 1  ;;  %v1366_v9 = vld [vmem:[#allocation2 + $0x528] sm:$0xff] }
 0x52d   :  { %1438 = vmatpush1.bf16.msra.mxu1 %v1323_v14  ;;  %v1357_v14 = vld [vmem:[#allocation2 + $0x4e0] sm:$0xff] }
 0x52e   :  { %1439 = vmatprep.subr.bf16.mxu1 %v1326_v19  ;;  %v1360_v19 = vld [vmem:[#allocation2 + $0x4f8] sm:$0xff] }
 0x531   :  { %1440 = vmatpush1.bf16.msra.mxu1 %v1325_v37  ;;  %v1267_v37 = vsel %vm152_vm1, %v1265_v34, %v1266_v17 }
 0x532   :  { %1441 = vmatprep.subr.bf16.mxu1 %v1328_v5  ;;  %v1273_v5 = vsel %vm152_vm1, %v1271_v6, %v1272_v15 }
 0x535   :  { %1442 = vmatpush1.bf16.msra.mxu1 %v1327_v26  ;;  %v1395_v26 = vpack.c.bf16 %v1273_v5, %v1267_v37 }
 0x536   :  { %1454 = vmatprep.subr.bf16.mxu1 %v1330_v62  ;;  %v1369_v62 = vld [vmem:[#allocation2 + $0x540] sm:$0xff] }
 0x538   :  { %6211 = vmatmul.mubr.msk.bf16.vlgmr.msra.gmra.mrb[8].mxu1 %vm7262_vm11, %v6210_v29  ;;  %v1376_v29 = vld [vmem:[#allocation2 + $0x578] sm:$0xff] }
 0x539   :  { %1455 = vmatpush1.bf16.msra.mxu1 %v1329_v22  ;;  %1486 = vmatprep.mubr.bf16.mxu1 %v1396_v44  ;;  %v1344_v44 = vld [vmem:[#allocation2 + $0x478] sm:$0xff] }
 0x53a   :  { %1456 = vmatprep.subr.bf16.mxu1 %v1332_v27  ;;  %v1380_v22 = vld [vmem:[#allocation2 + $0x598] sm:$0xff]  ;;  %v1379_v27 = vld [vmem:[#allocation2 + $0x590] sm:$0xff] }
 0x53d   :  { %1457 = vmatpush1.bf16.msra.mxu1 %v1331_v48  ;;  %v1382_v48 = vld [vmem:[#allocation2 + $0x5a8] sm:$0xff] }
 0x53e   :  { %1458 = vmatprep.subr.bf16.mxu1 %v1334_v50  ;;  %v1381_v50 = vld [vmem:[#allocation2 + $0x5a0] sm:$0xff] }
 0x541   :  { %1459 = vmatpush1.bf16.msra.mxu1 %v1333_v51  ;;  %v1384_v51 = vld [vmem:[#allocation2 + $0x5b8] sm:$0xff] }
 0x542   :  { %1460 = vmatprep.subr.bf16.mxu1 %v1336_v55  ;;  %v1383_v55 = vld [vmem:[#allocation2 + $0x5b0] sm:$0xff] }
 0x545   :  { %1461 = vmatpush1.bf16.msra.mxu1 %v1335_v47  ;;  %v1386_v47 = vld [vmem:[#allocation2 + $0x5c8] sm:$0xff] }
 0x546   :  { %1462 = vmatprep.subr.bf16.mxu1 %v1338_v39  ;;  %v1385_v39 = vld [vmem:[#allocation2 + $0x5c0] sm:$0xff] }
 0x549   :  { %1463 = vmatpush1.bf16.msra.mxu1 %v1337_v58  ;;  %v1388_v58 = vld [vmem:[#allocation2 + $0x5d8] sm:$0xff] }
 0x54a   :  { %1464 = vmatprep.subr.bf16.mxu1 %v1340_v52  ;;  %v1387_v52 = vld [vmem:[#allocation2 + $0x5d0] sm:$0xff] }
 0x54d   :  { %1465 = vmatpush1.bf16.msra.mxu1 %v1339_v53  ;;  %v1390_v53 = vld [vmem:[#allocation2 + $0x5e8] sm:$0xff] }
 0x54e   :  { %1466 = vmatprep.subr.bf16.mxu1 %v1342_v38  ;;  %v1389_v38 = vld [vmem:[#allocation2 + $0x5e0] sm:$0xff] }
 0x551   :  { %1467 = vmatpush1.bf16.msra.mxu1 %v1341_v40  ;;  %v1392_v40 = vld [vmem:[#allocation2 + $0x5f8] sm:$0xff] }
 0x552   :  { %1468 = vmatprep.subr.bf16.mxu1 %v1344_v44  ;;  %v1391_v44 = vld [vmem:[#allocation2 + $0x5f0] sm:$0xff] }
 0x555   :  { %1469 = vmatpush1.bf16.msra.mxu1 %v1343_v42  ;;  %v1399_v42 = vld [vmem:[#allocation8 + $0x6] sm:$0x3] }
 0x556   :  { %1470 = vmatprep.subr.bf16.mxu1 %v1346_v24  ;;  %v1404_v24 = vrot.slane %v1399_v42, %v6873_v12 }
 0x559   :  { %1471 = vmatpush1.bf16.msra.mxu1 %v1345_v25  ;;  %v1408_v25 = vrot.slane %v1399_v42, %v6876_v16 }
 0x55a   :  { %1472 = vmatprep.subr.bf16.mxu1 %v1348_v0 }
 0x55d   :  { %1473 = vmatpush1.bf16.msra.mxu1 %v1347_v13 }
 0x55e   :  { %1474 = vmatprep.subr.bf16.mxu1 %v1350_v18 }
 0x561   :  { %1475 = vmatpush1.bf16.msra.mxu1 %v1349_v1 }
 0x562   :  { %1476 = vmatprep.subr.bf16.mxu1 %v1352_v2 }
 0x565   :  { %1477 = vmatpush1.bf16.msra.mxu1 %v1351_v3 }
 0x566   :  { %1478 = vmatprep.subr.bf16.mxu1 %v1354_v4 }
 0x569   :  { %1479 = vmatpush1.bf16.msra.mxu1 %v1353_v46 }
 0x56a   :  { %1480 = vmatprep.subr.bf16.mxu1 %v1356_v35 }
 0x56d   :  { %1481 = vmatpush1.bf16.msra.mxu1 %v1355_v49 }
 0x56e   :  { %1482 = vmatprep.subr.bf16.mxu1 %v1358_v7 }
 0x571   :  { %1483 = vmatpush1.bf16.msra.mxu1 %v1357_v14 }
 0x572   :  { %1484 = vmatprep.subr.bf16.mxu1 %v1360_v19 }
 0x575   :  { %1485 = vmatpush1.bf16.msra.mxu1 %v1359_v60 }
 0x576   :  { %1497 = vmatprep.subr.bf16.mxu1 %v1362_v32 }
 0x578   :  { %1487 = vmatmul.mubr.bf16.vlgmr.msra.gmra.mrb[8].mxu1 %v1395_v26 }
 0x579   :  { %1498 = vmatpush1.bf16.msra.mxu1 %v1361_v61  ;;  %1529 = vmatprep.mubr.bf16.mxu1 %v1398_v31  ;;  %v1377_v31 = vld [vmem:[#allocation2 + $0x580] sm:$0xff] }
 0x57a   :  { %1499 = vmatprep.subr.bf16.mxu1 %v1364_v41 }
 0x57d   :  { %1500 = vmatpush1.bf16.msra.mxu1 %v1363_v54 }
 0x57e   :  { %1501 = vmatprep.subr.bf16.mxu1 %v1366_v9 }
 0x581   :  { %1502 = vmatpush1.bf16.msra.mxu1 %v1365_v33 }
 0x582   :  { %1503 = vmatprep.subr.bf16.mxu1 %v1368_v20 }
 0x585   :  { %1504 = vmatpush1.bf16.msra.mxu1 %v1367_v21 }
 0x586   :  { %1505 = vmatprep.subr.bf16.mxu1 %v1370_v28 }
 0x589   :  { %1506 = vmatpush1.bf16.msra.mxu1 %v1369_v62 }
 0x58a   :  { %1507 = vmatprep.subr.bf16.mxu1 %v1372_v57 }
 0x58d   :  { %1508 = vmatpush1.bf16.msra.mxu1 %v1371_v30 }
 0x58e   :  { %1509 = vmatprep.subr.bf16.mxu1 %v1374_v10 }
 0x591   :  { %1510 = vmatpush1.bf16.msra.mxu1 %v1373_v59 }
 0x592   :  { %1511 = vmatprep.subr.bf16.mxu1 %v1376_v29 }
 0x595   :  { %1512 = vmatpush1.bf16.msra.mxu1 %v1375_v56 }
 0x596   :  { %1513 = vmatprep.subr.bf16.mxu1 %v1378_v43 }
 0x599   :  { %1514 = vmatpush1.bf16.msra.mxu1 %v1377_v31 }
 0x59a   :  { %1515 = vmatprep.subr.bf16.mxu1 %v1380_v22 }
 0x59d   :  { %1516 = vmatpush1.bf16.msra.mxu1 %v1379_v27 }
 0x59e   :  { %1517 = vmatprep.subr.bf16.mxu1 %v1382_v48 }
 0x5a1   :  { %1518 = vmatpush1.bf16.msra.mxu1 %v1381_v50 }
 0x5a2   :  { %1519 = vmatprep.subr.bf16.mxu1 %v1384_v51 }
 0x5a5   :  { %1520 = vmatpush1.bf16.msra.mxu1 %v1383_v55 }
 0x5a6   :  { %1521 = vmatprep.subr.bf16.mxu1 %v1386_v47 }
 0x5a9   :  { %1522 = vmatpush1.bf16.msra.mxu1 %v1385_v39 }
 0x5aa   :  { %1523 = vmatprep.subr.bf16.mxu1 %v1388_v58 }
 0x5ad   :  { %1524 = vmatpush1.bf16.msra.mxu1 %v1387_v52 }
 0x5ae   :  { %1525 = vmatprep.subr.bf16.mxu1 %v1390_v53 }
 0x5b1   :  { %1526 = vmatpush1.bf16.msra.mxu1 %v1389_v38 }
 0x5b2   :  { %1527 = vmatprep.subr.bf16.mxu1 %v1392_v40 }
 0x5b5   :  { %1528 = vmatpush1.bf16.msra.mxu1 %v1391_v44 }
 0x5b8   :  { %1530 = vmatmul.mubr.bf16.vlgmr.msra.gmra.mrb[8].mxu1 %v1397_v23 }
 0x68b   :  { %v1531_v0 = vpop.f32.mrb[8].mxu1 }
 0x68c   :  { %v7365_v13 = vadd.f32 %v1531_v0, %v1404_v24  ;;  %v1533_v18 = vpop.f32.mrb[9].mxu1 }
 0x68d   :  { %v6292_v1 = vadd.f32 %v1533_v18, %v1408_v25  ;;  %v1535_v2 = vpop.f32.mrb[10].mxu1 }
 0x68e   :  { %v1540_v3 = vmax.f32 %v7365_v13, 0.0  ;;  %v7368_v4 = vadd.f32 %v1535_v2, %v1404_v24  ;;  %v1537_v46 = vpop.f32.mrb[11].mxu1 }
 0x68f   :  { %v1541_v35 = vmax.f32 %v6292_v1, 0.0  ;;  %v6294_v49 = vadd.f32 %v1537_v46, %v1408_v25 }
 0x690   :  { %v1542_v45 = vmax.f32 %v7368_v4, 0.0 }
 0x691   :  { %v1543_v36 = vmax.f32 %v6294_v49, 0.0 }
 0x692   :  { %6636 = dma.done.wait [#allocation4], 12288 }
 0x693   :  { %6637 = vsyncadd [#allocation4], 4294955008  ;;  %v1586_v23 = vrot.slane %v1541_v35, 7  ;;  %v1588_v7 = vrot.slane %v1543_v36, 7  ;;  %1562 = sst [smem:[#allocation27]] %s6674_s27  ;;  %s1546_s25 = scalar_lea.hbm %s8257_s2, 52224 }
 0x694   :  { %1564 = sst [smem:[#allocation27 + $0x1]] %s6674_s27  ;;  %s6688_s26 = smov [#allocation26]   ;;  %v1585_v24 = vrot.slane %v1540_v3, 7  ;;  %v1587_v25 = vrot.slane %v1542_v45, 7 }
 0x695   :  { %v6217_v34 = vpack.c.bf16 %v1588_v7, %v1586_v23  ;;  %1566 = sst [smem:[#allocation27 + $0x2]] %s6675_s28  ;;  %v7389_v17 = vsel %vm131_vm0, 0.0, %v1586_v23  ;;  %v7392_v6 = vsel %vm131_vm0, 0.0, %v1588_v7  ;;  %v7395_v15 = vsel %vm131_vm0, %v1586_v23, 0.0 }
 0x696   :  { %1568 = sst [smem:[#allocation27 + $0x3]] %s6676_s29  ;;  %v7398_v14 = vsel %vm131_vm0, %v1588_v7, 0.0  ;;  %v1612_v19 = vrot.slane %v7389_v17, 1  ;;  %v1613_v37 = vrot.slane %v7395_v15, 1  ;;  %v1618_v5 = vrot.slane %v7392_v6, 1 }
 0x697   :  { %6218 = vmatprep.mubr.msk.bf16.mxu0 %vm7262_vm11, %v6217_v34  ;;  %1570 = sst [smem:[#allocation27 + $0x4]] %s6671_s11  ;;  %v1619_v60 = vrot.slane %v7398_v14, 1  ;;  %v7417_v0 = vsel %vm131_vm0, 0.0, %v1585_v24  ;;  %v7420_v18 = vsel %vm131_vm0, 0.0, %v1587_v25  ;;  %v7423_v1 = vsel %vm131_vm0, %v1585_v24, 0.0 }
 0x698   :  { %1572 = sst [smem:[#allocation27 + $0x5]] %s6675_s28  ;;  %v7405_v32 = vsel %vm152_vm1, %v1612_v19, %v1613_v37  ;;  %v7426_v2 = vsel %vm131_vm0, %v1587_v25, 0.0  ;;  %v1628_v13 = vrot.slane %v7389_v17, 2  ;;  %v1629_v3 = vrot.slane %v7395_v15, 2 }
 0x699   :  { %1574 = sst [smem:[#allocation27 + $0x6]] %s6671_s11  ;;  %v7408_v26 = vsel %vm152_vm1, %v1618_v5, %v1619_v60  ;;  %v1634_v4 = vrot.slane %v7392_v6, 2  ;;  %v1635_v35 = vrot.slane %v7398_v14, 2  ;;  %v1625_v45 = vrot.slane %v7417_v0, 2 }
 0x69a   :  { %1576 = sst [smem:[#allocation27 + $0x7]] %s6676_s29  ;;  %v1740_v61 = vpack.c.bf16 %v7408_v26, %v7405_v32  ;;  %v1626_v36 = vrot.slane %v7423_v1, 2  ;;  %v1631_v23 = vrot.slane %v7420_v18, 2  ;;  %v1632_v7 = vrot.slane %v7426_v2, 2 }
 0x69b   :  { %1578 = sst [smem:[#allocation27 + $0x8]] %s6678_s10  ;;  %v6222_v34 = vpack.c.bf16 %v1587_v25, %v1585_v24  ;;  %v7437_v19 = vsel %vm175_vm2, %v1628_v13, %v1629_v3  ;;  %v7440_v17 = vsel %vm175_vm2, %v1634_v4, %v1635_v35 }
 0x69c   :  { %1580 = dma.general %s1546_s25, 12288, %s6826_s18, %s6682_s22, %s6688_s26, [#allocation27], %s6787_s9, 0   ;;  %v1742_v6 = vpack.c.bf16 %v7440_v17, %v7437_v19  ;;  %v7445_v15 = vsel %vm175_vm2, %v1625_v45, %v1626_v36  ;;  %v7448_v14 = vsel %vm175_vm2, %v1631_v23, %v1632_v7 }
 0x69d   :  { %v1642_v41 = vld [vmem:[#allocation2 + $0x8] sm:$0xff]  ;;  %v1641_v54 = vld [vmem:[#allocation2] sm:$0xff]  ;;  %v1644_v9 = vld [vmem:[#allocation2 + $0x18] sm:$0xff]  ;;  %v1741_v5 = vpack.c.bf16 %v7448_v14, %v7445_v15 }
 0x69e   :  { %1755 = vmatprep.subr.bf16.mxu0 %v1642_v41  ;;  %v1643_v33 = vld [vmem:[#allocation2 + $0x10] sm:$0xff]  ;;  %v1646_v20 = vld [vmem:[#allocation2 + $0x28] sm:$0xff]  ;;  %v1645_v21 = vld [vmem:[#allocation2 + $0x20] sm:$0xff] }
 0x69f   :  { %1756 = vmatpush1.bf16.msra.mxu0 %v1641_v54  ;;  %v1648_v28 = vld [vmem:[#allocation2 + $0x38] sm:$0xff]  ;;  %v1647_v62 = vld [vmem:[#allocation2 + $0x30] sm:$0xff]  ;;  %v1650_v57 = vld [vmem:[#allocation2 + $0x48] sm:$0xff] }
 0x6a0   :  { %1757 = vmatprep.subr.bf16.mxu0 %v1644_v9  ;;  %v1649_v30 = vld [vmem:[#allocation2 + $0x40] sm:$0xff]  ;;  %v1652_v10 = vld [vmem:[#allocation2 + $0x58] sm:$0xff]  ;;  %v1651_v59 = vld [vmem:[#allocation2 + $0x50] sm:$0xff] }
 0x6a1   :  { %v1654_v29 = vld [vmem:[#allocation2 + $0x68] sm:$0xff]  ;;  %v1653_v56 = vld [vmem:[#allocation2 + $0x60] sm:$0xff]  ;;  %v1656_v43 = vld [vmem:[#allocation2 + $0x78] sm:$0xff] }
 0x6a2   :  { %v1655_v31 = vld [vmem:[#allocation2 + $0x70] sm:$0xff]  ;;  %v1658_v22 = vld [vmem:[#allocation2 + $0x88] sm:$0xff]  ;;  %v1657_v27 = vld [vmem:[#allocation2 + $0x80] sm:$0xff] }
 0x6a3   :  { %1758 = vmatpush1.bf16.msra.mxu0 %v1643_v33  ;;  %v1660_v48 = vld [vmem:[#allocation2 + $0x98] sm:$0xff]  ;;  %v1659_v50 = vld [vmem:[#allocation2 + $0x90] sm:$0xff]  ;;  %v1662_v51 = vld [vmem:[#allocation2 + $0xa8] sm:$0xff] }
 0x6a4   :  { %1759 = vmatprep.subr.bf16.mxu0 %v1646_v20  ;;  %v1661_v55 = vld [vmem:[#allocation2 + $0xa0] sm:$0xff]  ;;  %v1664_v47 = vld [vmem:[#allocation2 + $0xb8] sm:$0xff]  ;;  %v1663_v39 = vld [vmem:[#allocation2 + $0xb0] sm:$0xff] }
 0x6a5   :  { %v1666_v58 = vld [vmem:[#allocation2 + $0xc8] sm:$0xff]  ;;  %v1665_v52 = vld [vmem:[#allocation2 + $0xc0] sm:$0xff]  ;;  %v1668_v53 = vld [vmem:[#allocation2 + $0xd8] sm:$0xff] }
 0x6a6   :  { %v1667_v38 = vld [vmem:[#allocation2 + $0xd0] sm:$0xff]  ;;  %v1670_v40 = vld [vmem:[#allocation2 + $0xe8] sm:$0xff]  ;;  %v1669_v44 = vld [vmem:[#allocation2 + $0xe0] sm:$0xff] }
 0x6a7   :  { %1760 = vmatpush1.bf16.msra.mxu0 %v1645_v21  ;;  %v1672_v42 = vld [vmem:[#allocation2 + $0xf8] sm:$0xff]  ;;  %v1671_v46 = vld [vmem:[#allocation2 + $0xf0] sm:$0xff]  ;;  %v1674_v49 = vld [vmem:[#allocation2 + $0x108] sm:$0xff] }
 0x6a8   :  { %1761 = vmatprep.subr.bf16.mxu0 %v1648_v28  ;;  %v1673_v37 = vld [vmem:[#allocation2 + $0x100] sm:$0xff]  ;;  %v1676_v60 = vld [vmem:[#allocation2 + $0x118] sm:$0xff]  ;;  %v1675_v41 = vld [vmem:[#allocation2 + $0x110] sm:$0xff] }
 0x6a9   :  { %v1678_v54 = vld [vmem:[#allocation2 + $0x128] sm:$0xff]  ;;  %v1677_v9 = vld [vmem:[#allocation2 + $0x120] sm:$0xff]  ;;  %v1680_v33 = vld [vmem:[#allocation2 + $0x138] sm:$0xff] }
 0x6aa   :  { %v1679_v20 = vld [vmem:[#allocation2 + $0x130] sm:$0xff]  ;;  %v1682_v21 = vld [vmem:[#allocation2 + $0x148] sm:$0xff]  ;;  %v1681_v63 = vld [vmem:[#allocation2 + $0x140] sm:$0xff] }
 0x6ab   :  { %1762 = vmatpush1.bf16.msra.mxu0 %v1647_v62  ;;  %v1684_v28 = vld [vmem:[#allocation2 + $0x158] sm:$0xff]  ;;  %v1683_v62 = vld [vmem:[#allocation2 + $0x150] sm:$0xff]  ;;  %v1686_v32 = vld [vmem:[#allocation2 + $0x168] sm:$0xff] }
 0x6ac   :  { %1763 = vmatprep.subr.bf16.mxu0 %v1650_v57  ;;  %v1685_v26 = vld [vmem:[#allocation2 + $0x160] sm:$0xff]  ;;  %v1687_v57 = vld [vmem:[#allocation2 + $0x170] sm:$0xff]  ;;  %v1706_v24 = vld [vmem:[#allocation2 + $0x208] sm:$0xff] }
 0x6ad   :  { %v1712_v13 = vld [vmem:[#allocation2 + $0x238] sm:$0xff]  ;;  %v1711_v3 = vld [vmem:[#allocation2 + $0x230] sm:$0xff]  ;;  %v1714_v4 = vld [vmem:[#allocation2 + $0x248] sm:$0xff] }
 0x6ae   :  { %v1713_v35 = vld [vmem:[#allocation2 + $0x240] sm:$0xff]  ;;  %v1715_v45 = vld [vmem:[#allocation2 + $0x250] sm:$0xff]  ;;  %v1718_v36 = vld [vmem:[#allocation2 + $0x268] sm:$0xff] }
 0x6af   :  { %1764 = vmatpush1.bf16.msra.mxu0 %v1649_v30  ;;  %v1690_v30 = vld [vmem:[#allocation2 + $0x188] sm:$0xff]  ;;  %v1717_v23 = vld [vmem:[#allocation2 + $0x260] sm:$0xff]  ;;  %v1720_v7 = vld [vmem:[#allocation2 + $0x278] sm:$0xff] }
 0x6b0   :  { %1765 = vmatprep.subr.bf16.mxu0 %v1652_v10  ;;  %v1689_v10 = vld [vmem:[#allocation2 + $0x180] sm:$0xff]  ;;  %v1722_v19 = vld [vmem:[#allocation2 + $0x288] sm:$0xff] }
 0x6b1   :  { %v1721_v17 = vld [vmem:[#allocation2 + $0x280] sm:$0xff] }
 0x6b3   :  { %1766 = vmatpush1.bf16.msra.mxu0 %v1651_v59  ;;  %v1692_v59 = vld [vmem:[#allocation2 + $0x198] sm:$0xff] }
 0x6b4   :  { %1767 = vmatprep.subr.bf16.mxu0 %v1654_v29  ;;  %v1691_v29 = vld [vmem:[#allocation2 + $0x190] sm:$0xff] }
 0x6b7   :  { %1768 = vmatpush1.bf16.msra.mxu0 %v1653_v56  ;;  %v1694_v56 = vld [vmem:[#allocation2 + $0x1a8] sm:$0xff] }
 0x6b8   :  { %1769 = vmatprep.subr.bf16.mxu0 %v1656_v43  ;;  %v1693_v43 = vld [vmem:[#allocation2 + $0x1a0] sm:$0xff] }
 0x6bb   :  { %1770 = vmatpush1.bf16.msra.mxu0 %v1655_v31  ;;  %v1696_v31 = vld [vmem:[#allocation2 + $0x1b8] sm:$0xff] }
 0x6bc   :  { %1771 = vmatprep.subr.bf16.mxu0 %v1658_v22  ;;  %v1695_v22 = vld [vmem:[#allocation2 + $0x1b0] sm:$0xff] }
 0x6bf   :  { %1772 = vmatpush1.bf16.msra.mxu0 %v1657_v27  ;;  %v1698_v27 = vld [vmem:[#allocation2 + $0x1c8] sm:$0xff] }
 0x6c0   :  { %1773 = vmatprep.subr.bf16.mxu0 %v1660_v48  ;;  %v1697_v48 = vld [vmem:[#allocation2 + $0x1c0] sm:$0xff] }
 0x6c3   :  { %1774 = vmatpush1.bf16.msra.mxu0 %v1659_v50  ;;  %v1700_v50 = vld [vmem:[#allocation2 + $0x1d8] sm:$0xff] }
 0x6c4   :  { %1775 = vmatprep.subr.bf16.mxu0 %v1662_v51  ;;  %v1699_v51 = vld [vmem:[#allocation2 + $0x1d0] sm:$0xff] }
 0x6c7   :  { %1776 = vmatpush1.bf16.msra.mxu0 %v1661_v55  ;;  %v1702_v55 = vld [vmem:[#allocation2 + $0x1e8] sm:$0xff] }
 0x6c8   :  { %1777 = vmatprep.subr.bf16.mxu0 %v1664_v47  ;;  %v1609_v47 = vrot.slane %v7417_v0, 1  ;;  %v1705_v0 = vld [vmem:[#allocation2 + $0x200] sm:$0xff] }
 0x6cb   :  { %1778 = vmatpush1.bf16.msra.mxu0 %v1663_v39  ;;  %v1610_v39 = vrot.slane %v7423_v1, 1  ;;  %v1708_v1 = vld [vmem:[#allocation2 + $0x218] sm:$0xff] }
 0x6cc   :  { %1779 = vmatprep.subr.bf16.mxu0 %v1666_v58  ;;  %v1615_v58 = vrot.slane %v7420_v18, 1  ;;  %v1707_v18 = vld [vmem:[#allocation2 + $0x210] sm:$0xff] }
 0x6cf   :  { %1780 = vmatpush1.bf16.msra.mxu0 %v1665_v52  ;;  %v1616_v52 = vrot.slane %v7426_v2, 1  ;;  %v1710_v2 = vld [vmem:[#allocation2 + $0x228] sm:$0xff] }
 0x6d0   :  { %1781 = vmatprep.subr.bf16.mxu0 %v1668_v53  ;;  %v1701_v53 = vld [vmem:[#allocation2 + $0x1e0] sm:$0xff] }
 0x6d3   :  { %1782 = vmatpush1.bf16.msra.mxu0 %v1667_v38  ;;  %v1704_v38 = vld [vmem:[#allocation2 + $0x1f8] sm:$0xff] }
 0x6d4   :  { %1783 = vmatprep.subr.bf16.mxu0 %v1670_v40  ;;  %v1611_v40 = vsel %vm152_vm1, %v1609_v47, %v1610_v39 }
 0x6d7   :  { %1784 = vmatpush1.bf16.msra.mxu0 %v1669_v44  ;;  %v1617_v44 = vsel %vm152_vm1, %v1615_v58, %v1616_v52 }
 0x6d8   :  { %1785 = vmatprep.subr.bf16.mxu0 %v1672_v42  ;;  %v1703_v42 = vld [vmem:[#allocation2 + $0x1f0] sm:$0xff]  ;;  %v1739_v25 = vpack.c.bf16 %v1617_v44, %v1611_v40 }
 0x6db   :  { %1786 = vmatpush1.bf16.msra.mxu0 %v1671_v46  ;;  %v1709_v46 = vld [vmem:[#allocation2 + $0x220] sm:$0xff] }
 0x6dc   :  { %1798 = vmatprep.subr.bf16.mxu0 %v1674_v49  ;;  %v1716_v49 = vld [vmem:[#allocation2 + $0x258] sm:$0xff] }
 0x6de   :  { %6223 = vmatmul.mubr.msk.bf16.vlgmr.msra.gmra.mrb[12].mxu0 %vm7262_vm11, %v6222_v34  ;;  %v1719_v34 = vld [vmem:[#allocation2 + $0x270] sm:$0xff] }
 0x6df   :  { %1799 = vmatpush1.bf16.msra.mxu0 %v1673_v37  ;;  %1830 = vmatprep.mubr.bf16.mxu0 %v1740_v61  ;;  %v1688_v61 = vld [vmem:[#allocation2 + $0x178] sm:$0xff]  ;;  %v1723_v37 = vld [vmem:[#allocation2 + $0x290] sm:$0xff] }
 0x6e0   :  { %1800 = vmatprep.subr.bf16.mxu0 %v1676_v60  ;;  %v1726_v60 = vld [vmem:[#allocation2 + $0x2a8] sm:$0xff] }
 0x6e3   :  { %1801 = vmatpush1.bf16.msra.mxu0 %v1675_v41  ;;  %v1725_v41 = vld [vmem:[#allocation2 + $0x2a0] sm:$0xff] }
 0x6e4   :  { %1802 = vmatprep.subr.bf16.mxu0 %v1678_v54  ;;  %v1728_v54 = vld [vmem:[#allocation2 + $0x2b8] sm:$0xff] }
 0x6e7   :  { %1803 = vmatpush1.bf16.msra.mxu0 %v1677_v9  ;;  %v1727_v9 = vld [vmem:[#allocation2 + $0x2b0] sm:$0xff] }
 0x6e8   :  { %1804 = vmatprep.subr.bf16.mxu0 %v1680_v33  ;;  %v1730_v33 = vld [vmem:[#allocation2 + $0x2c8] sm:$0xff] }
 0x6eb   :  { %1805 = vmatpush1.bf16.msra.mxu0 %v1679_v20  ;;  %v1729_v20 = vld [vmem:[#allocation2 + $0x2c0] sm:$0xff] }
 0x6ec   :  { %1806 = vmatprep.subr.bf16.mxu0 %v1682_v21  ;;  %v1732_v21 = vld [vmem:[#allocation2 + $0x2d8] sm:$0xff] }
 0x6ef   :  { %1807 = vmatpush1.bf16.msra.mxu0 %v1681_v63  ;;  %v1731_v63 = vld [vmem:[#allocation2 + $0x2d0] sm:$0xff] }
 0x6f0   :  { %1808 = vmatprep.subr.bf16.mxu0 %v1684_v28  ;;  %v1734_v28 = vld [vmem:[#allocation2 + $0x2e8] sm:$0xff] }
 0x6f3   :  { %1809 = vmatpush1.bf16.msra.mxu0 %v1683_v62  ;;  %v1733_v62 = vld [vmem:[#allocation2 + $0x2e0] sm:$0xff] }
 0x6f4   :  { %1810 = vmatprep.subr.bf16.mxu0 %v1686_v32  ;;  %v1736_v32 = vld [vmem:[#allocation2 + $0x2f8] sm:$0xff] }
 0x6f7   :  { %1811 = vmatpush1.bf16.msra.mxu0 %v1685_v26  ;;  %v1735_v26 = vld [vmem:[#allocation2 + $0x2f0] sm:$0xff] }
 0x6f8   :  { %1812 = vmatprep.subr.bf16.mxu0 %v1688_v61  ;;  %v1743_v61 = vld [vmem:[#allocation8 + $0x8] sm:$0x3] }
 0x6fb   :  { %1813 = vmatpush1.bf16.msra.mxu0 %v1687_v57  ;;  %v1748_v57 = vrot.slane %v1743_v61, %v6873_v12 }
 0x6fc   :  { %1814 = vmatprep.subr.bf16.mxu0 %v1690_v30  ;;  %v1752_v30 = vrot.slane %v1743_v61, %v6876_v16 }
 0x6ff   :  { %1815 = vmatpush1.bf16.msra.mxu0 %v1689_v10 }
 0x700   :  { %1816 = vmatprep.subr.bf16.mxu0 %v1692_v59 }
 0x703   :  { %1817 = vmatpush1.bf16.msra.mxu0 %v1691_v29 }
 0x704   :  { %1818 = vmatprep.subr.bf16.mxu0 %v1694_v56 }
 0x707   :  { %1819 = vmatpush1.bf16.msra.mxu0 %v1693_v43 }
 0x708   :  { %1820 = vmatprep.subr.bf16.mxu0 %v1696_v31 }
 0x70b   :  { %1821 = vmatpush1.bf16.msra.mxu0 %v1695_v22 }
 0x70c   :  { %1822 = vmatprep.subr.bf16.mxu0 %v1698_v27 }
 0x70f   :  { %1823 = vmatpush1.bf16.msra.mxu0 %v1697_v48 }
 0x710   :  { %1824 = vmatprep.subr.bf16.mxu0 %v1700_v50 }
 0x713   :  { %1825 = vmatpush1.bf16.msra.mxu0 %v1699_v51 }
 0x714   :  { %1826 = vmatprep.subr.bf16.mxu0 %v1702_v55 }
 0x717   :  { %1827 = vmatpush1.bf16.msra.mxu0 %v1701_v53 }
 0x718   :  { %1828 = vmatprep.subr.bf16.mxu0 %v1704_v38 }
 0x71b   :  { %1829 = vmatpush1.bf16.msra.mxu0 %v1703_v42 }
 0x71c   :  { %1841 = vmatprep.subr.bf16.mxu0 %v1706_v24 }
 0x71e   :  { %1831 = vmatmul.mubr.bf16.vlgmr.msra.gmra.mrb[12].mxu0 %v1739_v25 }
 0x71f   :  { %1842 = vmatpush1.bf16.msra.mxu0 %v1705_v0  ;;  %1873 = vmatprep.mubr.bf16.mxu0 %v1742_v6  ;;  %v1724_v6 = vld [vmem:[#allocation2 + $0x298] sm:$0xff] }
 0x720   :  { %1843 = vmatprep.subr.bf16.mxu0 %v1708_v1 }
 0x723   :  { %1844 = vmatpush1.bf16.msra.mxu0 %v1707_v18 }
 0x724   :  { %1845 = vmatprep.subr.bf16.mxu0 %v1710_v2 }
 0x727   :  { %1846 = vmatpush1.bf16.msra.mxu0 %v1709_v46 }
 0x728   :  { %1847 = vmatprep.subr.bf16.mxu0 %v1712_v13 }
 0x72b   :  { %1848 = vmatpush1.bf16.msra.mxu0 %v1711_v3 }
 0x72c   :  { %1849 = vmatprep.subr.bf16.mxu0 %v1714_v4 }
 0x72f   :  { %1850 = vmatpush1.bf16.msra.mxu0 %v1713_v35 }
 0x730   :  { %1851 = vmatprep.subr.bf16.mxu0 %v1716_v49 }
 0x733   :  { %1852 = vmatpush1.bf16.msra.mxu0 %v1715_v45 }
 0x734   :  { %1853 = vmatprep.subr.bf16.mxu0 %v1718_v36 }
 0x737   :  { %1854 = vmatpush1.bf16.msra.mxu0 %v1717_v23 }
 0x738   :  { %1855 = vmatprep.subr.bf16.mxu0 %v1720_v7 }
 0x73b   :  { %1856 = vmatpush1.bf16.msra.mxu0 %v1719_v34 }
 0x73c   :  { %1857 = vmatprep.subr.bf16.mxu0 %v1722_v19 }
 0x73f   :  { %1858 = vmatpush1.bf16.msra.mxu0 %v1721_v17 }
 0x740   :  { %1859 = vmatprep.subr.bf16.mxu0 %v1724_v6 }
 0x743   :  { %1860 = vmatpush1.bf16.msra.mxu0 %v1723_v37 }
 0x744   :  { %1861 = vmatprep.subr.bf16.mxu0 %v1726_v60 }
 0x747   :  { %1862 = vmatpush1.bf16.msra.mxu0 %v1725_v41 }
 0x748   :  { %1863 = vmatprep.subr.bf16.mxu0 %v1728_v54 }
 0x74b   :  { %1864 = vmatpush1.bf16.msra.mxu0 %v1727_v9 }
 0x74c   :  { %1865 = vmatprep.subr.bf16.mxu0 %v1730_v33 }
 0x74f   :  { %1866 = vmatpush1.bf16.msra.mxu0 %v1729_v20 }
 0x750   :  { %1867 = vmatprep.subr.bf16.mxu0 %v1732_v21 }
 0x753   :  { %1868 = vmatpush1.bf16.msra.mxu0 %v1731_v63 }
 0x754   :  { %1869 = vmatprep.subr.bf16.mxu0 %v1734_v28 }
 0x757   :  { %1870 = vmatpush1.bf16.msra.mxu0 %v1733_v62 }
 0x758   :  { %1871 = vmatprep.subr.bf16.mxu0 %v1736_v32 }
 0x75b   :  { %1872 = vmatpush1.bf16.msra.mxu0 %v1735_v26 }
 0x75e   :  { %1874 = vmatmul.mubr.bf16.vlgmr.msra.gmra.mrb[12].mxu0 %v1741_v5 }
 0x831   :  { %v1875_v10 = vpop.f32.mrb[12].mxu0 }
 0x832   :  { %v6295_v59 = vadd.f32 %v1875_v10, %v1748_v57  ;;  %v1877_v29 = vpop.f32.mrb[13].mxu0 }
 0x833   :  { %v6296_v56 = vadd.f32 %v1877_v29, %v1752_v30  ;;  %v1879_v43 = vpop.f32.mrb[14].mxu0 }
 0x834   :  { %v7471_v31 = vmax.f32 %v6295_v59, 0.0  ;;  %v6297_v22 = vadd.f32 %v1879_v43, %v1748_v57  ;;  %v1881_v27 = vpop.f32.mrb[15].mxu0 }
 0x835   :  { %v1885_v48 = vmax.f32 %v6296_v56, 0.0  ;;  %v6298_v50 = vadd.f32 %v1881_v27, %v1752_v30 }
 0x836   :  { %v7473_v51 = vmax.f32 %v6297_v22, 0.0 }
 0x837   :  { %v1887_v15 = vmax.f32 %v6298_v50, 0.0 }
 0x838   :  { %6638 = dma.done.wait [#allocation4 + $0x1], 12288 }
 0x839   :  { %6639 = vsyncadd [#allocation4 + $0x1], 4294955008  ;;  %v1930_v14 = vrot.slane %v1885_v48, 1  ;;  %v1932_v5 = vrot.slane %v1887_v15, 1  ;;  %1906 = sst [smem:[#allocation29]] %s6674_s27  ;;  %v1938_v55 = vrot.slane %v1885_v48, 2 }
 0x83a   :  { %v1940_v47 = vrot.slane %v1887_v15, 2  ;;  %1908 = sst [smem:[#allocation29 + $0x1]] %s6674_s27  ;;  %v1946_v39 = vrot.slane %v1885_v48, 3  ;;  %v1948_v58 = vrot.slane %v1887_v15, 3  ;;  %v1978_v52 = vsel %vm131_vm0, 0.0, %v1885_v48  ;;  %s1890_s14 = scalar_lea.hbm %s8257_s2, 64512 }
 0x83b   :  { %1910 = sst [smem:[#allocation29 + $0x2]] %s6675_s28  ;;  %v1980_v53 = vsel %vm131_vm0, 0.0, %v1887_v15  ;;  %v1954_v38 = vrot.slane %v1885_v48, 4  ;;  %v1956_v40 = vrot.slane %v1887_v15, 4  ;;  %v1982_v44 = vsel %vm853_vm7, %v1978_v52, %v1930_v14  ;;  %s6689_s15 = smov [#allocation28]  }
 0x83c   :  { %1912 = sst [smem:[#allocation29 + $0x3]] %s6676_s29  ;;  %v1984_v42 = vsel %vm853_vm7, %v1980_v53, %v1932_v5  ;;  %v1962_v24 = vrot.slane %v1885_v48, 5  ;;  %v1964_v25 = vrot.slane %v1887_v15, 5  ;;  %v1986_v0 = vsel %vm858_vm8, %v1982_v44, %v1938_v55 }
 0x83d   :  { %1914 = sst [smem:[#allocation29 + $0x4]] %s6671_s11  ;;  %v1988_v1 = vsel %vm858_vm8, %v1984_v42, %v1940_v47  ;;  %v1990_v18 = vsel %vm863_vm9, %v1986_v0, %v1946_v39  ;;  %v1970_v36 = vrot.slane %v1885_v48, 6  ;;  %v1972_v23 = vrot.slane %v1887_v15, 6 }
 0x83e   :  { %1916 = sst [smem:[#allocation29 + $0x5]] %s6675_s28  ;;  %v1992_v2 = vsel %vm863_vm9, %v1988_v1, %v1948_v58  ;;  %v1994_v46 = vsel %vm868_vm10, %v1990_v18, %v1946_v39  ;;  %v1929_v15 = vrot.slane %v7471_v31, 1  ;;  %v1931_v14 = vrot.slane %v7473_v51, 1 }
 0x83f   :  { %1918 = sst [smem:[#allocation29 + $0x6]] %s6671_s11  ;;  %v1996_v13 = vsel %vm868_vm10, %v1992_v2, %v1948_v58  ;;  %v1998_v3 = vsel %vm175_vm2, %v1994_v46, %v1954_v38  ;;  %v2006_v17 = vsel %vm131_vm0, %v1970_v36, 0.0  ;;  %v2008_v6 = vsel %vm131_vm0, %v1972_v23, 0.0 }
 0x840   :  { %1920 = sst [smem:[#allocation29 + $0x7]] %s6676_s29  ;;  %v2000_v4 = vsel %vm175_vm2, %v1996_v13, %v1956_v40  ;;  %v7500_v35 = vsel %vm152_vm1, %v1998_v3, %v1962_v24  ;;  %v2021_v37 = vrot.slane %v2006_v17, 5  ;;  %v2027_v60 = vrot.slane %v2008_v6, 5 }
 0x841   :  { %1922 = sst [smem:[#allocation29 + $0x8]] %s6678_s10  ;;  %v7503_v49 = vsel %vm152_vm1, %v2000_v4, %v1964_v25  ;;  %v2020_v7 = vrot.slane %v7500_v35, 5  ;;  %v1977_v55 = vsel %vm131_vm0, 0.0, %v7471_v31  ;;  %v1979_v47 = vsel %vm131_vm0, 0.0, %v7473_v51 }
 0x842   :  { %1924 = dma.general %s1890_s14, 12288, %s6784_s1, %s6679_s13, %s6689_s15, [#allocation29], %s6787_s9, 0   ;;  %v6227_v45 = vcombine.low %v7500_v35, %v7503_v49  ;;  %v2026_v34 = vrot.slane %v7503_v49, 5  ;;  %v1937_v39 = vrot.slane %v7471_v31, 2  ;;  %v1939_v58 = vrot.slane %v7473_v51, 2 }
 0x843   :  { %v2040_v41 = vld [vmem:[#allocation2 + $0x308] sm:$0xff]  ;;  %v2039_v54 = vld [vmem:[#allocation2 + $0x300] sm:$0xff]  ;;  %v2042_v9 = vld [vmem:[#allocation2 + $0x318] sm:$0xff]  ;;  %v2022_v33 = vsel %vm858_vm8, %v2020_v7, %v2021_v37  ;;  %v1981_v53 = vsel %vm853_vm7, %v1977_v55, %v1929_v15  ;;  %v1983_v38 = vsel %vm853_vm7, %v1979_v47, %v1931_v14  ;;  %v1945_v44 = vrot.slane %v7471_v31, 3 }
 0x844   :  { %v2148_v19 = vpack.c.bf16 %v6227_v45, %v6227_v45  ;;  %v2028_v20 = vsel %vm858_vm8, %v2026_v34, %v2027_v60  ;;  %2165 = vmatprep.subr.bf16.mxu1 %v2040_v41  ;;  %v2041_v63 = vld [vmem:[#allocation2 + $0x310] sm:$0xff]  ;;  %v2044_v28 = vld [vmem:[#allocation2 + $0x328] sm:$0xff]  ;;  %v2043_v62 = vld [vmem:[#allocation2 + $0x320] sm:$0xff]  ;;  %v1947_v42 = vrot.slane %v7473_v51, 3  ;;  %v1985_v24 = vsel %vm858_vm8, %v1981_v53, %v1937_v39 }
 0x845   :  { %v7516_v21 = vcombine.low %v2022_v33, %v2028_v20  ;;  %2166 = vmatpush1.bf16.msra.mxu1 %v2039_v54  ;;  %v2046_v32 = vld [vmem:[#allocation2 + $0x338] sm:$0xff]  ;;  %v2045_v26 = vld [vmem:[#allocation2 + $0x330] sm:$0xff]  ;;  %v2048_v61 = vld [vmem:[#allocation2 + $0x348] sm:$0xff]  ;;  %v1987_v25 = vsel %vm858_vm8, %v1983_v38, %v1939_v58  ;;  %v1989_v18 = vsel %vm863_vm9, %v1985_v24, %v1945_v44  ;;  %v1953_v13 = vrot.slane %v7471_v31, 4 }
 0x846   :  { %2197 = vmatprep.mubr.bf16.mxu1 %v2148_v19  ;;  %2167 = vmatprep.subr.bf16.mxu1 %v2042_v9  ;;  %v2047_v57 = vld [vmem:[#allocation2 + $0x340] sm:$0xff]  ;;  %v2050_v30 = vld [vmem:[#allocation2 + $0x358] sm:$0xff]  ;;  %v2049_v10 = vld [vmem:[#allocation2 + $0x350] sm:$0xff]  ;;  %v1991_v2 = vsel %vm863_vm9, %v1987_v25, %v1947_v42  ;;  %v1955_v3 = vrot.slane %v7473_v51, 4  ;;  %v1993_v45 = vsel %vm868_vm10, %v1989_v18, %v1945_v44  ;;  %v1961_v23 = vrot.slane %v7471_v31, 5 }
 0x847   :  { %v2052_v59 = vld [vmem:[#allocation2 + $0x368] sm:$0xff]  ;;  %v2051_v29 = vld [vmem:[#allocation2 + $0x360] sm:$0xff]  ;;  %v2054_v56 = vld [vmem:[#allocation2 + $0x378] sm:$0xff]  ;;  %v1995_v36 = vsel %vm868_vm10, %v1991_v2, %v1947_v42  ;;  %v1963_v7 = vrot.slane %v7473_v51, 5  ;;  %v1997_v19 = vsel %vm175_vm2, %v1993_v45, %v1953_v13  ;;  %v2030_v9 = vrot.slane %v7500_v35, 1 }
 0x848   :  { %v2053_v43 = vld [vmem:[#allocation2 + $0x370] sm:$0xff]  ;;  %v2056_v22 = vld [vmem:[#allocation2 + $0x388] sm:$0xff]  ;;  %v2055_v27 = vld [vmem:[#allocation2 + $0x380] sm:$0xff]  ;;  %v1999_v17 = vsel %vm175_vm2, %v1995_v36, %v1955_v3  ;;  %v7543_v37 = vsel %vm152_vm1, %v1997_v19, %v1961_v23  ;;  %v2032_v33 = vrot.slane %v7503_v49, 1  ;;  %v2150_v35 = vpack.c.bf16 %v7516_v21, %v7516_v21 }
 0x849   :  { %2168 = vmatpush1.bf16.msra.mxu1 %v2041_v63  ;;  %v2058_v48 = vld [vmem:[#allocation2 + $0x398] sm:$0xff]  ;;  %v2057_v50 = vld [vmem:[#allocation2 + $0x390] sm:$0xff]  ;;  %v2060_v5 = vld [vmem:[#allocation2 + $0x3a8] sm:$0xff]  ;;  %v7546_v60 = vsel %vm152_vm1, %v1999_v17, %v1963_v7  ;;  %v2029_v20 = vrot.slane %v7543_v37, 1  ;;  %v1969_v44 = vrot.slane %v7471_v31, 6  ;;  %v1971_v42 = vrot.slane %v7473_v51, 6 }
 0x84a   :  { %2169 = vmatprep.subr.bf16.mxu1 %v2044_v28  ;;  %v2059_v52 = vld [vmem:[#allocation2 + $0x3a0] sm:$0xff]  ;;  %v2062_v40 = vld [vmem:[#allocation2 + $0x3b8] sm:$0xff]  ;;  %v2061_v0 = vld [vmem:[#allocation2 + $0x3b0] sm:$0xff]  ;;  %v2031_v63 = vrot.slane %v7546_v60, 1  ;;  %v6226_v28 = vcombine.low %v7543_v37, %v7546_v60  ;;  %v2017_v2 = vrot.slane %v7543_v37, 5 }
 0x84b   :  { %v2064_v1 = vld [vmem:[#allocation2 + $0x3c8] sm:$0xff]  ;;  %v2063_v46 = vld [vmem:[#allocation2 + $0x3c0] sm:$0xff]  ;;  %v2066_v4 = vld [vmem:[#allocation2 + $0x3d8] sm:$0xff] }
 0x84c   :  { %v2065_v34 = vld [vmem:[#allocation2 + $0x3d0] sm:$0xff]  ;;  %v2068_v6 = vld [vmem:[#allocation2 + $0x3e8] sm:$0xff]  ;;  %v2067_v41 = vld [vmem:[#allocation2 + $0x3e0] sm:$0xff] }
 0x84d   :  { %2170 = vmatpush1.bf16.msra.mxu1 %v2043_v62  ;;  %v2070_v54 = vld [vmem:[#allocation2 + $0x3f8] sm:$0xff]  ;;  %v2069_v62 = vld [vmem:[#allocation2 + $0x3f0] sm:$0xff]  ;;  %v2071_v49 = vld [vmem:[#allocation2 + $0x400] sm:$0xff] }
 0x84e   :  { %2171 = vmatprep.subr.bf16.mxu1 %v2046_v32  ;;  %v2072_v32 = vld [vmem:[#allocation2 + $0x408] sm:$0xff]  ;;  %v2079_v21 = vld [vmem:[#allocation2 + $0x440] sm:$0xff]  ;;  %v2086_v14 = vld [vmem:[#allocation2 + $0x478] sm:$0xff] }
 0x84f   :  { %v2083_v15 = vld [vmem:[#allocation2 + $0x460] sm:$0xff]  ;;  %v2088_v55 = vld [vmem:[#allocation2 + $0x488] sm:$0xff]  ;;  %v2090_v39 = vld [vmem:[#allocation2 + $0x498] sm:$0xff] }
 0x850   :  { %v2087_v47 = vld [vmem:[#allocation2 + $0x480] sm:$0xff]  ;;  %v2089_v58 = vld [vmem:[#allocation2 + $0x490] sm:$0xff]  ;;  %v2094_v38 = vld [vmem:[#allocation2 + $0x4b8] sm:$0xff] }
 0x851   :  { %2172 = vmatpush1.bf16.msra.mxu1 %v2045_v26  ;;  %v7554_v26 = vcombine.low %v2030_v9, %v2032_v33  ;;  %v2091_v53 = vld [vmem:[#allocation2 + $0x4a0] sm:$0xff]  ;;  %v2096_v24 = vld [vmem:[#allocation2 + $0x4c8] sm:$0xff]  ;;  %v2098_v18 = vld [vmem:[#allocation2 + $0x4d8] sm:$0xff] }
 0x852   :  { %2173 = vmatprep.subr.bf16.mxu1 %v2048_v61  ;;  %v2147_v61 = vpack.c.bf16 %v6226_v28, %v6226_v28  ;;  %v2095_v25 = vld [vmem:[#allocation2 + $0x4c0] sm:$0xff]  ;;  %v2097_v31 = vld [vmem:[#allocation2 + $0x4d0] sm:$0xff]  ;;  %v2102_v23 = vld [vmem:[#allocation2 + $0x4f8] sm:$0xff] }
 0x853   :  { %v2099_v36 = vld [vmem:[#allocation2 + $0x4e0] sm:$0xff]  ;;  %v2104_v19 = vld [vmem:[#allocation2 + $0x508] sm:$0xff]  ;;  %v2110_v33 = vld [vmem:[#allocation2 + $0x538] sm:$0xff] }
 0x854   :  { %v2103_v37 = vld [vmem:[#allocation2 + $0x500] sm:$0xff] }
 0x855   :  { %2174 = vmatpush1.bf16.msra.mxu1 %v2047_v57  ;;  %v7556_v57 = vcombine.low %v2029_v20, %v2031_v63  ;;  %v2107_v9 = vld [vmem:[#allocation2 + $0x520] sm:$0xff]  ;;  %v2109_v20 = vld [vmem:[#allocation2 + $0x530] sm:$0xff]  ;;  %v2112_v63 = vld [vmem:[#allocation2 + $0x548] sm:$0xff] }
 0x856   :  { %2175 = vmatprep.subr.bf16.mxu1 %v2050_v30  ;;  %v2074_v30 = vld [vmem:[#allocation2 + $0x418] sm:$0xff]  ;;  %v2111_v28 = vld [vmem:[#allocation2 + $0x540] sm:$0xff] }
 0x859   :  { %2176 = vmatpush1.bf16.msra.mxu1 %v2049_v10  ;;  %v2073_v10 = vld [vmem:[#allocation2 + $0x410] sm:$0xff] }
 0x85a   :  { %2177 = vmatprep.subr.bf16.mxu1 %v2052_v59  ;;  %v2076_v59 = vld [vmem:[#allocation2 + $0x428] sm:$0xff] }
 0x85d   :  { %2178 = vmatpush1.bf16.msra.mxu1 %v2051_v29  ;;  %v2075_v29 = vld [vmem:[#allocation2 + $0x420] sm:$0xff] }
 0x85e   :  { %2179 = vmatprep.subr.bf16.mxu1 %v2054_v56  ;;  %v2078_v56 = vld [vmem:[#allocation2 + $0x438] sm:$0xff] }
 0x861   :  { %2180 = vmatpush1.bf16.msra.mxu1 %v2053_v43  ;;  %v2077_v43 = vld [vmem:[#allocation2 + $0x430] sm:$0xff] }
 0x862   :  { %2181 = vmatprep.subr.bf16.mxu1 %v2056_v22  ;;  %v2080_v22 = vld [vmem:[#allocation2 + $0x448] sm:$0xff] }
 0x865   :  { %2182 = vmatpush1.bf16.msra.mxu1 %v2055_v27  ;;  %v2082_v27 = vld [vmem:[#allocation2 + $0x458] sm:$0xff] }
 0x866   :  { %2183 = vmatprep.subr.bf16.mxu1 %v2058_v48  ;;  %v2081_v48 = vld [vmem:[#allocation2 + $0x450] sm:$0xff] }
 0x869   :  { %2184 = vmatpush1.bf16.msra.mxu1 %v2057_v50  ;;  %v2084_v50 = vld [vmem:[#allocation2 + $0x468] sm:$0xff] }
 0x86a   :  { %2185 = vmatprep.subr.bf16.mxu1 %v2060_v5  ;;  %v2085_v5 = vld [vmem:[#allocation2 + $0x470] sm:$0xff] }
 0x86d   :  { %2186 = vmatpush1.bf16.msra.mxu1 %v2059_v52  ;;  %v2092_v52 = vld [vmem:[#allocation2 + $0x4a8] sm:$0xff] }
 0x86e   :  { %2187 = vmatprep.subr.bf16.mxu1 %v2062_v40  ;;  %v2093_v40 = vld [vmem:[#allocation2 + $0x4b0] sm:$0xff] }
 0x871   :  { %2188 = vmatpush1.bf16.msra.mxu1 %v2061_v0  ;;  %v2005_v0 = vsel %vm131_vm0, %v1969_v44, 0.0 }
 0x872   :  { %2189 = vmatprep.subr.bf16.mxu1 %v2064_v1  ;;  %v2007_v1 = vsel %vm131_vm0, %v1971_v42, 0.0  ;;  %v2018_v13 = vrot.slane %v2005_v0, 5 }
 0x873   :  { %v2024_v3 = vrot.slane %v2007_v1, 5 }
 0x874   :  { %v2019_v51 = vsel %vm858_vm8, %v2017_v2, %v2018_v13 }
 0x875   :  { %2190 = vmatpush1.bf16.msra.mxu1 %v2063_v46  ;;  %v2023_v46 = vrot.slane %v7546_v60, 5  ;;  %v2106_v60 = vld [vmem:[#allocation2 + $0x518] sm:$0xff] }
 0x876   :  { %2191 = vmatprep.subr.bf16.mxu1 %v2066_v4  ;;  %v2100_v4 = vld [vmem:[#allocation2 + $0x4e8] sm:$0xff] }
 0x877   :  { %v2025_v45 = vsel %vm858_vm8, %v2023_v46, %v2024_v3 }
 0x878   :  { %v6228_v7 = vcombine.low %v2019_v51, %v2025_v45 }
 0x879   :  { %2192 = vmatpush1.bf16.msra.mxu1 %v2065_v34  ;;  %v2101_v34 = vld [vmem:[#allocation2 + $0x4f0] sm:$0xff] }
 0x87a   :  { %2193 = vmatprep.subr.bf16.mxu1 %v2068_v6  ;;  %v2149_v17 = vpack.c.bf16 %v6228_v7, %v6228_v7  ;;  %v2152_v6 = vpack.c.bf16 %v7554_v26, %v7554_v26  ;;  %v2116_v26 = vld [vmem:[#allocation2 + $0x568] sm:$0xff] }
 0x87d   :  { %2194 = vmatpush1.bf16.msra.mxu1 %v2067_v41  ;;  %v2105_v41 = vld [vmem:[#allocation2 + $0x510] sm:$0xff] }
 0x87e   :  { %2195 = vmatprep.subr.bf16.mxu1 %v2070_v54  ;;  %v2108_v54 = vld [vmem:[#allocation2 + $0x528] sm:$0xff] }
 0x881   :  { %2196 = vmatpush1.bf16.msra.mxu1 %v2069_v62  ;;  %v2114_v62 = vld [vmem:[#allocation2 + $0x558] sm:$0xff] }
 0x882   :  { %2206 = vmatprep.subr.bf16.mxu1 %v2072_v32  ;;  %v2113_v32 = vld [vmem:[#allocation2 + $0x550] sm:$0xff] }
 0x884   :  { %2198 = vmatmul.mubr.bf16.vlgmr.msra.gmra.mrb[12].mxu1 %v2147_v61  ;;  %v2115_v61 = vld [vmem:[#allocation2 + $0x560] sm:$0xff] }
 0x885   :  { %2207 = vmatpush1.bf16.msra.mxu1 %v2071_v49  ;;  %2238 = vmatprep.mubr.bf16.mxu1 %v2150_v35  ;;  %v2118_v35 = vld [vmem:[#allocation2 + $0x578] sm:$0xff]  ;;  %v2117_v49 = vld [vmem:[#allocation2 + $0x570] sm:$0xff] }
 0x886   :  { %2208 = vmatprep.subr.bf16.mxu1 %v2074_v30  ;;  %v2120_v30 = vld [vmem:[#allocation2 + $0x588] sm:$0xff] }
 0x889   :  { %2209 = vmatpush1.bf16.msra.mxu1 %v2073_v10  ;;  %v2119_v10 = vld [vmem:[#allocation2 + $0x580] sm:$0xff] }
 0x88a   :  { %2210 = vmatprep.subr.bf16.mxu1 %v2076_v59  ;;  %v2122_v59 = vld [vmem:[#allocation2 + $0x598] sm:$0xff] }
 0x88d   :  { %2211 = vmatpush1.bf16.msra.mxu1 %v2075_v29  ;;  %v2121_v29 = vld [vmem:[#allocation2 + $0x590] sm:$0xff] }
 0x88e   :  { %2212 = vmatprep.subr.bf16.mxu1 %v2078_v56  ;;  %v2124_v56 = vld [vmem:[#allocation2 + $0x5a8] sm:$0xff] }
 0x891   :  { %2213 = vmatpush1.bf16.msra.mxu1 %v2077_v43  ;;  %v2123_v43 = vld [vmem:[#allocation2 + $0x5a0] sm:$0xff] }
 0x892   :  { %2214 = vmatprep.subr.bf16.mxu1 %v2080_v22  ;;  %v2126_v22 = vld [vmem:[#allocation2 + $0x5b8] sm:$0xff] }
 0x895   :  { %2215 = vmatpush1.bf16.msra.mxu1 %v2079_v21  ;;  %v2125_v21 = vld [vmem:[#allocation2 + $0x5b0] sm:$0xff] }
 0x896   :  { %2216 = vmatprep.subr.bf16.mxu1 %v2082_v27  ;;  %v2128_v27 = vld [vmem:[#allocation2 + $0x5c8] sm:$0xff] }
 0x899   :  { %2217 = vmatpush1.bf16.msra.mxu1 %v2081_v48  ;;  %v2127_v48 = vld [vmem:[#allocation2 + $0x5c0] sm:$0xff] }
 0x89a   :  { %2218 = vmatprep.subr.bf16.mxu1 %v2084_v50  ;;  %v2130_v50 = vld [vmem:[#allocation2 + $0x5d8] sm:$0xff] }
 0x89d   :  { %2219 = vmatpush1.bf16.msra.mxu1 %v2083_v15  ;;  %v2129_v15 = vld [vmem:[#allocation2 + $0x5d0] sm:$0xff] }
 0x89e   :  { %2220 = vmatprep.subr.bf16.mxu1 %v2086_v14  ;;  %v2132_v14 = vld [vmem:[#allocation2 + $0x5e8] sm:$0xff] }
 0x8a1   :  { %2221 = vmatpush1.bf16.msra.mxu1 %v2085_v5  ;;  %v2131_v5 = vld [vmem:[#allocation2 + $0x5e0] sm:$0xff] }
 0x8a2   :  { %2222 = vmatprep.subr.bf16.mxu1 %v2088_v55  ;;  %v2134_v55 = vld [vmem:[#allocation2 + $0x5f8] sm:$0xff] }
 0x8a5   :  { %2223 = vmatpush1.bf16.msra.mxu1 %v2087_v47  ;;  %v2133_v47 = vld [vmem:[#allocation2 + $0x5f0] sm:$0xff] }
 0x8a6   :  { %2224 = vmatprep.subr.bf16.mxu1 %v2090_v39  ;;  %v2151_v39 = vpack.c.bf16 %v7556_v57, %v7556_v57 }
 0x8a9   :  { %2225 = vmatpush1.bf16.msra.mxu1 %v2089_v58  ;;  %v2153_v58 = vld [vmem:[#allocation8 + $0xa] sm:$0x3] }
 0x8aa   :  { %2226 = vmatprep.subr.bf16.mxu1 %v2092_v52  ;;  %v2158_v52 = vrot.slane %v2153_v58, %v6873_v12 }
 0x8ad   :  { %2227 = vmatpush1.bf16.msra.mxu1 %v2091_v53  ;;  %v2162_v53 = vrot.slane %v2153_v58, %v6876_v16 }
 0x8ae   :  { %2228 = vmatprep.subr.bf16.mxu1 %v2094_v38 }
 0x8b1   :  { %2229 = vmatpush1.bf16.msra.mxu1 %v2093_v40 }
 0x8b2   :  { %2230 = vmatprep.subr.bf16.mxu1 %v2096_v24 }
 0x8b5   :  { %2231 = vmatpush1.bf16.msra.mxu1 %v2095_v25 }
 0x8b6   :  { %2232 = vmatprep.subr.bf16.mxu1 %v2098_v18 }
 0x8b9   :  { %2233 = vmatpush1.bf16.msra.mxu1 %v2097_v31 }
 0x8ba   :  { %2234 = vmatprep.subr.bf16.mxu1 %v2100_v4 }
 0x8bd   :  { %2235 = vmatpush1.bf16.msra.mxu1 %v2099_v36 }
 0x8be   :  { %2236 = vmatprep.subr.bf16.mxu1 %v2102_v23 }
 0x8c1   :  { %2237 = vmatpush1.bf16.msra.mxu1 %v2101_v34 }
 0x8c2   :  { %2247 = vmatprep.subr.bf16.mxu1 %v2104_v19 }
 0x8c4   :  { %2239 = vmatmul.mubr.bf16.vlgmr.msra.gmra.mrb[12].mxu1 %v2149_v17 }
 0x8c5   :  { %2248 = vmatpush1.bf16.msra.mxu1 %v2103_v37  ;;  %2279 = vmatprep.mubr.bf16.mxu1 %v2152_v6 }
 0x8c6   :  { %2249 = vmatprep.subr.bf16.mxu1 %v2106_v60 }
 0x8c9   :  { %2250 = vmatpush1.bf16.msra.mxu1 %v2105_v41 }
 0x8ca   :  { %2251 = vmatprep.subr.bf16.mxu1 %v2108_v54 }
 0x8cd   :  { %2252 = vmatpush1.bf16.msra.mxu1 %v2107_v9 }
 0x8ce   :  { %2253 = vmatprep.subr.bf16.mxu1 %v2110_v33 }
 0x8d1   :  { %2254 = vmatpush1.bf16.msra.mxu1 %v2109_v20 }
 0x8d2   :  { %2255 = vmatprep.subr.bf16.mxu1 %v2112_v63 }
 0x8d5   :  { %2256 = vmatpush1.bf16.msra.mxu1 %v2111_v28 }
 0x8d6   :  { %2257 = vmatprep.subr.bf16.mxu1 %v2114_v62 }
 0x8d9   :  { %2258 = vmatpush1.bf16.msra.mxu1 %v2113_v32 }
 0x8da   :  { %2259 = vmatprep.subr.bf16.mxu1 %v2116_v26 }
 0x8dd   :  { %2260 = vmatpush1.bf16.msra.mxu1 %v2115_v61 }
 0x8de   :  { %2261 = vmatprep.subr.bf16.mxu1 %v2118_v35 }
 0x8e1   :  { %2262 = vmatpush1.bf16.msra.mxu1 %v2117_v49 }
 0x8e2   :  { %2263 = vmatprep.subr.bf16.mxu1 %v2120_v30 }
 0x8e5   :  { %2264 = vmatpush1.bf16.msra.mxu1 %v2119_v10 }
 0x8e6   :  { %2265 = vmatprep.subr.bf16.mxu1 %v2122_v59 }
 0x8e9   :  { %2266 = vmatpush1.bf16.msra.mxu1 %v2121_v29 }
 0x8ea   :  { %2267 = vmatprep.subr.bf16.mxu1 %v2124_v56 }
 0x8ed   :  { %2268 = vmatpush1.bf16.msra.mxu1 %v2123_v43 }
 0x8ee   :  { %2269 = vmatprep.subr.bf16.mxu1 %v2126_v22 }
 0x8f1   :  { %2270 = vmatpush1.bf16.msra.mxu1 %v2125_v21 }
 0x8f2   :  { %2271 = vmatprep.subr.bf16.mxu1 %v2128_v27 }
 0x8f5   :  { %2272 = vmatpush1.bf16.msra.mxu1 %v2127_v48 }
 0x8f6   :  { %2273 = vmatprep.subr.bf16.mxu1 %v2130_v50 }
 0x8f9   :  { %2274 = vmatpush1.bf16.msra.mxu1 %v2129_v15 }
 0x8fa   :  { %2275 = vmatprep.subr.bf16.mxu1 %v2132_v14 }
 0x8fd   :  { %2276 = vmatpush1.bf16.msra.mxu1 %v2131_v5 }
 0x8fe   :  { %2277 = vmatprep.subr.bf16.mxu1 %v2134_v55 }
 0x901   :  { %2278 = vmatpush1.bf16.msra.mxu1 %v2133_v47 }
 0x904   :  { %2280 = vmatmul.mubr.bf16.vlgmr.msra.gmra.mrb[12].mxu1 %v2151_v39 }
 0x9d7   :  { %v2281_v38 = vpop.f32.mrb[12].mxu1 }
 0x9d8   :  { %v6299_v40 = vadd.f32 %v2281_v38, %v2158_v52  ;;  %v2283_v44 = vpop.f32.mrb[13].mxu1 }
 0x9d9   :  { %v6300_v42 = vadd.f32 %v2283_v44, %v2162_v53  ;;  %v2285_v24 = vpop.f32.mrb[14].mxu1 }
 0x9da   :  { %v2288_v25 = vmax.f32 %v6299_v40, 0.0  ;;  %v2286_v0 = vpop.f32.mrb[15].mxu1 }
 0x9db   :  { %v2289_v1 = vmax.f32 %v6300_v42, 0.0 }
 0x9dd   :  { %v7574_v18 = vcombine.low %v2288_v25, %v2289_v1  ;;  %v7576_v2 = vcombine.high %v2288_v25, %v2289_v1 }
 0x9de   :  { %6640 = dma.done.wait [#allocation4], 12288 }
 0x9df   :  { %6641 = vsyncadd [#allocation4], 4294955008  ;;  %v6234_v57 = vcombine.low %v2289_v1, %v2289_v1  ;;  %v6235_v46 = vcombine.high %v2289_v1, %v2289_v1  ;;  %2312 = sst [smem:[#allocation31]] %s6674_s27  ;;  %s2296_s19 = scalar_lea.hbm %s8257_s2, 76800  ;;  %v2333_v48 = vrot.slane %v7574_v18, 7  ;;  %v2335_v50 = vrot.slane %v7576_v2, 7 }
 0x9e0   :  { %2314 = sst [smem:[#allocation31 + $0x1]] %s6674_s27  ;;  %s6690_s20 = smov [#allocation30]  }
 0x9e1   :  { %v2334_v13 = vrot.slane %v6234_v57, 7  ;;  %v2336_v3 = vrot.slane %v6235_v46, 7  ;;  %2316 = sst [smem:[#allocation31 + $0x2]] %s6675_s28  ;;  %v2341_v5 = vsel %vm131_vm0, 0.0, %v2333_v48  ;;  %v2343_v55 = vsel %vm131_vm0, 0.0, %v2335_v50 }
 0x9e2   :  { %2318 = sst [smem:[#allocation31 + $0x3]] %s6676_s29  ;;  %v7612_v39 = vsel %vm868_vm10, %v2341_v5, 0.0  ;;  %v7615_v58 = vsel %vm868_vm10, %v2343_v55, 0.0 }
 0x9e3   :  { %v2342_v31 = vsel %vm131_vm0, 0.0, %v2334_v13  ;;  %v2344_v4 = vsel %vm131_vm0, 0.0, %v2336_v3  ;;  %2320 = sst [smem:[#allocation31 + $0x4]] %s6671_s11  ;;  %v2357_v44 = vrot.slane %v7612_v39, 2  ;;  %v2359_v42 = vrot.slane %v7615_v58, 2 }
 0x9e4   :  { %v7586_v51 = vsel %vm868_vm10, %v2342_v31, 0.0  ;;  %v7589_v45 = vsel %vm868_vm10, %v2344_v4, 0.0  ;;  %2322 = sst [smem:[#allocation31 + $0x5]] %s6675_s28  ;;  %v6236_v24 = vcombine.low %v7612_v39, %v7615_v58 }
 0x9e5   :  { %2324 = sst [smem:[#allocation31 + $0x6]] %s6671_s11  ;;  %v6237_v36 = vcombine.low %v7586_v51, %v7589_v45  ;;  %v2354_v7 = vrot.slane %v7586_v51, 1  ;;  %v2356_v34 = vrot.slane %v7589_v45, 1  ;;  %v2358_v38 = vrot.slane %v7586_v51, 2 }
 0x9e6   :  { %2326 = sst [smem:[#allocation31 + $0x7]] %s6676_s29  ;;  %v2360_v40 = vrot.slane %v7589_v45, 2  ;;  %v2475_v18 = vpack.c.bf16 %v6236_v24, %v6236_v24  ;;  %v7625_v2 = vcombine.low %v2357_v44, %v2359_v42 }
 0x9e7   :  { %2328 = sst [smem:[#allocation31 + $0x8]] %s6678_s10  ;;  %v2476_v23 = vpack.c.bf16 %v6237_v36, %v6237_v36  ;;  %v7605_v19 = vcombine.low %v2354_v7, %v2356_v34 }
 0x9e8   :  { %2330 = dma.general %s2296_s19, 12288, %s6826_s18, %s6682_s22, %s6690_s20, [#allocation31], %s6787_s9, 0   ;;  %v7623_v1 = vcombine.low %v2358_v38, %v2360_v40 }
 0x9e9   :  { %2525 = vmatprep.mubr.bf16.mxu0 %v2476_v23  ;;  %v2368_v17 = vld [vmem:[#allocation2 + $0x8] sm:$0xff]  ;;  %v2367_v6 = vld [vmem:[#allocation2] sm:$0xff]  ;;  %v2370_v37 = vld [vmem:[#allocation2 + $0x18] sm:$0xff]  ;;  %v2478_v57 = vpack.c.bf16 %v7605_v19, %v7605_v19 }
 0x9ea   :  { %2493 = vmatprep.subr.bf16.mxu0 %v2368_v17  ;;  %v2369_v60 = vld [vmem:[#allocation2 + $0x10] sm:$0xff]  ;;  %v2372_v41 = vld [vmem:[#allocation2 + $0x28] sm:$0xff]  ;;  %v2371_v54 = vld [vmem:[#allocation2 + $0x20] sm:$0xff] }
 0x9eb   :  { %2494 = vmatpush1.bf16.msra.mxu0 %v2367_v6  ;;  %v2374_v9 = vld [vmem:[#allocation2 + $0x38] sm:$0xff]  ;;  %v2373_v33 = vld [vmem:[#allocation2 + $0x30] sm:$0xff]  ;;  %v2376_v20 = vld [vmem:[#allocation2 + $0x48] sm:$0xff] }
 0x9ec   :  { %2495 = vmatprep.subr.bf16.mxu0 %v2370_v37  ;;  %v2375_v63 = vld [vmem:[#allocation2 + $0x40] sm:$0xff]  ;;  %v2378_v28 = vld [vmem:[#allocation2 + $0x58] sm:$0xff]  ;;  %v2377_v62 = vld [vmem:[#allocation2 + $0x50] sm:$0xff] }
 0x9ed   :  { %v2380_v32 = vld [vmem:[#allocation2 + $0x68] sm:$0xff]  ;;  %v2379_v26 = vld [vmem:[#allocation2 + $0x60] sm:$0xff]  ;;  %v2382_v61 = vld [vmem:[#allocation2 + $0x78] sm:$0xff] }
 0x9ee   :  { %v2381_v35 = vld [vmem:[#allocation2 + $0x70] sm:$0xff]  ;;  %v2384_v49 = vld [vmem:[#allocation2 + $0x88] sm:$0xff]  ;;  %v2383_v30 = vld [vmem:[#allocation2 + $0x80] sm:$0xff] }
 0x9ef   :  { %2496 = vmatpush1.bf16.msra.mxu0 %v2369_v60  ;;  %v2386_v10 = vld [vmem:[#allocation2 + $0x98] sm:$0xff]  ;;  %v2385_v59 = vld [vmem:[#allocation2 + $0x90] sm:$0xff]  ;;  %v2388_v29 = vld [vmem:[#allocation2 + $0xa8] sm:$0xff] }
 0x9f0   :  { %2497 = vmatprep.subr.bf16.mxu0 %v2372_v41  ;;  %v2387_v56 = vld [vmem:[#allocation2 + $0xa0] sm:$0xff]  ;;  %v2390_v43 = vld [vmem:[#allocation2 + $0xb8] sm:$0xff]  ;;  %v2389_v22 = vld [vmem:[#allocation2 + $0xb0] sm:$0xff] }
 0x9f1   :  { %v2392_v21 = vld [vmem:[#allocation2 + $0xc8] sm:$0xff]  ;;  %v2391_v27 = vld [vmem:[#allocation2 + $0xc0] sm:$0xff]  ;;  %v2394_v15 = vld [vmem:[#allocation2 + $0xd8] sm:$0xff] }
 0x9f2   :  { %v2393_v14 = vld [vmem:[#allocation2 + $0xd0] sm:$0xff]  ;;  %v2396_v47 = vld [vmem:[#allocation2 + $0xe8] sm:$0xff]  ;;  %v2395_v52 = vld [vmem:[#allocation2 + $0xe0] sm:$0xff] }
 0x9f3   :  { %2498 = vmatpush1.bf16.msra.mxu0 %v2371_v54  ;;  %v2398_v53 = vld [vmem:[#allocation2 + $0xf8] sm:$0xff]  ;;  %v2397_v25 = vld [vmem:[#allocation2 + $0xf0] sm:$0xff]  ;;  %v2400_v0 = vld [vmem:[#allocation2 + $0x108] sm:$0xff] }
 0x9f4   :  { %2499 = vmatprep.subr.bf16.mxu0 %v2374_v9  ;;  %v2399_v46 = vld [vmem:[#allocation2 + $0x100] sm:$0xff]  ;;  %v2402_v13 = vld [vmem:[#allocation2 + $0x118] sm:$0xff]  ;;  %v2401_v3 = vld [vmem:[#allocation2 + $0x110] sm:$0xff] }
 0x9f5   :  { %v2404_v31 = vld [vmem:[#allocation2 + $0x128] sm:$0xff]  ;;  %v2403_v4 = vld [vmem:[#allocation2 + $0x120] sm:$0xff]  ;;  %v2406_v51 = vld [vmem:[#allocation2 + $0x138] sm:$0xff] }
 0x9f6   :  { %v2405_v45 = vld [vmem:[#allocation2 + $0x130] sm:$0xff]  ;;  %v2408_v36 = vld [vmem:[#allocation2 + $0x148] sm:$0xff]  ;;  %v2407_v23 = vld [vmem:[#allocation2 + $0x140] sm:$0xff] }
 0x9f7   :  { %2500 = vmatpush1.bf16.msra.mxu0 %v2373_v33  ;;  %v2410_v7 = vld [vmem:[#allocation2 + $0x158] sm:$0xff]  ;;  %v2409_v34 = vld [vmem:[#allocation2 + $0x150] sm:$0xff]  ;;  %v2412_v19 = vld [vmem:[#allocation2 + $0x168] sm:$0xff] }
 0x9f8   :  { %2501 = vmatprep.subr.bf16.mxu0 %v2376_v20  ;;  %v2411_v17 = vld [vmem:[#allocation2 + $0x160] sm:$0xff]  ;;  %v2414_v6 = vld [vmem:[#allocation2 + $0x178] sm:$0xff]  ;;  %v2413_v37 = vld [vmem:[#allocation2 + $0x170] sm:$0xff] }
 0x9f9   :  { %v2416_v60 = vld [vmem:[#allocation2 + $0x188] sm:$0xff]  ;;  %v2415_v41 = vld [vmem:[#allocation2 + $0x180] sm:$0xff]  ;;  %v2418_v54 = vld [vmem:[#allocation2 + $0x198] sm:$0xff] }
 0x9fa   :  { %v2417_v9 = vld [vmem:[#allocation2 + $0x190] sm:$0xff]  ;;  %v2420_v33 = vld [vmem:[#allocation2 + $0x1a8] sm:$0xff]  ;;  %v2419_v20 = vld [vmem:[#allocation2 + $0x1a0] sm:$0xff] }
 0x9fb   :  { %2502 = vmatpush1.bf16.msra.mxu0 %v2375_v63  ;;  %v2422_v63 = vld [vmem:[#allocation2 + $0x1b8] sm:$0xff]  ;;  %v2433_v50 = vld [vmem:[#allocation2 + $0x210] sm:$0xff]  ;;  %v2443_v38 = vld [vmem:[#allocation2 + $0x260] sm:$0xff] }
 0x9fc   :  { %2503 = vmatprep.subr.bf16.mxu0 %v2378_v28  ;;  %v2421_v28 = vld [vmem:[#allocation2 + $0x1b0] sm:$0xff]  ;;  %v2434_v48 = vld [vmem:[#allocation2 + $0x218] sm:$0xff]  ;;  %v2448_v42 = vld [vmem:[#allocation2 + $0x288] sm:$0xff] }
 0x9fd   :  { %v2438_v5 = vld [vmem:[#allocation2 + $0x238] sm:$0xff]  ;;  %v2437_v55 = vld [vmem:[#allocation2 + $0x230] sm:$0xff]  ;;  %v2447_v24 = vld [vmem:[#allocation2 + $0x280] sm:$0xff] }
 0x9fe   :  { %v2446_v40 = vld [vmem:[#allocation2 + $0x278] sm:$0xff]  ;;  %v2445_v44 = vld [vmem:[#allocation2 + $0x270] sm:$0xff] }
 0x9ff   :  { %2504 = vmatpush1.bf16.msra.mxu0 %v2377_v62  ;;  %v2424_v62 = vld [vmem:[#allocation2 + $0x1c8] sm:$0xff] }
 0xa00   :  { %2505 = vmatprep.subr.bf16.mxu0 %v2380_v32  ;;  %v2423_v32 = vld [vmem:[#allocation2 + $0x1c0] sm:$0xff] }
 0xa03   :  { %2506 = vmatpush1.bf16.msra.mxu0 %v2379_v26  ;;  %v2426_v26 = vld [vmem:[#allocation2 + $0x1d8] sm:$0xff] }
 0xa04   :  { %2507 = vmatprep.subr.bf16.mxu0 %v2382_v61  ;;  %v2425_v61 = vld [vmem:[#allocation2 + $0x1d0] sm:$0xff] }
 0xa07   :  { %2508 = vmatpush1.bf16.msra.mxu0 %v2381_v35  ;;  %v2428_v35 = vld [vmem:[#allocation2 + $0x1e8] sm:$0xff] }
 0xa08   :  { %2509 = vmatprep.subr.bf16.mxu0 %v2384_v49  ;;  %v2353_v49 = vrot.slane %v7612_v39, 1  ;;  %v2439_v39 = vld [vmem:[#allocation2 + $0x240] sm:$0xff] }
 0xa0b   :  { %2510 = vmatpush1.bf16.msra.mxu0 %v2383_v30  ;;  %v2355_v30 = vrot.slane %v7615_v58, 1  ;;  %v2442_v58 = vld [vmem:[#allocation2 + $0x258] sm:$0xff] }
 0xa0c   :  { %2511 = vmatprep.subr.bf16.mxu0 %v2386_v10  ;;  %v2427_v10 = vld [vmem:[#allocation2 + $0x1e0] sm:$0xff] }
 0xa0f   :  { %2512 = vmatpush1.bf16.msra.mxu0 %v2385_v59  ;;  %v2430_v59 = vld [vmem:[#allocation2 + $0x1f8] sm:$0xff] }
 0xa10   :  { %2513 = vmatprep.subr.bf16.mxu0 %v2388_v29  ;;  %v6238_v29 = vcombine.low %v2353_v49, %v2355_v30 }
 0xa13   :  { %2514 = vmatpush1.bf16.msra.mxu0 %v2387_v56  ;;  %v2429_v56 = vld [vmem:[#allocation2 + $0x1f0] sm:$0xff] }
 0xa14   :  { %2515 = vmatprep.subr.bf16.mxu0 %v2390_v43  ;;  %v2432_v43 = vld [vmem:[#allocation2 + $0x208] sm:$0xff] }
 0xa17   :  { %2516 = vmatpush1.bf16.msra.mxu0 %v2389_v22  ;;  %v2477_v22 = vpack.c.bf16 %v6238_v29, %v6238_v29 }
 0xa18   :  { %2517 = vmatprep.subr.bf16.mxu0 %v2392_v21  ;;  %v2480_v21 = vpack.c.bf16 %v7623_v1, %v7623_v1  ;;  %v2452_v1 = vld [vmem:[#allocation2 + $0x2a8] sm:$0xff] }
 0xa1b   :  { %2518 = vmatpush1.bf16.msra.mxu0 %v2391_v27  ;;  %v2431_v27 = vld [vmem:[#allocation2 + $0x200] sm:$0xff] }
 0xa1c   :  { %2519 = vmatprep.subr.bf16.mxu0 %v2394_v15  ;;  %v2436_v15 = vld [vmem:[#allocation2 + $0x228] sm:$0xff] }
 0xa1f   :  { %2520 = vmatpush1.bf16.msra.mxu0 %v2393_v14  ;;  %v2435_v14 = vld [vmem:[#allocation2 + $0x220] sm:$0xff] }
 0xa20   :  { %2521 = vmatprep.subr.bf16.mxu0 %v2396_v47  ;;  %v2440_v47 = vld [vmem:[#allocation2 + $0x248] sm:$0xff] }
 0xa23   :  { %2522 = vmatpush1.bf16.msra.mxu0 %v2395_v52  ;;  %v2441_v52 = vld [vmem:[#allocation2 + $0x250] sm:$0xff] }
 0xa24   :  { %2523 = vmatprep.subr.bf16.mxu0 %v2398_v53  ;;  %v2444_v53 = vld [vmem:[#allocation2 + $0x268] sm:$0xff] }
 0xa27   :  { %2524 = vmatpush1.bf16.msra.mxu0 %v2397_v25  ;;  %v2450_v25 = vld [vmem:[#allocation2 + $0x298] sm:$0xff] }
 0xa28   :  { %2534 = vmatprep.subr.bf16.mxu0 %v2400_v0  ;;  %v2449_v0 = vld [vmem:[#allocation2 + $0x290] sm:$0xff] }
 0xa2a   :  { %2526 = vmatmul.mubr.bf16.vlgmr.msra.gmra.mrb[16].mxu0 %v2475_v18  ;;  %v2451_v18 = vld [vmem:[#allocation2 + $0x2a0] sm:$0xff] }
 0xa2b   :  { %2535 = vmatpush1.bf16.msra.mxu0 %v2399_v46  ;;  %2566 = vmatprep.mubr.bf16.mxu0 %v2478_v57  ;;  %v2454_v57 = vld [vmem:[#allocation2 + $0x2b8] sm:$0xff]  ;;  %v2453_v46 = vld [vmem:[#allocation2 + $0x2b0] sm:$0xff] }
 0xa2c   :  { %2536 = vmatprep.subr.bf16.mxu0 %v2402_v13  ;;  %v2456_v13 = vld [vmem:[#allocation2 + $0x2c8] sm:$0xff] }
 0xa2f   :  { %2537 = vmatpush1.bf16.msra.mxu0 %v2401_v3  ;;  %v2455_v3 = vld [vmem:[#allocation2 + $0x2c0] sm:$0xff] }
 0xa30   :  { %2538 = vmatprep.subr.bf16.mxu0 %v2404_v31  ;;  %v2458_v31 = vld [vmem:[#allocation2 + $0x2d8] sm:$0xff] }
 0xa33   :  { %2539 = vmatpush1.bf16.msra.mxu0 %v2403_v4  ;;  %v2457_v4 = vld [vmem:[#allocation2 + $0x2d0] sm:$0xff] }
 0xa34   :  { %2540 = vmatprep.subr.bf16.mxu0 %v2406_v51  ;;  %v2460_v51 = vld [vmem:[#allocation2 + $0x2e8] sm:$0xff] }
 0xa37   :  { %2541 = vmatpush1.bf16.msra.mxu0 %v2405_v45  ;;  %v2459_v45 = vld [vmem:[#allocation2 + $0x2e0] sm:$0xff] }
 0xa38   :  { %2542 = vmatprep.subr.bf16.mxu0 %v2408_v36  ;;  %v2462_v36 = vld [vmem:[#allocation2 + $0x2f8] sm:$0xff] }
 0xa3b   :  { %2543 = vmatpush1.bf16.msra.mxu0 %v2407_v23  ;;  %v2461_v23 = vld [vmem:[#allocation2 + $0x2f0] sm:$0xff] }
 0xa3c   :  { %2544 = vmatprep.subr.bf16.mxu0 %v2410_v7  ;;  %v2479_v7 = vpack.c.bf16 %v7625_v2, %v7625_v2 }
 0xa3f   :  { %2545 = vmatpush1.bf16.msra.mxu0 %v2409_v34  ;;  %v2481_v34 = vld [vmem:[#allocation8 + $0xc] sm:$0x3] }
 0xa40   :  { %2546 = vmatprep.subr.bf16.mxu0 %v2412_v19  ;;  %v2486_v19 = vrot.slane %v2481_v34, %v6873_v12 }
 0xa43   :  { %2547 = vmatpush1.bf16.msra.mxu0 %v2411_v17  ;;  %v2490_v17 = vrot.slane %v2481_v34, %v6876_v16 }
 0xa44   :  { %2548 = vmatprep.subr.bf16.mxu0 %v2414_v6 }
 0xa47   :  { %2549 = vmatpush1.bf16.msra.mxu0 %v2413_v37 }
 0xa48   :  { %2550 = vmatprep.subr.bf16.mxu0 %v2416_v60 }
 0xa4b   :  { %2551 = vmatpush1.bf16.msra.mxu0 %v2415_v41 }
 0xa4c   :  { %2552 = vmatprep.subr.bf16.mxu0 %v2418_v54 }
 0xa4f   :  { %2553 = vmatpush1.bf16.msra.mxu0 %v2417_v9 }
 0xa50   :  { %2554 = vmatprep.subr.bf16.mxu0 %v2420_v33 }
 0xa53   :  { %2555 = vmatpush1.bf16.msra.mxu0 %v2419_v20 }
 0xa54   :  { %2556 = vmatprep.subr.bf16.mxu0 %v2422_v63 }
 0xa57   :  { %2557 = vmatpush1.bf16.msra.mxu0 %v2421_v28 }
 0xa58   :  { %2558 = vmatprep.subr.bf16.mxu0 %v2424_v62 }
 0xa5b   :  { %2559 = vmatpush1.bf16.msra.mxu0 %v2423_v32 }
 0xa5c   :  { %2560 = vmatprep.subr.bf16.mxu0 %v2426_v26 }
 0xa5f   :  { %2561 = vmatpush1.bf16.msra.mxu0 %v2425_v61 }
 0xa60   :  { %2562 = vmatprep.subr.bf16.mxu0 %v2428_v35 }
 0xa63   :  { %2563 = vmatpush1.bf16.msra.mxu0 %v2427_v10 }
 0xa64   :  { %2564 = vmatprep.subr.bf16.mxu0 %v2430_v59 }
 0xa67   :  { %2565 = vmatpush1.bf16.msra.mxu0 %v2429_v56 }
 0xa68   :  { %2575 = vmatprep.subr.bf16.mxu0 %v2432_v43 }
 0xa6a   :  { %2567 = vmatmul.mubr.bf16.vlgmr.msra.gmra.mrb[16].mxu0 %v2477_v22 }
 0xa6b   :  { %2576 = vmatpush1.bf16.msra.mxu0 %v2431_v27  ;;  %2607 = vmatprep.mubr.bf16.mxu0 %v2480_v21 }
 0xa6c   :  { %2577 = vmatprep.subr.bf16.mxu0 %v2434_v48 }
 0xa6f   :  { %2578 = vmatpush1.bf16.msra.mxu0 %v2433_v50 }
 0xa70   :  { %2579 = vmatprep.subr.bf16.mxu0 %v2436_v15 }
 0xa73   :  { %2580 = vmatpush1.bf16.msra.mxu0 %v2435_v14 }
 0xa74   :  { %2581 = vmatprep.subr.bf16.mxu0 %v2438_v5 }
 0xa77   :  { %2582 = vmatpush1.bf16.msra.mxu0 %v2437_v55 }
 0xa78   :  { %2583 = vmatprep.subr.bf16.mxu0 %v2440_v47 }
 0xa7b   :  { %2584 = vmatpush1.bf16.msra.mxu0 %v2439_v39 }
 0xa7c   :  { %2585 = vmatprep.subr.bf16.mxu0 %v2442_v58 }
 0xa7f   :  { %2586 = vmatpush1.bf16.msra.mxu0 %v2441_v52 }
 0xa80   :  { %2587 = vmatprep.subr.bf16.mxu0 %v2444_v53 }
 0xa83   :  { %2588 = vmatpush1.bf16.msra.mxu0 %v2443_v38 }
 0xa84   :  { %2589 = vmatprep.subr.bf16.mxu0 %v2446_v40 }
 0xa87   :  { %2590 = vmatpush1.bf16.msra.mxu0 %v2445_v44 }
 0xa88   :  { %2591 = vmatprep.subr.bf16.mxu0 %v2448_v42 }
 0xa8b   :  { %2592 = vmatpush1.bf16.msra.mxu0 %v2447_v24 }
 0xa8c   :  { %2593 = vmatprep.subr.bf16.mxu0 %v2450_v25 }
 0xa8f   :  { %2594 = vmatpush1.bf16.msra.mxu0 %v2449_v0 }
 0xa90   :  { %2595 = vmatprep.subr.bf16.mxu0 %v2452_v1 }
 0xa93   :  { %2596 = vmatpush1.bf16.msra.mxu0 %v2451_v18 }
 0xa94   :  { %2597 = vmatprep.subr.bf16.mxu0 %v2454_v57 }
 0xa97   :  { %2598 = vmatpush1.bf16.msra.mxu0 %v2453_v46 }
 0xa98   :  { %2599 = vmatprep.subr.bf16.mxu0 %v2456_v13 }
 0xa9b   :  { %2600 = vmatpush1.bf16.msra.mxu0 %v2455_v3 }
 0xa9c   :  { %2601 = vmatprep.subr.bf16.mxu0 %v2458_v31 }
 0xa9f   :  { %2602 = vmatpush1.bf16.msra.mxu0 %v2457_v4 }
 0xaa0   :  { %2603 = vmatprep.subr.bf16.mxu0 %v2460_v51 }
 0xaa3   :  { %2604 = vmatpush1.bf16.msra.mxu0 %v2459_v45 }
 0xaa4   :  { %2605 = vmatprep.subr.bf16.mxu0 %v2462_v36 }
 0xaa7   :  { %2606 = vmatpush1.bf16.msra.mxu0 %v2461_v23 }
 0xaaa   :  { %2608 = vmatmul.mubr.bf16.vlgmr.msra.gmra.mrb[16].mxu0 %v2479_v7 }
 0xb7d   :  { %v2609_v6 = vpop.f32.mrb[16].mxu0 }
 0xb7e   :  { %v6301_v37 = vadd.f32 %v2609_v6, %v2486_v19  ;;  %v2611_v60 = vpop.f32.mrb[17].mxu0 }
 0xb7f   :  { %v6302_v41 = vadd.f32 %v2611_v60, %v2490_v17  ;;  %v2613_v54 = vpop.f32.mrb[18].mxu0 }
 0xb80   :  { %v2616_v9 = vmax.f32 %v6301_v37, 0.0  ;;  %v2614_v33 = vpop.f32.mrb[19].mxu0 }
 0xb81   :  { %v2617_v20 = vmax.f32 %v6302_v41, 0.0 }
 0xb83   :  { %v7637_v63 = vcombine.low %v2616_v9, %v2617_v20  ;;  %v7639_v28 = vcombine.high %v2616_v9, %v2617_v20 }
 0xb84   :  { %6642 = dma.done.wait [#allocation4 + $0x1], 12288 }
 0xb85   :  { %6643 = vsyncadd [#allocation4 + $0x1], 4294955008  ;;  %v6244_v2 = vcombine.low %v2617_v20, %v2617_v20  ;;  %v6245_v62 = vcombine.high %v2617_v20, %v2617_v20  ;;  %2640 = sst [smem:[#allocation33]] %s6674_s27  ;;  %s2624_s24 = scalar_lea.hbm %s8257_s2, 89088  ;;  %v2661_v3 = vrot.slane %v7637_v63, 7  ;;  %v2663_v31 = vrot.slane %v7639_v28, 7 }
 0xb86   :  { %2642 = sst [smem:[#allocation33 + $0x1]] %s6674_s27  ;;  %s6691_s0 = smov [#allocation32]  }
 0xb87   :  { %v2662_v32 = vrot.slane %v6244_v2, 7  ;;  %v2664_v26 = vrot.slane %v6245_v62, 7  ;;  %2644 = sst [smem:[#allocation33 + $0x2]] %s6675_s28  ;;  %v2669_v45 = vsel %vm131_vm0, 0.0, %v2661_v3  ;;  %v2671_v36 = vsel %vm131_vm0, 0.0, %v2663_v31 }
 0xb88   :  { %2646 = sst [smem:[#allocation33 + $0x3]] %s6676_s29  ;;  %v7675_v7 = vsel %vm868_vm10, %v2669_v45, 0.0  ;;  %v7678_v34 = vsel %vm868_vm10, %v2671_v36, 0.0 }
 0xb89   :  { %v2670_v61 = vsel %vm131_vm0, 0.0, %v2662_v32  ;;  %v2672_v35 = vsel %vm131_vm0, 0.0, %v2664_v26  ;;  %2648 = sst [smem:[#allocation33 + $0x4]] %s6671_s11  ;;  %v2685_v60 = vrot.slane %v7675_v7, 2  ;;  %v2687_v41 = vrot.slane %v7678_v34, 2 }
 0xb8a   :  { %v7649_v49 = vsel %vm868_vm10, %v2670_v61, 0.0  ;;  %v7652_v30 = vsel %vm868_vm10, %v2672_v35, 0.0  ;;  %2650 = sst [smem:[#allocation33 + $0x5]] %s6675_s28  ;;  %v6246_v54 = vcombine.low %v7675_v7, %v7678_v34 }
 0xb8b   :  { %2652 = sst [smem:[#allocation33 + $0x6]] %s6671_s11  ;;  %v6247_v10 = vcombine.low %v7649_v49, %v7652_v30  ;;  %v2682_v29 = vrot.slane %v7649_v49, 1  ;;  %v2684_v56 = vrot.slane %v7652_v30, 1  ;;  %v2686_v6 = vrot.slane %v7649_v49, 2 }
 0xb8c   :  { %2654 = sst [smem:[#allocation33 + $0x7]] %s6676_s29  ;;  %v2688_v37 = vrot.slane %v7652_v30, 2  ;;  %v2803_v63 = vpack.c.bf16 %v6246_v54, %v6246_v54  ;;  %v7688_v28 = vcombine.low %v2685_v60, %v2687_v41 }
 0xb8d   :  { %2656 = sst [smem:[#allocation33 + $0x8]] %s6678_s10  ;;  %v2804_v59 = vpack.c.bf16 %v6247_v10, %v6247_v10  ;;  %v7668_v43 = vcombine.low %v2682_v29, %v2684_v56 }
 0xb8e   :  { %2658 = dma.general %s2624_s24, 12288, %s6784_s1, %s6679_s13, %s6691_s0, [#allocation33], %s6787_s9, 0   ;;  %v7686_v20 = vcombine.low %v2686_v6, %v2688_v37 }
 0xb8f   :  { %2853 = vmatprep.mubr.bf16.mxu1 %v2804_v59  ;;  %v2696_v22 = vld [vmem:[#allocation2 + $0x308] sm:$0xff]  ;;  %v2695_v21 = vld [vmem:[#allocation2 + $0x300] sm:$0xff]  ;;  %v2698_v27 = vld [vmem:[#allocation2 + $0x318] sm:$0xff]  ;;  %v2806_v2 = vpack.c.bf16 %v7668_v43, %v7668_v43 }
 0xb90   :  { %2821 = vmatprep.subr.bf16.mxu1 %v2696_v22  ;;  %v2697_v48 = vld [vmem:[#allocation2 + $0x310] sm:$0xff]  ;;  %v2700_v50 = vld [vmem:[#allocation2 + $0x328] sm:$0xff]  ;;  %v2699_v15 = vld [vmem:[#allocation2 + $0x320] sm:$0xff] }
 0xb91   :  { %2822 = vmatpush1.bf16.msra.mxu1 %v2695_v21  ;;  %v2702_v14 = vld [vmem:[#allocation2 + $0x338] sm:$0xff]  ;;  %v2701_v5 = vld [vmem:[#allocation2 + $0x330] sm:$0xff]  ;;  %v2704_v55 = vld [vmem:[#allocation2 + $0x348] sm:$0xff] }
 0xb92   :  { %2823 = vmatprep.subr.bf16.mxu1 %v2698_v27  ;;  %v2703_v47 = vld [vmem:[#allocation2 + $0x340] sm:$0xff]  ;;  %v2706_v39 = vld [vmem:[#allocation2 + $0x358] sm:$0xff]  ;;  %v2705_v58 = vld [vmem:[#allocation2 + $0x350] sm:$0xff] }
 0xb93   :  { %v2708_v52 = vld [vmem:[#allocation2 + $0x368] sm:$0xff]  ;;  %v2707_v53 = vld [vmem:[#allocation2 + $0x360] sm:$0xff]  ;;  %v2710_v38 = vld [vmem:[#allocation2 + $0x378] sm:$0xff] }
 0xb94   :  { %v2709_v40 = vld [vmem:[#allocation2 + $0x370] sm:$0xff]  ;;  %v2712_v44 = vld [vmem:[#allocation2 + $0x388] sm:$0xff]  ;;  %v2711_v42 = vld [vmem:[#allocation2 + $0x380] sm:$0xff] }
 0xb95   :  { %2824 = vmatpush1.bf16.msra.mxu1 %v2697_v48  ;;  %v2714_v24 = vld [vmem:[#allocation2 + $0x398] sm:$0xff]  ;;  %v2713_v25 = vld [vmem:[#allocation2 + $0x390] sm:$0xff]  ;;  %v2716_v0 = vld [vmem:[#allocation2 + $0x3a8] sm:$0xff] }
 0xb96   :  { %2825 = vmatprep.subr.bf16.mxu1 %v2700_v50  ;;  %v2715_v1 = vld [vmem:[#allocation2 + $0x3a0] sm:$0xff]  ;;  %v2718_v18 = vld [vmem:[#allocation2 + $0x3b8] sm:$0xff]  ;;  %v2717_v57 = vld [vmem:[#allocation2 + $0x3b0] sm:$0xff] }
 0xb97   :  { %v2720_v46 = vld [vmem:[#allocation2 + $0x3c8] sm:$0xff]  ;;  %v2719_v13 = vld [vmem:[#allocation2 + $0x3c0] sm:$0xff]  ;;  %v2722_v4 = vld [vmem:[#allocation2 + $0x3d8] sm:$0xff] }
 0xb98   :  { %v2721_v51 = vld [vmem:[#allocation2 + $0x3d0] sm:$0xff]  ;;  %v2724_v23 = vld [vmem:[#allocation2 + $0x3e8] sm:$0xff]  ;;  %v2723_v19 = vld [vmem:[#allocation2 + $0x3e0] sm:$0xff] }
 0xb99   :  { %2826 = vmatpush1.bf16.msra.mxu1 %v2699_v15  ;;  %v2726_v17 = vld [vmem:[#allocation2 + $0x3f8] sm:$0xff]  ;;  %v2725_v9 = vld [vmem:[#allocation2 + $0x3f0] sm:$0xff]  ;;  %v2728_v33 = vld [vmem:[#allocation2 + $0x408] sm:$0xff] }
 0xb9a   :  { %2827 = vmatprep.subr.bf16.mxu1 %v2702_v14  ;;  %v2727_v62 = vld [vmem:[#allocation2 + $0x400] sm:$0xff]  ;;  %v2730_v32 = vld [vmem:[#allocation2 + $0x418] sm:$0xff]  ;;  %v2729_v26 = vld [vmem:[#allocation2 + $0x410] sm:$0xff] }
 0xb9b   :  { %v2732_v61 = vld [vmem:[#allocation2 + $0x428] sm:$0xff]  ;;  %v2731_v35 = vld [vmem:[#allocation2 + $0x420] sm:$0xff]  ;;  %v2734_v49 = vld [vmem:[#allocation2 + $0x438] sm:$0xff] }
 0xb9c   :  { %v2733_v30 = vld [vmem:[#allocation2 + $0x430] sm:$0xff]  ;;  %v2736_v10 = vld [vmem:[#allocation2 + $0x448] sm:$0xff]  ;;  %v2735_v59 = vld [vmem:[#allocation2 + $0x440] sm:$0xff] }
 0xb9d   :  { %2828 = vmatpush1.bf16.msra.mxu1 %v2701_v5  ;;  %v2738_v29 = vld [vmem:[#allocation2 + $0x458] sm:$0xff]  ;;  %v2737_v56 = vld [vmem:[#allocation2 + $0x450] sm:$0xff]  ;;  %v2740_v43 = vld [vmem:[#allocation2 + $0x468] sm:$0xff] }
 0xb9e   :  { %2829 = vmatprep.subr.bf16.mxu1 %v2704_v55  ;;  %v2739_v22 = vld [vmem:[#allocation2 + $0x460] sm:$0xff]  ;;  %v2742_v21 = vld [vmem:[#allocation2 + $0x478] sm:$0xff]  ;;  %v2741_v27 = vld [vmem:[#allocation2 + $0x470] sm:$0xff] }
 0xb9f   :  { %v2744_v48 = vld [vmem:[#allocation2 + $0x488] sm:$0xff]  ;;  %v2743_v50 = vld [vmem:[#allocation2 + $0x480] sm:$0xff]  ;;  %v2746_v15 = vld [vmem:[#allocation2 + $0x498] sm:$0xff] }
 0xba0   :  { %v2745_v14 = vld [vmem:[#allocation2 + $0x490] sm:$0xff]  ;;  %v2748_v5 = vld [vmem:[#allocation2 + $0x4a8] sm:$0xff]  ;;  %v2747_v55 = vld [vmem:[#allocation2 + $0x4a0] sm:$0xff] }
 0xba1   :  { %2830 = vmatpush1.bf16.msra.mxu1 %v2703_v47  ;;  %v2750_v47 = vld [vmem:[#allocation2 + $0x4b8] sm:$0xff]  ;;  %v2761_v31 = vld [vmem:[#allocation2 + $0x510] sm:$0xff]  ;;  %v2771_v6 = vld [vmem:[#allocation2 + $0x560] sm:$0xff] }
 0xba2   :  { %2831 = vmatprep.subr.bf16.mxu1 %v2706_v39  ;;  %v2749_v39 = vld [vmem:[#allocation2 + $0x4b0] sm:$0xff]  ;;  %v2762_v3 = vld [vmem:[#allocation2 + $0x518] sm:$0xff]  ;;  %v2776_v41 = vld [vmem:[#allocation2 + $0x588] sm:$0xff] }
 0xba3   :  { %v2766_v45 = vld [vmem:[#allocation2 + $0x538] sm:$0xff]  ;;  %v2765_v36 = vld [vmem:[#allocation2 + $0x530] sm:$0xff]  ;;  %v2775_v54 = vld [vmem:[#allocation2 + $0x580] sm:$0xff] }
 0xba4   :  { %v2774_v37 = vld [vmem:[#allocation2 + $0x578] sm:$0xff]  ;;  %v2773_v60 = vld [vmem:[#allocation2 + $0x570] sm:$0xff] }
 0xba5   :  { %2832 = vmatpush1.bf16.msra.mxu1 %v2705_v58  ;;  %v2752_v58 = vld [vmem:[#allocation2 + $0x4c8] sm:$0xff] }
 0xba6   :  { %2833 = vmatprep.subr.bf16.mxu1 %v2708_v52  ;;  %v2751_v52 = vld [vmem:[#allocation2 + $0x4c0] sm:$0xff] }
 0xba9   :  { %2834 = vmatpush1.bf16.msra.mxu1 %v2707_v53  ;;  %v2754_v53 = vld [vmem:[#allocation2 + $0x4d8] sm:$0xff] }
 0xbaa   :  { %2835 = vmatprep.subr.bf16.mxu1 %v2710_v38  ;;  %v2753_v38 = vld [vmem:[#allocation2 + $0x4d0] sm:$0xff] }
 0xbad   :  { %2836 = vmatpush1.bf16.msra.mxu1 %v2709_v40  ;;  %v2756_v40 = vld [vmem:[#allocation2 + $0x4e8] sm:$0xff] }
 0xbae   :  { %2837 = vmatprep.subr.bf16.mxu1 %v2712_v44  ;;  %v2681_v44 = vrot.slane %v7675_v7, 1  ;;  %v2767_v7 = vld [vmem:[#allocation2 + $0x540] sm:$0xff] }
 0xbb1   :  { %2838 = vmatpush1.bf16.msra.mxu1 %v2711_v42  ;;  %v2683_v42 = vrot.slane %v7678_v34, 1  ;;  %v2770_v34 = vld [vmem:[#allocation2 + $0x558] sm:$0xff] }
 0xbb2   :  { %2839 = vmatprep.subr.bf16.mxu1 %v2714_v24  ;;  %v2755_v24 = vld [vmem:[#allocation2 + $0x4e0] sm:$0xff] }
 0xbb5   :  { %2840 = vmatpush1.bf16.msra.mxu1 %v2713_v25  ;;  %v2758_v25 = vld [vmem:[#allocation2 + $0x4f8] sm:$0xff] }
 0xbb6   :  { %2841 = vmatprep.subr.bf16.mxu1 %v2716_v0  ;;  %v6248_v0 = vcombine.low %v2681_v44, %v2683_v42 }
 0xbb9   :  { %2842 = vmatpush1.bf16.msra.mxu1 %v2715_v1  ;;  %v2757_v1 = vld [vmem:[#allocation2 + $0x4f0] sm:$0xff] }
 0xbba   :  { %2843 = vmatprep.subr.bf16.mxu1 %v2718_v18  ;;  %v2760_v18 = vld [vmem:[#allocation2 + $0x508] sm:$0xff] }
 0xbbd   :  { %2844 = vmatpush1.bf16.msra.mxu1 %v2717_v57  ;;  %v2805_v57 = vpack.c.bf16 %v6248_v0, %v6248_v0 }
 0xbbe   :  { %2845 = vmatprep.subr.bf16.mxu1 %v2720_v46  ;;  %v2808_v46 = vpack.c.bf16 %v7686_v20, %v7686_v20  ;;  %v2780_v20 = vld [vmem:[#allocation2 + $0x5a8] sm:$0xff] }
 0xbc1   :  { %2846 = vmatpush1.bf16.msra.mxu1 %v2719_v13  ;;  %v2759_v13 = vld [vmem:[#allocation2 + $0x500] sm:$0xff] }
 0xbc2   :  { %2847 = vmatprep.subr.bf16.mxu1 %v2722_v4  ;;  %v2764_v4 = vld [vmem:[#allocation2 + $0x528] sm:$0xff] }
 0xbc5   :  { %2848 = vmatpush1.bf16.msra.mxu1 %v2721_v51  ;;  %v2763_v51 = vld [vmem:[#allocation2 + $0x520] sm:$0xff] }
 0xbc6   :  { %2849 = vmatprep.subr.bf16.mxu1 %v2724_v23  ;;  %v2768_v23 = vld [vmem:[#allocation2 + $0x548] sm:$0xff] }
 0xbc9   :  { %2850 = vmatpush1.bf16.msra.mxu1 %v2723_v19  ;;  %v2769_v19 = vld [vmem:[#allocation2 + $0x550] sm:$0xff] }
 0xbca   :  { %2851 = vmatprep.subr.bf16.mxu1 %v2726_v17  ;;  %v2772_v17 = vld [vmem:[#allocation2 + $0x568] sm:$0xff] }
 0xbcd   :  { %2852 = vmatpush1.bf16.msra.mxu1 %v2725_v9  ;;  %v2778_v9 = vld [vmem:[#allocation2 + $0x598] sm:$0xff] }
 0xbce   :  { %2862 = vmatprep.subr.bf16.mxu1 %v2728_v33  ;;  %v2777_v33 = vld [vmem:[#allocation2 + $0x590] sm:$0xff] }
 0xbd0   :  { %2854 = vmatmul.mubr.bf16.vlgmr.msra.gmra.mrb[16].mxu1 %v2803_v63  ;;  %v2779_v63 = vld [vmem:[#allocation2 + $0x5a0] sm:$0xff] }
 0xbd1   :  { %2863 = vmatpush1.bf16.msra.mxu1 %v2727_v62  ;;  %2894 = vmatprep.mubr.bf16.mxu1 %v2806_v2  ;;  %v2782_v2 = vld [vmem:[#allocation2 + $0x5b8] sm:$0xff]  ;;  %v2781_v62 = vld [vmem:[#allocation2 + $0x5b0] sm:$0xff] }
 0xbd2   :  { %2864 = vmatprep.subr.bf16.mxu1 %v2730_v32  ;;  %v2784_v32 = vld [vmem:[#allocation2 + $0x5c8] sm:$0xff] }
 0xbd5   :  { %2865 = vmatpush1.bf16.msra.mxu1 %v2729_v26  ;;  %v2783_v26 = vld [vmem:[#allocation2 + $0x5c0] sm:$0xff] }
 0xbd6   :  { %2866 = vmatprep.subr.bf16.mxu1 %v2732_v61  ;;  %v2786_v61 = vld [vmem:[#allocation2 + $0x5d8] sm:$0xff] }
 0xbd9   :  { %2867 = vmatpush1.bf16.msra.mxu1 %v2731_v35  ;;  %v2785_v35 = vld [vmem:[#allocation2 + $0x5d0] sm:$0xff] }
 0xbda   :  { %2868 = vmatprep.subr.bf16.mxu1 %v2734_v49  ;;  %v2788_v49 = vld [vmem:[#allocation2 + $0x5e8] sm:$0xff] }
 0xbdd   :  { %2869 = vmatpush1.bf16.msra.mxu1 %v2733_v30  ;;  %v2787_v30 = vld [vmem:[#allocation2 + $0x5e0] sm:$0xff] }
 0xbde   :  { %2870 = vmatprep.subr.bf16.mxu1 %v2736_v10  ;;  %v2790_v10 = vld [vmem:[#allocation2 + $0x5f8] sm:$0xff] }
 0xbe1   :  { %2871 = vmatpush1.bf16.msra.mxu1 %v2735_v59  ;;  %v2789_v59 = vld [vmem:[#allocation2 + $0x5f0] sm:$0xff] }
 0xbe2   :  { %2872 = vmatprep.subr.bf16.mxu1 %v2738_v29  ;;  %v2807_v29 = vpack.c.bf16 %v7688_v28, %v7688_v28 }
 0xbe5   :  { %2873 = vmatpush1.bf16.msra.mxu1 %v2737_v56  ;;  %v2809_v56 = vld [vmem:[#allocation8 + $0xe] sm:$0x3] }
 0xbe6   :  { %2874 = vmatprep.subr.bf16.mxu1 %v2740_v43  ;;  %v2814_v43 = vrot.slane %v2809_v56, %v6873_v12 }
 0xbe9   :  { %2875 = vmatpush1.bf16.msra.mxu1 %v2739_v22  ;;  %v2818_v22 = vrot.slane %v2809_v56, %v6876_v16 }
 0xbea   :  { %2876 = vmatprep.subr.bf16.mxu1 %v2742_v21 }
 0xbed   :  { %2877 = vmatpush1.bf16.msra.mxu1 %v2741_v27 }
 0xbee   :  { %2878 = vmatprep.subr.bf16.mxu1 %v2744_v48 }
 0xbf1   :  { %2879 = vmatpush1.bf16.msra.mxu1 %v2743_v50 }
 0xbf2   :  { %2880 = vmatprep.subr.bf16.mxu1 %v2746_v15 }
 0xbf5   :  { %2881 = vmatpush1.bf16.msra.mxu1 %v2745_v14 }
 0xbf6   :  { %2882 = vmatprep.subr.bf16.mxu1 %v2748_v5 }
 0xbf9   :  { %2883 = vmatpush1.bf16.msra.mxu1 %v2747_v55 }
 0xbfa   :  { %2884 = vmatprep.subr.bf16.mxu1 %v2750_v47 }
 0xbfd   :  { %2885 = vmatpush1.bf16.msra.mxu1 %v2749_v39 }
 0xbfe   :  { %2886 = vmatprep.subr.bf16.mxu1 %v2752_v58 }
 0xc01   :  { %2887 = vmatpush1.bf16.msra.mxu1 %v2751_v52 }
 0xc02   :  { %2888 = vmatprep.subr.bf16.mxu1 %v2754_v53 }
 0xc05   :  { %2889 = vmatpush1.bf16.msra.mxu1 %v2753_v38 }
 0xc06   :  { %2890 = vmatprep.subr.bf16.mxu1 %v2756_v40 }
 0xc09   :  { %2891 = vmatpush1.bf16.msra.mxu1 %v2755_v24 }
 0xc0a   :  { %2892 = vmatprep.subr.bf16.mxu1 %v2758_v25 }
 0xc0d   :  { %2893 = vmatpush1.bf16.msra.mxu1 %v2757_v1 }
 0xc0e   :  { %2903 = vmatprep.subr.bf16.mxu1 %v2760_v18 }
 0xc10   :  { %2895 = vmatmul.mubr.bf16.vlgmr.msra.gmra.mrb[16].mxu1 %v2805_v57 }
 0xc11   :  { %2904 = vmatpush1.bf16.msra.mxu1 %v2759_v13  ;;  %2935 = vmatprep.mubr.bf16.mxu1 %v2808_v46 }
 0xc12   :  { %2905 = vmatprep.subr.bf16.mxu1 %v2762_v3 }
 0xc15   :  { %2906 = vmatpush1.bf16.msra.mxu1 %v2761_v31 }
 0xc16   :  { %2907 = vmatprep.subr.bf16.mxu1 %v2764_v4 }
 0xc19   :  { %2908 = vmatpush1.bf16.msra.mxu1 %v2763_v51 }
 0xc1a   :  { %2909 = vmatprep.subr.bf16.mxu1 %v2766_v45 }
 0xc1d   :  { %2910 = vmatpush1.bf16.msra.mxu1 %v2765_v36 }
 0xc1e   :  { %2911 = vmatprep.subr.bf16.mxu1 %v2768_v23 }
 0xc21   :  { %2912 = vmatpush1.bf16.msra.mxu1 %v2767_v7 }
 0xc22   :  { %2913 = vmatprep.subr.bf16.mxu1 %v2770_v34 }
 0xc25   :  { %2914 = vmatpush1.bf16.msra.mxu1 %v2769_v19 }
 0xc26   :  { %2915 = vmatprep.subr.bf16.mxu1 %v2772_v17 }
 0xc29   :  { %2916 = vmatpush1.bf16.msra.mxu1 %v2771_v6 }
 0xc2a   :  { %2917 = vmatprep.subr.bf16.mxu1 %v2774_v37 }
 0xc2d   :  { %2918 = vmatpush1.bf16.msra.mxu1 %v2773_v60 }
 0xc2e   :  { %2919 = vmatprep.subr.bf16.mxu1 %v2776_v41 }
 0xc31   :  { %2920 = vmatpush1.bf16.msra.mxu1 %v2775_v54 }
 0xc32   :  { %2921 = vmatprep.subr.bf16.mxu1 %v2778_v9 }
 0xc35   :  { %2922 = vmatpush1.bf16.msra.mxu1 %v2777_v33 }
 0xc36   :  { %2923 = vmatprep.subr.bf16.mxu1 %v2780_v20 }
 0xc39   :  { %2924 = vmatpush1.bf16.msra.mxu1 %v2779_v63 }
 0xc3a   :  { %2925 = vmatprep.subr.bf16.mxu1 %v2782_v2 }
 0xc3d   :  { %2926 = vmatpush1.bf16.msra.mxu1 %v2781_v62 }
 0xc3e   :  { %2927 = vmatprep.subr.bf16.mxu1 %v2784_v32 }
 0xc41   :  { %2928 = vmatpush1.bf16.msra.mxu1 %v2783_v26 }
 0xc42   :  { %2929 = vmatprep.subr.bf16.mxu1 %v2786_v61 }
 0xc45   :  { %2930 = vmatpush1.bf16.msra.mxu1 %v2785_v35 }
 0xc46   :  { %2931 = vmatprep.subr.bf16.mxu1 %v2788_v49 }
 0xc49   :  { %2932 = vmatpush1.bf16.msra.mxu1 %v2787_v30 }
 0xc4a   :  { %2933 = vmatprep.subr.bf16.mxu1 %v2790_v10 }
 0xc4d   :  { %2934 = vmatpush1.bf16.msra.mxu1 %v2789_v59 }
 0xc50   :  { %2936 = vmatmul.mubr.bf16.vlgmr.msra.gmra.mrb[16].mxu1 %v2807_v29 }
 0xd23   :  { %v2937_v21 = vpop.f32.mrb[16].mxu1 }
 0xd24   :  { %v6303_v27 = vadd.f32 %v2937_v21, %v2814_v43  ;;  %v2939_v48 = vpop.f32.mrb[17].mxu1 }
 0xd25   :  { %v6304_v50 = vadd.f32 %v2939_v48, %v2818_v22  ;;  %v2941_v15 = vpop.f32.mrb[18].mxu1 }
 0xd26   :  { %v2944_v14 = vmax.f32 %v6303_v27, 0.0  ;;  %v2942_v5 = vpop.f32.mrb[19].mxu1 }
 0xd27   :  { %v2945_v55 = vmax.f32 %v6304_v50, 0.0 }
 0xd29   :  { %v2948_v47 = vcombine.low %v2944_v14, %v2945_v55  ;;  %v2949_v39 = vcombine.high %v2944_v14, %v2945_v55 }
 0xd2b   :  { %2952 = vst [vmem:[#allocation10] sm:$0xff] %v2948_v47  ;;  %2953 = vst [vmem:[#allocation10 + $0x8] sm:$0xff] %v2949_v39 }
 0xd2c   :  { %6644 = dma.done.wait [#allocation4], 12288 }
 0xd2d   :  { %6645 = vsyncadd [#allocation4], 4294955008  ;;  %v2994_v28 = vrot.slane %v2948_v47, %v6876_v16  ;;  %v2997_v58 = vsub.s32 5, %v6870_v8  ;;  %v3002_v52 = vrot.slane %v2949_v39, %v6876_v16  ;;  %v7704_v53 = vsub.s32 3, %v6870_v8  ;;  %2972 = sst [smem:[#allocation35]] %s6674_s27  ;;  %s2956_s30 = scalar_lea.hbm %s8257_s2, 101376 }
 0xd2e   :  { %v3017_v38 = vsub.s32 7, %v6870_v8  ;;  %v3034_v40 = vrot.slane %v2948_v47, %v6873_v12  ;;  %v3037_v44 = vsub.s32 4, %v6870_v8  ;;  %v3042_v42 = vrot.slane %v2949_v39, %v6873_v12  ;;  %2974 = sst [smem:[#allocation35 + $0x1]] %s6674_s27  ;;  %s6692_s8 = smov [#allocation34]  }
 0xd2f   :  { %v2998_v24 = vrot.slane %v2948_v47, %v2997_v58  ;;  %v3006_v25 = vrot.slane %v2949_v39, %v2997_v58  ;;  %v3014_v0 = vrot.slane %v2948_v47, %v7704_v53  ;;  %v3022_v1 = vrot.slane %v2949_v39, %v7704_v53  ;;  %2976 = sst [smem:[#allocation35 + $0x2]] %s6675_s28 }
 0xd30   :  { %v3018_v18 = vrot.slane %v2948_v47, %v3017_v38  ;;  %v3026_v57 = vrot.slane %v2949_v39, %v3017_v38  ;;  %v3038_v46 = vrot.slane %v2948_v47, %v3037_v44  ;;  %v3046_v13 = vrot.slane %v2949_v39, %v3037_v44  ;;  %2978 = sst [smem:[#allocation35 + $0x3]] %s6676_s29 }
 0xd31   :  { %v7717_v3 = vsub.s32 2, %v6870_v8  ;;  %v3057_v31 = vsub.s32 6, %v6870_v8  ;;  %v3071_v4 = vsel %vm131_vm0, 0.0, %v2994_v28  ;;  %v3072_v51 = vsel %vm131_vm0, 0.0, %v2998_v24  ;;  %2980 = sst [smem:[#allocation35 + $0x4]] %s6671_s11 }
 0xd32   :  { %v3073_v45 = vsel %vm131_vm0, 0.0, %v3002_v52  ;;  %v3074_v36 = vsel %vm131_vm0, 0.0, %v3006_v25  ;;  %v3075_v23 = vsel %vm853_vm7, %v3071_v4, %v3014_v0  ;;  %v3076_v7 = vsel %vm853_vm7, %v3072_v51, %v3018_v18  ;;  %2982 = sst [smem:[#allocation35 + $0x5]] %s6675_s28 }
 0xd33   :  { %v3054_v34 = vrot.slane %v2948_v47, %v7717_v3  ;;  %v3058_v19 = vrot.slane %v2948_v47, %v3057_v31  ;;  %v3062_v17 = vrot.slane %v2949_v39, %v7717_v3  ;;  %v3066_v6 = vrot.slane %v2949_v39, %v3057_v31  ;;  %2984 = sst [smem:[#allocation35 + $0x6]] %s6671_s11 }
 0xd34   :  { %v3077_v37 = vsel %vm853_vm7, %v3073_v45, %v3022_v1  ;;  %v3078_v60 = vsel %vm853_vm7, %v3074_v36, %v3026_v57  ;;  %v3079_v41 = vsel %vm858_vm8, %v3075_v23, %v3034_v40  ;;  %v3080_v54 = vsel %vm858_vm8, %v3076_v7, %v3038_v46  ;;  %2986 = sst [smem:[#allocation35 + $0x7]] %s6676_s29 }
 0xd35   :  { %v3081_v9 = vsel %vm858_vm8, %v3077_v37, %v3042_v42  ;;  %v3082_v33 = vsel %vm858_vm8, %v3078_v60, %v3046_v13  ;;  %v3083_v20 = vsel %vm863_vm9, %v3079_v41, %v3054_v34  ;;  %2988 = sst [smem:[#allocation35 + $0x8]] %s6678_s10  ;;  %v3084_v63 = vsel %vm863_vm9, %v3080_v54, %v3058_v19 }
 0xd36   :  { %v3085_v2 = vsel %vm863_vm9, %v3081_v9, %v3062_v17  ;;  %v3086_v62 = vsel %vm863_vm9, %v3082_v33, %v3066_v6  ;;  %2990 = dma.general %s2956_s30, 12288, %s6826_s18, %s6682_s22, %s6692_s8, [#allocation35], %s6787_s9, 0   ;;  %v7750_v32 = vsel %vm868_vm10, %v3083_v20, 0.0  ;;  %v7753_v26 = vsel %vm868_vm10, %v3084_v63, 0.0 }
 0xd37   :  { %v7756_v61 = vsel %vm868_vm10, %v3085_v2, 0.0  ;;  %v7759_v35 = vsel %vm868_vm10, %v3086_v62, 0.0  ;;  %v6693_v49 = vmov 1983009808   ;;  %v3103_v10 = vcombine.low %v7750_v32, %v7753_v26  ;;  %v3154_v56 = vld [vmem:[#allocation2 + $0x8] sm:$0xff]  ;;  %v3153_v43 = vld [vmem:[#allocation2] sm:$0xff] }
 0xd38   :  { %v3106_v30 = vunpack.c.l.s4 %v6693_v49  ;;  %v3128_v29 = vcombine.low %v7756_v61, %v7759_v35  ;;  %v3156_v22 = vld [vmem:[#allocation2 + $0x18] sm:$0xff]  ;;  %3300 = vmatprep.subr.bf16.mxu0 %v3154_v56  ;;  %v3155_v50 = vld [vmem:[#allocation2 + $0x10] sm:$0xff]  ;;  %v3158_v15 = vld [vmem:[#allocation2 + $0x28] sm:$0xff]  ;;  %v3095_v31 = vrot.slane %v7750_v32, 3  ;;  %v3096_v4 = vrot.slane %v7753_v26, 3 }
 0xd39   :  { %3301 = vmatpush1.bf16.msra.mxu0 %v3153_v43  ;;  %v3157_v55 = vld [vmem:[#allocation2 + $0x20] sm:$0xff]  ;;  %v3160_v47 = vld [vmem:[#allocation2 + $0x38] sm:$0xff]  ;;  %v3159_v58 = vld [vmem:[#allocation2 + $0x30] sm:$0xff]  ;;  %v3097_v51 = vrot.slane %v7756_v61, 3  ;;  %v3098_v45 = vrot.slane %v7759_v35, 3  ;;  %v3099_v54 = vrot.slane %v7750_v32, 1 }
 0xd3a   :  { %v3107_v59 = vunpack.c.0.s8 %v3106_v30  ;;  %3302 = vmatprep.subr.bf16.mxu0 %v3156_v22  ;;  %v3162_v52 = vld [vmem:[#allocation2 + $0x48] sm:$0xff]  ;;  %v3161_v38 = vld [vmem:[#allocation2 + $0x40] sm:$0xff]  ;;  %v3164_v40 = vld [vmem:[#allocation2 + $0x58] sm:$0xff]  ;;  %v3104_v7 = vcombine.low %v3095_v31, %v3096_v4  ;;  %v3100_v9 = vrot.slane %v7753_v26, 1  ;;  %v3101_v33 = vrot.slane %v7756_v61, 1 }
 0xd3b   :  { %v3163_v44 = vld [vmem:[#allocation2 + $0x50] sm:$0xff]  ;;  %v3166_v42 = vld [vmem:[#allocation2 + $0x68] sm:$0xff]  ;;  %v3165_v24 = vld [vmem:[#allocation2 + $0x60] sm:$0xff]  ;;  %v3129_v34 = vcombine.low %v3097_v51, %v3098_v45  ;;  %v3102_v20 = vrot.slane %v7759_v35, 1 }
 0xd3c   :  { %v7766_v21 = vsub.s32 %v3107_v59, %v6870_v8  ;;  %v3168_v25 = vld [vmem:[#allocation2 + $0x78] sm:$0xff]  ;;  %v3167_v0 = vld [vmem:[#allocation2 + $0x70] sm:$0xff]  ;;  %v3170_v1 = vld [vmem:[#allocation2 + $0x88] sm:$0xff]  ;;  %v3120_v49 = vcombine.low %v3099_v54, %v3100_v9 }
 0xd3d   :  { %3303 = vmatpush1.bf16.msra.mxu0 %v3155_v50  ;;  %v3169_v18 = vld [vmem:[#allocation2 + $0x80] sm:$0xff]  ;;  %v3172_v57 = vld [vmem:[#allocation2 + $0x98] sm:$0xff]  ;;  %v3171_v46 = vld [vmem:[#allocation2 + $0x90] sm:$0xff]  ;;  %v3145_v30 = vcombine.low %v3101_v33, %v3102_v20 }
 0xd3e   :  { %v3111_v27 = vrot.slane %v3103_v10, %v7766_v21  ;;  %v3136_v48 = vrot.slane %v3128_v29, %v7766_v21  ;;  %3304 = vmatprep.subr.bf16.mxu0 %v3158_v15  ;;  %v3174_v13 = vld [vmem:[#allocation2 + $0xa8] sm:$0xff]  ;;  %v3173_v36 = vld [vmem:[#allocation2 + $0xa0] sm:$0xff]  ;;  %v3176_v23 = vld [vmem:[#allocation2 + $0xb8] sm:$0xff]  ;;  %v3118_v6 = vrot.slane %v3104_v7, %v7766_v21  ;;  %v3143_v37 = vrot.slane %v3129_v34, %v7766_v21 }
 0xd3f   :  { %v3175_v19 = vld [vmem:[#allocation2 + $0xb0] sm:$0xff]  ;;  %v3178_v17 = vld [vmem:[#allocation2 + $0xc8] sm:$0xff]  ;;  %v3177_v60 = vld [vmem:[#allocation2 + $0xc0] sm:$0xff]  ;;  %v3127_v59 = vrot.slane %v3120_v49, %v7766_v21  ;;  %v3152_v32 = vrot.slane %v3145_v30, %v7766_v21 }
 0xd40   :  { %v6254_v14 = vcombine.low %v3111_v27, %v3136_v48  ;;  %v3180_v41 = vld [vmem:[#allocation2 + $0xd8] sm:$0xff]  ;;  %v6255_v63 = vcombine.low %v3118_v6, %v3143_v37  ;;  %v3179_v2 = vld [vmem:[#allocation2 + $0xd0] sm:$0xff]  ;;  %v3182_v62 = vld [vmem:[#allocation2 + $0xe8] sm:$0xff] }
 0xd41   :  { %3305 = vmatpush1.bf16.msra.mxu0 %v3157_v55  ;;  %v3181_v26 = vld [vmem:[#allocation2 + $0xe0] sm:$0xff]  ;;  %v3184_v61 = vld [vmem:[#allocation2 + $0xf8] sm:$0xff]  ;;  %v7790_v29 = vcombine.low %v3127_v59, %v3152_v32  ;;  %v3183_v56 = vld [vmem:[#allocation2 + $0xf0] sm:$0xff] }
 0xd42   :  { %v7771_v5 = vrot.slane %v6254_v14, %v7766_v21  ;;  %3306 = vmatprep.subr.bf16.mxu0 %v3160_v47  ;;  %v7786_v10 = vrot.slane %v6255_v63, %v7766_v21  ;;  %v3186_v43 = vld [vmem:[#allocation2 + $0x108] sm:$0xff]  ;;  %v3185_v48 = vld [vmem:[#allocation2 + $0x100] sm:$0xff]  ;;  %v3188_v50 = vld [vmem:[#allocation2 + $0x118] sm:$0xff] }
 0xd43   :  { %v3187_v15 = vld [vmem:[#allocation2 + $0x110] sm:$0xff]  ;;  %v3190_v14 = vld [vmem:[#allocation2 + $0x128] sm:$0xff]  ;;  %v3189_v55 = vld [vmem:[#allocation2 + $0x120] sm:$0xff] }
 0xd44   :  { %v3265_v39 = vcombine.high %v7771_v5, %v7771_v5  ;;  %v3266_v35 = vcombine.high %v7786_v10, %v7786_v10  ;;  %v3282_v22 = vpack.c.bf16 %v7771_v5, %v7771_v5  ;;  %v3192_v47 = vld [vmem:[#allocation2 + $0x138] sm:$0xff]  ;;  %v3193_v5 = vld [vmem:[#allocation2 + $0x140] sm:$0xff]  ;;  %v3210_v31 = vld [vmem:[#allocation2 + $0x1c8] sm:$0xff]  ;;  %v3284_v37 = vpack.c.bf16 %v7786_v10, %v7786_v10 }
 0xd45   :  { %3307 = vmatpush1.bf16.msra.mxu0 %v3159_v58  ;;  %v3196_v58 = vld [vmem:[#allocation2 + $0x158] sm:$0xff]  ;;  %v3209_v4 = vld [vmem:[#allocation2 + $0x1c0] sm:$0xff]  ;;  %v3211_v45 = vld [vmem:[#allocation2 + $0x1d0] sm:$0xff] }
 0xd46   :  { %v3283_v28 = vpack.c.bf16 %v3265_v39, %v3265_v39  ;;  %3308 = vmatprep.subr.bf16.mxu0 %v3162_v52  ;;  %v3285_v27 = vpack.c.bf16 %v3266_v35, %v3266_v35  ;;  %v3191_v39 = vld [vmem:[#allocation2 + $0x130] sm:$0xff]  ;;  %v3212_v51 = vld [vmem:[#allocation2 + $0x1d8] sm:$0xff]  ;;  %v3213_v7 = vld [vmem:[#allocation2 + $0x1e0] sm:$0xff] }
 0xd47   :  { %v3195_v52 = vld [vmem:[#allocation2 + $0x150] sm:$0xff]  ;;  %v3216_v34 = vld [vmem:[#allocation2 + $0x1f8] sm:$0xff]  ;;  %v3218_v6 = vld [vmem:[#allocation2 + $0x208] sm:$0xff] }
 0xd48   :  { %3332 = vmatprep.mubr.bf16.mxu0 %v3283_v28  ;;  %v3194_v28 = vld [vmem:[#allocation2 + $0x148] sm:$0xff]  ;;  %v3220_v54 = vld [vmem:[#allocation2 + $0x218] sm:$0xff]  ;;  %v3219_v9 = vld [vmem:[#allocation2 + $0x210] sm:$0xff] }
 0xd49   :  { %3309 = vmatpush1.bf16.msra.mxu0 %v3161_v38  ;;  %v3198_v38 = vld [vmem:[#allocation2 + $0x168] sm:$0xff]  ;;  %v3221_v20 = vld [vmem:[#allocation2 + $0x220] sm:$0xff]  ;;  %v3224_v63 = vld [vmem:[#allocation2 + $0x238] sm:$0xff] }
 0xd4a   :  { %3310 = vmatprep.subr.bf16.mxu0 %v3164_v40  ;;  %v3197_v40 = vld [vmem:[#allocation2 + $0x160] sm:$0xff]  ;;  %v3222_v33 = vld [vmem:[#allocation2 + $0x228] sm:$0xff]  ;;  %v3228_v30 = vld [vmem:[#allocation2 + $0x258] sm:$0xff] }
 0xd4b   :  { %v3225_v49 = vld [vmem:[#allocation2 + $0x240] sm:$0xff]  ;;  %v3227_v10 = vld [vmem:[#allocation2 + $0x250] sm:$0xff]  ;;  %v3230_v59 = vld [vmem:[#allocation2 + $0x268] sm:$0xff] }
 0xd4c   :  { %v3229_v32 = vld [vmem:[#allocation2 + $0x260] sm:$0xff] }
 0xd4d   :  { %3311 = vmatpush1.bf16.msra.mxu0 %v3163_v44  ;;  %v3200_v44 = vld [vmem:[#allocation2 + $0x178] sm:$0xff]  ;;  %v3233_v35 = vld [vmem:[#allocation2 + $0x280] sm:$0xff] }
 0xd4e   :  { %3312 = vmatprep.subr.bf16.mxu0 %v3166_v42  ;;  %v3199_v42 = vld [vmem:[#allocation2 + $0x170] sm:$0xff] }
 0xd51   :  { %3313 = vmatpush1.bf16.msra.mxu0 %v3165_v24  ;;  %v3202_v24 = vld [vmem:[#allocation2 + $0x188] sm:$0xff] }
 0xd52   :  { %3314 = vmatprep.subr.bf16.mxu0 %v3168_v25  ;;  %v3201_v25 = vld [vmem:[#allocation2 + $0x180] sm:$0xff] }
 0xd55   :  { %3315 = vmatpush1.bf16.msra.mxu0 %v3167_v0  ;;  %v3204_v0 = vld [vmem:[#allocation2 + $0x198] sm:$0xff] }
 0xd56   :  { %3316 = vmatprep.subr.bf16.mxu0 %v3170_v1  ;;  %v3203_v1 = vld [vmem:[#allocation2 + $0x190] sm:$0xff] }
 0xd59   :  { %3317 = vmatpush1.bf16.msra.mxu0 %v3169_v18  ;;  %v3206_v18 = vld [vmem:[#allocation2 + $0x1a8] sm:$0xff] }
 0xd5a   :  { %3318 = vmatprep.subr.bf16.mxu0 %v3172_v57  ;;  %v3205_v57 = vld [vmem:[#allocation2 + $0x1a0] sm:$0xff] }
 0xd5d   :  { %3319 = vmatpush1.bf16.msra.mxu0 %v3171_v46  ;;  %v3208_v46 = vld [vmem:[#allocation2 + $0x1b8] sm:$0xff] }
 0xd5e   :  { %3320 = vmatprep.subr.bf16.mxu0 %v3174_v13  ;;  %v3207_v13 = vld [vmem:[#allocation2 + $0x1b0] sm:$0xff] }
 0xd61   :  { %3321 = vmatpush1.bf16.msra.mxu0 %v3173_v36  ;;  %v3214_v36 = vld [vmem:[#allocation2 + $0x1e8] sm:$0xff] }
 0xd62   :  { %3322 = vmatprep.subr.bf16.mxu0 %v3176_v23  ;;  %v7798_v23 = vrot.slane %v7790_v29, %v7766_v21  ;;  %v3234_v29 = vld [vmem:[#allocation2 + $0x288] sm:$0xff] }
 0xd65   :  { %3323 = vmatpush1.bf16.msra.mxu0 %v3175_v19  ;;  %v3275_v19 = vcombine.high %v7798_v23, %v7798_v23 }
 0xd66   :  { %3324 = vmatprep.subr.bf16.mxu0 %v3178_v17  ;;  %v3215_v17 = vld [vmem:[#allocation2 + $0x1f0] sm:$0xff] }
 0xd69   :  { %3325 = vmatpush1.bf16.msra.mxu0 %v3177_v60  ;;  %v3287_v60 = vpack.c.bf16 %v3275_v19, %v3275_v19 }
 0xd6a   :  { %3326 = vmatprep.subr.bf16.mxu0 %v3180_v41  ;;  %v3217_v41 = vld [vmem:[#allocation2 + $0x200] sm:$0xff] }
 0xd6d   :  { %3327 = vmatpush1.bf16.msra.mxu0 %v3179_v2  ;;  %v3223_v2 = vld [vmem:[#allocation2 + $0x230] sm:$0xff] }
 0xd6e   :  { %3328 = vmatprep.subr.bf16.mxu0 %v3182_v62  ;;  %v3226_v62 = vld [vmem:[#allocation2 + $0x248] sm:$0xff] }
 0xd71   :  { %3329 = vmatpush1.bf16.msra.mxu0 %v3181_v26  ;;  %v3232_v26 = vld [vmem:[#allocation2 + $0x278] sm:$0xff] }
 0xd72   :  { %3330 = vmatprep.subr.bf16.mxu0 %v3184_v61  ;;  %v3231_v61 = vld [vmem:[#allocation2 + $0x270] sm:$0xff] }
 0xd75   :  { %3331 = vmatpush1.bf16.msra.mxu0 %v3183_v56  ;;  %v3236_v56 = vld [vmem:[#allocation2 + $0x298] sm:$0xff] }
 0xd76   :  { %3341 = vmatprep.subr.bf16.mxu0 %v3186_v43  ;;  %v3235_v43 = vld [vmem:[#allocation2 + $0x290] sm:$0xff] }
 0xd78   :  { %3333 = vmatmul.mubr.bf16.vlgmr.msra.gmra.mrb[20].mxu0 %v3282_v22  ;;  %v3238_v22 = vld [vmem:[#allocation2 + $0x2a8] sm:$0xff] }
 0xd79   :  { %3342 = vmatpush1.bf16.msra.mxu0 %v3185_v48  ;;  %3373 = vmatprep.mubr.bf16.mxu0 %v3285_v27  ;;  %v3237_v27 = vld [vmem:[#allocation2 + $0x2a0] sm:$0xff]  ;;  %v3240_v48 = vld [vmem:[#allocation2 + $0x2b8] sm:$0xff] }
 0xd7a   :  { %3343 = vmatprep.subr.bf16.mxu0 %v3188_v50  ;;  %v3239_v50 = vld [vmem:[#allocation2 + $0x2b0] sm:$0xff] }
 0xd7d   :  { %3344 = vmatpush1.bf16.msra.mxu0 %v3187_v15  ;;  %v3242_v15 = vld [vmem:[#allocation2 + $0x2c8] sm:$0xff] }
 0xd7e   :  { %3345 = vmatprep.subr.bf16.mxu0 %v3190_v14  ;;  %v3241_v14 = vld [vmem:[#allocation2 + $0x2c0] sm:$0xff] }
 0xd81   :  { %3346 = vmatpush1.bf16.msra.mxu0 %v3189_v55  ;;  %v3244_v55 = vld [vmem:[#allocation2 + $0x2d8] sm:$0xff] }
 0xd82   :  { %3347 = vmatprep.subr.bf16.mxu0 %v3192_v47  ;;  %v3243_v47 = vld [vmem:[#allocation2 + $0x2d0] sm:$0xff] }
 0xd85   :  { %3348 = vmatpush1.bf16.msra.mxu0 %v3191_v39  ;;  %v3246_v39 = vld [vmem:[#allocation2 + $0x2e8] sm:$0xff] }
 0xd86   :  { %3349 = vmatprep.subr.bf16.mxu0 %v3194_v28  ;;  %v3245_v28 = vld [vmem:[#allocation2 + $0x2e0] sm:$0xff] }
 0xd89   :  { %3350 = vmatpush1.bf16.msra.mxu0 %v3193_v5  ;;  %v3248_v5 = vld [vmem:[#allocation2 + $0x2f8] sm:$0xff] }
 0xd8a   :  { %3351 = vmatprep.subr.bf16.mxu0 %v3196_v58  ;;  %v3247_v58 = vld [vmem:[#allocation2 + $0x2f0] sm:$0xff] }
 0xd8d   :  { %3352 = vmatpush1.bf16.msra.mxu0 %v3195_v52  ;;  %v3286_v52 = vpack.c.bf16 %v7798_v23, %v7798_v23 }
 0xd8e   :  { %3353 = vmatprep.subr.bf16.mxu0 %v3198_v38  ;;  %v3288_v38 = vld [vmem:[#allocation8 + $0x10] sm:$0x3] }
 0xd91   :  { %3354 = vmatpush1.bf16.msra.mxu0 %v3197_v40  ;;  %v3293_v40 = vrot.slane %v3288_v38, %v6873_v12 }
 0xd92   :  { %3355 = vmatprep.subr.bf16.mxu0 %v3200_v44  ;;  %v3297_v44 = vrot.slane %v3288_v38, %v6876_v16 }
 0xd95   :  { %3356 = vmatpush1.bf16.msra.mxu0 %v3199_v42 }
 0xd96   :  { %3357 = vmatprep.subr.bf16.mxu0 %v3202_v24 }
 0xd99   :  { %3358 = vmatpush1.bf16.msra.mxu0 %v3201_v25 }
 0xd9a   :  { %3359 = vmatprep.subr.bf16.mxu0 %v3204_v0 }
 0xd9d   :  { %3360 = vmatpush1.bf16.msra.mxu0 %v3203_v1 }
 0xd9e   :  { %3361 = vmatprep.subr.bf16.mxu0 %v3206_v18 }
 0xda1   :  { %3362 = vmatpush1.bf16.msra.mxu0 %v3205_v57 }
 0xda2   :  { %3363 = vmatprep.subr.bf16.mxu0 %v3208_v46 }
 0xda5   :  { %3364 = vmatpush1.bf16.msra.mxu0 %v3207_v13 }
 0xda6   :  { %3365 = vmatprep.subr.bf16.mxu0 %v3210_v31 }
 0xda9   :  { %3366 = vmatpush1.bf16.msra.mxu0 %v3209_v4 }
 0xdaa   :  { %3367 = vmatprep.subr.bf16.mxu0 %v3212_v51 }
 0xdad   :  { %3368 = vmatpush1.bf16.msra.mxu0 %v3211_v45 }
 0xdae   :  { %3369 = vmatprep.subr.bf16.mxu0 %v3214_v36 }
 0xdb1   :  { %3370 = vmatpush1.bf16.msra.mxu0 %v3213_v7 }
 0xdb2   :  { %3371 = vmatprep.subr.bf16.mxu0 %v3216_v34 }
 0xdb5   :  { %3372 = vmatpush1.bf16.msra.mxu0 %v3215_v17 }
 0xdb6   :  { %3382 = vmatprep.subr.bf16.mxu0 %v3218_v6 }
 0xdb8   :  { %3374 = vmatmul.mubr.bf16.vlgmr.msra.gmra.mrb[20].mxu0 %v3284_v37 }
 0xdb9   :  { %3383 = vmatpush1.bf16.msra.mxu0 %v3217_v41  ;;  %3414 = vmatprep.mubr.bf16.mxu0 %v3287_v60 }
 0xdba   :  { %3384 = vmatprep.subr.bf16.mxu0 %v3220_v54 }
 0xdbd   :  { %3385 = vmatpush1.bf16.msra.mxu0 %v3219_v9 }
 0xdbe   :  { %3386 = vmatprep.subr.bf16.mxu0 %v3222_v33 }
 0xdc1   :  { %3387 = vmatpush1.bf16.msra.mxu0 %v3221_v20 }
 0xdc2   :  { %3388 = vmatprep.subr.bf16.mxu0 %v3224_v63 }
 0xdc5   :  { %3389 = vmatpush1.bf16.msra.mxu0 %v3223_v2 }
 0xdc6   :  { %3390 = vmatprep.subr.bf16.mxu0 %v3226_v62 }
 0xdc9   :  { %3391 = vmatpush1.bf16.msra.mxu0 %v3225_v49 }
 0xdca   :  { %3392 = vmatprep.subr.bf16.mxu0 %v3228_v30 }
 0xdcd   :  { %3393 = vmatpush1.bf16.msra.mxu0 %v3227_v10 }
 0xdce   :  { %3394 = vmatprep.subr.bf16.mxu0 %v3230_v59 }
 0xdd1   :  { %3395 = vmatpush1.bf16.msra.mxu0 %v3229_v32 }
 0xdd2   :  { %3396 = vmatprep.subr.bf16.mxu0 %v3232_v26 }
 0xdd5   :  { %3397 = vmatpush1.bf16.msra.mxu0 %v3231_v61 }
 0xdd6   :  { %3398 = vmatprep.subr.bf16.mxu0 %v3234_v29 }
 0xdd9   :  { %3399 = vmatpush1.bf16.msra.mxu0 %v3233_v35 }
 0xdda   :  { %3400 = vmatprep.subr.bf16.mxu0 %v3236_v56 }
 0xddd   :  { %3401 = vmatpush1.bf16.msra.mxu0 %v3235_v43 }
 0xdde   :  { %3402 = vmatprep.subr.bf16.mxu0 %v3238_v22 }
 0xde1   :  { %3403 = vmatpush1.bf16.msra.mxu0 %v3237_v27 }
 0xde2   :  { %3404 = vmatprep.subr.bf16.mxu0 %v3240_v48 }
 0xde5   :  { %3405 = vmatpush1.bf16.msra.mxu0 %v3239_v50 }
 0xde6   :  { %3406 = vmatprep.subr.bf16.mxu0 %v3242_v15 }
 0xde9   :  { %3407 = vmatpush1.bf16.msra.mxu0 %v3241_v14 }
 0xdea   :  { %3408 = vmatprep.subr.bf16.mxu0 %v3244_v55 }
 0xded   :  { %3409 = vmatpush1.bf16.msra.mxu0 %v3243_v47 }
 0xdee   :  { %3410 = vmatprep.subr.bf16.mxu0 %v3246_v39 }
 0xdf1   :  { %3411 = vmatpush1.bf16.msra.mxu0 %v3245_v28 }
 0xdf2   :  { %3412 = vmatprep.subr.bf16.mxu0 %v3248_v5 }
 0xdf5   :  { %3413 = vmatpush1.bf16.msra.mxu0 %v3247_v58 }
 0xdf8   :  { %3415 = vmatmul.mubr.bf16.vlgmr.msra.gmra.mrb[20].mxu0 %v3286_v52 }
 0xecb   :  { %v3416_v42 = vpop.f32.mrb[20].mxu0 }
 0xecc   :  { %v6305_v24 = vadd.f32 %v3416_v42, %v3293_v40  ;;  %v3418_v25 = vpop.f32.mrb[21].mxu0 }
 0xecd   :  { %v6306_v0 = vadd.f32 %v3418_v25, %v3297_v44  ;;  %v3420_v1 = vpop.f32.mrb[22].mxu0 }
 0xece   :  { %v3423_v18 = vmax.f32 %v6305_v24, 0.0  ;;  %v3421_v57 = vpop.f32.mrb[23].mxu0 }
 0xecf   :  { %v3424_v46 = vmax.f32 %v6306_v0, 0.0 }
 0xed1   :  { %v3427_v13 = vcombine.low %v3423_v18, %v3424_v46 }
 0xed3   :  { %v3434_v31 = vrot.slane %v3427_v13, %v7766_v21 }
 0xed5   :  { %v3435_v4 = vcombine.high %v3434_v31, %v3434_v31 }
 0xed6   :  { %6646 = dma.done.wait [#allocation4 + $0x1], 12288 }
 0xed7   :  { %6647 = vsyncadd [#allocation4 + $0x1], 4294955008  ;;  %v3479_v51 = vrot.slane %v3434_v31, %v7766_v21  ;;  %v3487_v45 = vrot.slane %v3435_v4, %v7766_v21  ;;  %3454 = sst [smem:[#allocation37]] %s6674_s27  ;;  %s3438_s16 = scalar_lea.hbm %s8257_s2, 113664 }
 0xed8   :  { %3456 = sst [smem:[#allocation37 + $0x1]] %s6674_s27  ;;  %s6694_s17 = smov [#allocation36]  }
 0xed9   :  { %v3480_v36 = vcombine.high %v3479_v51, %v3479_v51  ;;  %v3488_v23 = vcombine.high %v3487_v45, %v3487_v45  ;;  %v3489_v7 = vrot.slane %v3479_v51, 7  ;;  %v3491_v34 = vrot.slane %v3487_v45, 7  ;;  %3458 = sst [smem:[#allocation37 + $0x2]] %s6675_s28 }
 0xeda   :  { %3460 = sst [smem:[#allocation37 + $0x3]] %s6676_s29 }
 0xedb   :  { %v3490_v19 = vrot.slane %v3480_v36, 7  ;;  %v3492_v17 = vrot.slane %v3488_v23, 7  ;;  %v3497_v6 = vsel %vm131_vm0, 0.0, %v3489_v7  ;;  %v3499_v37 = vsel %vm131_vm0, 0.0, %v3491_v34  ;;  %3462 = sst [smem:[#allocation37 + $0x4]] %s6671_s11 }
 0xedc   :  { %3464 = sst [smem:[#allocation37 + $0x5]] %s6675_s28  ;;  %v7825_v54 = vsel %vm858_vm8, %v3497_v6, 0.0  ;;  %v7828_v9 = vsel %vm858_vm8, %v3499_v37, 0.0 }
 0xedd   :  { %v3498_v60 = vsel %vm131_vm0, 0.0, %v3490_v19  ;;  %v3500_v41 = vsel %vm131_vm0, 0.0, %v3492_v17  ;;  %3466 = sst [smem:[#allocation37 + $0x6]] %s6671_s11  ;;  %v3509_v44 = vrot.slane %v7825_v54, 1  ;;  %v3511_v24 = vrot.slane %v7828_v9, 1 }
 0xede   :  { %v7832_v33 = vsel %vm858_vm8, %v3498_v60, 0.0  ;;  %v7835_v20 = vsel %vm858_vm8, %v3500_v41, 0.0  ;;  %3468 = sst [smem:[#allocation37 + $0x7]] %s6676_s29  ;;  %v3513_v36 = vrot.slane %v7825_v54, 2  ;;  %v3515_v7 = vrot.slane %v7828_v9, 2 }
 0xedf   :  { %3470 = sst [smem:[#allocation37 + $0x8]] %s6678_s10  ;;  %v3517_v63 = vcombine.low %v7825_v54, %v7832_v33  ;;  %v3542_v2 = vcombine.low %v7828_v9, %v7835_v20  ;;  %v3510_v42 = vrot.slane %v7832_v33, 1  ;;  %v3512_v25 = vrot.slane %v7835_v20, 1 }
 0xee0   :  { %3472 = dma.general %s3438_s16, 12288, %s6784_s1, %s6679_s13, %s6694_s17, [#allocation37], %s6787_s9, 0   ;;  %v3514_v23 = vrot.slane %v7832_v33, 2  ;;  %v3516_v34 = vrot.slane %v7835_v20, 2 }
 0xee1   :  { %v3525_v62 = vrot.slane %v3517_v63, %v7766_v21  ;;  %v3550_v49 = vrot.slane %v3542_v2, %v7766_v21  ;;  %v3568_v59 = vld [vmem:[#allocation2 + $0x308] sm:$0xff]  ;;  %v3567_v32 = vld [vmem:[#allocation2 + $0x300] sm:$0xff]  ;;  %v3570_v26 = vld [vmem:[#allocation2 + $0x318] sm:$0xff]  ;;  %v3518_v18 = vcombine.low %v3509_v44, %v3510_v42  ;;  %v3543_v57 = vcombine.low %v3511_v24, %v3512_v25 }
 0xee2   :  { %3714 = vmatprep.subr.bf16.mxu1 %v3568_v59  ;;  %v3569_v35 = vld [vmem:[#allocation2 + $0x310] sm:$0xff]  ;;  %v3572_v56 = vld [vmem:[#allocation2 + $0x328] sm:$0xff]  ;;  %v3571_v43 = vld [vmem:[#allocation2 + $0x320] sm:$0xff]  ;;  %v3534_v37 = vcombine.low %v3513_v36, %v3514_v23  ;;  %v3559_v60 = vcombine.low %v3515_v7, %v3516_v34 }
 0xee3   :  { %v6258_v30 = vcombine.low %v3525_v62, %v3550_v49  ;;  %3715 = vmatpush1.bf16.msra.mxu1 %v3567_v32  ;;  %v3574_v22 = vld [vmem:[#allocation2 + $0x338] sm:$0xff]  ;;  %v3573_v27 = vld [vmem:[#allocation2 + $0x330] sm:$0xff]  ;;  %v3576_v48 = vld [vmem:[#allocation2 + $0x348] sm:$0xff]  ;;  %v3532_v31 = vrot.slane %v3518_v18, %v7766_v21  ;;  %v3557_v4 = vrot.slane %v3543_v57, %v7766_v21 }
 0xee4   :  { %3716 = vmatprep.subr.bf16.mxu1 %v3570_v26  ;;  %v3575_v50 = vld [vmem:[#allocation2 + $0x340] sm:$0xff]  ;;  %v3578_v15 = vld [vmem:[#allocation2 + $0x358] sm:$0xff]  ;;  %v3577_v14 = vld [vmem:[#allocation2 + $0x350] sm:$0xff]  ;;  %v3541_v63 = vrot.slane %v3534_v37, %v7766_v21  ;;  %v3566_v54 = vrot.slane %v3559_v60, %v7766_v21 }
 0xee5   :  { %v7849_v10 = vrot.slane %v6258_v30, %v7766_v21  ;;  %v3580_v55 = vld [vmem:[#allocation2 + $0x368] sm:$0xff]  ;;  %v3579_v47 = vld [vmem:[#allocation2 + $0x360] sm:$0xff]  ;;  %v3582_v39 = vld [vmem:[#allocation2 + $0x378] sm:$0xff]  ;;  %v6259_v19 = vcombine.low %v3532_v31, %v3557_v4 }
 0xee6   :  { %v3581_v28 = vld [vmem:[#allocation2 + $0x370] sm:$0xff]  ;;  %v3584_v5 = vld [vmem:[#allocation2 + $0x388] sm:$0xff]  ;;  %v3583_v58 = vld [vmem:[#allocation2 + $0x380] sm:$0xff]  ;;  %v7868_v2 = vcombine.low %v3541_v63, %v3566_v54 }
 0xee7   :  { %v3679_v61 = vcombine.high %v7849_v10, %v7849_v10  ;;  %3717 = vmatpush1.bf16.msra.mxu1 %v3569_v35  ;;  %v3586_v52 = vld [vmem:[#allocation2 + $0x398] sm:$0xff]  ;;  %v3585_v38 = vld [vmem:[#allocation2 + $0x390] sm:$0xff]  ;;  %v3588_v40 = vld [vmem:[#allocation2 + $0x3a8] sm:$0xff]  ;;  %v7864_v41 = vrot.slane %v6259_v19, %v7766_v21  ;;  %v3696_v30 = vpack.c.bf16 %v7849_v10, %v7849_v10 }
 0xee8   :  { %3718 = vmatprep.subr.bf16.mxu1 %v3572_v56  ;;  %v3587_v0 = vld [vmem:[#allocation2 + $0x3a0] sm:$0xff]  ;;  %v3590_v1 = vld [vmem:[#allocation2 + $0x3b8] sm:$0xff]  ;;  %v3589_v46 = vld [vmem:[#allocation2 + $0x3b0] sm:$0xff] }
 0xee9   :  { %v3697_v29 = vpack.c.bf16 %v3679_v61, %v3679_v61  ;;  %v3592_v13 = vld [vmem:[#allocation2 + $0x3c8] sm:$0xff]  ;;  %v3591_v51 = vld [vmem:[#allocation2 + $0x3c0] sm:$0xff]  ;;  %v3594_v45 = vld [vmem:[#allocation2 + $0x3d8] sm:$0xff]  ;;  %v3680_v20 = vcombine.high %v7864_v41, %v7864_v41  ;;  %v3698_v4 = vpack.c.bf16 %v7864_v41, %v7864_v41 }
 0xeea   :  { %v3593_v17 = vld [vmem:[#allocation2 + $0x3d0] sm:$0xff]  ;;  %v3596_v6 = vld [vmem:[#allocation2 + $0x3e8] sm:$0xff]  ;;  %v3595_v33 = vld [vmem:[#allocation2 + $0x3e0] sm:$0xff] }
 0xeeb   :  { %3746 = vmatprep.mubr.bf16.mxu1 %v3697_v29  ;;  %3719 = vmatpush1.bf16.msra.mxu1 %v3571_v43  ;;  %v3598_v9 = vld [vmem:[#allocation2 + $0x3f8] sm:$0xff]  ;;  %v3597_v62 = vld [vmem:[#allocation2 + $0x3f0] sm:$0xff]  ;;  %v3600_v49 = vld [vmem:[#allocation2 + $0x408] sm:$0xff]  ;;  %v3699_v59 = vpack.c.bf16 %v3680_v20, %v3680_v20 }
 0xeec   :  { %3720 = vmatprep.subr.bf16.mxu1 %v3574_v22  ;;  %v3599_v32 = vld [vmem:[#allocation2 + $0x400] sm:$0xff]  ;;  %v3602_v26 = vld [vmem:[#allocation2 + $0x418] sm:$0xff]  ;;  %v3601_v61 = vld [vmem:[#allocation2 + $0x410] sm:$0xff] }
 0xeed   :  { %v3604_v29 = vld [vmem:[#allocation2 + $0x428] sm:$0xff]  ;;  %v3603_v35 = vld [vmem:[#allocation2 + $0x420] sm:$0xff]  ;;  %v3606_v56 = vld [vmem:[#allocation2 + $0x438] sm:$0xff] }
 0xeee   :  { %v3605_v43 = vld [vmem:[#allocation2 + $0x430] sm:$0xff]  ;;  %v3608_v22 = vld [vmem:[#allocation2 + $0x448] sm:$0xff]  ;;  %v3607_v10 = vld [vmem:[#allocation2 + $0x440] sm:$0xff] }
 0xeef   :  { %3721 = vmatpush1.bf16.msra.mxu1 %v3573_v27  ;;  %v3610_v27 = vld [vmem:[#allocation2 + $0x458] sm:$0xff]  ;;  %v3624_v44 = vld [vmem:[#allocation2 + $0x4c8] sm:$0xff]  ;;  %v3623_v42 = vld [vmem:[#allocation2 + $0x4c0] sm:$0xff] }
 0xef0   :  { %3722 = vmatprep.subr.bf16.mxu1 %v3576_v48  ;;  %v3609_v48 = vld [vmem:[#allocation2 + $0x450] sm:$0xff]  ;;  %v3626_v24 = vld [vmem:[#allocation2 + $0x4d8] sm:$0xff]  ;;  %v3627_v18 = vld [vmem:[#allocation2 + $0x4e0] sm:$0xff] }
 0xef1   :  { %v3625_v25 = vld [vmem:[#allocation2 + $0x4d0] sm:$0xff]  ;;  %v3630_v57 = vld [vmem:[#allocation2 + $0x4f8] sm:$0xff]  ;;  %v3632_v31 = vld [vmem:[#allocation2 + $0x508] sm:$0xff] }
 0xef2   :  { %v3634_v36 = vld [vmem:[#allocation2 + $0x518] sm:$0xff]  ;;  %v3633_v23 = vld [vmem:[#allocation2 + $0x510] sm:$0xff]  ;;  %v3636_v7 = vld [vmem:[#allocation2 + $0x528] sm:$0xff] }
 0xef3   :  { %3723 = vmatpush1.bf16.msra.mxu1 %v3575_v50  ;;  %v3612_v50 = vld [vmem:[#allocation2 + $0x468] sm:$0xff]  ;;  %v3635_v34 = vld [vmem:[#allocation2 + $0x520] sm:$0xff]  ;;  %v3638_v19 = vld [vmem:[#allocation2 + $0x538] sm:$0xff] }
 0xef4   :  { %3724 = vmatprep.subr.bf16.mxu1 %v3578_v15  ;;  %v3611_v15 = vld [vmem:[#allocation2 + $0x460] sm:$0xff]  ;;  %v3642_v60 = vld [vmem:[#allocation2 + $0x558] sm:$0xff]  ;;  %v3641_v41 = vld [vmem:[#allocation2 + $0x550] sm:$0xff] }
 0xef5   :  { %v3639_v37 = vld [vmem:[#allocation2 + $0x540] sm:$0xff]  ;;  %v3644_v63 = vld [vmem:[#allocation2 + $0x568] sm:$0xff] }
 0xef6   :  { %v3643_v54 = vld [vmem:[#allocation2 + $0x560] sm:$0xff] }
 0xef7   :  { %3725 = vmatpush1.bf16.msra.mxu1 %v3577_v14  ;;  %v3614_v14 = vld [vmem:[#allocation2 + $0x478] sm:$0xff]  ;;  %v3647_v20 = vld [vmem:[#allocation2 + $0x580] sm:$0xff] }
 0xef8   :  { %3726 = vmatprep.subr.bf16.mxu1 %v3580_v55  ;;  %v3613_v55 = vld [vmem:[#allocation2 + $0x470] sm:$0xff] }
 0xefb   :  { %3727 = vmatpush1.bf16.msra.mxu1 %v3579_v47  ;;  %v3616_v47 = vld [vmem:[#allocation2 + $0x488] sm:$0xff] }
 0xefc   :  { %3728 = vmatprep.subr.bf16.mxu1 %v3582_v39  ;;  %v3615_v39 = vld [vmem:[#allocation2 + $0x480] sm:$0xff] }
 0xeff   :  { %3729 = vmatpush1.bf16.msra.mxu1 %v3581_v28  ;;  %v3618_v28 = vld [vmem:[#allocation2 + $0x498] sm:$0xff] }
 0xf00   :  { %3730 = vmatprep.subr.bf16.mxu1 %v3584_v5  ;;  %v3617_v5 = vld [vmem:[#allocation2 + $0x490] sm:$0xff] }
 0xf03   :  { %3731 = vmatpush1.bf16.msra.mxu1 %v3583_v58  ;;  %v3620_v58 = vld [vmem:[#allocation2 + $0x4a8] sm:$0xff] }
 0xf04   :  { %3732 = vmatprep.subr.bf16.mxu1 %v3586_v52  ;;  %v3619_v52 = vld [vmem:[#allocation2 + $0x4a0] sm:$0xff] }
 0xf07   :  { %3733 = vmatpush1.bf16.msra.mxu1 %v3585_v38  ;;  %v3622_v38 = vld [vmem:[#allocation2 + $0x4b8] sm:$0xff] }
 0xf08   :  { %3734 = vmatprep.subr.bf16.mxu1 %v3588_v40  ;;  %v3621_v40 = vld [vmem:[#allocation2 + $0x4b0] sm:$0xff] }
 0xf0b   :  { %3735 = vmatpush1.bf16.msra.mxu1 %v3587_v0  ;;  %v3628_v0 = vld [vmem:[#allocation2 + $0x4e8] sm:$0xff] }
 0xf0c   :  { %3736 = vmatprep.subr.bf16.mxu1 %v3590_v1  ;;  %v7876_v1 = vrot.slane %v7868_v2, %v7766_v21  ;;  %v3648_v2 = vld [vmem:[#allocation2 + $0x588] sm:$0xff] }
 0xf0f   :  { %3737 = vmatpush1.bf16.msra.mxu1 %v3589_v46  ;;  %v3689_v46 = vcombine.high %v7876_v1, %v7876_v1 }
 0xf10   :  { %3738 = vmatprep.subr.bf16.mxu1 %v3592_v13  ;;  %v3629_v13 = vld [vmem:[#allocation2 + $0x4f0] sm:$0xff] }
 0xf13   :  { %3739 = vmatpush1.bf16.msra.mxu1 %v3591_v51  ;;  %v3701_v51 = vpack.c.bf16 %v3689_v46, %v3689_v46 }
 0xf14   :  { %3740 = vmatprep.subr.bf16.mxu1 %v3594_v45  ;;  %v3631_v45 = vld [vmem:[#allocation2 + $0x500] sm:$0xff] }
 0xf17   :  { %3741 = vmatpush1.bf16.msra.mxu1 %v3593_v17  ;;  %v3637_v17 = vld [vmem:[#allocation2 + $0x530] sm:$0xff] }
 0xf18   :  { %3742 = vmatprep.subr.bf16.mxu1 %v3596_v6  ;;  %v3640_v6 = vld [vmem:[#allocation2 + $0x548] sm:$0xff] }
 0xf1b   :  { %3743 = vmatpush1.bf16.msra.mxu1 %v3595_v33  ;;  %v3646_v33 = vld [vmem:[#allocation2 + $0x578] sm:$0xff] }
 0xf1c   :  { %3744 = vmatprep.subr.bf16.mxu1 %v3598_v9  ;;  %v3645_v9 = vld [vmem:[#allocation2 + $0x570] sm:$0xff] }
 0xf1f   :  { %3745 = vmatpush1.bf16.msra.mxu1 %v3597_v62  ;;  %v3650_v62 = vld [vmem:[#allocation2 + $0x598] sm:$0xff] }
 0xf20   :  { %3755 = vmatprep.subr.bf16.mxu1 %v3600_v49  ;;  %v3649_v49 = vld [vmem:[#allocation2 + $0x590] sm:$0xff] }
 0xf22   :  { %3747 = vmatmul.mubr.bf16.vlgmr.msra.gmra.mrb[20].mxu1 %v3696_v30  ;;  %v3652_v30 = vld [vmem:[#allocation2 + $0x5a8] sm:$0xff] }
 0xf23   :  { %3756 = vmatpush1.bf16.msra.mxu1 %v3599_v32  ;;  %3787 = vmatprep.mubr.bf16.mxu1 %v3699_v59  ;;  %v3651_v59 = vld [vmem:[#allocation2 + $0x5a0] sm:$0xff]  ;;  %v3654_v32 = vld [vmem:[#allocation2 + $0x5b8] sm:$0xff] }
 0xf24   :  { %3757 = vmatprep.subr.bf16.mxu1 %v3602_v26  ;;  %v3653_v26 = vld [vmem:[#allocation2 + $0x5b0] sm:$0xff] }
 0xf27   :  { %3758 = vmatpush1.bf16.msra.mxu1 %v3601_v61  ;;  %v3656_v61 = vld [vmem:[#allocation2 + $0x5c8] sm:$0xff] }
 0xf28   :  { %3759 = vmatprep.subr.bf16.mxu1 %v3604_v29  ;;  %v3655_v29 = vld [vmem:[#allocation2 + $0x5c0] sm:$0xff] }
 0xf2b   :  { %3760 = vmatpush1.bf16.msra.mxu1 %v3603_v35  ;;  %v3658_v35 = vld [vmem:[#allocation2 + $0x5d8] sm:$0xff] }
 0xf2c   :  { %3761 = vmatprep.subr.bf16.mxu1 %v3606_v56  ;;  %v3657_v56 = vld [vmem:[#allocation2 + $0x5d0] sm:$0xff] }
 0xf2f   :  { %3762 = vmatpush1.bf16.msra.mxu1 %v3605_v43  ;;  %v3660_v43 = vld [vmem:[#allocation2 + $0x5e8] sm:$0xff] }
 0xf30   :  { %3763 = vmatprep.subr.bf16.mxu1 %v3608_v22  ;;  %v3659_v22 = vld [vmem:[#allocation2 + $0x5e0] sm:$0xff] }
 0xf33   :  { %3764 = vmatpush1.bf16.msra.mxu1 %v3607_v10  ;;  %v3662_v10 = vld [vmem:[#allocation2 + $0x5f8] sm:$0xff] }
 0xf34   :  { %3765 = vmatprep.subr.bf16.mxu1 %v3610_v27  ;;  %v3661_v27 = vld [vmem:[#allocation2 + $0x5f0] sm:$0xff] }
 0xf37   :  { %3766 = vmatpush1.bf16.msra.mxu1 %v3609_v48  ;;  %v3700_v48 = vpack.c.bf16 %v7876_v1, %v7876_v1 }
 0xf38   :  { %3767 = vmatprep.subr.bf16.mxu1 %v3612_v50  ;;  %v3702_v50 = vld [vmem:[#allocation8 + $0x12] sm:$0x3] }
 0xf3b   :  { %3768 = vmatpush1.bf16.msra.mxu1 %v3611_v15  ;;  %v3707_v15 = vrot.slane %v3702_v50, %v6873_v12 }
 0xf3c   :  { %3769 = vmatprep.subr.bf16.mxu1 %v3614_v14  ;;  %v3711_v14 = vrot.slane %v3702_v50, %v6876_v16 }
 0xf3f   :  { %3770 = vmatpush1.bf16.msra.mxu1 %v3613_v55 }
 0xf40   :  { %3771 = vmatprep.subr.bf16.mxu1 %v3616_v47 }
 0xf43   :  { %3772 = vmatpush1.bf16.msra.mxu1 %v3615_v39 }
 0xf44   :  { %3773 = vmatprep.subr.bf16.mxu1 %v3618_v28 }
 0xf47   :  { %3774 = vmatpush1.bf16.msra.mxu1 %v3617_v5 }
 0xf48   :  { %3775 = vmatprep.subr.bf16.mxu1 %v3620_v58 }
 0xf4b   :  { %3776 = vmatpush1.bf16.msra.mxu1 %v3619_v52 }
 0xf4c   :  { %3777 = vmatprep.subr.bf16.mxu1 %v3622_v38 }
 0xf4f   :  { %3778 = vmatpush1.bf16.msra.mxu1 %v3621_v40 }
 0xf50   :  { %3779 = vmatprep.subr.bf16.mxu1 %v3624_v44 }
 0xf53   :  { %3780 = vmatpush1.bf16.msra.mxu1 %v3623_v42 }
 0xf54   :  { %3781 = vmatprep.subr.bf16.mxu1 %v3626_v24 }
 0xf57   :  { %3782 = vmatpush1.bf16.msra.mxu1 %v3625_v25 }
 0xf58   :  { %3783 = vmatprep.subr.bf16.mxu1 %v3628_v0 }
 0xf5b   :  { %3784 = vmatpush1.bf16.msra.mxu1 %v3627_v18 }
 0xf5c   :  { %3785 = vmatprep.subr.bf16.mxu1 %v3630_v57 }
 0xf5f   :  { %3786 = vmatpush1.bf16.msra.mxu1 %v3629_v13 }
 0xf60   :  { %3796 = vmatprep.subr.bf16.mxu1 %v3632_v31 }
 0xf62   :  { %3788 = vmatmul.mubr.bf16.vlgmr.msra.gmra.mrb[20].mxu1 %v3698_v4 }
 0xf63   :  { %3797 = vmatpush1.bf16.msra.mxu1 %v3631_v45  ;;  %3828 = vmatprep.mubr.bf16.mxu1 %v3701_v51 }
 0xf64   :  { %3798 = vmatprep.subr.bf16.mxu1 %v3634_v36 }
 0xf67   :  { %3799 = vmatpush1.bf16.msra.mxu1 %v3633_v23 }
 0xf68   :  { %3800 = vmatprep.subr.bf16.mxu1 %v3636_v7 }
 0xf6b   :  { %3801 = vmatpush1.bf16.msra.mxu1 %v3635_v34 }
 0xf6c   :  { %3802 = vmatprep.subr.bf16.mxu1 %v3638_v19 }
 0xf6f   :  { %3803 = vmatpush1.bf16.msra.mxu1 %v3637_v17 }
 0xf70   :  { %3804 = vmatprep.subr.bf16.mxu1 %v3640_v6 }
 0xf73   :  { %3805 = vmatpush1.bf16.msra.mxu1 %v3639_v37 }
 0xf74   :  { %3806 = vmatprep.subr.bf16.mxu1 %v3642_v60 }
 0xf77   :  { %3807 = vmatpush1.bf16.msra.mxu1 %v3641_v41 }
 0xf78   :  { %3808 = vmatprep.subr.bf16.mxu1 %v3644_v63 }
 0xf7b   :  { %3809 = vmatpush1.bf16.msra.mxu1 %v3643_v54 }
 0xf7c   :  { %3810 = vmatprep.subr.bf16.mxu1 %v3646_v33 }
 0xf7f   :  { %3811 = vmatpush1.bf16.msra.mxu1 %v3645_v9 }
 0xf80   :  { %3812 = vmatprep.subr.bf16.mxu1 %v3648_v2 }
 0xf83   :  { %3813 = vmatpush1.bf16.msra.mxu1 %v3647_v20 }
 0xf84   :  { %3814 = vmatprep.subr.bf16.mxu1 %v3650_v62 }
 0xf87   :  { %3815 = vmatpush1.bf16.msra.mxu1 %v3649_v49 }
 0xf88   :  { %3816 = vmatprep.subr.bf16.mxu1 %v3652_v30 }
 0xf8b   :  { %3817 = vmatpush1.bf16.msra.mxu1 %v3651_v59 }
 0xf8c   :  { %3818 = vmatprep.subr.bf16.mxu1 %v3654_v32 }
 0xf8f   :  { %3819 = vmatpush1.bf16.msra.mxu1 %v3653_v26 }
 0xf90   :  { %3820 = vmatprep.subr.bf16.mxu1 %v3656_v61 }
 0xf93   :  { %3821 = vmatpush1.bf16.msra.mxu1 %v3655_v29 }
 0xf94   :  { %3822 = vmatprep.subr.bf16.mxu1 %v3658_v35 }
 0xf97   :  { %3823 = vmatpush1.bf16.msra.mxu1 %v3657_v56 }
 0xf98   :  { %3824 = vmatprep.subr.bf16.mxu1 %v3660_v43 }
 0xf9b   :  { %3825 = vmatpush1.bf16.msra.mxu1 %v3659_v22 }
 0xf9c   :  { %3826 = vmatprep.subr.bf16.mxu1 %v3662_v10 }
 0xf9f   :  { %3827 = vmatpush1.bf16.msra.mxu1 %v3661_v27 }
 0xfa2   :  { %3829 = vmatmul.mubr.bf16.vlgmr.msra.gmra.mrb[20].mxu1 %v3700_v48 }
0x1075   :  { %v3830_v55 = vpop.f32.mrb[20].mxu1 }
0x1076   :  { %v6307_v47 = vadd.f32 %v3830_v55, %v3707_v15  ;;  %v3832_v39 = vpop.f32.mrb[21].mxu1 }
0x1077   :  { %v6308_v28 = vadd.f32 %v3832_v39, %v3711_v14  ;;  %v3834_v5 = vpop.f32.mrb[22].mxu1 }
0x1078   :  { %v3837_v58 = vmax.f32 %v6307_v47, 0.0  ;;  %v3835_v52 = vpop.f32.mrb[23].mxu1 }
0x1079   :  { %v3838_v38 = vmax.f32 %v6308_v28, 0.0 }
0x107b   :  { %v3841_v40 = vcombine.low %v3837_v58, %v3838_v38 }
0x107d   :  { %v3848_v44 = vrot.slane %v3841_v40, %v7766_v21 }
0x107f   :  { %v3849_v42 = vcombine.high %v3848_v44, %v3848_v44 }
0x1080   :  { %6648 = dma.done.wait [#allocation4], 12288 }
0x1081   :  { %6649 = vsyncadd [#allocation4], 4294955008  ;;  %v3893_v24 = vrot.slane %v3848_v44, %v7766_v21  ;;  %v3901_v25 = vrot.slane %v3849_v42, %v7766_v21  ;;  %3868 = sst [smem:[#allocation39]] %s6674_s27  ;;  %s3852_s21 = scalar_lea.hbm %s8257_s2, 125952 }
0x1082   :  { %3870 = sst [smem:[#allocation39 + $0x1]] %s6674_s27  ;;  %s6695_s23 = smov [#allocation38]  }
0x1083   :  { %v3894_v0 = vcombine.high %v3893_v24, %v3893_v24  ;;  %v3902_v1 = vcombine.high %v3901_v25, %v3901_v25  ;;  %v3903_v18 = vrot.slane %v3893_v24, 7  ;;  %v3905_v57 = vrot.slane %v3901_v25, 7  ;;  %3872 = sst [smem:[#allocation39 + $0x2]] %s6675_s28 }
0x1084   :  { %3874 = sst [smem:[#allocation39 + $0x3]] %s6676_s29 }
0x1085   :  { %v3904_v46 = vrot.slane %v3894_v0, 7  ;;  %v3906_v13 = vrot.slane %v3902_v1, 7  ;;  %v3911_v31 = vsel %vm131_vm0, 0.0, %v3903_v18  ;;  %v3913_v4 = vsel %vm131_vm0, 0.0, %v3905_v57  ;;  %3876 = sst [smem:[#allocation39 + $0x4]] %s6671_s11 }
0x1086   :  { %3878 = sst [smem:[#allocation39 + $0x5]] %s6675_s28  ;;  %v7903_v36 = vsel %vm858_vm8, %v3911_v31, 0.0  ;;  %v7906_v23 = vsel %vm858_vm8, %v3913_v4, 0.0 }
0x1087   :  { %v3912_v51 = vsel %vm131_vm0, 0.0, %v3904_v46  ;;  %v3914_v45 = vsel %vm131_vm0, 0.0, %v3906_v13  ;;  %3880 = sst [smem:[#allocation39 + $0x6]] %s6671_s11  ;;  %v3923_v14 = vrot.slane %v7903_v36, 1  ;;  %v3925_v47 = vrot.slane %v7906_v23, 1 }
0x1088   :  { %v7910_v7 = vsel %vm858_vm8, %v3912_v51, 0.0  ;;  %v7913_v34 = vsel %vm858_vm8, %v3914_v45, 0.0  ;;  %3882 = sst [smem:[#allocation39 + $0x7]] %s6676_s29  ;;  %v3927_v0 = vrot.slane %v7903_v36, 2  ;;  %v3929_v18 = vrot.slane %v7906_v23, 2 }
0x1089   :  { %3884 = sst [smem:[#allocation39 + $0x8]] %s6678_s10  ;;  %v3931_v19 = vcombine.low %v7903_v36, %v7910_v7  ;;  %v3956_v17 = vcombine.low %v7906_v23, %v7913_v34  ;;  %v3924_v55 = vrot.slane %v7910_v7, 1  ;;  %v3926_v39 = vrot.slane %v7913_v34, 1 }
0x108a   :  { %3886 = dma.general %s3852_s21, 8192, %s6826_s18, %s6682_s22, %s6695_s23, [#allocation39], %s6787_s9, 0   ;;  %v3928_v1 = vrot.slane %v7910_v7, 2  ;;  %v3930_v57 = vrot.slane %v7913_v34, 2 }
0x108b   :  { %v3939_v6 = vrot.slane %v3931_v19, %v7766_v21  ;;  %v3964_v37 = vrot.slane %v3956_v17, %v7766_v21  ;;  %v3982_v63 = vld [vmem:[#allocation2 + $0x8] sm:$0xff]  ;;  %v3981_v54 = vld [vmem:[#allocation2] sm:$0xff]  ;;  %v3984_v33 = vld [vmem:[#allocation2 + $0x18] sm:$0xff]  ;;  %v3932_v58 = vcombine.low %v3923_v14, %v3924_v55  ;;  %v3957_v52 = vcombine.low %v3925_v47, %v3926_v39 }
0x108c   :  { %4128 = vmatprep.subr.bf16.mxu0 %v3982_v63  ;;  %v3983_v20 = vld [vmem:[#allocation2 + $0x10] sm:$0xff]  ;;  %v3986_v62 = vld [vmem:[#allocation2 + $0x28] sm:$0xff]  ;;  %v3985_v49 = vld [vmem:[#allocation2 + $0x20] sm:$0xff]  ;;  %v3948_v4 = vcombine.low %v3927_v0, %v3928_v1  ;;  %v3973_v51 = vcombine.low %v3929_v18, %v3930_v57 }
0x108d   :  { %v6262_v60 = vcombine.low %v3939_v6, %v3964_v37  ;;  %4129 = vmatpush1.bf16.msra.mxu0 %v3981_v54  ;;  %v3988_v30 = vld [vmem:[#allocation2 + $0x38] sm:$0xff]  ;;  %v3987_v59 = vld [vmem:[#allocation2 + $0x30] sm:$0xff]  ;;  %v3990_v32 = vld [vmem:[#allocation2 + $0x48] sm:$0xff]  ;;  %v3946_v44 = vrot.slane %v3932_v58, %v7766_v21  ;;  %v3971_v42 = vrot.slane %v3957_v52, %v7766_v21 }
0x108e   :  { %4130 = vmatprep.subr.bf16.mxu0 %v3984_v33  ;;  %v3989_v26 = vld [vmem:[#allocation2 + $0x40] sm:$0xff]  ;;  %v3992_v61 = vld [vmem:[#allocation2 + $0x58] sm:$0xff]  ;;  %v3991_v29 = vld [vmem:[#allocation2 + $0x50] sm:$0xff]  ;;  %v3955_v19 = vrot.slane %v3948_v4, %v7766_v21  ;;  %v3980_v36 = vrot.slane %v3973_v51, %v7766_v21 }
0x108f   :  { %v7927_v41 = vrot.slane %v6262_v60, %v7766_v21  ;;  %v3994_v35 = vld [vmem:[#allocation2 + $0x68] sm:$0xff]  ;;  %v3993_v56 = vld [vmem:[#allocation2 + $0x60] sm:$0xff]  ;;  %v3996_v43 = vld [vmem:[#allocation2 + $0x78] sm:$0xff]  ;;  %v6263_v46 = vcombine.low %v3946_v44, %v3971_v42 }
0x1090   :  { %v3995_v22 = vld [vmem:[#allocation2 + $0x70] sm:$0xff]  ;;  %v3998_v10 = vld [vmem:[#allocation2 + $0x88] sm:$0xff]  ;;  %v3997_v27 = vld [vmem:[#allocation2 + $0x80] sm:$0xff]  ;;  %v7946_v17 = vcombine.low %v3955_v19, %v3980_v36 }
0x1091   :  { %v4093_v9 = vcombine.high %v7927_v41, %v7927_v41  ;;  %4131 = vmatpush1.bf16.msra.mxu0 %v3983_v20  ;;  %v4000_v48 = vld [vmem:[#allocation2 + $0x98] sm:$0xff]  ;;  %v3999_v50 = vld [vmem:[#allocation2 + $0x90] sm:$0xff]  ;;  %v4002_v15 = vld [vmem:[#allocation2 + $0xa8] sm:$0xff]  ;;  %v7942_v45 = vrot.slane %v6263_v46, %v7766_v21  ;;  %v4110_v60 = vpack.c.bf16 %v7927_v41, %v7927_v41 }
0x1092   :  { %4132 = vmatprep.subr.bf16.mxu0 %v3986_v62  ;;  %v4001_v28 = vld [vmem:[#allocation2 + $0xa0] sm:$0xff]  ;;  %v4004_v5 = vld [vmem:[#allocation2 + $0xb8] sm:$0xff]  ;;  %v4003_v38 = vld [vmem:[#allocation2 + $0xb0] sm:$0xff] }
0x1093   :  { %v4111_v2 = vpack.c.bf16 %v4093_v9, %v4093_v9  ;;  %v4006_v40 = vld [vmem:[#allocation2 + $0xc8] sm:$0xff]  ;;  %v4005_v24 = vld [vmem:[#allocation2 + $0xc0] sm:$0xff]  ;;  %v4008_v25 = vld [vmem:[#allocation2 + $0xd8] sm:$0xff]  ;;  %v4094_v34 = vcombine.high %v7942_v45, %v7942_v45  ;;  %v4112_v42 = vpack.c.bf16 %v7942_v45, %v7942_v45 }
0x1094   :  { %v4007_v13 = vld [vmem:[#allocation2 + $0xd0] sm:$0xff]  ;;  %v4010_v31 = vld [vmem:[#allocation2 + $0xe8] sm:$0xff]  ;;  %v4009_v7 = vld [vmem:[#allocation2 + $0xe0] sm:$0xff] }
0x1095   :  { %4160 = vmatprep.mubr.bf16.mxu0 %v4111_v2  ;;  %4133 = vmatpush1.bf16.msra.mxu0 %v3985_v49  ;;  %v4012_v23 = vld [vmem:[#allocation2 + $0xf8] sm:$0xff]  ;;  %v4011_v6 = vld [vmem:[#allocation2 + $0xf0] sm:$0xff]  ;;  %v4014_v37 = vld [vmem:[#allocation2 + $0x108] sm:$0xff]  ;;  %v4113_v63 = vpack.c.bf16 %v4094_v34, %v4094_v34 }
0x1096   :  { %4134 = vmatprep.subr.bf16.mxu0 %v3988_v30  ;;  %v4013_v54 = vld [vmem:[#allocation2 + $0x100] sm:$0xff]  ;;  %v4016_v33 = vld [vmem:[#allocation2 + $0x118] sm:$0xff]  ;;  %v4015_v9 = vld [vmem:[#allocation2 + $0x110] sm:$0xff] }
0x1097   :  { %v4018_v2 = vld [vmem:[#allocation2 + $0x128] sm:$0xff]  ;;  %v4017_v20 = vld [vmem:[#allocation2 + $0x120] sm:$0xff]  ;;  %v4020_v62 = vld [vmem:[#allocation2 + $0x138] sm:$0xff] }
0x1098   :  { %v4019_v49 = vld [vmem:[#allocation2 + $0x130] sm:$0xff]  ;;  %v4022_v30 = vld [vmem:[#allocation2 + $0x148] sm:$0xff]  ;;  %v4021_v41 = vld [vmem:[#allocation2 + $0x140] sm:$0xff] }
0x1099   :  { %4135 = vmatpush1.bf16.msra.mxu0 %v3987_v59  ;;  %v4024_v59 = vld [vmem:[#allocation2 + $0x158] sm:$0xff]  ;;  %v4038_v14 = vld [vmem:[#allocation2 + $0x1c8] sm:$0xff]  ;;  %v4037_v55 = vld [vmem:[#allocation2 + $0x1c0] sm:$0xff] }
0x109a   :  { %4136 = vmatprep.subr.bf16.mxu0 %v3990_v32  ;;  %v4023_v32 = vld [vmem:[#allocation2 + $0x150] sm:$0xff]  ;;  %v4040_v47 = vld [vmem:[#allocation2 + $0x1d8] sm:$0xff]  ;;  %v4041_v58 = vld [vmem:[#allocation2 + $0x1e0] sm:$0xff] }
0x109b   :  { %v4039_v39 = vld [vmem:[#allocation2 + $0x1d0] sm:$0xff]  ;;  %v4044_v52 = vld [vmem:[#allocation2 + $0x1f8] sm:$0xff]  ;;  %v4046_v44 = vld [vmem:[#allocation2 + $0x208] sm:$0xff] }
0x109c   :  { %v4048_v0 = vld [vmem:[#allocation2 + $0x218] sm:$0xff]  ;;  %v4047_v1 = vld [vmem:[#allocation2 + $0x210] sm:$0xff]  ;;  %v4050_v18 = vld [vmem:[#allocation2 + $0x228] sm:$0xff] }
0x109d   :  { %4137 = vmatpush1.bf16.msra.mxu0 %v3989_v26  ;;  %v4026_v26 = vld [vmem:[#allocation2 + $0x168] sm:$0xff]  ;;  %v4049_v57 = vld [vmem:[#allocation2 + $0x220] sm:$0xff]  ;;  %v4052_v46 = vld [vmem:[#allocation2 + $0x238] sm:$0xff] }
0x109e   :  { %4138 = vmatprep.subr.bf16.mxu0 %v3992_v61  ;;  %v4025_v61 = vld [vmem:[#allocation2 + $0x160] sm:$0xff]  ;;  %v4056_v51 = vld [vmem:[#allocation2 + $0x258] sm:$0xff]  ;;  %v4055_v45 = vld [vmem:[#allocation2 + $0x250] sm:$0xff] }
0x109f   :  { %v4053_v4 = vld [vmem:[#allocation2 + $0x240] sm:$0xff]  ;;  %v4058_v19 = vld [vmem:[#allocation2 + $0x268] sm:$0xff] }
0x10a0   :  { %v4057_v36 = vld [vmem:[#allocation2 + $0x260] sm:$0xff] }
0x10a1   :  { %4139 = vmatpush1.bf16.msra.mxu0 %v3991_v29  ;;  %v4028_v29 = vld [vmem:[#allocation2 + $0x178] sm:$0xff]  ;;  %v4061_v34 = vld [vmem:[#allocation2 + $0x280] sm:$0xff] }
0x10a2   :  { %4140 = vmatprep.subr.bf16.mxu0 %v3994_v35  ;;  %v4027_v35 = vld [vmem:[#allocation2 + $0x170] sm:$0xff] }
0x10a5   :  { %4141 = vmatpush1.bf16.msra.mxu0 %v3993_v56  ;;  %v4030_v56 = vld [vmem:[#allocation2 + $0x188] sm:$0xff] }
0x10a6   :  { %4142 = vmatprep.subr.bf16.mxu0 %v3996_v43  ;;  %v4029_v43 = vld [vmem:[#allocation2 + $0x180] sm:$0xff] }
0x10a9   :  { %4143 = vmatpush1.bf16.msra.mxu0 %v3995_v22  ;;  %v4032_v22 = vld [vmem:[#allocation2 + $0x198] sm:$0xff] }
0x10aa   :  { %4144 = vmatprep.subr.bf16.mxu0 %v3998_v10  ;;  %v4031_v10 = vld [vmem:[#allocation2 + $0x190] sm:$0xff] }
0x10ad   :  { %4145 = vmatpush1.bf16.msra.mxu0 %v3997_v27  ;;  %v4034_v27 = vld [vmem:[#allocation2 + $0x1a8] sm:$0xff] }
0x10ae   :  { %4146 = vmatprep.subr.bf16.mxu0 %v4000_v48  ;;  %v4033_v48 = vld [vmem:[#allocation2 + $0x1a0] sm:$0xff] }
0x10b1   :  { %4147 = vmatpush1.bf16.msra.mxu0 %v3999_v50  ;;  %v4036_v50 = vld [vmem:[#allocation2 + $0x1b8] sm:$0xff] }
0x10b2   :  { %4148 = vmatprep.subr.bf16.mxu0 %v4002_v15  ;;  %v4035_v15 = vld [vmem:[#allocation2 + $0x1b0] sm:$0xff] }
0x10b5   :  { %4149 = vmatpush1.bf16.msra.mxu0 %v4001_v28  ;;  %v4042_v28 = vld [vmem:[#allocation2 + $0x1e8] sm:$0xff] }
0x10b6   :  { %4150 = vmatprep.subr.bf16.mxu0 %v4004_v5  ;;  %v7954_v5 = vrot.slane %v7946_v17, %v7766_v21  ;;  %v4062_v17 = vld [vmem:[#allocation2 + $0x288] sm:$0xff] }
0x10b9   :  { %4151 = vmatpush1.bf16.msra.mxu0 %v4003_v38  ;;  %v4103_v38 = vcombine.high %v7954_v5, %v7954_v5 }
0x10ba   :  { %4152 = vmatprep.subr.bf16.mxu0 %v4006_v40  ;;  %v4043_v40 = vld [vmem:[#allocation2 + $0x1f0] sm:$0xff] }
0x10bd   :  { %4153 = vmatpush1.bf16.msra.mxu0 %v4005_v24  ;;  %v4115_v24 = vpack.c.bf16 %v4103_v38, %v4103_v38 }
0x10be   :  { %4154 = vmatprep.subr.bf16.mxu0 %v4008_v25  ;;  %v4045_v25 = vld [vmem:[#allocation2 + $0x200] sm:$0xff] }
0x10c1   :  { %4155 = vmatpush1.bf16.msra.mxu0 %v4007_v13  ;;  %v4051_v13 = vld [vmem:[#allocation2 + $0x230] sm:$0xff] }
0x10c2   :  { %4156 = vmatprep.subr.bf16.mxu0 %v4010_v31  ;;  %v4054_v31 = vld [vmem:[#allocation2 + $0x248] sm:$0xff] }
0x10c5   :  { %4157 = vmatpush1.bf16.msra.mxu0 %v4009_v7  ;;  %v4060_v7 = vld [vmem:[#allocation2 + $0x278] sm:$0xff] }
0x10c6   :  { %4158 = vmatprep.subr.bf16.mxu0 %v4012_v23  ;;  %v4059_v23 = vld [vmem:[#allocation2 + $0x270] sm:$0xff] }
0x10c9   :  { %4159 = vmatpush1.bf16.msra.mxu0 %v4011_v6  ;;  %v4064_v6 = vld [vmem:[#allocation2 + $0x298] sm:$0xff] }
0x10ca   :  { %4169 = vmatprep.subr.bf16.mxu0 %v4014_v37  ;;  %v4063_v37 = vld [vmem:[#allocation2 + $0x290] sm:$0xff] }
0x10cc   :  { %4161 = vmatmul.mubr.bf16.vlgmr.msra.gmra.mrb[24].mxu0 %v4110_v60  ;;  %v4066_v60 = vld [vmem:[#allocation2 + $0x2a8] sm:$0xff] }
0x10cd   :  { %4170 = vmatpush1.bf16.msra.mxu0 %v4013_v54  ;;  %4201 = vmatprep.mubr.bf16.mxu0 %v4113_v63  ;;  %v4065_v63 = vld [vmem:[#allocation2 + $0x2a0] sm:$0xff]  ;;  %v4068_v54 = vld [vmem:[#allocation2 + $0x2b8] sm:$0xff] }
0x10ce   :  { %4171 = vmatprep.subr.bf16.mxu0 %v4016_v33  ;;  %v4067_v33 = vld [vmem:[#allocation2 + $0x2b0] sm:$0xff] }
0x10d1   :  { %4172 = vmatpush1.bf16.msra.mxu0 %v4015_v9  ;;  %v4070_v9 = vld [vmem:[#allocation2 + $0x2c8] sm:$0xff] }
0x10d2   :  { %4173 = vmatprep.subr.bf16.mxu0 %v4018_v2  ;;  %v4069_v2 = vld [vmem:[#allocation2 + $0x2c0] sm:$0xff] }
0x10d5   :  { %4174 = vmatpush1.bf16.msra.mxu0 %v4017_v20  ;;  %v4072_v20 = vld [vmem:[#allocation2 + $0x2d8] sm:$0xff] }
0x10d6   :  { %4175 = vmatprep.subr.bf16.mxu0 %v4020_v62  ;;  %v4071_v62 = vld [vmem:[#allocation2 + $0x2d0] sm:$0xff] }
0x10d9   :  { %4176 = vmatpush1.bf16.msra.mxu0 %v4019_v49  ;;  %v4074_v49 = vld [vmem:[#allocation2 + $0x2e8] sm:$0xff] }
0x10da   :  { %4177 = vmatprep.subr.bf16.mxu0 %v4022_v30  ;;  %v4073_v30 = vld [vmem:[#allocation2 + $0x2e0] sm:$0xff] }
0x10dd   :  { %4178 = vmatpush1.bf16.msra.mxu0 %v4021_v41  ;;  %v4076_v41 = vld [vmem:[#allocation2 + $0x2f8] sm:$0xff] }
0x10de   :  { %4179 = vmatprep.subr.bf16.mxu0 %v4024_v59  ;;  %v4075_v59 = vld [vmem:[#allocation2 + $0x2f0] sm:$0xff] }
0x10e1   :  { %4180 = vmatpush1.bf16.msra.mxu0 %v4023_v32  ;;  %v4114_v32 = vpack.c.bf16 %v7954_v5, %v7954_v5 }
0x10e2   :  { %4181 = vmatprep.subr.bf16.mxu0 %v4026_v26  ;;  %v4116_v26 = vld [vmem:[#allocation8 + $0x14] sm:$0x3] }
0x10e5   :  { %4182 = vmatpush1.bf16.msra.mxu0 %v4025_v61  ;;  %v4121_v61 = vrot.slane %v4116_v26, %v6873_v12 }
0x10e6   :  { %4183 = vmatprep.subr.bf16.mxu0 %v4028_v29  ;;  %v4125_v29 = vrot.slane %v4116_v26, %v6876_v16 }
0x10e9   :  { %4184 = vmatpush1.bf16.msra.mxu0 %v4027_v35 }
0x10ea   :  { %4185 = vmatprep.subr.bf16.mxu0 %v4030_v56 }
0x10ed   :  { %4186 = vmatpush1.bf16.msra.mxu0 %v4029_v43 }
0x10ee   :  { %4187 = vmatprep.subr.bf16.mxu0 %v4032_v22 }
0x10f1   :  { %4188 = vmatpush1.bf16.msra.mxu0 %v4031_v10 }
0x10f2   :  { %4189 = vmatprep.subr.bf16.mxu0 %v4034_v27 }
0x10f5   :  { %4190 = vmatpush1.bf16.msra.mxu0 %v4033_v48 }
0x10f6   :  { %4191 = vmatprep.subr.bf16.mxu0 %v4036_v50 }
0x10f9   :  { %4192 = vmatpush1.bf16.msra.mxu0 %v4035_v15 }
0x10fa   :  { %4193 = vmatprep.subr.bf16.mxu0 %v4038_v14 }
0x10fd   :  { %4194 = vmatpush1.bf16.msra.mxu0 %v4037_v55 }
0x10fe   :  { %4195 = vmatprep.subr.bf16.mxu0 %v4040_v47 }
0x1101   :  { %4196 = vmatpush1.bf16.msra.mxu0 %v4039_v39 }
0x1102   :  { %4197 = vmatprep.subr.bf16.mxu0 %v4042_v28 }
0x1105   :  { %4198 = vmatpush1.bf16.msra.mxu0 %v4041_v58 }
0x1106   :  { %4199 = vmatprep.subr.bf16.mxu0 %v4044_v52 }
0x1109   :  { %4200 = vmatpush1.bf16.msra.mxu0 %v4043_v40 }
0x110a   :  { %4210 = vmatprep.subr.bf16.mxu0 %v4046_v44 }
0x110c   :  { %4202 = vmatmul.mubr.bf16.vlgmr.msra.gmra.mrb[24].mxu0 %v4112_v42 }
0x110d   :  { %4211 = vmatpush1.bf16.msra.mxu0 %v4045_v25  ;;  %4242 = vmatprep.mubr.bf16.mxu0 %v4115_v24 }
0x110e   :  { %4212 = vmatprep.subr.bf16.mxu0 %v4048_v0 }
0x1111   :  { %4213 = vmatpush1.bf16.msra.mxu0 %v4047_v1 }
0x1112   :  { %4214 = vmatprep.subr.bf16.mxu0 %v4050_v18 }
0x1115   :  { %4215 = vmatpush1.bf16.msra.mxu0 %v4049_v57 }
0x1116   :  { %4216 = vmatprep.subr.bf16.mxu0 %v4052_v46 }
0x1119   :  { %4217 = vmatpush1.bf16.msra.mxu0 %v4051_v13 }
0x111a   :  { %4218 = vmatprep.subr.bf16.mxu0 %v4054_v31 }
0x111d   :  { %4219 = vmatpush1.bf16.msra.mxu0 %v4053_v4 }
0x111e   :  { %4220 = vmatprep.subr.bf16.mxu0 %v4056_v51 }
0x1121   :  { %4221 = vmatpush1.bf16.msra.mxu0 %v4055_v45 }
0x1122   :  { %4222 = vmatprep.subr.bf16.mxu0 %v4058_v19 }
0x1125   :  { %4223 = vmatpush1.bf16.msra.mxu0 %v4057_v36 }
0x1126   :  { %4224 = vmatprep.subr.bf16.mxu0 %v4060_v7 }
0x1129   :  { %4225 = vmatpush1.bf16.msra.mxu0 %v4059_v23 }
0x112a   :  { %4226 = vmatprep.subr.bf16.mxu0 %v4062_v17 }
0x112d   :  { %4227 = vmatpush1.bf16.msra.mxu0 %v4061_v34 }
0x112e   :  { %4228 = vmatprep.subr.bf16.mxu0 %v4064_v6 }
0x1131   :  { %4229 = vmatpush1.bf16.msra.mxu0 %v4063_v37 }
0x1132   :  { %4230 = vmatprep.subr.bf16.mxu0 %v4066_v60 }
0x1135   :  { %4231 = vmatpush1.bf16.msra.mxu0 %v4065_v63 }
0x1136   :  { %4232 = vmatprep.subr.bf16.mxu0 %v4068_v54 }
0x1139   :  { %4233 = vmatpush1.bf16.msra.mxu0 %v4067_v33 }
0x113a   :  { %4234 = vmatprep.subr.bf16.mxu0 %v4070_v9 }
0x113d   :  { %4235 = vmatpush1.bf16.msra.mxu0 %v4069_v2 }
0x113e   :  { %4236 = vmatprep.subr.bf16.mxu0 %v4072_v20 }
0x1141   :  { %4237 = vmatpush1.bf16.msra.mxu0 %v4071_v62 }
0x1142   :  { %4238 = vmatprep.subr.bf16.mxu0 %v4074_v49 }
0x1145   :  { %4239 = vmatpush1.bf16.msra.mxu0 %v4073_v30 }
0x1146   :  { %4240 = vmatprep.subr.bf16.mxu0 %v4076_v41 }
0x1149   :  { %4241 = vmatpush1.bf16.msra.mxu0 %v4075_v59 }
0x114c   :  { %4243 = vmatmul.mubr.bf16.vlgmr.msra.gmra.mrb[24].mxu0 %v4114_v32 }
0x121f   :  { %v4244_v35 = vpop.f32.mrb[24].mxu0 }
0x1220   :  { %v6309_v56 = vadd.f32 %v4244_v35, %v4121_v61  ;;  %v4246_v43 = vpop.f32.mrb[25].mxu0 }
0x1221   :  { %v6310_v22 = vadd.f32 %v4246_v43, %v4125_v29  ;;  %v4248_v10 = vpop.f32.mrb[26].mxu0 }
0x1222   :  { %v4251_v27 = vmax.f32 %v6309_v56, 0.0  ;;  %v4249_v48 = vpop.f32.mrb[27].mxu0 }
0x1223   :  { %v4252_v50 = vmax.f32 %v6310_v22, 0.0 }
0x1225   :  { %v4255_v15 = vcombine.low %v4251_v27, %v4252_v50 }
0x1227   :  { %v7965_v14 = vrot.slane %v4255_v15, %v7766_v21  ;;  %6264 = vst.sshfl [vmem:[#allocation11] sm:$0x33 pattern:$0x76325410] %v4255_v15 }
0x1229   :  { %v7969_v55 = vcombine.high %v7965_v14, %v7965_v14 }
0x122b   :  { %4267 = vst [vmem:[#allocation11 + $0x4] sm:$0xf] %v7969_v55 }
0x122c   :  { %6650 = dma.done.wait [#allocation4 + $0x1], 8192 }
0x122d   :  { %6651 = vsyncadd [#allocation4 + $0x1], 4294959104  ;;  %v4314_v47 = vrot.slane %v7965_v14, %v7717_v3  ;;  %v4322_v39 = vrot.slane %v7969_v55, %v7717_v3  ;;  %vm4323_vm12 = vcmask 1041409   ;;  %4288 = sst [smem:[#allocation41]] %s6674_s27  ;;  %s4272_s25 = scalar_lea.hbm %s8257_s2, 134144  ;;  %v4310_v54 = vrot.slane %v7965_v14, %v6873_v12 }
0x122e   :  { %4290 = sst [smem:[#allocation41 + $0x1]] %s6674_s27  ;;  %s6696_s26 = smov [#allocation40]   ;;  %v4318_v33 = vrot.slane %v7969_v55, %v6873_v12  ;;  %v4335_v2 = vrot.slane %v7965_v14, %v7704_v53  ;;  %v4343_v20 = vrot.slane %v7969_v55, %v7704_v53 }
0x122f   :  { %v4325_v21 = vsel %vm4323_vm12, %v4322_v39, %v4314_v47  ;;  %4292 = sst [smem:[#allocation41 + $0x2]] %s6675_s28 }
0x1230   :  { %v4413_v28 = vpack.c.bf16 %v4325_v21, %v4325_v21  ;;  %4294 = sst [smem:[#allocation41 + $0x3]] %s6676_s29  ;;  %v4324_v49 = vsel %vm4323_vm12, %v4318_v33, %v4310_v54  ;;  %v4345_v41 = vsel %vm4323_vm12, %v4343_v20, %v4335_v2 }
0x1231   :  { %4296 = sst [smem:[#allocation41 + $0x4]] %s6671_s11  ;;  %v4412_v32 = vpack.c.bf16 %v4324_v49, %v4324_v49  ;;  %v4415_v26 = vpack.c.bf16 %v4345_v41, %v4345_v41 }
0x1232   :  { %4460 = vmatprep.mubr.bf16.mxu1 %v4413_v28  ;;  %4298 = sst [smem:[#allocation41 + $0x5]] %s6675_s28 }
0x1233   :  { %4300 = sst [smem:[#allocation41 + $0x6]] %s6671_s11 }
0x1234   :  { %4302 = sst [smem:[#allocation41 + $0x7]] %s6676_s29 }
0x1235   :  { %4304 = sst [smem:[#allocation41 + $0x8]] %s6678_s10 }
0x1236   :  { %4306 = dma.general %s4272_s25, 4096, %s6784_s1, %s6679_s13, %s6696_s26, [#allocation41], %s6787_s9, 0  }
0x1237   :  { %v4349_v5 = vld [vmem:[#allocation2 + $0x308] sm:$0xff]  ;;  %v4348_v58 = vld [vmem:[#allocation2 + $0x300] sm:$0xff]  ;;  %v4351_v52 = vld [vmem:[#allocation2 + $0x318] sm:$0xff] }
0x1238   :  { %4428 = vmatprep.subr.bf16.mxu1 %v4349_v5  ;;  %v4350_v38 = vld [vmem:[#allocation2 + $0x310] sm:$0xff]  ;;  %v4353_v40 = vld [vmem:[#allocation2 + $0x328] sm:$0xff]  ;;  %v4352_v44 = vld [vmem:[#allocation2 + $0x320] sm:$0xff] }
0x1239   :  { %4429 = vmatpush1.bf16.msra.mxu1 %v4348_v58  ;;  %v4355_v42 = vld [vmem:[#allocation2 + $0x338] sm:$0xff]  ;;  %v4354_v24 = vld [vmem:[#allocation2 + $0x330] sm:$0xff]  ;;  %v4357_v25 = vld [vmem:[#allocation2 + $0x348] sm:$0xff] }
0x123a   :  { %4430 = vmatprep.subr.bf16.mxu1 %v4351_v52  ;;  %v4356_v0 = vld [vmem:[#allocation2 + $0x340] sm:$0xff]  ;;  %v4359_v1 = vld [vmem:[#allocation2 + $0x358] sm:$0xff]  ;;  %v4358_v18 = vld [vmem:[#allocation2 + $0x350] sm:$0xff] }
0x123b   :  { %v4361_v57 = vld [vmem:[#allocation2 + $0x368] sm:$0xff]  ;;  %v4360_v46 = vld [vmem:[#allocation2 + $0x360] sm:$0xff]  ;;  %v4363_v13 = vld [vmem:[#allocation2 + $0x378] sm:$0xff] }
0x123c   :  { %v4362_v31 = vld [vmem:[#allocation2 + $0x370] sm:$0xff]  ;;  %v4365_v4 = vld [vmem:[#allocation2 + $0x388] sm:$0xff]  ;;  %v4364_v51 = vld [vmem:[#allocation2 + $0x380] sm:$0xff] }
0x123d   :  { %4431 = vmatpush1.bf16.msra.mxu1 %v4350_v38  ;;  %v4367_v45 = vld [vmem:[#allocation2 + $0x398] sm:$0xff]  ;;  %v4366_v19 = vld [vmem:[#allocation2 + $0x390] sm:$0xff]  ;;  %v4369_v36 = vld [vmem:[#allocation2 + $0x3a8] sm:$0xff] }
0x123e   :  { %4432 = vmatprep.subr.bf16.mxu1 %v4353_v40  ;;  %v4368_v7 = vld [vmem:[#allocation2 + $0x3a0] sm:$0xff]  ;;  %v4371_v23 = vld [vmem:[#allocation2 + $0x3b8] sm:$0xff]  ;;  %v4370_v17 = vld [vmem:[#allocation2 + $0x3b0] sm:$0xff] }
0x123f   :  { %v4373_v34 = vld [vmem:[#allocation2 + $0x3c8] sm:$0xff]  ;;  %v4372_v6 = vld [vmem:[#allocation2 + $0x3c0] sm:$0xff]  ;;  %v4375_v37 = vld [vmem:[#allocation2 + $0x3d8] sm:$0xff] }
0x1240   :  { %v4374_v60 = vld [vmem:[#allocation2 + $0x3d0] sm:$0xff]  ;;  %v4377_v63 = vld [vmem:[#allocation2 + $0x3e8] sm:$0xff]  ;;  %v4376_v9 = vld [vmem:[#allocation2 + $0x3e0] sm:$0xff] }
0x1241   :  { %4433 = vmatpush1.bf16.msra.mxu1 %v4352_v44  ;;  %v4379_v62 = vld [vmem:[#allocation2 + $0x3f8] sm:$0xff]  ;;  %v4378_v30 = vld [vmem:[#allocation2 + $0x3f0] sm:$0xff]  ;;  %v4381_v59 = vld [vmem:[#allocation2 + $0x408] sm:$0xff] }
0x1242   :  { %4434 = vmatprep.subr.bf16.mxu1 %v4355_v42  ;;  %v4380_v61 = vld [vmem:[#allocation2 + $0x400] sm:$0xff]  ;;  %v4383_v29 = vld [vmem:[#allocation2 + $0x418] sm:$0xff]  ;;  %v4382_v35 = vld [vmem:[#allocation2 + $0x410] sm:$0xff] }
0x1243   :  { %v4385_v56 = vld [vmem:[#allocation2 + $0x428] sm:$0xff]  ;;  %v4384_v43 = vld [vmem:[#allocation2 + $0x420] sm:$0xff]  ;;  %v4387_v22 = vld [vmem:[#allocation2 + $0x438] sm:$0xff] }
0x1244   :  { %v4386_v10 = vld [vmem:[#allocation2 + $0x430] sm:$0xff]  ;;  %v4389_v27 = vld [vmem:[#allocation2 + $0x448] sm:$0xff]  ;;  %v4388_v48 = vld [vmem:[#allocation2 + $0x440] sm:$0xff] }
0x1245   :  { %4435 = vmatpush1.bf16.msra.mxu1 %v4354_v24  ;;  %v4391_v50 = vld [vmem:[#allocation2 + $0x458] sm:$0xff]  ;;  %v4390_v15 = vld [vmem:[#allocation2 + $0x450] sm:$0xff]  ;;  %v4393_v47 = vld [vmem:[#allocation2 + $0x468] sm:$0xff] }
0x1246   :  { %4436 = vmatprep.subr.bf16.mxu1 %v4357_v25  ;;  %v4392_v39 = vld [vmem:[#allocation2 + $0x460] sm:$0xff]  ;;  %v4395_v21 = vld [vmem:[#allocation2 + $0x478] sm:$0xff]  ;;  %v4394_v28 = vld [vmem:[#allocation2 + $0x470] sm:$0xff] }
0x1247   :  { %v4397_v5 = vld [vmem:[#allocation2 + $0x488] sm:$0xff]  ;;  %v4396_v58 = vld [vmem:[#allocation2 + $0x480] sm:$0xff]  ;;  %v4399_v52 = vld [vmem:[#allocation2 + $0x498] sm:$0xff] }
0x1248   :  { %v4398_v38 = vld [vmem:[#allocation2 + $0x490] sm:$0xff]  ;;  %v4401_v40 = vld [vmem:[#allocation2 + $0x4a8] sm:$0xff]  ;;  %v4400_v44 = vld [vmem:[#allocation2 + $0x4a0] sm:$0xff] }
0x1249   :  { %4437 = vmatpush1.bf16.msra.mxu1 %v4356_v0  ;;  %v4403_v42 = vld [vmem:[#allocation2 + $0x4b8] sm:$0xff]  ;;  %v4402_v24 = vld [vmem:[#allocation2 + $0x4b0] sm:$0xff]  ;;  %v4405_v25 = vld [vmem:[#allocation2 + $0x4c8] sm:$0xff] }
0x124a   :  { %4438 = vmatprep.subr.bf16.mxu1 %v4359_v1  ;;  %v4404_v0 = vld [vmem:[#allocation2 + $0x4c0] sm:$0xff]  ;;  %v4407_v1 = vld [vmem:[#allocation2 + $0x4d8] sm:$0xff] }
0x124d   :  { %4439 = vmatpush1.bf16.msra.mxu1 %v4358_v18  ;;  %v4406_v18 = vld [vmem:[#allocation2 + $0x4d0] sm:$0xff] }
0x124e   :  { %4440 = vmatprep.subr.bf16.mxu1 %v4361_v57  ;;  %v4409_v57 = vld [vmem:[#allocation2 + $0x4e8] sm:$0xff] }
0x1251   :  { %4441 = vmatpush1.bf16.msra.mxu1 %v4360_v46  ;;  %v4331_v46 = vrot.slane %v7965_v14, %v6876_v16 }
0x1252   :  { %4442 = vmatprep.subr.bf16.mxu1 %v4363_v13  ;;  %v4339_v13 = vrot.slane %v7969_v55, %v6876_v16 }
0x1255   :  { %4443 = vmatpush1.bf16.msra.mxu1 %v4362_v31  ;;  %v4408_v31 = vld [vmem:[#allocation2 + $0x4e0] sm:$0xff] }
0x1256   :  { %4444 = vmatprep.subr.bf16.mxu1 %v4365_v4  ;;  %v4411_v4 = vld [vmem:[#allocation2 + $0x4f8] sm:$0xff] }
0x1259   :  { %4445 = vmatpush1.bf16.msra.mxu1 %v4364_v51  ;;  %v4344_v51 = vsel %vm4323_vm12, %v4339_v13, %v4331_v46 }
0x125a   :  { %4446 = vmatprep.subr.bf16.mxu1 %v4367_v45  ;;  %v4410_v45 = vld [vmem:[#allocation2 + $0x4f0] sm:$0xff] }
0x125d   :  { %4447 = vmatpush1.bf16.msra.mxu1 %v4366_v19  ;;  %v4414_v19 = vpack.c.bf16 %v4344_v51, %v4344_v51 }
0x125e   :  { %4448 = vmatprep.subr.bf16.mxu1 %v4369_v36  ;;  %v4416_v36 = vld [vmem:[#allocation8 + $0x16] sm:$0x3] }
0x1261   :  { %4449 = vmatpush1.bf16.msra.mxu1 %v4368_v7  ;;  %v4421_v7 = vrot.slane %v4416_v36, %v6873_v12 }
0x1262   :  { %4450 = vmatprep.subr.bf16.mxu1 %v4371_v23  ;;  %v4425_v23 = vrot.slane %v4416_v36, %v6876_v16 }
0x1265   :  { %4451 = vmatpush1.bf16.msra.mxu1 %v4370_v17 }
0x1266   :  { %4452 = vmatprep.subr.bf16.mxu1 %v4373_v34 }
0x1269   :  { %4453 = vmatpush1.bf16.msra.mxu1 %v4372_v6 }
0x126a   :  { %4454 = vmatprep.subr.bf16.mxu1 %v4375_v37 }
0x126d   :  { %4455 = vmatpush1.bf16.msra.mxu1 %v4374_v60 }
0x126e   :  { %4456 = vmatprep.subr.bf16.mxu1 %v4377_v63 }
0x1271   :  { %4457 = vmatpush1.bf16.msra.mxu1 %v4376_v9 }
0x1272   :  { %4458 = vmatprep.subr.bf16.mxu1 %v4379_v62 }
0x1275   :  { %4459 = vmatpush1.bf16.msra.mxu1 %v4378_v30 }
0x1276   :  { %4469 = vmatprep.subr.bf16.mxu1 %v4381_v59 }
0x1278   :  { %4461 = vmatmul.mubr.bf16.vlgmr.msra.gmra.mrb[24].mxu1 %v4412_v32 }
0x1279   :  { %4470 = vmatpush1.bf16.msra.mxu1 %v4380_v61  ;;  %4501 = vmatprep.mubr.bf16.mxu1 %v4415_v26 }
0x127a   :  { %4471 = vmatprep.subr.bf16.mxu1 %v4383_v29 }
0x127d   :  { %4472 = vmatpush1.bf16.msra.mxu1 %v4382_v35 }
0x127e   :  { %4473 = vmatprep.subr.bf16.mxu1 %v4385_v56 }
0x1281   :  { %4474 = vmatpush1.bf16.msra.mxu1 %v4384_v43 }
0x1282   :  { %4475 = vmatprep.subr.bf16.mxu1 %v4387_v22 }
0x1285   :  { %4476 = vmatpush1.bf16.msra.mxu1 %v4386_v10 }
0x1286   :  { %4477 = vmatprep.subr.bf16.mxu1 %v4389_v27 }
0x1289   :  { %4478 = vmatpush1.bf16.msra.mxu1 %v4388_v48 }
0x128a   :  { %4479 = vmatprep.subr.bf16.mxu1 %v4391_v50 }
0x128d   :  { %4480 = vmatpush1.bf16.msra.mxu1 %v4390_v15 }
0x128e   :  { %4481 = vmatprep.subr.bf16.mxu1 %v4393_v47 }
0x1291   :  { %4482 = vmatpush1.bf16.msra.mxu1 %v4392_v39 }
0x1292   :  { %4483 = vmatprep.subr.bf16.mxu1 %v4395_v21 }
0x1295   :  { %4484 = vmatpush1.bf16.msra.mxu1 %v4394_v28 }
0x1296   :  { %4485 = vmatprep.subr.bf16.mxu1 %v4397_v5 }
0x1299   :  { %4486 = vmatpush1.bf16.msra.mxu1 %v4396_v58 }
0x129a   :  { %4487 = vmatprep.subr.bf16.mxu1 %v4399_v52 }
0x129d   :  { %4488 = vmatpush1.bf16.msra.mxu1 %v4398_v38 }
0x129e   :  { %4489 = vmatprep.subr.bf16.mxu1 %v4401_v40 }
0x12a1   :  { %4490 = vmatpush1.bf16.msra.mxu1 %v4400_v44 }
0x12a2   :  { %4491 = vmatprep.subr.bf16.mxu1 %v4403_v42 }
0x12a5   :  { %4492 = vmatpush1.bf16.msra.mxu1 %v4402_v24 }
0x12a6   :  { %4493 = vmatprep.subr.bf16.mxu1 %v4405_v25 }
0x12a9   :  { %4494 = vmatpush1.bf16.msra.mxu1 %v4404_v0 }
0x12aa   :  { %4495 = vmatprep.subr.bf16.mxu1 %v4407_v1 }
0x12ad   :  { %4496 = vmatpush1.bf16.msra.mxu1 %v4406_v18 }
0x12ae   :  { %4497 = vmatprep.subr.bf16.mxu1 %v4409_v57 }
0x12b1   :  { %4498 = vmatpush1.bf16.msra.mxu1 %v4408_v31 }
0x12b2   :  { %4499 = vmatprep.subr.bf16.mxu1 %v4411_v4 }
0x12b5   :  { %4500 = vmatpush1.bf16.msra.mxu1 %v4410_v45 }
0x12b8   :  { %4502 = vmatmul.mubr.bf16.vlgmr.msra.gmra.mrb[24].mxu1 %v4414_v19 }
0x138b   :  { %v4503_v14 = vpop.f32.mrb[24].mxu1 }
0x138c   :  { %v8009_v17 = vadd.f32 %v4503_v14, %v4421_v7  ;;  %v4505_v55 = vpop.f32.mrb[25].mxu1 }
0x138d   :  { %v6312_v34 = vadd.f32 %v4505_v55, %v4425_v23  ;;  %v4507_v6 = vpop.f32.mrb[26].mxu1 }
0x138e   :  { %v4510_v37 = vmax.f32 %v8009_v17, 0.0  ;;  %v4508_v60 = vpop.f32.mrb[27].mxu1 }
0x138f   :  { %v4511_v63 = vmax.f32 %v6312_v34, 0.0 }
0x1390   :  { %6652 = dma.done.wait [#allocation4], 4096 }
0x1391   :  { %6653 = vsyncadd [#allocation4], 4294963200  ;;  %v4584_v54 = vpack.c.bf16 %v4511_v63, %v4511_v63  ;;  %4532 = sst [smem:[#allocation43]] %s6674_s27  ;;  %s4516_s8 = scalar_lea.hbm %s8257_s2, 138240  ;;  %v4583_v42 = vpack.c.bf16 %v4510_v37, %v4510_v37 }
0x1392   :  { %4534 = sst [smem:[#allocation43 + $0x1]] %s6674_s27  ;;  %s6697_s14 = smov [#allocation42]  }
0x1393   :  { %4629 = vmatprep.mubr.bf16.mxu0 %v4584_v54  ;;  %4536 = sst [smem:[#allocation43 + $0x2]] %s6675_s28 }
0x1394   :  { %4538 = sst [smem:[#allocation43 + $0x3]] %s6676_s29 }
0x1395   :  { %4540 = sst [smem:[#allocation43 + $0x4]] %s6671_s11 }
0x1396   :  { %4542 = sst [smem:[#allocation43 + $0x5]] %s6675_s28 }
0x1397   :  { %4544 = sst [smem:[#allocation43 + $0x6]] %s6671_s11 }
0x1398   :  { %4546 = sst [smem:[#allocation43 + $0x7]] %s6676_s29 }
0x1399   :  { %4548 = sst [smem:[#allocation43 + $0x8]] %s6678_s10 }
0x139a   :  { %4550 = dma.general %s4516_s8, 4096, %s6826_s18, %s6682_s22, %s6697_s14, [#allocation43], %s6787_s9, 0  }
0x139b   :  { %v4552_v33 = vld [vmem:[#allocation2 + $0x8] sm:$0xff]  ;;  %v4551_v9 = vld [vmem:[#allocation2] sm:$0xff]  ;;  %v4554_v2 = vld [vmem:[#allocation2 + $0x18] sm:$0xff] }
0x139c   :  { %4597 = vmatprep.subr.bf16.mxu0 %v4552_v33  ;;  %v4553_v20 = vld [vmem:[#allocation2 + $0x10] sm:$0xff]  ;;  %v4556_v62 = vld [vmem:[#allocation2 + $0x28] sm:$0xff]  ;;  %v4555_v49 = vld [vmem:[#allocation2 + $0x20] sm:$0xff] }
0x139d   :  { %4598 = vmatpush1.bf16.msra.mxu0 %v4551_v9  ;;  %v4558_v30 = vld [vmem:[#allocation2 + $0x38] sm:$0xff]  ;;  %v4557_v41 = vld [vmem:[#allocation2 + $0x30] sm:$0xff]  ;;  %v4560_v59 = vld [vmem:[#allocation2 + $0x48] sm:$0xff] }
0x139e   :  { %4599 = vmatprep.subr.bf16.mxu0 %v4554_v2  ;;  %v4559_v32 = vld [vmem:[#allocation2 + $0x40] sm:$0xff]  ;;  %v4562_v26 = vld [vmem:[#allocation2 + $0x58] sm:$0xff]  ;;  %v4561_v61 = vld [vmem:[#allocation2 + $0x50] sm:$0xff] }
0x139f   :  { %v4564_v29 = vld [vmem:[#allocation2 + $0x68] sm:$0xff]  ;;  %v4563_v35 = vld [vmem:[#allocation2 + $0x60] sm:$0xff]  ;;  %v4566_v56 = vld [vmem:[#allocation2 + $0x78] sm:$0xff] }
0x13a0   :  { %v4565_v43 = vld [vmem:[#allocation2 + $0x70] sm:$0xff]  ;;  %v4568_v22 = vld [vmem:[#allocation2 + $0x88] sm:$0xff]  ;;  %v4567_v10 = vld [vmem:[#allocation2 + $0x80] sm:$0xff] }
0x13a1   :  { %4600 = vmatpush1.bf16.msra.mxu0 %v4553_v20  ;;  %v4570_v27 = vld [vmem:[#allocation2 + $0x98] sm:$0xff]  ;;  %v4569_v48 = vld [vmem:[#allocation2 + $0x90] sm:$0xff]  ;;  %v4572_v50 = vld [vmem:[#allocation2 + $0xa8] sm:$0xff] }
0x13a2   :  { %4601 = vmatprep.subr.bf16.mxu0 %v4556_v62  ;;  %v4571_v15 = vld [vmem:[#allocation2 + $0xa0] sm:$0xff]  ;;  %v4574_v47 = vld [vmem:[#allocation2 + $0xb8] sm:$0xff]  ;;  %v4573_v39 = vld [vmem:[#allocation2 + $0xb0] sm:$0xff] }
0x13a3   :  { %v4576_v21 = vld [vmem:[#allocation2 + $0xc8] sm:$0xff]  ;;  %v4575_v28 = vld [vmem:[#allocation2 + $0xc0] sm:$0xff]  ;;  %v4578_v5 = vld [vmem:[#allocation2 + $0xd8] sm:$0xff] }
0x13a4   :  { %v4577_v58 = vld [vmem:[#allocation2 + $0xd0] sm:$0xff]  ;;  %v4580_v52 = vld [vmem:[#allocation2 + $0xe8] sm:$0xff]  ;;  %v4579_v38 = vld [vmem:[#allocation2 + $0xe0] sm:$0xff] }
0x13a5   :  { %4602 = vmatpush1.bf16.msra.mxu0 %v4555_v49  ;;  %v4582_v40 = vld [vmem:[#allocation2 + $0xf8] sm:$0xff]  ;;  %v4581_v44 = vld [vmem:[#allocation2 + $0xf0] sm:$0xff] }
0x13a6   :  { %4603 = vmatprep.subr.bf16.mxu0 %v4558_v30  ;;  %v4585_v24 = vld [vmem:[#allocation8 + $0x18] sm:$0x3] }
0x13a7   :  { %v4590_v25 = vrot.slane %v4585_v24, %v6873_v12  ;;  %v4594_v0 = vrot.slane %v4585_v24, %v6876_v16 }
0x13a9   :  { %4604 = vmatpush1.bf16.msra.mxu0 %v4557_v41 }
0x13aa   :  { %4605 = vmatprep.subr.bf16.mxu0 %v4560_v59 }
0x13ad   :  { %4606 = vmatpush1.bf16.msra.mxu0 %v4559_v32 }
0x13ae   :  { %4607 = vmatprep.subr.bf16.mxu0 %v4562_v26 }
0x13b1   :  { %4608 = vmatpush1.bf16.msra.mxu0 %v4561_v61 }
0x13b2   :  { %4609 = vmatprep.subr.bf16.mxu0 %v4564_v29 }
0x13b5   :  { %4610 = vmatpush1.bf16.msra.mxu0 %v4563_v35 }
0x13b6   :  { %4611 = vmatprep.subr.bf16.mxu0 %v4566_v56 }
0x13b9   :  { %4612 = vmatpush1.bf16.msra.mxu0 %v4565_v43 }
0x13ba   :  { %4613 = vmatprep.subr.bf16.mxu0 %v4568_v22 }
0x13bd   :  { %4614 = vmatpush1.bf16.msra.mxu0 %v4567_v10 }
0x13be   :  { %4615 = vmatprep.subr.bf16.mxu0 %v4570_v27 }
0x13c1   :  { %4616 = vmatpush1.bf16.msra.mxu0 %v4569_v48 }
0x13c2   :  { %4617 = vmatprep.subr.bf16.mxu0 %v4572_v50 }
0x13c5   :  { %4618 = vmatpush1.bf16.msra.mxu0 %v4571_v15 }
0x13c6   :  { %4619 = vmatprep.subr.bf16.mxu0 %v4574_v47 }
0x13c9   :  { %4620 = vmatpush1.bf16.msra.mxu0 %v4573_v39 }
0x13ca   :  { %4621 = vmatprep.subr.bf16.mxu0 %v4576_v21 }
0x13cd   :  { %4622 = vmatpush1.bf16.msra.mxu0 %v4575_v28 }
0x13ce   :  { %4623 = vmatprep.subr.bf16.mxu0 %v4578_v5 }
0x13d1   :  { %4624 = vmatpush1.bf16.msra.mxu0 %v4577_v58 }
0x13d2   :  { %4625 = vmatprep.subr.bf16.mxu0 %v4580_v52 }
0x13d5   :  { %4626 = vmatpush1.bf16.msra.mxu0 %v4579_v38 }
0x13d6   :  { %4627 = vmatprep.subr.bf16.mxu0 %v4582_v40 }
0x13d9   :  { %4628 = vmatpush1.bf16.msra.mxu0 %v4581_v44 }
0x13dc   :  { %4630 = vmatmul.mubr.bf16.vlgmr.msra.gmra.mrb[28].mxu0 %v4583_v42 }
0x14af   :  { %v4631_v1 = vpop.f32.mrb[28].mxu0 }
0x14b0   :  { %v8032_v18 = vadd.f32 %v4631_v1, %v4590_v25  ;;  %v4633_v57 = vpop.f32.mrb[29].mxu0 }
0x14b1   :  { %v4634_v46 = vadd.f32 %v4633_v57, %v4594_v0  ;;  %v4635_v13 = vpop.f32.mrb[30].mxu0 }
0x14b2   :  { %v4638_v31 = vmax.f32 %v8032_v18, 0.0  ;;  %v4636_v4 = vpop.f32.mrb[31].mxu0 }
0x14b3   :  { %v4639_v51 = vmax.f32 %v4634_v46, 0.0 }
0x14b4   :  { %6654 = dma.done.wait [#allocation4 + $0x1], 4096 }
0x14b5   :  { %6655 = vsyncadd [#allocation4 + $0x1], 4294963200  ;;  %v4709_v45 = vpack.c.bf16 %v4639_v51, %v4639_v51  ;;  %s6698_s2 = smov 512   ;;  %4661 = sst [smem:[#allocation45 + $0x2]] %s6678_s10  ;;  %v4708_v48 = vpack.c.bf16 %v4638_v31, %v4638_v31  ;;  %v6701_v15 = vmov 1966171168  }
0x14b6   :  { %4657 = sst [smem:[#allocation45]] %s6698_s2  ;;  %s6699_s18 = smov [#allocation3]   ;;  %v4769_v47 = vunpack.c.l.s4 %v6701_v15  ;;  %vm4794_vm13 = vcmp.lt.s32.totalorder %v225_v11, 256 }
0x14b7   :  { %4659 = sst [smem:[#allocation45 + $0x1]] %s6698_s2  ;;  %4754 = vmatprep.mubr.bf16.mxu0 %v4709_v45  ;;  %s8038_s15 = sshll.u32 %s6699_s18, 4  ;;  %s4654_s15 = int_to_ptr.vmem [resolvable:$true] %s8038_s15 }
0x14b8   :  { %4663 = sst [smem:[#allocation45 + $0x3]] %s6676_s29  ;;  %s6700_s16 = smov [#allocation44]   ;;  %v4770_v5 = vunpack.c.0.s8 %v4769_v47 }
0x14b9   :  { %4665 = sst [smem:[#allocation45 + $0x4]] %s6671_s11 }
0x14ba   :  { %4667 = sst [smem:[#allocation45 + $0x5]] %s6675_s28  ;;  %v8062_v25 = vsub.s32 %v4770_v5, %v6870_v8 }
0x14bb   :  { %4669 = sst [smem:[#allocation45 + $0x6]] %s6674_s27 }
0x14bc   :  { %4671 = sst [smem:[#allocation45 + $0x7]] %s6676_s29 }
0x14bd   :  { %4673 = sst [smem:[#allocation45 + $0x8]] %s6678_s10 }
0x14be   :  { %4675 = dma.general %s8258_s3, 8192, %s4654_s15, %s6679_s13, %s6700_s16, [#allocation45], %s6787_s9, 0  }
0x14bf   :  { %v4677_v19 = vld [vmem:[#allocation2 + $0x308] sm:$0xff]  ;;  %v4676_v36 = vld [vmem:[#allocation2 + $0x300] sm:$0xff]  ;;  %v4679_v7 = vld [vmem:[#allocation2 + $0x318] sm:$0xff] }
0x14c0   :  { %4722 = vmatprep.subr.bf16.mxu0 %v4677_v19  ;;  %v4678_v23 = vld [vmem:[#allocation2 + $0x310] sm:$0xff]  ;;  %v4681_v14 = vld [vmem:[#allocation2 + $0x328] sm:$0xff]  ;;  %v4680_v17 = vld [vmem:[#allocation2 + $0x320] sm:$0xff] }
0x14c1   :  { %4723 = vmatpush1.bf16.msra.mxu0 %v4676_v36  ;;  %v4683_v55 = vld [vmem:[#allocation2 + $0x338] sm:$0xff]  ;;  %v4682_v34 = vld [vmem:[#allocation2 + $0x330] sm:$0xff]  ;;  %v4685_v6 = vld [vmem:[#allocation2 + $0x348] sm:$0xff] }
0x14c2   :  { %4724 = vmatprep.subr.bf16.mxu0 %v4679_v7  ;;  %v4684_v37 = vld [vmem:[#allocation2 + $0x340] sm:$0xff]  ;;  %v4687_v60 = vld [vmem:[#allocation2 + $0x358] sm:$0xff]  ;;  %v4686_v63 = vld [vmem:[#allocation2 + $0x350] sm:$0xff] }
0x14c3   :  { %v4689_v54 = vld [vmem:[#allocation2 + $0x368] sm:$0xff]  ;;  %v4688_v33 = vld [vmem:[#allocation2 + $0x360] sm:$0xff]  ;;  %v4691_v9 = vld [vmem:[#allocation2 + $0x378] sm:$0xff] }
0x14c4   :  { %v4690_v2 = vld [vmem:[#allocation2 + $0x370] sm:$0xff]  ;;  %v4693_v20 = vld [vmem:[#allocation2 + $0x388] sm:$0xff]  ;;  %v4692_v62 = vld [vmem:[#allocation2 + $0x380] sm:$0xff] }
0x14c5   :  { %4725 = vmatpush1.bf16.msra.mxu0 %v4678_v23  ;;  %v4695_v49 = vld [vmem:[#allocation2 + $0x398] sm:$0xff]  ;;  %v4694_v30 = vld [vmem:[#allocation2 + $0x390] sm:$0xff]  ;;  %v4697_v41 = vld [vmem:[#allocation2 + $0x3a8] sm:$0xff] }
0x14c6   :  { %4726 = vmatprep.subr.bf16.mxu0 %v4681_v14  ;;  %v4696_v59 = vld [vmem:[#allocation2 + $0x3a0] sm:$0xff]  ;;  %v4699_v32 = vld [vmem:[#allocation2 + $0x3b8] sm:$0xff]  ;;  %v4698_v26 = vld [vmem:[#allocation2 + $0x3b0] sm:$0xff] }
0x14c7   :  { %v4701_v61 = vld [vmem:[#allocation2 + $0x3c8] sm:$0xff]  ;;  %v4700_v29 = vld [vmem:[#allocation2 + $0x3c0] sm:$0xff]  ;;  %v4703_v35 = vld [vmem:[#allocation2 + $0x3d8] sm:$0xff] }
0x14c8   :  { %v4702_v56 = vld [vmem:[#allocation2 + $0x3d0] sm:$0xff]  ;;  %v4705_v43 = vld [vmem:[#allocation2 + $0x3e8] sm:$0xff]  ;;  %v4704_v22 = vld [vmem:[#allocation2 + $0x3e0] sm:$0xff] }
0x14c9   :  { %4727 = vmatpush1.bf16.msra.mxu0 %v4680_v17  ;;  %v4707_v10 = vld [vmem:[#allocation2 + $0x3f8] sm:$0xff]  ;;  %v4706_v27 = vld [vmem:[#allocation2 + $0x3f0] sm:$0xff] }
0x14ca   :  { %4728 = vmatprep.subr.bf16.mxu0 %v4683_v55  ;;  %v4710_v50 = vld [vmem:[#allocation8 + $0x1a] sm:$0x3] }
0x14cb   :  { %v4715_v39 = vrot.slane %v4710_v50, %v6873_v12  ;;  %v4719_v21 = vrot.slane %v4710_v50, %v6876_v16 }
0x14cd   :  { %4729 = vmatpush1.bf16.msra.mxu0 %v4682_v34 }
0x14ce   :  { %4730 = vmatprep.subr.bf16.mxu0 %v4685_v6 }
0x14d1   :  { %4731 = vmatpush1.bf16.msra.mxu0 %v4684_v37 }
0x14d2   :  { %4732 = vmatprep.subr.bf16.mxu0 %v4687_v60 }
0x14d5   :  { %4733 = vmatpush1.bf16.msra.mxu0 %v4686_v63 }
0x14d6   :  { %4734 = vmatprep.subr.bf16.mxu0 %v4689_v54 }
0x14d9   :  { %4735 = vmatpush1.bf16.msra.mxu0 %v4688_v33 }
0x14da   :  { %4736 = vmatprep.subr.bf16.mxu0 %v4691_v9 }
0x14dd   :  { %4737 = vmatpush1.bf16.msra.mxu0 %v4690_v2 }
0x14de   :  { %4738 = vmatprep.subr.bf16.mxu0 %v4693_v20 }
0x14e1   :  { %4739 = vmatpush1.bf16.msra.mxu0 %v4692_v62 }
0x14e2   :  { %4740 = vmatprep.subr.bf16.mxu0 %v4695_v49 }
0x14e5   :  { %4741 = vmatpush1.bf16.msra.mxu0 %v4694_v30 }
0x14e6   :  { %4742 = vmatprep.subr.bf16.mxu0 %v4697_v41 }
0x14e9   :  { %4743 = vmatpush1.bf16.msra.mxu0 %v4696_v59 }
0x14ea   :  { %4744 = vmatprep.subr.bf16.mxu0 %v4699_v32 }
0x14ed   :  { %4745 = vmatpush1.bf16.msra.mxu0 %v4698_v26 }
0x14ee   :  { %4746 = vmatprep.subr.bf16.mxu0 %v4701_v61 }
0x14f1   :  { %4747 = vmatpush1.bf16.msra.mxu0 %v4700_v29 }
0x14f2   :  { %4748 = vmatprep.subr.bf16.mxu0 %v4703_v35 }
0x14f5   :  { %4749 = vmatpush1.bf16.msra.mxu0 %v4702_v56 }
0x14f6   :  { %4750 = vmatprep.subr.bf16.mxu0 %v4705_v43 }
0x14f9   :  { %4751 = vmatpush1.bf16.msra.mxu0 %v4704_v22 }
0x14fa   :  { %4752 = vmatprep.subr.bf16.mxu0 %v4707_v10 }
0x14fd   :  { %4753 = vmatpush1.bf16.msra.mxu0 %v4706_v27 }
0x1500   :  { %4755 = vmatmul.mubr.bf16.vlgmr.msra.gmra.mrb[32].mxu0 %v4708_v48 }
0x15d3   :  { %v4756_v28 = vpop.f32.mrb[32].mxu0 }
0x15d4   :  { %v4757_v58 = vadd.f32 %v4756_v28, %v4715_v39  ;;  %v4758_v52 = vpop.f32.mrb[33].mxu0 }
0x15d5   :  { %v4759_v38 = vadd.f32 %v4758_v52, %v4719_v21  ;;  %v4760_v40 = vpop.f32.mrb[34].mxu0 }
0x15d6   :  { %v8059_v44 = vmax.f32 %v4757_v58, 0.0  ;;  %v4761_v42 = vpop.f32.mrb[35].mxu0 }
0x15d7   :  { %v4764_v24 = vmax.f32 %v4759_v38, 0.0 }
0x15d9   :  { %v4767_v0 = vcombine.low %v8059_v44, %v4764_v24 }
0x15db   :  { %v4774_v1 = vrot.slane %v4767_v0, %v8062_v25 }
0x15dd   :  { %v4775_v18 = vcombine.high %v4774_v1, %v4774_v1  ;;  %v4782_v57 = vrot.slane %v4774_v1, %v8062_v25 }
0x15df   :  { %v4789_v46 = vrot.slane %v4775_v18, %v8062_v25  ;;  %4796 = vst.msk [vmem:[#allocation13] sm:$0x3] %vm4794_vm13, %v4782_v57 }
0x15e1   :  { %4797 = vst.msk [vmem:[#allocation13 + $0x2] sm:$0x3] %vm4794_vm13, %v4789_v46 }
0x15e2   :  { %6656 = dma.done.wait [#allocation4], 8192 }
0x15e3   :  { %6657 = vsyncadd [#allocation4], 4294959104  ;;  %v4902_v13 = vpack.c.bf16 %v4764_v24, %v4764_v24  ;;  %4818 = sst [smem:[#allocation47]] %s6698_s2  ;;  %s6702_s20 = smov [#allocation3 + $0x400]  }
0x15e4   :  { %4820 = sst [smem:[#allocation47 + $0x1]] %s6698_s2  ;;  %s8072_s21 = sshll.u32 %s6702_s20, 4  ;;  %s4815_s21 = int_to_ptr.vmem [resolvable:$true] %s8072_s21 }
0x15e5   :  { %4957 = vmatprep.mubr.bf16.mxu1 %v4902_v13  ;;  %4998 = vmatprep.mubr.bf16.mxu0 %v4902_v13  ;;  %4822 = sst [smem:[#allocation47 + $0x2]] %s6678_s10  ;;  %s4801_s0 = scalar_lea.hbm %s8258_s3, 8192 }
0x15e6   :  { %4824 = sst [smem:[#allocation47 + $0x3]] %s6676_s29  ;;  %s6703_s25 = smov [#allocation46]  }
0x15e7   :  { %4826 = sst [smem:[#allocation47 + $0x4]] %s6671_s11 }
0x15e8   :  { %4828 = sst [smem:[#allocation47 + $0x5]] %s6675_s28 }
0x15e9   :  { %4830 = sst [smem:[#allocation47 + $0x6]] %s6674_s27 }
0x15ea   :  { %4832 = sst [smem:[#allocation47 + $0x7]] %s6676_s29 }
0x15eb   :  { %4834 = sst [smem:[#allocation47 + $0x8]] %s6678_s10 }
0x15ec   :  { %4836 = dma.general %s4801_s0, 16384, %s4815_s21, %s6682_s22, %s6703_s25, [#allocation47], %s6787_s9, 0  }
0x15ed   :  { %v4838_v8 = vld [vmem:[#allocation3 + $0x8] sm:$0xff]  ;;  %v4840_v31 = vld [vmem:[#allocation3 + $0x18] sm:$0xff]  ;;  %v4837_v4 = vld [vmem:[#allocation3] sm:$0xff] }
0x15ee   :  { %4925 = vmatprep.subr.bf16.mxu1 %v4838_v8  ;;  %4966 = vmatprep.subr.bf16.mxu0 %v4840_v31  ;;  %v4839_v51 = vld [vmem:[#allocation3 + $0x10] sm:$0xff]  ;;  %v4842_v45 = vld [vmem:[#allocation3 + $0x28] sm:$0xff]  ;;  %v4844_v19 = vld [vmem:[#allocation3 + $0x38] sm:$0xff] }
0x15ef   :  { %4926 = vmatpush1.bf16.msra.mxu1 %v4837_v4  ;;  %4967 = vmatpush1.bf16.msra.mxu0 %v4839_v51  ;;  %v4841_v36 = vld [vmem:[#allocation3 + $0x20] sm:$0xff]  ;;  %v4843_v7 = vld [vmem:[#allocation3 + $0x30] sm:$0xff]  ;;  %v4846_v23 = vld [vmem:[#allocation3 + $0x48] sm:$0xff] }
0x15f0   :  { %4927 = vmatprep.subr.bf16.mxu1 %v4842_v45  ;;  %4968 = vmatprep.subr.bf16.mxu0 %v4844_v19  ;;  %v4848_v14 = vld [vmem:[#allocation3 + $0x58] sm:$0xff]  ;;  %v4845_v17 = vld [vmem:[#allocation3 + $0x40] sm:$0xff]  ;;  %v4847_v55 = vld [vmem:[#allocation3 + $0x50] sm:$0xff] }
0x15f1   :  { %v4850_v34 = vld [vmem:[#allocation3 + $0x68] sm:$0xff]  ;;  %v4852_v6 = vld [vmem:[#allocation3 + $0x78] sm:$0xff]  ;;  %v4849_v37 = vld [vmem:[#allocation3 + $0x60] sm:$0xff] }
0x15f2   :  { %v4851_v60 = vld [vmem:[#allocation3 + $0x70] sm:$0xff]  ;;  %v4854_v63 = vld [vmem:[#allocation3 + $0x88] sm:$0xff]  ;;  %v4856_v54 = vld [vmem:[#allocation3 + $0x98] sm:$0xff] }
0x15f3   :  { %4928 = vmatpush1.bf16.msra.mxu1 %v4841_v36  ;;  %4969 = vmatpush1.bf16.msra.mxu0 %v4843_v7  ;;  %v4853_v33 = vld [vmem:[#allocation3 + $0x80] sm:$0xff]  ;;  %v4855_v9 = vld [vmem:[#allocation3 + $0x90] sm:$0xff]  ;;  %v4858_v2 = vld [vmem:[#allocation3 + $0xa8] sm:$0xff]  ;;  %v4901_v7 = vpack.c.bf16 %v8059_v44, %v8059_v44 }
0x15f4   :  { %4929 = vmatprep.subr.bf16.mxu1 %v4846_v23  ;;  %4970 = vmatprep.subr.bf16.mxu0 %v4848_v14  ;;  %v4860_v20 = vld [vmem:[#allocation3 + $0xb8] sm:$0xff]  ;;  %v4857_v62 = vld [vmem:[#allocation3 + $0xa0] sm:$0xff]  ;;  %v4859_v49 = vld [vmem:[#allocation3 + $0xb0] sm:$0xff] }
0x15f5   :  { %v4862_v30 = vld [vmem:[#allocation3 + $0xc8] sm:$0xff]  ;;  %v4864_v41 = vld [vmem:[#allocation3 + $0xd8] sm:$0xff]  ;;  %v4861_v59 = vld [vmem:[#allocation3 + $0xc0] sm:$0xff] }
0x15f6   :  { %v4863_v32 = vld [vmem:[#allocation3 + $0xd0] sm:$0xff]  ;;  %v4866_v26 = vld [vmem:[#allocation3 + $0xe8] sm:$0xff]  ;;  %v4868_v61 = vld [vmem:[#allocation3 + $0xf8] sm:$0xff] }
0x15f7   :  { %4930 = vmatpush1.bf16.msra.mxu1 %v4845_v17  ;;  %4971 = vmatpush1.bf16.msra.mxu0 %v4847_v55  ;;  %v4865_v29 = vld [vmem:[#allocation3 + $0xe0] sm:$0xff]  ;;  %v4867_v35 = vld [vmem:[#allocation3 + $0xf0] sm:$0xff]  ;;  %v4870_v56 = vld [vmem:[#allocation3 + $0x108] sm:$0xff] }
0x15f8   :  { %4931 = vmatprep.subr.bf16.mxu1 %v4850_v34  ;;  %4972 = vmatprep.subr.bf16.mxu0 %v4852_v6  ;;  %v4872_v43 = vld [vmem:[#allocation3 + $0x118] sm:$0xff]  ;;  %v4869_v22 = vld [vmem:[#allocation3 + $0x100] sm:$0xff]  ;;  %v4871_v10 = vld [vmem:[#allocation3 + $0x110] sm:$0xff] }
0x15f9   :  { %v4874_v27 = vld [vmem:[#allocation3 + $0x128] sm:$0xff]  ;;  %v4876_v48 = vld [vmem:[#allocation3 + $0x138] sm:$0xff]  ;;  %v4873_v50 = vld [vmem:[#allocation3 + $0x120] sm:$0xff] }
0x15fa   :  { %v4875_v15 = vld [vmem:[#allocation3 + $0x130] sm:$0xff]  ;;  %v4878_v47 = vld [vmem:[#allocation3 + $0x148] sm:$0xff]  ;;  %v4880_v39 = vld [vmem:[#allocation3 + $0x158] sm:$0xff] }
0x15fb   :  { %4932 = vmatpush1.bf16.msra.mxu1 %v4849_v37  ;;  %4973 = vmatpush1.bf16.msra.mxu0 %v4851_v60  ;;  %v4877_v21 = vld [vmem:[#allocation3 + $0x140] sm:$0xff]  ;;  %v4879_v28 = vld [vmem:[#allocation3 + $0x150] sm:$0xff]  ;;  %v4882_v5 = vld [vmem:[#allocation3 + $0x168] sm:$0xff] }
0x15fc   :  { %4933 = vmatprep.subr.bf16.mxu1 %v4854_v63  ;;  %4974 = vmatprep.subr.bf16.mxu0 %v4856_v54  ;;  %v4884_v58 = vld [vmem:[#allocation3 + $0x178] sm:$0xff]  ;;  %v4881_v52 = vld [vmem:[#allocation3 + $0x160] sm:$0xff]  ;;  %v4883_v38 = vld [vmem:[#allocation3 + $0x170] sm:$0xff] }
0x15fd   :  { %v4886_v40 = vld [vmem:[#allocation3 + $0x188] sm:$0xff]  ;;  %v4888_v42 = vld [vmem:[#allocation3 + $0x198] sm:$0xff]  ;;  %v4885_v24 = vld [vmem:[#allocation3 + $0x180] sm:$0xff] }
0x15fe   :  { %v4887_v0 = vld [vmem:[#allocation3 + $0x190] sm:$0xff]  ;;  %v4890_v1 = vld [vmem:[#allocation3 + $0x1a8] sm:$0xff]  ;;  %v4892_v18 = vld [vmem:[#allocation3 + $0x1b8] sm:$0xff] }
0x15ff   :  { %4934 = vmatpush1.bf16.msra.mxu1 %v4853_v33  ;;  %4975 = vmatpush1.bf16.msra.mxu0 %v4855_v9  ;;  %v4889_v57 = vld [vmem:[#allocation3 + $0x1a0] sm:$0xff]  ;;  %v4891_v46 = vld [vmem:[#allocation3 + $0x1b0] sm:$0xff]  ;;  %v4894_v13 = vld [vmem:[#allocation3 + $0x1c8] sm:$0xff] }
0x1600   :  { %4935 = vmatprep.subr.bf16.mxu1 %v4858_v2  ;;  %4976 = vmatprep.subr.bf16.mxu0 %v4860_v20  ;;  %v4896_v8 = vld [vmem:[#allocation3 + $0x1d8] sm:$0xff]  ;;  %v4893_v31 = vld [vmem:[#allocation3 + $0x1c0] sm:$0xff]  ;;  %v4895_v4 = vld [vmem:[#allocation3 + $0x1d0] sm:$0xff] }
0x1601   :  { %v4898_v51 = vld [vmem:[#allocation3 + $0x1e8] sm:$0xff]  ;;  %v4900_v45 = vld [vmem:[#allocation3 + $0x1f8] sm:$0xff]  ;;  %v4897_v19 = vld [vmem:[#allocation3 + $0x1e0] sm:$0xff] }
0x1602   :  { %v4899_v36 = vld [vmem:[#allocation3 + $0x1f0] sm:$0xff]  ;;  %v4903_v23 = vld [vmem:[#allocation8 + $0x1c] sm:$0xf] }
0x1603   :  { %4936 = vmatpush1.bf16.msra.mxu1 %v4857_v62  ;;  %4977 = vmatpush1.bf16.msra.mxu0 %v4859_v49  ;;  %v4908_v14 = vrot.slane %v4903_v23, %v6873_v12  ;;  %v4916_v17 = vrot.slane %v4903_v23, %v7717_v3  ;;  %v4912_v55 = vrot.slane %v4903_v23, %v6876_v16 }
0x1604   :  { %4937 = vmatprep.subr.bf16.mxu1 %v4862_v30  ;;  %4978 = vmatprep.subr.bf16.mxu0 %v4864_v41  ;;  %v4920_v34 = vrot.slane %v4903_v23, %v7704_v53 }
0x1607   :  { %4938 = vmatpush1.bf16.msra.mxu1 %v4861_v59  ;;  %4979 = vmatpush1.bf16.msra.mxu0 %v4863_v32 }
0x1608   :  { %4939 = vmatprep.subr.bf16.mxu1 %v4866_v26  ;;  %4980 = vmatprep.subr.bf16.mxu0 %v4868_v61 }
0x160b   :  { %4940 = vmatpush1.bf16.msra.mxu1 %v4865_v29  ;;  %4981 = vmatpush1.bf16.msra.mxu0 %v4867_v35 }
0x160c   :  { %4941 = vmatprep.subr.bf16.mxu1 %v4870_v56  ;;  %4982 = vmatprep.subr.bf16.mxu0 %v4872_v43 }
0x160f   :  { %4942 = vmatpush1.bf16.msra.mxu1 %v4869_v22  ;;  %4983 = vmatpush1.bf16.msra.mxu0 %v4871_v10 }
0x1610   :  { %4943 = vmatprep.subr.bf16.mxu1 %v4874_v27  ;;  %4984 = vmatprep.subr.bf16.mxu0 %v4876_v48 }
0x1613   :  { %4944 = vmatpush1.bf16.msra.mxu1 %v4873_v50  ;;  %4985 = vmatpush1.bf16.msra.mxu0 %v4875_v15 }
0x1614   :  { %4945 = vmatprep.subr.bf16.mxu1 %v4878_v47  ;;  %4986 = vmatprep.subr.bf16.mxu0 %v4880_v39 }
0x1617   :  { %4946 = vmatpush1.bf16.msra.mxu1 %v4877_v21  ;;  %4987 = vmatpush1.bf16.msra.mxu0 %v4879_v28 }
0x1618   :  { %4947 = vmatprep.subr.bf16.mxu1 %v4882_v5  ;;  %4988 = vmatprep.subr.bf16.mxu0 %v4884_v58 }
0x161b   :  { %4948 = vmatpush1.bf16.msra.mxu1 %v4881_v52  ;;  %4989 = vmatpush1.bf16.msra.mxu0 %v4883_v38 }
0x161c   :  { %4949 = vmatprep.subr.bf16.mxu1 %v4886_v40  ;;  %4990 = vmatprep.subr.bf16.mxu0 %v4888_v42 }
0x161f   :  { %4950 = vmatpush1.bf16.msra.mxu1 %v4885_v24  ;;  %4991 = vmatpush1.bf16.msra.mxu0 %v4887_v0 }
0x1620   :  { %4951 = vmatprep.subr.bf16.mxu1 %v4890_v1  ;;  %4992 = vmatprep.subr.bf16.mxu0 %v4892_v18 }
0x1623   :  { %4952 = vmatpush1.bf16.msra.mxu1 %v4889_v57  ;;  %4993 = vmatpush1.bf16.msra.mxu0 %v4891_v46 }
0x1624   :  { %4953 = vmatprep.subr.bf16.mxu1 %v4894_v13  ;;  %4994 = vmatprep.subr.bf16.mxu0 %v4896_v8 }
0x1627   :  { %4954 = vmatpush1.bf16.msra.mxu1 %v4893_v31  ;;  %4995 = vmatpush1.bf16.msra.mxu0 %v4895_v4 }
0x1628   :  { %4955 = vmatprep.subr.bf16.mxu1 %v4898_v51  ;;  %4996 = vmatprep.subr.bf16.mxu0 %v4900_v45 }
0x162b   :  { %4956 = vmatpush1.bf16.msra.mxu1 %v4897_v19  ;;  %4997 = vmatpush1.bf16.msra.mxu0 %v4899_v36 }
0x162e   :  { %4958 = vmatmul.mubr.bf16.vlgmr.msra.gmra.mrb[28].mxu1 %v4901_v7  ;;  %4999 = vmatmul.mubr.bf16.vlgmr.msra.gmra.mrb[36].mxu0 %v4901_v7 }
0x1701   :  { %v4959_v6 = vpop.f32.mrb[28].mxu1  ;;  %v5000_v37 = vpop.f32.mrb[36].mxu0 }
0x1702   :  { %v8094_v60 = vadd.f32 %v4959_v6, %v4908_v14  ;;  %v8096_v63 = vadd.f32 %v5000_v37, %v4916_v17  ;;  %v4961_v44 = vpop.f32.mrb[29].mxu1  ;;  %v5002_v54 = vpop.f32.mrb[37].mxu0 }
0x1703   :  { %v4962_v33 = vadd.f32 %v4961_v44, %v4912_v55  ;;  %v8098_v9 = vadd.f32 %v5002_v54, %v4920_v34  ;;  %v4963_v2 = vpop.f32.mrb[30].mxu1  ;;  %v5004_v20 = vpop.f32.mrb[38].mxu0 }
0x1704   :  { %v5007_v62 = vmax.f32 %v8094_v60, 0.0  ;;  %v5009_v49 = vmax.f32 %v8096_v63, 0.0  ;;  %v4964_v30 = vpop.f32.mrb[31].mxu1  ;;  %v5005_v41 = vpop.f32.mrb[39].mxu0 }
0x1705   :  { %v5008_v59 = vmax.f32 %v4962_v33, 0.0  ;;  %v5010_v32 = vmax.f32 %v8098_v9, 0.0 }
0x1706   :  { %6658 = dma.done.wait [#allocation4 + $0x1], 16384 }
0x1707   :  { %6659 = vsyncadd [#allocation4 + $0x1], 4294950912  ;;  %v5178_v26 = vpack.c.bf16 %v5008_v59, %v5008_v59  ;;  %5030 = sst [smem:[#allocation49]] %s6698_s2  ;;  %s5014_s30 = scalar_lea.hbm %s8258_s3, 24576 }
0x1708   :  { %5032 = sst [smem:[#allocation49 + $0x1]] %s6698_s2  ;;  %s6704_s8 = smov [#allocation48]  }
0x1709   :  { %5235 = vmatprep.mubr.bf16.mxu1 %v5178_v26  ;;  %5317 = vmatprep.mubr.bf16.mxu0 %v5178_v26  ;;  %5034 = sst [smem:[#allocation49 + $0x2]] %s6678_s10 }
0x170a   :  { %5036 = sst [smem:[#allocation49 + $0x3]] %s6676_s29 }
0x170b   :  { %5038 = sst [smem:[#allocation49 + $0x4]] %s6671_s11 }
0x170c   :  { %5040 = sst [smem:[#allocation49 + $0x5]] %s6675_s28 }
0x170d   :  { %5042 = sst [smem:[#allocation49 + $0x6]] %s6674_s27 }
0x170e   :  { %5044 = sst [smem:[#allocation49 + $0x7]] %s6676_s29 }
0x170f   :  { %5046 = sst [smem:[#allocation49 + $0x8]] %s6678_s10 }
0x1710   :  { %5048 = dma.general %s5014_s30, 16384, %s4654_s15, %s6679_s13, %s6704_s8, [#allocation49], %s6787_s9, 0  }
0x1711   :  { %v5050_v61 = vld [vmem:[#allocation3 + $0x408] sm:$0xff]  ;;  %v5052_v29 = vld [vmem:[#allocation3 + $0x418] sm:$0xff]  ;;  %v5049_v35 = vld [vmem:[#allocation3 + $0x400] sm:$0xff] }
0x1712   :  { %5203 = vmatprep.subr.bf16.mxu1 %v5050_v61  ;;  %5285 = vmatprep.subr.bf16.mxu0 %v5052_v29  ;;  %v5051_v56 = vld [vmem:[#allocation3 + $0x410] sm:$0xff]  ;;  %v5054_v43 = vld [vmem:[#allocation3 + $0x428] sm:$0xff]  ;;  %v5056_v22 = vld [vmem:[#allocation3 + $0x438] sm:$0xff] }
0x1713   :  { %5204 = vmatpush1.bf16.msra.mxu1 %v5049_v35  ;;  %5286 = vmatpush1.bf16.msra.mxu0 %v5051_v56  ;;  %v5053_v10 = vld [vmem:[#allocation3 + $0x420] sm:$0xff]  ;;  %v5055_v27 = vld [vmem:[#allocation3 + $0x430] sm:$0xff]  ;;  %v5058_v48 = vld [vmem:[#allocation3 + $0x448] sm:$0xff] }
0x1714   :  { %5205 = vmatprep.subr.bf16.mxu1 %v5054_v43  ;;  %5287 = vmatprep.subr.bf16.mxu0 %v5056_v22  ;;  %v5060_v50 = vld [vmem:[#allocation3 + $0x458] sm:$0xff]  ;;  %v5057_v15 = vld [vmem:[#allocation3 + $0x440] sm:$0xff]  ;;  %v5059_v47 = vld [vmem:[#allocation3 + $0x450] sm:$0xff] }
0x1715   :  { %v5062_v39 = vld [vmem:[#allocation3 + $0x468] sm:$0xff]  ;;  %v5064_v21 = vld [vmem:[#allocation3 + $0x478] sm:$0xff]  ;;  %v5061_v28 = vld [vmem:[#allocation3 + $0x460] sm:$0xff] }
0x1716   :  { %v5063_v5 = vld [vmem:[#allocation3 + $0x470] sm:$0xff]  ;;  %v5066_v58 = vld [vmem:[#allocation3 + $0x488] sm:$0xff]  ;;  %v5068_v52 = vld [vmem:[#allocation3 + $0x498] sm:$0xff] }
0x1717   :  { %5206 = vmatpush1.bf16.msra.mxu1 %v5053_v10  ;;  %5288 = vmatpush1.bf16.msra.mxu0 %v5055_v27  ;;  %v5065_v38 = vld [vmem:[#allocation3 + $0x480] sm:$0xff]  ;;  %v5067_v40 = vld [vmem:[#allocation3 + $0x490] sm:$0xff]  ;;  %v5070_v42 = vld [vmem:[#allocation3 + $0x4a8] sm:$0xff] }
0x1718   :  { %5207 = vmatprep.subr.bf16.mxu1 %v5058_v48  ;;  %5289 = vmatprep.subr.bf16.mxu0 %v5060_v50  ;;  %v5072_v24 = vld [vmem:[#allocation3 + $0x4b8] sm:$0xff]  ;;  %v5069_v0 = vld [vmem:[#allocation3 + $0x4a0] sm:$0xff]  ;;  %v5071_v1 = vld [vmem:[#allocation3 + $0x4b0] sm:$0xff] }
0x1719   :  { %v5074_v18 = vld [vmem:[#allocation3 + $0x4c8] sm:$0xff]  ;;  %v5076_v57 = vld [vmem:[#allocation3 + $0x4d8] sm:$0xff]  ;;  %v5073_v46 = vld [vmem:[#allocation3 + $0x4c0] sm:$0xff] }
0x171a   :  { %v5075_v13 = vld [vmem:[#allocation3 + $0x4d0] sm:$0xff]  ;;  %v5078_v8 = vld [vmem:[#allocation3 + $0x4e8] sm:$0xff]  ;;  %v5080_v31 = vld [vmem:[#allocation3 + $0x4f8] sm:$0xff] }
0x171b   :  { %5208 = vmatpush1.bf16.msra.mxu1 %v5057_v15  ;;  %5290 = vmatpush1.bf16.msra.mxu0 %v5059_v47  ;;  %v5077_v4 = vld [vmem:[#allocation3 + $0x4e0] sm:$0xff]  ;;  %v5079_v51 = vld [vmem:[#allocation3 + $0x4f0] sm:$0xff]  ;;  %v5082_v45 = vld [vmem:[#allocation3 + $0x508] sm:$0xff] }
0x171c   :  { %5209 = vmatprep.subr.bf16.mxu1 %v5062_v39  ;;  %5291 = vmatprep.subr.bf16.mxu0 %v5064_v21  ;;  %v5084_v19 = vld [vmem:[#allocation3 + $0x518] sm:$0xff]  ;;  %v5081_v36 = vld [vmem:[#allocation3 + $0x500] sm:$0xff]  ;;  %v5083_v7 = vld [vmem:[#allocation3 + $0x510] sm:$0xff] }
0x171d   :  { %v5086_v23 = vld [vmem:[#allocation3 + $0x528] sm:$0xff]  ;;  %v5088_v14 = vld [vmem:[#allocation3 + $0x538] sm:$0xff]  ;;  %v5085_v17 = vld [vmem:[#allocation3 + $0x520] sm:$0xff] }
0x171e   :  { %v5087_v55 = vld [vmem:[#allocation3 + $0x530] sm:$0xff]  ;;  %v5090_v34 = vld [vmem:[#allocation3 + $0x548] sm:$0xff]  ;;  %v5092_v6 = vld [vmem:[#allocation3 + $0x558] sm:$0xff] }
0x171f   :  { %5210 = vmatpush1.bf16.msra.mxu1 %v5061_v28  ;;  %5292 = vmatpush1.bf16.msra.mxu0 %v5063_v5  ;;  %v5089_v37 = vld [vmem:[#allocation3 + $0x540] sm:$0xff]  ;;  %v5091_v44 = vld [vmem:[#allocation3 + $0x550] sm:$0xff]  ;;  %v5094_v54 = vld [vmem:[#allocation3 + $0x568] sm:$0xff]  ;;  %v5177_v28 = vpack.c.bf16 %v5007_v62, %v5007_v62 }
0x1720   :  { %5211 = vmatprep.subr.bf16.mxu1 %v5066_v58  ;;  %5293 = vmatprep.subr.bf16.mxu0 %v5068_v52  ;;  %v5096_v33 = vld [vmem:[#allocation3 + $0x578] sm:$0xff]  ;;  %v5093_v2 = vld [vmem:[#allocation3 + $0x560] sm:$0xff]  ;;  %v5095_v20 = vld [vmem:[#allocation3 + $0x570] sm:$0xff] }
0x1721   :  { %v5098_v30 = vld [vmem:[#allocation3 + $0x588] sm:$0xff]  ;;  %v5100_v41 = vld [vmem:[#allocation3 + $0x598] sm:$0xff]  ;;  %v5097_v59 = vld [vmem:[#allocation3 + $0x580] sm:$0xff] }
0x1722   :  { %v5099_v26 = vld [vmem:[#allocation3 + $0x590] sm:$0xff]  ;;  %v5102_v61 = vld [vmem:[#allocation3 + $0x5a8] sm:$0xff]  ;;  %v5104_v29 = vld [vmem:[#allocation3 + $0x5b8] sm:$0xff] }
0x1723   :  { %5212 = vmatpush1.bf16.msra.mxu1 %v5065_v38  ;;  %5294 = vmatpush1.bf16.msra.mxu0 %v5067_v40  ;;  %v5101_v35 = vld [vmem:[#allocation3 + $0x5a0] sm:$0xff]  ;;  %v5103_v56 = vld [vmem:[#allocation3 + $0x5b0] sm:$0xff]  ;;  %v5106_v43 = vld [vmem:[#allocation3 + $0x5c8] sm:$0xff]  ;;  %v5180_v40 = vpack.c.bf16 %v5010_v32, %v5010_v32 }
0x1724   :  { %5213 = vmatprep.subr.bf16.mxu1 %v5070_v42  ;;  %5295 = vmatprep.subr.bf16.mxu0 %v5072_v24  ;;  %v5108_v22 = vld [vmem:[#allocation3 + $0x5d8] sm:$0xff]  ;;  %v5105_v10 = vld [vmem:[#allocation3 + $0x5c0] sm:$0xff]  ;;  %v5107_v27 = vld [vmem:[#allocation3 + $0x5d0] sm:$0xff] }
0x1725   :  { %v5110_v48 = vld [vmem:[#allocation3 + $0x5e8] sm:$0xff]  ;;  %v5112_v50 = vld [vmem:[#allocation3 + $0x5f8] sm:$0xff]  ;;  %v5109_v15 = vld [vmem:[#allocation3 + $0x5e0] sm:$0xff] }
0x1726   :  { %v5111_v47 = vld [vmem:[#allocation3 + $0x5f0] sm:$0xff]  ;;  %v5114_v39 = vld [vmem:[#allocation3 + $0x608] sm:$0xff]  ;;  %v5116_v21 = vld [vmem:[#allocation3 + $0x618] sm:$0xff] }
0x1727   :  { %5214 = vmatpush1.bf16.msra.mxu1 %v5069_v0  ;;  %5296 = vmatpush1.bf16.msra.mxu0 %v5071_v1  ;;  %v5113_v5 = vld [vmem:[#allocation3 + $0x600] sm:$0xff]  ;;  %v5115_v58 = vld [vmem:[#allocation3 + $0x610] sm:$0xff]  ;;  %v5118_v52 = vld [vmem:[#allocation3 + $0x628] sm:$0xff] }
0x1728   :  { %5215 = vmatprep.subr.bf16.mxu1 %v5074_v18  ;;  %5297 = vmatprep.subr.bf16.mxu0 %v5076_v57  ;;  %v5120_v38 = vld [vmem:[#allocation3 + $0x638] sm:$0xff]  ;;  %v5117_v60 = vld [vmem:[#allocation3 + $0x620] sm:$0xff]  ;;  %v5119_v62 = vld [vmem:[#allocation3 + $0x630] sm:$0xff] }
0x1729   :  { %v5122_v42 = vld [vmem:[#allocation3 + $0x648] sm:$0xff]  ;;  %v5124_v24 = vld [vmem:[#allocation3 + $0x658] sm:$0xff]  ;;  %v5121_v0 = vld [vmem:[#allocation3 + $0x640] sm:$0xff] }
0x172a   :  { %v5123_v9 = vld [vmem:[#allocation3 + $0x650] sm:$0xff]  ;;  %v5126_v1 = vld [vmem:[#allocation3 + $0x668] sm:$0xff]  ;;  %v5128_v32 = vld [vmem:[#allocation3 + $0x678] sm:$0xff] }
0x172b   :  { %5216 = vmatpush1.bf16.msra.mxu1 %v5073_v46  ;;  %5298 = vmatpush1.bf16.msra.mxu0 %v5075_v13  ;;  %v5125_v18 = vld [vmem:[#allocation3 + $0x660] sm:$0xff]  ;;  %v5127_v57 = vld [vmem:[#allocation3 + $0x670] sm:$0xff]  ;;  %v5130_v46 = vld [vmem:[#allocation3 + $0x688] sm:$0xff] }
0x172c   :  { %5217 = vmatprep.subr.bf16.mxu1 %v5078_v8  ;;  %5299 = vmatprep.subr.bf16.mxu0 %v5080_v31  ;;  %v5132_v13 = vld [vmem:[#allocation3 + $0x698] sm:$0xff]  ;;  %v5129_v8 = vld [vmem:[#allocation3 + $0x680] sm:$0xff]  ;;  %v5131_v31 = vld [vmem:[#allocation3 + $0x690] sm:$0xff] }
0x172f   :  { %5218 = vmatpush1.bf16.msra.mxu1 %v5077_v4  ;;  %5300 = vmatpush1.bf16.msra.mxu0 %v5079_v51  ;;  %v5134_v4 = vld [vmem:[#allocation3 + $0x6a8] sm:$0xff]  ;;  %v5136_v51 = vld [vmem:[#allocation3 + $0x6b8] sm:$0xff] }
0x1730   :  { %5219 = vmatprep.subr.bf16.mxu1 %v5082_v45  ;;  %5301 = vmatprep.subr.bf16.mxu0 %v5084_v19  ;;  %v5133_v45 = vld [vmem:[#allocation3 + $0x6a0] sm:$0xff]  ;;  %v5135_v19 = vld [vmem:[#allocation3 + $0x6b0] sm:$0xff] }
0x1733   :  { %5220 = vmatpush1.bf16.msra.mxu1 %v5081_v36  ;;  %5302 = vmatpush1.bf16.msra.mxu0 %v5083_v7  ;;  %v5138_v36 = vld [vmem:[#allocation3 + $0x6c8] sm:$0xff]  ;;  %v5140_v7 = vld [vmem:[#allocation3 + $0x6d8] sm:$0xff] }
0x1734   :  { %5221 = vmatprep.subr.bf16.mxu1 %v5086_v23  ;;  %5303 = vmatprep.subr.bf16.mxu0 %v5088_v14  ;;  %v5137_v23 = vld [vmem:[#allocation3 + $0x6c0] sm:$0xff]  ;;  %v5139_v14 = vld [vmem:[#allocation3 + $0x6d0] sm:$0xff] }
0x1737   :  { %5222 = vmatpush1.bf16.msra.mxu1 %v5085_v17  ;;  %5304 = vmatpush1.bf16.msra.mxu0 %v5087_v55  ;;  %v5142_v17 = vld [vmem:[#allocation3 + $0x6e8] sm:$0xff]  ;;  %v5144_v55 = vld [vmem:[#allocation3 + $0x6f8] sm:$0xff] }
0x1738   :  { %5223 = vmatprep.subr.bf16.mxu1 %v5090_v34  ;;  %5305 = vmatprep.subr.bf16.mxu0 %v5092_v6  ;;  %v5141_v34 = vld [vmem:[#allocation3 + $0x6e0] sm:$0xff]  ;;  %v5143_v6 = vld [vmem:[#allocation3 + $0x6f0] sm:$0xff] }
0x173b   :  { %5224 = vmatpush1.bf16.msra.mxu1 %v5089_v37  ;;  %5306 = vmatpush1.bf16.msra.mxu0 %v5091_v44  ;;  %v5146_v37 = vld [vmem:[#allocation3 + $0x708] sm:$0xff]  ;;  %v5148_v44 = vld [vmem:[#allocation3 + $0x718] sm:$0xff] }
0x173c   :  { %5225 = vmatprep.subr.bf16.mxu1 %v5094_v54  ;;  %5307 = vmatprep.subr.bf16.mxu0 %v5096_v33  ;;  %v5145_v54 = vld [vmem:[#allocation3 + $0x700] sm:$0xff]  ;;  %v5147_v33 = vld [vmem:[#allocation3 + $0x710] sm:$0xff] }
0x173f   :  { %5226 = vmatpush1.bf16.msra.mxu1 %v5093_v2  ;;  %5308 = vmatpush1.bf16.msra.mxu0 %v5095_v20  ;;  %v5150_v2 = vld [vmem:[#allocation3 + $0x728] sm:$0xff]  ;;  %v5152_v20 = vld [vmem:[#allocation3 + $0x738] sm:$0xff] }
0x1740   :  { %5227 = vmatprep.subr.bf16.mxu1 %v5098_v30  ;;  %5309 = vmatprep.subr.bf16.mxu0 %v5100_v41  ;;  %v5149_v30 = vld [vmem:[#allocation3 + $0x720] sm:$0xff]  ;;  %v5151_v41 = vld [vmem:[#allocation3 + $0x730] sm:$0xff] }
0x1743   :  { %5228 = vmatpush1.bf16.msra.mxu1 %v5097_v59  ;;  %5310 = vmatpush1.bf16.msra.mxu0 %v5099_v26  ;;  %v5154_v59 = vld [vmem:[#allocation3 + $0x748] sm:$0xff]  ;;  %v5156_v26 = vld [vmem:[#allocation3 + $0x758] sm:$0xff] }
0x1744   :  { %5229 = vmatprep.subr.bf16.mxu1 %v5102_v61  ;;  %5311 = vmatprep.subr.bf16.mxu0 %v5104_v29  ;;  %v5153_v61 = vld [vmem:[#allocation3 + $0x740] sm:$0xff]  ;;  %v5155_v29 = vld [vmem:[#allocation3 + $0x750] sm:$0xff] }
0x1747   :  { %5230 = vmatpush1.bf16.msra.mxu1 %v5101_v35  ;;  %5312 = vmatpush1.bf16.msra.mxu0 %v5103_v56  ;;  %v5158_v35 = vld [vmem:[#allocation3 + $0x768] sm:$0xff]  ;;  %v5160_v56 = vld [vmem:[#allocation3 + $0x778] sm:$0xff] }
0x1748   :  { %5231 = vmatprep.subr.bf16.mxu1 %v5106_v43  ;;  %5313 = vmatprep.subr.bf16.mxu0 %v5108_v22  ;;  %v5157_v43 = vld [vmem:[#allocation3 + $0x760] sm:$0xff]  ;;  %v5159_v22 = vld [vmem:[#allocation3 + $0x770] sm:$0xff] }
0x174b   :  { %5232 = vmatpush1.bf16.msra.mxu1 %v5105_v10  ;;  %5314 = vmatpush1.bf16.msra.mxu0 %v5107_v27  ;;  %v5162_v10 = vld [vmem:[#allocation3 + $0x788] sm:$0xff]  ;;  %v5164_v27 = vld [vmem:[#allocation3 + $0x798] sm:$0xff] }
0x174c   :  { %5233 = vmatprep.subr.bf16.mxu1 %v5110_v48  ;;  %5315 = vmatprep.subr.bf16.mxu0 %v5112_v50  ;;  %v5161_v48 = vld [vmem:[#allocation3 + $0x780] sm:$0xff]  ;;  %v5163_v50 = vld [vmem:[#allocation3 + $0x790] sm:$0xff] }
0x174f   :  { %5234 = vmatpush1.bf16.msra.mxu1 %v5109_v15  ;;  %5316 = vmatpush1.bf16.msra.mxu0 %v5111_v47  ;;  %v5166_v15 = vld [vmem:[#allocation3 + $0x7a8] sm:$0xff]  ;;  %v5168_v47 = vld [vmem:[#allocation3 + $0x7b8] sm:$0xff] }
0x1750   :  { %5244 = vmatprep.subr.bf16.mxu1 %v5114_v39  ;;  %5326 = vmatprep.subr.bf16.mxu0 %v5116_v21  ;;  %v5165_v39 = vld [vmem:[#allocation3 + $0x7a0] sm:$0xff]  ;;  %v5167_v21 = vld [vmem:[#allocation3 + $0x7b0] sm:$0xff] }
0x1752   :  { %5236 = vmatmul.mubr.bf16.vlgmr.msra.gmra.mrb[32].mxu1 %v5177_v28  ;;  %5318 = vmatmul.mubr.bf16.vlgmr.msra.gmra.mrb[40].mxu0 %v5177_v28  ;;  %v5170_v28 = vld [vmem:[#allocation3 + $0x7c8] sm:$0xff] }
0x1753   :  { %5245 = vmatpush1.bf16.msra.mxu1 %v5113_v5  ;;  %5327 = vmatpush1.bf16.msra.mxu0 %v5115_v58  ;;  %v5172_v5 = vld [vmem:[#allocation3 + $0x7d8] sm:$0xff]  ;;  %v5169_v58 = vld [vmem:[#allocation3 + $0x7c0] sm:$0xff] }
0x1754   :  { %5246 = vmatprep.subr.bf16.mxu1 %v5118_v52  ;;  %5328 = vmatprep.subr.bf16.mxu0 %v5120_v38  ;;  %v5171_v52 = vld [vmem:[#allocation3 + $0x7d0] sm:$0xff]  ;;  %v5174_v38 = vld [vmem:[#allocation3 + $0x7e8] sm:$0xff] }
0x1755   :  { %5276 = vmatprep.mubr.bf16.mxu1 %v5180_v40  ;;  %5358 = vmatprep.mubr.bf16.mxu0 %v5180_v40  ;;  %v5176_v40 = vld [vmem:[#allocation3 + $0x7f8] sm:$0xff] }
0x1757   :  { %5247 = vmatpush1.bf16.msra.mxu1 %v5117_v60  ;;  %5329 = vmatpush1.bf16.msra.mxu0 %v5119_v62  ;;  %v5173_v60 = vld [vmem:[#allocation3 + $0x7e0] sm:$0xff]  ;;  %v5175_v62 = vld [vmem:[#allocation3 + $0x7f0] sm:$0xff] }
0x1758   :  { %5248 = vmatprep.subr.bf16.mxu1 %v5122_v42  ;;  %5330 = vmatprep.subr.bf16.mxu0 %v5124_v24  ;;  %v5179_v42 = vpack.c.bf16 %v5009_v49, %v5009_v49  ;;  %v5181_v24 = vld [vmem:[#allocation8 + $0x20] sm:$0xf] }
0x175b   :  { %5249 = vmatpush1.bf16.msra.mxu1 %v5121_v0  ;;  %5331 = vmatpush1.bf16.msra.mxu0 %v5123_v9  ;;  %v5186_v0 = vrot.slane %v5181_v24, %v6873_v12  ;;  %v5194_v9 = vrot.slane %v5181_v24, %v7717_v3 }
0x175c   :  { %5250 = vmatprep.subr.bf16.mxu1 %v5126_v1  ;;  %5332 = vmatprep.subr.bf16.mxu0 %v5128_v32  ;;  %v5190_v1 = vrot.slane %v5181_v24, %v6876_v16  ;;  %v5198_v32 = vrot.slane %v5181_v24, %v7704_v53 }
0x175f   :  { %5251 = vmatpush1.bf16.msra.mxu1 %v5125_v18  ;;  %5333 = vmatpush1.bf16.msra.mxu0 %v5127_v57 }
0x1760   :  { %5252 = vmatprep.subr.bf16.mxu1 %v5130_v46  ;;  %5334 = vmatprep.subr.bf16.mxu0 %v5132_v13 }
0x1763   :  { %5253 = vmatpush1.bf16.msra.mxu1 %v5129_v8  ;;  %5335 = vmatpush1.bf16.msra.mxu0 %v5131_v31 }
0x1764   :  { %5254 = vmatprep.subr.bf16.mxu1 %v5134_v4  ;;  %5336 = vmatprep.subr.bf16.mxu0 %v5136_v51 }
0x1767   :  { %5255 = vmatpush1.bf16.msra.mxu1 %v5133_v45  ;;  %5337 = vmatpush1.bf16.msra.mxu0 %v5135_v19 }
0x1768   :  { %5256 = vmatprep.subr.bf16.mxu1 %v5138_v36  ;;  %5338 = vmatprep.subr.bf16.mxu0 %v5140_v7 }
0x176b   :  { %5257 = vmatpush1.bf16.msra.mxu1 %v5137_v23  ;;  %5339 = vmatpush1.bf16.msra.mxu0 %v5139_v14 }
0x176c   :  { %5258 = vmatprep.subr.bf16.mxu1 %v5142_v17  ;;  %5340 = vmatprep.subr.bf16.mxu0 %v5144_v55 }
0x176f   :  { %5259 = vmatpush1.bf16.msra.mxu1 %v5141_v34  ;;  %5341 = vmatpush1.bf16.msra.mxu0 %v5143_v6 }
0x1770   :  { %5260 = vmatprep.subr.bf16.mxu1 %v5146_v37  ;;  %5342 = vmatprep.subr.bf16.mxu0 %v5148_v44 }
0x1773   :  { %5261 = vmatpush1.bf16.msra.mxu1 %v5145_v54  ;;  %5343 = vmatpush1.bf16.msra.mxu0 %v5147_v33 }
0x1774   :  { %5262 = vmatprep.subr.bf16.mxu1 %v5150_v2  ;;  %5344 = vmatprep.subr.bf16.mxu0 %v5152_v20 }
0x1777   :  { %5263 = vmatpush1.bf16.msra.mxu1 %v5149_v30  ;;  %5345 = vmatpush1.bf16.msra.mxu0 %v5151_v41 }
0x1778   :  { %5264 = vmatprep.subr.bf16.mxu1 %v5154_v59  ;;  %5346 = vmatprep.subr.bf16.mxu0 %v5156_v26 }
0x177b   :  { %5265 = vmatpush1.bf16.msra.mxu1 %v5153_v61  ;;  %5347 = vmatpush1.bf16.msra.mxu0 %v5155_v29 }
0x177c   :  { %5266 = vmatprep.subr.bf16.mxu1 %v5158_v35  ;;  %5348 = vmatprep.subr.bf16.mxu0 %v5160_v56 }
0x177f   :  { %5267 = vmatpush1.bf16.msra.mxu1 %v5157_v43  ;;  %5349 = vmatpush1.bf16.msra.mxu0 %v5159_v22 }
0x1780   :  { %5268 = vmatprep.subr.bf16.mxu1 %v5162_v10  ;;  %5350 = vmatprep.subr.bf16.mxu0 %v5164_v27 }
0x1783   :  { %5269 = vmatpush1.bf16.msra.mxu1 %v5161_v48  ;;  %5351 = vmatpush1.bf16.msra.mxu0 %v5163_v50 }
0x1784   :  { %5270 = vmatprep.subr.bf16.mxu1 %v5166_v15  ;;  %5352 = vmatprep.subr.bf16.mxu0 %v5168_v47 }
0x1787   :  { %5271 = vmatpush1.bf16.msra.mxu1 %v5165_v39  ;;  %5353 = vmatpush1.bf16.msra.mxu0 %v5167_v21 }
0x1788   :  { %5272 = vmatprep.subr.bf16.mxu1 %v5170_v28  ;;  %5354 = vmatprep.subr.bf16.mxu0 %v5172_v5 }
0x178b   :  { %5273 = vmatpush1.bf16.msra.mxu1 %v5169_v58  ;;  %5355 = vmatpush1.bf16.msra.mxu0 %v5171_v52 }
0x178c   :  { %5274 = vmatprep.subr.bf16.mxu1 %v5174_v38  ;;  %5356 = vmatprep.subr.bf16.mxu0 %v5176_v40 }
0x178f   :  { %5275 = vmatpush1.bf16.msra.mxu1 %v5173_v60  ;;  %5357 = vmatpush1.bf16.msra.mxu0 %v5175_v62 }
0x1792   :  { %5277 = vmatmul.mubr.bf16.vlgmr.msra.gmra.mrb[32].mxu1 %v5179_v42  ;;  %5359 = vmatmul.mubr.bf16.vlgmr.msra.gmra.mrb[40].mxu0 %v5179_v42 }
0x1865   :  { %v5278_v18 = vpop.f32.mrb[32].mxu1  ;;  %v5360_v57 = vpop.f32.mrb[40].mxu0 }
0x1866   :  { %v8132_v46 = vadd.f32 %v5278_v18, %v5186_v0  ;;  %v8134_v63 = vadd.f32 %v5360_v57, %v5194_v9  ;;  %v5280_v49 = vpop.f32.mrb[33].mxu1  ;;  %v5362_v13 = vpop.f32.mrb[41].mxu0 }
0x1867   :  { %v6314_v8 = vadd.f32 %v5280_v49, %v5190_v1  ;;  %v8136_v31 = vadd.f32 %v5362_v13, %v5198_v32  ;;  %v5282_v4 = vpop.f32.mrb[34].mxu1  ;;  %v5364_v51 = vpop.f32.mrb[42].mxu0 }
0x1868   :  { %v5367_v45 = vmax.f32 %v8132_v46, 0.0  ;;  %v5369_v19 = vmax.f32 %v8134_v63, 0.0  ;;  %v5283_v36 = vpop.f32.mrb[35].mxu1  ;;  %v5365_v7 = vpop.f32.mrb[43].mxu0 }
0x1869   :  { %v5368_v23 = vmax.f32 %v6314_v8, 0.0  ;;  %v5370_v14 = vmax.f32 %v8136_v31, 0.0 }
0x186a   :  { %6660 = dma.done.wait [#allocation4], 16384 }
0x186b   :  { %6661 = vsyncadd [#allocation4], 4294950912  ;;  %v5537_v17 = vpack.c.bf16 %v5368_v23, %v5368_v23  ;;  %5389 = sst [smem:[#allocation51]] %s6698_s2  ;;  %s5373_s18 = scalar_lea.hbm %s8258_s3, 40960 }
0x186c   :  { %5391 = sst [smem:[#allocation51 + $0x1]] %s6698_s2  ;;  %s6705_s2 = smov [#allocation50]  }
0x186d   :  { %5594 = vmatprep.mubr.bf16.mxu1 %v5537_v17  ;;  %5676 = vmatprep.mubr.bf16.mxu0 %v5537_v17  ;;  %5393 = sst [smem:[#allocation51 + $0x2]] %s6678_s10 }
0x186e   :  { %5395 = sst [smem:[#allocation51 + $0x3]] %s6676_s29 }
0x186f   :  { %5397 = sst [smem:[#allocation51 + $0x4]] %s6671_s11 }
0x1870   :  { %5399 = sst [smem:[#allocation51 + $0x5]] %s6675_s28 }
0x1871   :  { %5401 = sst [smem:[#allocation51 + $0x6]] %s6674_s27 }
0x1872   :  { %5403 = sst [smem:[#allocation51 + $0x7]] %s6676_s29 }
0x1873   :  { %5405 = sst [smem:[#allocation51 + $0x8]] %s6678_s10 }
0x1874   :  { %5407 = dma.general %s5373_s18, 16384, %s4815_s21, %s6682_s22, %s6705_s2, [#allocation51], %s6787_s9, 0  }
0x1875   :  { %v5409_v55 = vld [vmem:[#allocation3 + $0x8] sm:$0xff]  ;;  %v5411_v34 = vld [vmem:[#allocation3 + $0x18] sm:$0xff]  ;;  %v5408_v6 = vld [vmem:[#allocation3] sm:$0xff] }
0x1876   :  { %5562 = vmatprep.subr.bf16.mxu1 %v5409_v55  ;;  %5644 = vmatprep.subr.bf16.mxu0 %v5411_v34  ;;  %v5410_v37 = vld [vmem:[#allocation3 + $0x10] sm:$0xff]  ;;  %v5413_v44 = vld [vmem:[#allocation3 + $0x28] sm:$0xff]  ;;  %v5415_v54 = vld [vmem:[#allocation3 + $0x38] sm:$0xff] }
0x1877   :  { %5563 = vmatpush1.bf16.msra.mxu1 %v5408_v6  ;;  %5645 = vmatpush1.bf16.msra.mxu0 %v5410_v37  ;;  %v5412_v33 = vld [vmem:[#allocation3 + $0x20] sm:$0xff]  ;;  %v5414_v2 = vld [vmem:[#allocation3 + $0x30] sm:$0xff]  ;;  %v5417_v20 = vld [vmem:[#allocation3 + $0x48] sm:$0xff] }
0x1878   :  { %5564 = vmatprep.subr.bf16.mxu1 %v5413_v44  ;;  %5646 = vmatprep.subr.bf16.mxu0 %v5415_v54  ;;  %v5419_v30 = vld [vmem:[#allocation3 + $0x58] sm:$0xff]  ;;  %v5416_v41 = vld [vmem:[#allocation3 + $0x40] sm:$0xff]  ;;  %v5418_v59 = vld [vmem:[#allocation3 + $0x50] sm:$0xff] }
0x1879   :  { %v5421_v26 = vld [vmem:[#allocation3 + $0x68] sm:$0xff]  ;;  %v5423_v61 = vld [vmem:[#allocation3 + $0x78] sm:$0xff]  ;;  %v5420_v29 = vld [vmem:[#allocation3 + $0x60] sm:$0xff] }
0x187a   :  { %v5422_v35 = vld [vmem:[#allocation3 + $0x70] sm:$0xff]  ;;  %v5425_v56 = vld [vmem:[#allocation3 + $0x88] sm:$0xff]  ;;  %v5427_v43 = vld [vmem:[#allocation3 + $0x98] sm:$0xff] }
0x187b   :  { %5565 = vmatpush1.bf16.msra.mxu1 %v5412_v33  ;;  %5647 = vmatpush1.bf16.msra.mxu0 %v5414_v2  ;;  %v5424_v22 = vld [vmem:[#allocation3 + $0x80] sm:$0xff]  ;;  %v5426_v10 = vld [vmem:[#allocation3 + $0x90] sm:$0xff]  ;;  %v5429_v27 = vld [vmem:[#allocation3 + $0xa8] sm:$0xff] }
0x187c   :  { %5566 = vmatprep.subr.bf16.mxu1 %v5417_v20  ;;  %5648 = vmatprep.subr.bf16.mxu0 %v5419_v30  ;;  %v5431_v48 = vld [vmem:[#allocation3 + $0xb8] sm:$0xff]  ;;  %v5428_v50 = vld [vmem:[#allocation3 + $0xa0] sm:$0xff]  ;;  %v5430_v15 = vld [vmem:[#allocation3 + $0xb0] sm:$0xff] }
0x187d   :  { %v5433_v47 = vld [vmem:[#allocation3 + $0xc8] sm:$0xff]  ;;  %v5435_v39 = vld [vmem:[#allocation3 + $0xd8] sm:$0xff]  ;;  %v5432_v21 = vld [vmem:[#allocation3 + $0xc0] sm:$0xff] }
0x187e   :  { %v5434_v28 = vld [vmem:[#allocation3 + $0xd0] sm:$0xff]  ;;  %v5437_v5 = vld [vmem:[#allocation3 + $0xe8] sm:$0xff]  ;;  %v5439_v58 = vld [vmem:[#allocation3 + $0xf8] sm:$0xff] }
0x187f   :  { %5567 = vmatpush1.bf16.msra.mxu1 %v5416_v41  ;;  %5649 = vmatpush1.bf16.msra.mxu0 %v5418_v59  ;;  %v5436_v52 = vld [vmem:[#allocation3 + $0xe0] sm:$0xff]  ;;  %v5438_v38 = vld [vmem:[#allocation3 + $0xf0] sm:$0xff]  ;;  %v5441_v40 = vld [vmem:[#allocation3 + $0x108] sm:$0xff] }
0x1880   :  { %5568 = vmatprep.subr.bf16.mxu1 %v5421_v26  ;;  %5650 = vmatprep.subr.bf16.mxu0 %v5423_v61  ;;  %v5443_v60 = vld [vmem:[#allocation3 + $0x118] sm:$0xff]  ;;  %v5440_v62 = vld [vmem:[#allocation3 + $0x100] sm:$0xff]  ;;  %v5442_v42 = vld [vmem:[#allocation3 + $0x110] sm:$0xff] }
0x1881   :  { %v5445_v24 = vld [vmem:[#allocation3 + $0x128] sm:$0xff]  ;;  %v5447_v0 = vld [vmem:[#allocation3 + $0x138] sm:$0xff]  ;;  %v5444_v9 = vld [vmem:[#allocation3 + $0x120] sm:$0xff] }
0x1882   :  { %v5446_v1 = vld [vmem:[#allocation3 + $0x130] sm:$0xff]  ;;  %v5449_v32 = vld [vmem:[#allocation3 + $0x148] sm:$0xff]  ;;  %v5451_v18 = vld [vmem:[#allocation3 + $0x158] sm:$0xff] }
0x1883   :  { %5569 = vmatpush1.bf16.msra.mxu1 %v5420_v29  ;;  %5651 = vmatpush1.bf16.msra.mxu0 %v5422_v35  ;;  %v5448_v57 = vld [vmem:[#allocation3 + $0x140] sm:$0xff]  ;;  %v5450_v49 = vld [vmem:[#allocation3 + $0x150] sm:$0xff]  ;;  %v5453_v13 = vld [vmem:[#allocation3 + $0x168] sm:$0xff]  ;;  %v5536_v29 = vpack.c.bf16 %v5367_v45, %v5367_v45 }
0x1884   :  { %5570 = vmatprep.subr.bf16.mxu1 %v5425_v56  ;;  %5652 = vmatprep.subr.bf16.mxu0 %v5427_v43  ;;  %v5455_v8 = vld [vmem:[#allocation3 + $0x178] sm:$0xff]  ;;  %v5452_v4 = vld [vmem:[#allocation3 + $0x160] sm:$0xff]  ;;  %v5454_v51 = vld [vmem:[#allocation3 + $0x170] sm:$0xff] }
0x1885   :  { %v5457_v36 = vld [vmem:[#allocation3 + $0x188] sm:$0xff]  ;;  %v5459_v7 = vld [vmem:[#allocation3 + $0x198] sm:$0xff]  ;;  %v5456_v23 = vld [vmem:[#allocation3 + $0x180] sm:$0xff] }
0x1886   :  { %v5458_v17 = vld [vmem:[#allocation3 + $0x190] sm:$0xff]  ;;  %v5461_v55 = vld [vmem:[#allocation3 + $0x1a8] sm:$0xff]  ;;  %v5463_v34 = vld [vmem:[#allocation3 + $0x1b8] sm:$0xff] }
0x1887   :  { %5571 = vmatpush1.bf16.msra.mxu1 %v5424_v22  ;;  %5653 = vmatpush1.bf16.msra.mxu0 %v5426_v10  ;;  %v5460_v6 = vld [vmem:[#allocation3 + $0x1a0] sm:$0xff]  ;;  %v5462_v37 = vld [vmem:[#allocation3 + $0x1b0] sm:$0xff]  ;;  %v5465_v44 = vld [vmem:[#allocation3 + $0x1c8] sm:$0xff]  ;;  %v5539_v10 = vpack.c.bf16 %v5370_v14, %v5370_v14 }
0x1888   :  { %5572 = vmatprep.subr.bf16.mxu1 %v5429_v27  ;;  %5654 = vmatprep.subr.bf16.mxu0 %v5431_v48  ;;  %v5467_v54 = vld [vmem:[#allocation3 + $0x1d8] sm:$0xff]  ;;  %v5464_v33 = vld [vmem:[#allocation3 + $0x1c0] sm:$0xff]  ;;  %v5466_v2 = vld [vmem:[#allocation3 + $0x1d0] sm:$0xff] }
0x1889   :  { %v5469_v20 = vld [vmem:[#allocation3 + $0x1e8] sm:$0xff]  ;;  %v5471_v30 = vld [vmem:[#allocation3 + $0x1f8] sm:$0xff]  ;;  %v5468_v41 = vld [vmem:[#allocation3 + $0x1e0] sm:$0xff] }
0x188a   :  { %v5470_v59 = vld [vmem:[#allocation3 + $0x1f0] sm:$0xff]  ;;  %v5473_v26 = vld [vmem:[#allocation3 + $0x208] sm:$0xff]  ;;  %v5475_v61 = vld [vmem:[#allocation3 + $0x218] sm:$0xff] }
0x188b   :  { %5573 = vmatpush1.bf16.msra.mxu1 %v5428_v50  ;;  %5655 = vmatpush1.bf16.msra.mxu0 %v5430_v15  ;;  %v5472_v35 = vld [vmem:[#allocation3 + $0x200] sm:$0xff]  ;;  %v5474_v56 = vld [vmem:[#allocation3 + $0x210] sm:$0xff]  ;;  %v5477_v43 = vld [vmem:[#allocation3 + $0x228] sm:$0xff] }
0x188c   :  { %5574 = vmatprep.subr.bf16.mxu1 %v5433_v47  ;;  %5656 = vmatprep.subr.bf16.mxu0 %v5435_v39  ;;  %v5479_v22 = vld [vmem:[#allocation3 + $0x238] sm:$0xff]  ;;  %v5476_v46 = vld [vmem:[#allocation3 + $0x220] sm:$0xff]  ;;  %v5478_v45 = vld [vmem:[#allocation3 + $0x230] sm:$0xff] }
0x188d   :  { %v5481_v27 = vld [vmem:[#allocation3 + $0x248] sm:$0xff]  ;;  %v5483_v48 = vld [vmem:[#allocation3 + $0x258] sm:$0xff]  ;;  %v5480_v50 = vld [vmem:[#allocation3 + $0x240] sm:$0xff] }
0x188e   :  { %v5482_v31 = vld [vmem:[#allocation3 + $0x250] sm:$0xff]  ;;  %v5485_v15 = vld [vmem:[#allocation3 + $0x268] sm:$0xff]  ;;  %v5487_v14 = vld [vmem:[#allocation3 + $0x278] sm:$0xff] }
0x188f   :  { %5575 = vmatpush1.bf16.msra.mxu1 %v5432_v21  ;;  %5657 = vmatpush1.bf16.msra.mxu0 %v5434_v28  ;;  %v5484_v47 = vld [vmem:[#allocation3 + $0x260] sm:$0xff]  ;;  %v5486_v39 = vld [vmem:[#allocation3 + $0x270] sm:$0xff]  ;;  %v5489_v21 = vld [vmem:[#allocation3 + $0x288] sm:$0xff] }
0x1890   :  { %5576 = vmatprep.subr.bf16.mxu1 %v5437_v5  ;;  %5658 = vmatprep.subr.bf16.mxu0 %v5439_v58  ;;  %v5491_v28 = vld [vmem:[#allocation3 + $0x298] sm:$0xff]  ;;  %v5488_v5 = vld [vmem:[#allocation3 + $0x280] sm:$0xff]  ;;  %v5490_v58 = vld [vmem:[#allocation3 + $0x290] sm:$0xff] }
0x1893   :  { %5577 = vmatpush1.bf16.msra.mxu1 %v5436_v52  ;;  %5659 = vmatpush1.bf16.msra.mxu0 %v5438_v38  ;;  %v5493_v52 = vld [vmem:[#allocation3 + $0x2a8] sm:$0xff]  ;;  %v5495_v38 = vld [vmem:[#allocation3 + $0x2b8] sm:$0xff] }
0x1894   :  { %5578 = vmatprep.subr.bf16.mxu1 %v5441_v40  ;;  %5660 = vmatprep.subr.bf16.mxu0 %v5443_v60  ;;  %v5492_v40 = vld [vmem:[#allocation3 + $0x2a0] sm:$0xff]  ;;  %v5494_v60 = vld [vmem:[#allocation3 + $0x2b0] sm:$0xff] }
0x1897   :  { %5579 = vmatpush1.bf16.msra.mxu1 %v5440_v62  ;;  %5661 = vmatpush1.bf16.msra.mxu0 %v5442_v42  ;;  %v5497_v62 = vld [vmem:[#allocation3 + $0x2c8] sm:$0xff]  ;;  %v5499_v42 = vld [vmem:[#allocation3 + $0x2d8] sm:$0xff] }
0x1898   :  { %5580 = vmatprep.subr.bf16.mxu1 %v5445_v24  ;;  %5662 = vmatprep.subr.bf16.mxu0 %v5447_v0  ;;  %v5496_v24 = vld [vmem:[#allocation3 + $0x2c0] sm:$0xff]  ;;  %v5498_v0 = vld [vmem:[#allocation3 + $0x2d0] sm:$0xff] }
0x189b   :  { %5581 = vmatpush1.bf16.msra.mxu1 %v5444_v9  ;;  %5663 = vmatpush1.bf16.msra.mxu0 %v5446_v1  ;;  %v5501_v9 = vld [vmem:[#allocation3 + $0x2e8] sm:$0xff]  ;;  %v5503_v1 = vld [vmem:[#allocation3 + $0x2f8] sm:$0xff] }
0x189c   :  { %5582 = vmatprep.subr.bf16.mxu1 %v5449_v32  ;;  %5664 = vmatprep.subr.bf16.mxu0 %v5451_v18  ;;  %v5500_v32 = vld [vmem:[#allocation3 + $0x2e0] sm:$0xff]  ;;  %v5502_v18 = vld [vmem:[#allocation3 + $0x2f0] sm:$0xff] }
0x189f   :  { %5583 = vmatpush1.bf16.msra.mxu1 %v5448_v57  ;;  %5665 = vmatpush1.bf16.msra.mxu0 %v5450_v49  ;;  %v5505_v57 = vld [vmem:[#allocation3 + $0x308] sm:$0xff]  ;;  %v5507_v49 = vld [vmem:[#allocation3 + $0x318] sm:$0xff] }
0x18a0   :  { %5584 = vmatprep.subr.bf16.mxu1 %v5453_v13  ;;  %5666 = vmatprep.subr.bf16.mxu0 %v5455_v8  ;;  %v5504_v13 = vld [vmem:[#allocation3 + $0x300] sm:$0xff]  ;;  %v5506_v8 = vld [vmem:[#allocation3 + $0x310] sm:$0xff] }
0x18a3   :  { %5585 = vmatpush1.bf16.msra.mxu1 %v5452_v4  ;;  %5667 = vmatpush1.bf16.msra.mxu0 %v5454_v51  ;;  %v5509_v4 = vld [vmem:[#allocation3 + $0x328] sm:$0xff]  ;;  %v5511_v51 = vld [vmem:[#allocation3 + $0x338] sm:$0xff] }
0x18a4   :  { %5586 = vmatprep.subr.bf16.mxu1 %v5457_v36  ;;  %5668 = vmatprep.subr.bf16.mxu0 %v5459_v7  ;;  %v5508_v36 = vld [vmem:[#allocation3 + $0x320] sm:$0xff]  ;;  %v5510_v7 = vld [vmem:[#allocation3 + $0x330] sm:$0xff] }
0x18a7   :  { %5587 = vmatpush1.bf16.msra.mxu1 %v5456_v23  ;;  %5669 = vmatpush1.bf16.msra.mxu0 %v5458_v17  ;;  %v5513_v23 = vld [vmem:[#allocation3 + $0x348] sm:$0xff]  ;;  %v5515_v17 = vld [vmem:[#allocation3 + $0x358] sm:$0xff] }
0x18a8   :  { %5588 = vmatprep.subr.bf16.mxu1 %v5461_v55  ;;  %5670 = vmatprep.subr.bf16.mxu0 %v5463_v34  ;;  %v5512_v55 = vld [vmem:[#allocation3 + $0x340] sm:$0xff]  ;;  %v5514_v34 = vld [vmem:[#allocation3 + $0x350] sm:$0xff] }
0x18ab   :  { %5589 = vmatpush1.bf16.msra.mxu1 %v5460_v6  ;;  %5671 = vmatpush1.bf16.msra.mxu0 %v5462_v37  ;;  %v5517_v6 = vld [vmem:[#allocation3 + $0x368] sm:$0xff]  ;;  %v5519_v37 = vld [vmem:[#allocation3 + $0x378] sm:$0xff] }
0x18ac   :  { %5590 = vmatprep.subr.bf16.mxu1 %v5465_v44  ;;  %5672 = vmatprep.subr.bf16.mxu0 %v5467_v54  ;;  %v5516_v44 = vld [vmem:[#allocation3 + $0x360] sm:$0xff]  ;;  %v5518_v54 = vld [vmem:[#allocation3 + $0x370] sm:$0xff] }
0x18af   :  { %5591 = vmatpush1.bf16.msra.mxu1 %v5464_v33  ;;  %5673 = vmatpush1.bf16.msra.mxu0 %v5466_v2  ;;  %v5521_v33 = vld [vmem:[#allocation3 + $0x388] sm:$0xff]  ;;  %v5523_v2 = vld [vmem:[#allocation3 + $0x398] sm:$0xff] }
0x18b0   :  { %5592 = vmatprep.subr.bf16.mxu1 %v5469_v20  ;;  %5674 = vmatprep.subr.bf16.mxu0 %v5471_v30  ;;  %v5520_v20 = vld [vmem:[#allocation3 + $0x380] sm:$0xff]  ;;  %v5522_v30 = vld [vmem:[#allocation3 + $0x390] sm:$0xff] }
0x18b3   :  { %5593 = vmatpush1.bf16.msra.mxu1 %v5468_v41  ;;  %5675 = vmatpush1.bf16.msra.mxu0 %v5470_v59  ;;  %v5525_v41 = vld [vmem:[#allocation3 + $0x3a8] sm:$0xff]  ;;  %v5527_v59 = vld [vmem:[#allocation3 + $0x3b8] sm:$0xff] }
0x18b4   :  { %5603 = vmatprep.subr.bf16.mxu1 %v5473_v26  ;;  %5685 = vmatprep.subr.bf16.mxu0 %v5475_v61  ;;  %v5524_v26 = vld [vmem:[#allocation3 + $0x3a0] sm:$0xff]  ;;  %v5526_v61 = vld [vmem:[#allocation3 + $0x3b0] sm:$0xff] }
0x18b6   :  { %5595 = vmatmul.mubr.bf16.vlgmr.msra.gmra.mrb[36].mxu1 %v5536_v29  ;;  %5677 = vmatmul.mubr.bf16.vlgmr.msra.gmra.mrb[44].mxu0 %v5536_v29  ;;  %v5529_v29 = vld [vmem:[#allocation3 + $0x3c8] sm:$0xff] }
0x18b7   :  { %5604 = vmatpush1.bf16.msra.mxu1 %v5472_v35  ;;  %5686 = vmatpush1.bf16.msra.mxu0 %v5474_v56  ;;  %v5531_v35 = vld [vmem:[#allocation3 + $0x3d8] sm:$0xff]  ;;  %v5528_v56 = vld [vmem:[#allocation3 + $0x3c0] sm:$0xff] }
0x18b8   :  { %5605 = vmatprep.subr.bf16.mxu1 %v5477_v43  ;;  %5687 = vmatprep.subr.bf16.mxu0 %v5479_v22  ;;  %v5530_v43 = vld [vmem:[#allocation3 + $0x3d0] sm:$0xff]  ;;  %v5533_v22 = vld [vmem:[#allocation3 + $0x3e8] sm:$0xff] }
0x18b9   :  { %5635 = vmatprep.mubr.bf16.mxu1 %v5539_v10  ;;  %5717 = vmatprep.mubr.bf16.mxu0 %v5539_v10  ;;  %v5535_v10 = vld [vmem:[#allocation3 + $0x3f8] sm:$0xff] }
0x18bb   :  { %5606 = vmatpush1.bf16.msra.mxu1 %v5476_v46  ;;  %5688 = vmatpush1.bf16.msra.mxu0 %v5478_v45  ;;  %v5532_v46 = vld [vmem:[#allocation3 + $0x3e0] sm:$0xff]  ;;  %v5534_v45 = vld [vmem:[#allocation3 + $0x3f0] sm:$0xff] }
0x18bc   :  { %5607 = vmatprep.subr.bf16.mxu1 %v5481_v27  ;;  %5689 = vmatprep.subr.bf16.mxu0 %v5483_v48  ;;  %v5538_v27 = vpack.c.bf16 %v5369_v19, %v5369_v19  ;;  %v5540_v48 = vld [vmem:[#allocation8 + $0x24] sm:$0xf] }
0x18bf   :  { %5608 = vmatpush1.bf16.msra.mxu1 %v5480_v50  ;;  %5690 = vmatpush1.bf16.msra.mxu0 %v5482_v31  ;;  %v5545_v50 = vrot.slane %v5540_v48, %v6873_v12  ;;  %v5553_v31 = vrot.slane %v5540_v48, %v7717_v3 }
0x18c0   :  { %5609 = vmatprep.subr.bf16.mxu1 %v5485_v15  ;;  %5691 = vmatprep.subr.bf16.mxu0 %v5487_v14  ;;  %v5549_v15 = vrot.slane %v5540_v48, %v6876_v16  ;;  %v5557_v14 = vrot.slane %v5540_v48, %v7704_v53 }
0x18c3   :  { %5610 = vmatpush1.bf16.msra.mxu1 %v5484_v47  ;;  %5692 = vmatpush1.bf16.msra.mxu0 %v5486_v39 }
0x18c4   :  { %5611 = vmatprep.subr.bf16.mxu1 %v5489_v21  ;;  %5693 = vmatprep.subr.bf16.mxu0 %v5491_v28 }
0x18c7   :  { %5612 = vmatpush1.bf16.msra.mxu1 %v5488_v5  ;;  %5694 = vmatpush1.bf16.msra.mxu0 %v5490_v58 }
0x18c8   :  { %5613 = vmatprep.subr.bf16.mxu1 %v5493_v52  ;;  %5695 = vmatprep.subr.bf16.mxu0 %v5495_v38 }
0x18cb   :  { %5614 = vmatpush1.bf16.msra.mxu1 %v5492_v40  ;;  %5696 = vmatpush1.bf16.msra.mxu0 %v5494_v60 }
0x18cc   :  { %5615 = vmatprep.subr.bf16.mxu1 %v5497_v62  ;;  %5697 = vmatprep.subr.bf16.mxu0 %v5499_v42 }
0x18cf   :  { %5616 = vmatpush1.bf16.msra.mxu1 %v5496_v24  ;;  %5698 = vmatpush1.bf16.msra.mxu0 %v5498_v0 }
0x18d0   :  { %5617 = vmatprep.subr.bf16.mxu1 %v5501_v9  ;;  %5699 = vmatprep.subr.bf16.mxu0 %v5503_v1 }
0x18d3   :  { %5618 = vmatpush1.bf16.msra.mxu1 %v5500_v32  ;;  %5700 = vmatpush1.bf16.msra.mxu0 %v5502_v18 }
0x18d4   :  { %5619 = vmatprep.subr.bf16.mxu1 %v5505_v57  ;;  %5701 = vmatprep.subr.bf16.mxu0 %v5507_v49 }
0x18d7   :  { %5620 = vmatpush1.bf16.msra.mxu1 %v5504_v13  ;;  %5702 = vmatpush1.bf16.msra.mxu0 %v5506_v8 }
0x18d8   :  { %5621 = vmatprep.subr.bf16.mxu1 %v5509_v4  ;;  %5703 = vmatprep.subr.bf16.mxu0 %v5511_v51 }
0x18db   :  { %5622 = vmatpush1.bf16.msra.mxu1 %v5508_v36  ;;  %5704 = vmatpush1.bf16.msra.mxu0 %v5510_v7 }
0x18dc   :  { %5623 = vmatprep.subr.bf16.mxu1 %v5513_v23  ;;  %5705 = vmatprep.subr.bf16.mxu0 %v5515_v17 }
0x18df   :  { %5624 = vmatpush1.bf16.msra.mxu1 %v5512_v55  ;;  %5706 = vmatpush1.bf16.msra.mxu0 %v5514_v34 }
0x18e0   :  { %5625 = vmatprep.subr.bf16.mxu1 %v5517_v6  ;;  %5707 = vmatprep.subr.bf16.mxu0 %v5519_v37 }
0x18e3   :  { %5626 = vmatpush1.bf16.msra.mxu1 %v5516_v44  ;;  %5708 = vmatpush1.bf16.msra.mxu0 %v5518_v54 }
0x18e4   :  { %5627 = vmatprep.subr.bf16.mxu1 %v5521_v33  ;;  %5709 = vmatprep.subr.bf16.mxu0 %v5523_v2 }
0x18e7   :  { %5628 = vmatpush1.bf16.msra.mxu1 %v5520_v20  ;;  %5710 = vmatpush1.bf16.msra.mxu0 %v5522_v30 }
0x18e8   :  { %5629 = vmatprep.subr.bf16.mxu1 %v5525_v41  ;;  %5711 = vmatprep.subr.bf16.mxu0 %v5527_v59 }
0x18eb   :  { %5630 = vmatpush1.bf16.msra.mxu1 %v5524_v26  ;;  %5712 = vmatpush1.bf16.msra.mxu0 %v5526_v61 }
0x18ec   :  { %5631 = vmatprep.subr.bf16.mxu1 %v5529_v29  ;;  %5713 = vmatprep.subr.bf16.mxu0 %v5531_v35 }
0x18ef   :  { %5632 = vmatpush1.bf16.msra.mxu1 %v5528_v56  ;;  %5714 = vmatpush1.bf16.msra.mxu0 %v5530_v43 }
0x18f0   :  { %5633 = vmatprep.subr.bf16.mxu1 %v5533_v22  ;;  %5715 = vmatprep.subr.bf16.mxu0 %v5535_v10 }
0x18f3   :  { %5634 = vmatpush1.bf16.msra.mxu1 %v5532_v46  ;;  %5716 = vmatpush1.bf16.msra.mxu0 %v5534_v45 }
0x18f6   :  { %5636 = vmatmul.mubr.bf16.vlgmr.msra.gmra.mrb[36].mxu1 %v5538_v27  ;;  %5718 = vmatmul.mubr.bf16.vlgmr.msra.gmra.mrb[44].mxu0 %v5538_v27 }
0x19c9   :  { %v5637_v47 = vpop.f32.mrb[36].mxu1  ;;  %v5719_v39 = vpop.f32.mrb[44].mxu0 }
0x19ca   :  { %v8170_v21 = vadd.f32 %v5637_v47, %v5545_v50  ;;  %v8172_v63 = vadd.f32 %v5719_v39, %v5553_v31  ;;  %v5639_v19 = vpop.f32.mrb[37].mxu1  ;;  %v5721_v28 = vpop.f32.mrb[45].mxu0 }
0x19cb   :  { %v6318_v5 = vadd.f32 %v5639_v19, %v5549_v15  ;;  %v8174_v58 = vadd.f32 %v5721_v28, %v5557_v14  ;;  %v5641_v52 = vpop.f32.mrb[38].mxu1  ;;  %v5723_v38 = vpop.f32.mrb[46].mxu0 }
0x19cc   :  { %v5726_v40 = vmax.f32 %v8170_v21, 0.0  ;;  %v5728_v60 = vmax.f32 %v8172_v63, 0.0  ;;  %v5642_v62 = vpop.f32.mrb[39].mxu1  ;;  %v5724_v42 = vpop.f32.mrb[47].mxu0 }
0x19cd   :  { %v5727_v24 = vmax.f32 %v6318_v5, 0.0  ;;  %v5729_v0 = vmax.f32 %v8174_v58, 0.0 }
0x19ce   :  { %6662 = dma.done.wait [#allocation4 + $0x1], 16384 }
0x19cf   :  { %6663 = vsyncadd [#allocation4 + $0x1], 4294950912  ;;  %v5861_v9 = vpack.c.bf16 %v5727_v24, %v5727_v24  ;;  %v5733_v1 = vld [vmem:[#allocation3 + $0x408] sm:$0xff]  ;;  %v5735_v32 = vld [vmem:[#allocation3 + $0x418] sm:$0xff]  ;;  %s6706_s3 = smov [#allocation11]   ;;  %s6707_s9 = smov [#allocation10]  }
0x19d0   :  { %v5732_v18 = vld [vmem:[#allocation3 + $0x400] sm:$0xff]  ;;  %5886 = vmatprep.subr.bf16.mxu1 %v5733_v1  ;;  %5968 = vmatprep.subr.bf16.mxu0 %v5735_v32  ;;  %v5734_v57 = vld [vmem:[#allocation3 + $0x410] sm:$0xff]  ;;  %v5737_v49 = vld [vmem:[#allocation3 + $0x428] sm:$0xff]  ;;  %s6113_s27 = sshll.u32 %s6706_s3, 4  ;;  %s6101_s22 = sshll.u32 %s6707_s9, 4  ;;  %s6114_s27 = int_to_ptr.vmem [resolvable:$true] %s6113_s27  ;;  %s6102_s22 = int_to_ptr.vmem [resolvable:$true] %s6101_s22 }
0x19d1   :  { %5918 = vmatprep.mubr.bf16.mxu1 %v5861_v9  ;;  %6000 = vmatprep.mubr.bf16.mxu0 %v5861_v9  ;;  %v5739_v13 = vld [vmem:[#allocation3 + $0x438] sm:$0xff]  ;;  %v5736_v8 = vld [vmem:[#allocation3 + $0x420] sm:$0xff]  ;;  %v5738_v4 = vld [vmem:[#allocation3 + $0x430] sm:$0xff]  ;;  %s6536_s15 = scalar_lea.vmem %s6114_s27, 128  ;;  %p6541_p3 = scmp.lt.s32.totalorder %s6114_s27, %s6114_s27 }
0x19d2   :  { %5887 = vmatpush1.bf16.msra.mxu1 %v5732_v18  ;;  %5969 = vmatpush1.bf16.msra.mxu0 %v5734_v57  ;;  %v5741_v51 = vld [vmem:[#allocation3 + $0x448] sm:$0xff]  ;;  %v5743_v36 = vld [vmem:[#allocation3 + $0x458] sm:$0xff]  ;;  %v5740_v7 = vld [vmem:[#allocation3 + $0x440] sm:$0xff]  ;;  %p6537_p2 = scmp.ne.s32.totalorder %s6114_s27, %s6536_s15  ;;  %p6542_p4 = scmp.lt.s32.totalorder %s6536_s15, %s6536_s15 }
0x19d3   :  { %5888 = vmatprep.subr.bf16.mxu1 %v5737_v49  ;;  %5970 = vmatprep.subr.bf16.mxu0 %v5739_v13  ;;  %v5742_v23 = vld [vmem:[#allocation3 + $0x450] sm:$0xff]  ;;  %v5745_v17 = vld [vmem:[#allocation3 + $0x468] sm:$0xff]  ;;  %v5747_v55 = vld [vmem:[#allocation3 + $0x478] sm:$0xff] }
0x19d4   :  { %v5744_v34 = vld [vmem:[#allocation3 + $0x460] sm:$0xff]  ;;  %v5746_v6 = vld [vmem:[#allocation3 + $0x470] sm:$0xff]  ;;  %v5749_v37 = vld [vmem:[#allocation3 + $0x488] sm:$0xff]  ;;  %p6543_p5 = por %p6542_p4, %p6541_p3 }
0x19d5   :  { %v5751_v44 = vld [vmem:[#allocation3 + $0x498] sm:$0xff]  ;;  %v5748_v54 = vld [vmem:[#allocation3 + $0x480] sm:$0xff]  ;;  %v5750_v33 = vld [vmem:[#allocation3 + $0x490] sm:$0xff] }
0x19d6   :  { %5889 = vmatpush1.bf16.msra.mxu1 %v5736_v8  ;;  %5971 = vmatpush1.bf16.msra.mxu0 %v5738_v4  ;;  %v5753_v2 = vld [vmem:[#allocation3 + $0x4a8] sm:$0xff]  ;;  %v5755_v20 = vld [vmem:[#allocation3 + $0x4b8] sm:$0xff]  ;;  %v5752_v30 = vld [vmem:[#allocation3 + $0x4a0] sm:$0xff]  ;;  %p6544_p6 = pnand %p6543_p5, %p6537_p2 }
0x19d7   :  { %5890 = vmatprep.subr.bf16.mxu1 %v5741_v51  ;;  %5972 = vmatprep.subr.bf16.mxu0 %v5743_v36  ;;  %v5754_v41 = vld [vmem:[#allocation3 + $0x4b0] sm:$0xff]  ;;  %v5757_v59 = vld [vmem:[#allocation3 + $0x4c8] sm:$0xff]  ;;  %v5759_v26 = vld [vmem:[#allocation3 + $0x4d8] sm:$0xff] }
0x19d8   :  { %v5756_v61 = vld [vmem:[#allocation3 + $0x4c0] sm:$0xff]  ;;  %v5758_v29 = vld [vmem:[#allocation3 + $0x4d0] sm:$0xff]  ;;  %v5761_v35 = vld [vmem:[#allocation3 + $0x4e8] sm:$0xff] }
0x19d9   :  { %v5763_v56 = vld [vmem:[#allocation3 + $0x4f8] sm:$0xff]  ;;  %v5760_v43 = vld [vmem:[#allocation3 + $0x4e0] sm:$0xff]  ;;  %v5762_v22 = vld [vmem:[#allocation3 + $0x4f0] sm:$0xff] }
0x19da   :  { %5891 = vmatpush1.bf16.msra.mxu1 %v5740_v7  ;;  %5973 = vmatpush1.bf16.msra.mxu0 %v5742_v23  ;;  %v5765_v10 = vld [vmem:[#allocation3 + $0x508] sm:$0xff]  ;;  %v5767_v46 = vld [vmem:[#allocation3 + $0x518] sm:$0xff]  ;;  %v5764_v45 = vld [vmem:[#allocation3 + $0x500] sm:$0xff] }
0x19db   :  { %5892 = vmatprep.subr.bf16.mxu1 %v5745_v17  ;;  %5974 = vmatprep.subr.bf16.mxu0 %v5747_v55  ;;  %v5766_v27 = vld [vmem:[#allocation3 + $0x510] sm:$0xff]  ;;  %v5769_v48 = vld [vmem:[#allocation3 + $0x528] sm:$0xff]  ;;  %v5771_v50 = vld [vmem:[#allocation3 + $0x538] sm:$0xff] }
0x19dc   :  { %v5768_v31 = vld [vmem:[#allocation3 + $0x520] sm:$0xff]  ;;  %v5770_v15 = vld [vmem:[#allocation3 + $0x530] sm:$0xff]  ;;  %v5773_v14 = vld [vmem:[#allocation3 + $0x548] sm:$0xff] }
0x19dd   :  { %v5775_v47 = vld [vmem:[#allocation3 + $0x558] sm:$0xff]  ;;  %v5772_v39 = vld [vmem:[#allocation3 + $0x540] sm:$0xff]  ;;  %v5774_v19 = vld [vmem:[#allocation3 + $0x550] sm:$0xff] }
0x19de   :  { %5893 = vmatpush1.bf16.msra.mxu1 %v5744_v34  ;;  %5975 = vmatpush1.bf16.msra.mxu0 %v5746_v6  ;;  %v5777_v28 = vld [vmem:[#allocation3 + $0x568] sm:$0xff]  ;;  %v5779_v5 = vld [vmem:[#allocation3 + $0x578] sm:$0xff]  ;;  %v5776_v52 = vld [vmem:[#allocation3 + $0x560] sm:$0xff]  ;;  %v5860_v34 = vpack.c.bf16 %v5726_v40, %v5726_v40 }
0x19df   :  { %5894 = vmatprep.subr.bf16.mxu1 %v5749_v37  ;;  %5976 = vmatprep.subr.bf16.mxu0 %v5751_v44  ;;  %v5778_v38 = vld [vmem:[#allocation3 + $0x570] sm:$0xff]  ;;  %v5781_v62 = vld [vmem:[#allocation3 + $0x588] sm:$0xff]  ;;  %v5783_v42 = vld [vmem:[#allocation3 + $0x598] sm:$0xff] }
0x19e0   :  { %v5780_v24 = vld [vmem:[#allocation3 + $0x580] sm:$0xff]  ;;  %v5782_v9 = vld [vmem:[#allocation3 + $0x590] sm:$0xff]  ;;  %v5785_v1 = vld [vmem:[#allocation3 + $0x5a8] sm:$0xff] }
0x19e1   :  { %v5787_v32 = vld [vmem:[#allocation3 + $0x5b8] sm:$0xff]  ;;  %v5784_v18 = vld [vmem:[#allocation3 + $0x5a0] sm:$0xff]  ;;  %v5786_v57 = vld [vmem:[#allocation3 + $0x5b0] sm:$0xff] }
0x19e2   :  { %5895 = vmatpush1.bf16.msra.mxu1 %v5748_v54  ;;  %5977 = vmatpush1.bf16.msra.mxu0 %v5750_v33  ;;  %v5789_v49 = vld [vmem:[#allocation3 + $0x5c8] sm:$0xff]  ;;  %v5791_v13 = vld [vmem:[#allocation3 + $0x5d8] sm:$0xff]  ;;  %v5788_v8 = vld [vmem:[#allocation3 + $0x5c0] sm:$0xff]  ;;  %v5863_v33 = vpack.c.bf16 %v5729_v0, %v5729_v0 }
0x19e3   :  { %5896 = vmatprep.subr.bf16.mxu1 %v5753_v2  ;;  %5978 = vmatprep.subr.bf16.mxu0 %v5755_v20  ;;  %v5790_v4 = vld [vmem:[#allocation3 + $0x5d0] sm:$0xff]  ;;  %v5793_v51 = vld [vmem:[#allocation3 + $0x5e8] sm:$0xff]  ;;  %v5795_v36 = vld [vmem:[#allocation3 + $0x5f8] sm:$0xff] }
0x19e4   :  { %v5792_v7 = vld [vmem:[#allocation3 + $0x5e0] sm:$0xff]  ;;  %v5794_v23 = vld [vmem:[#allocation3 + $0x5f0] sm:$0xff]  ;;  %v5797_v17 = vld [vmem:[#allocation3 + $0x608] sm:$0xff] }
0x19e5   :  { %v5799_v55 = vld [vmem:[#allocation3 + $0x618] sm:$0xff]  ;;  %v5796_v6 = vld [vmem:[#allocation3 + $0x600] sm:$0xff]  ;;  %v5798_v37 = vld [vmem:[#allocation3 + $0x610] sm:$0xff] }
0x19e6   :  { %5897 = vmatpush1.bf16.msra.mxu1 %v5752_v30  ;;  %5979 = vmatpush1.bf16.msra.mxu0 %v5754_v41  ;;  %v5801_v44 = vld [vmem:[#allocation3 + $0x628] sm:$0xff]  ;;  %v5803_v54 = vld [vmem:[#allocation3 + $0x638] sm:$0xff]  ;;  %v5800_v21 = vld [vmem:[#allocation3 + $0x620] sm:$0xff] }
0x19e7   :  { %5898 = vmatprep.subr.bf16.mxu1 %v5757_v59  ;;  %5980 = vmatprep.subr.bf16.mxu0 %v5759_v26  ;;  %v5802_v40 = vld [vmem:[#allocation3 + $0x630] sm:$0xff]  ;;  %v5805_v2 = vld [vmem:[#allocation3 + $0x648] sm:$0xff]  ;;  %v5807_v20 = vld [vmem:[#allocation3 + $0x658] sm:$0xff] }
0x19e8   :  { %v5804_v30 = vld [vmem:[#allocation3 + $0x640] sm:$0xff]  ;;  %v5806_v58 = vld [vmem:[#allocation3 + $0x650] sm:$0xff]  ;;  %v5809_v41 = vld [vmem:[#allocation3 + $0x668] sm:$0xff] }
0x19e9   :  { %v5811_v0 = vld [vmem:[#allocation3 + $0x678] sm:$0xff]  ;;  %v5808_v59 = vld [vmem:[#allocation3 + $0x660] sm:$0xff]  ;;  %v5810_v26 = vld [vmem:[#allocation3 + $0x670] sm:$0xff] }
0x19ea   :  { %5899 = vmatpush1.bf16.msra.mxu1 %v5756_v61  ;;  %5981 = vmatpush1.bf16.msra.mxu0 %v5758_v29  ;;  %v5813_v61 = vld [vmem:[#allocation3 + $0x688] sm:$0xff]  ;;  %v5815_v29 = vld [vmem:[#allocation3 + $0x698] sm:$0xff] }
0x19eb   :  { %5900 = vmatprep.subr.bf16.mxu1 %v5761_v35  ;;  %5982 = vmatprep.subr.bf16.mxu0 %v5763_v56  ;;  %v5812_v35 = vld [vmem:[#allocation3 + $0x680] sm:$0xff]  ;;  %v5814_v56 = vld [vmem:[#allocation3 + $0x690] sm:$0xff] }
0x19ee   :  { %5901 = vmatpush1.bf16.msra.mxu1 %v5760_v43  ;;  %5983 = vmatpush1.bf16.msra.mxu0 %v5762_v22  ;;  %v5817_v43 = vld [vmem:[#allocation3 + $0x6a8] sm:$0xff]  ;;  %v5819_v22 = vld [vmem:[#allocation3 + $0x6b8] sm:$0xff] }
0x19ef   :  { %5902 = vmatprep.subr.bf16.mxu1 %v5765_v10  ;;  %5984 = vmatprep.subr.bf16.mxu0 %v5767_v46  ;;  %v5816_v10 = vld [vmem:[#allocation3 + $0x6a0] sm:$0xff]  ;;  %v5818_v46 = vld [vmem:[#allocation3 + $0x6b0] sm:$0xff] }
0x19f2   :  { %5903 = vmatpush1.bf16.msra.mxu1 %v5764_v45  ;;  %5985 = vmatpush1.bf16.msra.mxu0 %v5766_v27  ;;  %v5821_v45 = vld [vmem:[#allocation3 + $0x6c8] sm:$0xff]  ;;  %v5823_v27 = vld [vmem:[#allocation3 + $0x6d8] sm:$0xff] }
0x19f3   :  { %5904 = vmatprep.subr.bf16.mxu1 %v5769_v48  ;;  %5986 = vmatprep.subr.bf16.mxu0 %v5771_v50  ;;  %v5820_v48 = vld [vmem:[#allocation3 + $0x6c0] sm:$0xff]  ;;  %v5822_v50 = vld [vmem:[#allocation3 + $0x6d0] sm:$0xff] }
0x19f6   :  { %5905 = vmatpush1.bf16.msra.mxu1 %v5768_v31  ;;  %5987 = vmatpush1.bf16.msra.mxu0 %v5770_v15  ;;  %v5825_v31 = vld [vmem:[#allocation3 + $0x6e8] sm:$0xff]  ;;  %v5827_v15 = vld [vmem:[#allocation3 + $0x6f8] sm:$0xff] }
0x19f7   :  { %5906 = vmatprep.subr.bf16.mxu1 %v5773_v14  ;;  %5988 = vmatprep.subr.bf16.mxu0 %v5775_v47  ;;  %v5824_v14 = vld [vmem:[#allocation3 + $0x6e0] sm:$0xff]  ;;  %v5826_v47 = vld [vmem:[#allocation3 + $0x6f0] sm:$0xff] }
0x19fa   :  { %5907 = vmatpush1.bf16.msra.mxu1 %v5772_v39  ;;  %5989 = vmatpush1.bf16.msra.mxu0 %v5774_v19  ;;  %v5829_v39 = vld [vmem:[#allocation3 + $0x708] sm:$0xff]  ;;  %v5831_v19 = vld [vmem:[#allocation3 + $0x718] sm:$0xff] }
0x19fb   :  { %5908 = vmatprep.subr.bf16.mxu1 %v5777_v28  ;;  %5990 = vmatprep.subr.bf16.mxu0 %v5779_v5  ;;  %v5828_v28 = vld [vmem:[#allocation3 + $0x700] sm:$0xff]  ;;  %v5830_v5 = vld [vmem:[#allocation3 + $0x710] sm:$0xff] }
0x19fe   :  { %5909 = vmatpush1.bf16.msra.mxu1 %v5776_v52  ;;  %5991 = vmatpush1.bf16.msra.mxu0 %v5778_v38  ;;  %v5833_v52 = vld [vmem:[#allocation3 + $0x728] sm:$0xff]  ;;  %v5835_v38 = vld [vmem:[#allocation3 + $0x738] sm:$0xff] }
0x19ff   :  { %5910 = vmatprep.subr.bf16.mxu1 %v5781_v62  ;;  %5992 = vmatprep.subr.bf16.mxu0 %v5783_v42  ;;  %v5832_v62 = vld [vmem:[#allocation3 + $0x720] sm:$0xff]  ;;  %v5834_v42 = vld [vmem:[#allocation3 + $0x730] sm:$0xff] }
0x1a02   :  { %5911 = vmatpush1.bf16.msra.mxu1 %v5780_v24  ;;  %5993 = vmatpush1.bf16.msra.mxu0 %v5782_v9  ;;  %v5837_v24 = vld [vmem:[#allocation3 + $0x748] sm:$0xff]  ;;  %v5839_v9 = vld [vmem:[#allocation3 + $0x758] sm:$0xff] }
0x1a03   :  { %5912 = vmatprep.subr.bf16.mxu1 %v5785_v1  ;;  %5994 = vmatprep.subr.bf16.mxu0 %v5787_v32  ;;  %v5836_v1 = vld [vmem:[#allocation3 + $0x740] sm:$0xff]  ;;  %v5838_v32 = vld [vmem:[#allocation3 + $0x750] sm:$0xff] }
0x1a06   :  { %5913 = vmatpush1.bf16.msra.mxu1 %v5784_v18  ;;  %5995 = vmatpush1.bf16.msra.mxu0 %v5786_v57  ;;  %v5841_v18 = vld [vmem:[#allocation3 + $0x768] sm:$0xff]  ;;  %v5843_v57 = vld [vmem:[#allocation3 + $0x778] sm:$0xff] }
0x1a07   :  { %5914 = vmatprep.subr.bf16.mxu1 %v5789_v49  ;;  %5996 = vmatprep.subr.bf16.mxu0 %v5791_v13  ;;  %v5840_v49 = vld [vmem:[#allocation3 + $0x760] sm:$0xff]  ;;  %v5842_v13 = vld [vmem:[#allocation3 + $0x770] sm:$0xff] }
0x1a0a   :  { %5915 = vmatpush1.bf16.msra.mxu1 %v5788_v8  ;;  %5997 = vmatpush1.bf16.msra.mxu0 %v5790_v4  ;;  %v5845_v8 = vld [vmem:[#allocation3 + $0x788] sm:$0xff]  ;;  %v5847_v4 = vld [vmem:[#allocation3 + $0x798] sm:$0xff] }
0x1a0b   :  { %5916 = vmatprep.subr.bf16.mxu1 %v5793_v51  ;;  %5998 = vmatprep.subr.bf16.mxu0 %v5795_v36  ;;  %v5844_v51 = vld [vmem:[#allocation3 + $0x780] sm:$0xff]  ;;  %v5846_v36 = vld [vmem:[#allocation3 + $0x790] sm:$0xff] }
0x1a0e   :  { %5917 = vmatpush1.bf16.msra.mxu1 %v5792_v7  ;;  %5999 = vmatpush1.bf16.msra.mxu0 %v5794_v23  ;;  %v5849_v7 = vld [vmem:[#allocation3 + $0x7a8] sm:$0xff]  ;;  %v5851_v23 = vld [vmem:[#allocation3 + $0x7b8] sm:$0xff] }
0x1a0f   :  { %5927 = vmatprep.subr.bf16.mxu1 %v5797_v17  ;;  %6009 = vmatprep.subr.bf16.mxu0 %v5799_v55  ;;  %v5848_v17 = vld [vmem:[#allocation3 + $0x7a0] sm:$0xff]  ;;  %v5850_v55 = vld [vmem:[#allocation3 + $0x7b0] sm:$0xff] }
0x1a11   :  { %5919 = vmatmul.mubr.bf16.vlgmr.msra.gmra.mrb[40].mxu1 %v5860_v34  ;;  %6001 = vmatmul.mubr.bf16.vlgmr.msra.gmra.mrb[48].mxu0 %v5860_v34  ;;  %v5853_v34 = vld [vmem:[#allocation3 + $0x7c8] sm:$0xff] }
0x1a12   :  { %5928 = vmatpush1.bf16.msra.mxu1 %v5796_v6  ;;  %6010 = vmatpush1.bf16.msra.mxu0 %v5798_v37  ;;  %v5855_v6 = vld [vmem:[#allocation3 + $0x7d8] sm:$0xff]  ;;  %v5852_v37 = vld [vmem:[#allocation3 + $0x7c0] sm:$0xff] }
0x1a13   :  { %5929 = vmatprep.subr.bf16.mxu1 %v5801_v44  ;;  %6011 = vmatprep.subr.bf16.mxu0 %v5803_v54  ;;  %v5854_v44 = vld [vmem:[#allocation3 + $0x7d0] sm:$0xff]  ;;  %v5857_v54 = vld [vmem:[#allocation3 + $0x7e8] sm:$0xff] }
0x1a14   :  { %5959 = vmatprep.mubr.bf16.mxu1 %v5863_v33  ;;  %6041 = vmatprep.mubr.bf16.mxu0 %v5863_v33  ;;  %v5859_v33 = vld [vmem:[#allocation3 + $0x7f8] sm:$0xff] }
0x1a16   :  { %5930 = vmatpush1.bf16.msra.mxu1 %v5800_v21  ;;  %6012 = vmatpush1.bf16.msra.mxu0 %v5802_v40  ;;  %v5856_v21 = vld [vmem:[#allocation3 + $0x7e0] sm:$0xff]  ;;  %v5858_v40 = vld [vmem:[#allocation3 + $0x7f0] sm:$0xff] }
0x1a17   :  { %5931 = vmatprep.subr.bf16.mxu1 %v5805_v2  ;;  %6013 = vmatprep.subr.bf16.mxu0 %v5807_v20  ;;  %v5862_v2 = vpack.c.bf16 %v5728_v60, %v5728_v60 }
0x1a1a   :  { %5932 = vmatpush1.bf16.msra.mxu1 %v5804_v30  ;;  %6014 = vmatpush1.bf16.msra.mxu0 %v5806_v58 }
0x1a1b   :  { %5933 = vmatprep.subr.bf16.mxu1 %v5809_v41  ;;  %6015 = vmatprep.subr.bf16.mxu0 %v5811_v0 }
0x1a1e   :  { %5934 = vmatpush1.bf16.msra.mxu1 %v5808_v59  ;;  %6016 = vmatpush1.bf16.msra.mxu0 %v5810_v26 }
0x1a1f   :  { %5935 = vmatprep.subr.bf16.mxu1 %v5813_v61  ;;  %6017 = vmatprep.subr.bf16.mxu0 %v5815_v29 }
0x1a22   :  { %5936 = vmatpush1.bf16.msra.mxu1 %v5812_v35  ;;  %6018 = vmatpush1.bf16.msra.mxu0 %v5814_v56 }
0x1a23   :  { %5937 = vmatprep.subr.bf16.mxu1 %v5817_v43  ;;  %6019 = vmatprep.subr.bf16.mxu0 %v5819_v22 }
0x1a26   :  { %5938 = vmatpush1.bf16.msra.mxu1 %v5816_v10  ;;  %6020 = vmatpush1.bf16.msra.mxu0 %v5818_v46 }
0x1a27   :  { %5939 = vmatprep.subr.bf16.mxu1 %v5821_v45  ;;  %6021 = vmatprep.subr.bf16.mxu0 %v5823_v27 }
0x1a2a   :  { %5940 = vmatpush1.bf16.msra.mxu1 %v5820_v48  ;;  %6022 = vmatpush1.bf16.msra.mxu0 %v5822_v50 }
0x1a2b   :  { %5941 = vmatprep.subr.bf16.mxu1 %v5825_v31  ;;  %6023 = vmatprep.subr.bf16.mxu0 %v5827_v15 }
0x1a2e   :  { %5942 = vmatpush1.bf16.msra.mxu1 %v5824_v14  ;;  %6024 = vmatpush1.bf16.msra.mxu0 %v5826_v47 }
0x1a2f   :  { %5943 = vmatprep.subr.bf16.mxu1 %v5829_v39  ;;  %6025 = vmatprep.subr.bf16.mxu0 %v5831_v19 }
0x1a32   :  { %5944 = vmatpush1.bf16.msra.mxu1 %v5828_v28  ;;  %6026 = vmatpush1.bf16.msra.mxu0 %v5830_v5 }
0x1a33   :  { %5945 = vmatprep.subr.bf16.mxu1 %v5833_v52  ;;  %6027 = vmatprep.subr.bf16.mxu0 %v5835_v38 }
0x1a36   :  { %5946 = vmatpush1.bf16.msra.mxu1 %v5832_v62  ;;  %6028 = vmatpush1.bf16.msra.mxu0 %v5834_v42 }
0x1a37   :  { %5947 = vmatprep.subr.bf16.mxu1 %v5837_v24  ;;  %6029 = vmatprep.subr.bf16.mxu0 %v5839_v9 }
0x1a3a   :  { %5948 = vmatpush1.bf16.msra.mxu1 %v5836_v1  ;;  %6030 = vmatpush1.bf16.msra.mxu0 %v5838_v32 }
0x1a3b   :  { %5949 = vmatprep.subr.bf16.mxu1 %v5841_v18  ;;  %6031 = vmatprep.subr.bf16.mxu0 %v5843_v57 }
0x1a3e   :  { %5950 = vmatpush1.bf16.msra.mxu1 %v5840_v49  ;;  %6032 = vmatpush1.bf16.msra.mxu0 %v5842_v13 }
0x1a3f   :  { %5951 = vmatprep.subr.bf16.mxu1 %v5845_v8  ;;  %6033 = vmatprep.subr.bf16.mxu0 %v5847_v4 }
0x1a42   :  { %5952 = vmatpush1.bf16.msra.mxu1 %v5844_v51  ;;  %6034 = vmatpush1.bf16.msra.mxu0 %v5846_v36 }
0x1a43   :  { %5953 = vmatprep.subr.bf16.mxu1 %v5849_v7  ;;  %6035 = vmatprep.subr.bf16.mxu0 %v5851_v23 }
0x1a46   :  { %5954 = vmatpush1.bf16.msra.mxu1 %v5848_v17  ;;  %6036 = vmatpush1.bf16.msra.mxu0 %v5850_v55 }
0x1a47   :  { %5955 = vmatprep.subr.bf16.mxu1 %v5853_v34  ;;  %6037 = vmatprep.subr.bf16.mxu0 %v5855_v6 }
0x1a4a   :  { %5956 = vmatpush1.bf16.msra.mxu1 %v5852_v37  ;;  %6038 = vmatpush1.bf16.msra.mxu0 %v5854_v44 }
0x1a4b   :  { %5957 = vmatprep.subr.bf16.mxu1 %v5857_v54  ;;  %6039 = vmatprep.subr.bf16.mxu0 %v5859_v33 }
0x1a4e   :  { %5958 = vmatpush1.bf16.msra.mxu1 %v5856_v21  ;;  %6040 = vmatpush1.bf16.msra.mxu0 %v5858_v40 }
0x1a51   :  { %5960 = vmatmul.mubr.bf16.vlgmr.msra.gmra.mrb[40].mxu1 %v5862_v2  ;;  %6042 = vmatmul.mubr.bf16.vlgmr.msra.gmra.mrb[48].mxu0 %v5862_v2 }
0x1a52   :  { %6547 = shalt.err (!%p6544_p6)
}
0x1a53   :  { %s6548_s19 = scalar_lea.hbm %s8260_s5, 128 }
0x1a54   :  { %p6549_p7 = scmp.ne.s32.totalorder %s8260_s5, %s6548_s19  ;;  %p6552_p8 = scmp.lt.u32.totalorder %s6548_s19, %s8260_s5 }
0x1a56   :  { %p6554_p9 = pnand %p6552_p8, %p6549_p7 }
0x1a58   :  { %6557 = shalt.err (!%p6554_p9)
}
0x1a59   :  { %6119 = dma.vmem_to_hbm [thread:$0]  %s6114_s27, 128, %s8260_s5, [#allocation12], %s6676_s29, %s6676_s29, %s6678_s10  }
0x1a5a   :  { %s6558_s26 = scalar_lea.vmem %s6102_s22, 256  ;;  %p6563_p11 = scmp.lt.s32.totalorder %s6102_s22, %s6102_s22 }
0x1a5b   :  { %p6559_p10 = scmp.ne.s32.totalorder %s6102_s22, %s6558_s26  ;;  %p6564_p12 = scmp.lt.s32.totalorder %s6558_s26, %s6558_s26 }
0x1a5d   :  { %p6565_p13 = por %p6564_p12, %p6563_p11 }
0x1a5f   :  { %p6566_p0 = pnand %p6565_p13, %p6559_p10 }
0x1a61   :  { %6569 = shalt.err (!%p6566_p0)
}
0x1a62   :  { %s6570_s8 = scalar_lea.hbm %s8259_s4, 256 }
0x1a63   :  { %p6571_p1 = scmp.ne.s32.totalorder %s8259_s4, %s6570_s8  ;;  %p6574_p2 = scmp.lt.u32.totalorder %s6570_s8, %s8259_s4 }
0x1a65   :  { %p6576_p3 = pnand %p6574_p2, %p6571_p1 }
0x1a67   :  { %6579 = shalt.err (!%p6576_p3)
}
0x1a68   :  { %6107 = dma.vmem_to_hbm [thread:$0]  %s6102_s22, 256, %s8259_s4, [#allocation7], %s6671_s11, %s6671_s11, %s6672_s12  }
0x1a69   :  { %s6708_s27 = smov [#allocation13]  }
0x1a6a   :  { %s6125_s9 = sshll.u32 %s6708_s27, 4  ;;  %s6126_s9 = int_to_ptr.vmem [resolvable:$true] %s6125_s9 }
0x1a6b   :  { %s6580_s15 = scalar_lea.vmem %s6126_s9, 64  ;;  %p6585_p5 = scmp.lt.s32.totalorder %s6126_s9, %s6126_s9 }
0x1a6c   :  { %p6581_p4 = scmp.ne.s32.totalorder %s6126_s9, %s6580_s15  ;;  %p6586_p6 = scmp.lt.s32.totalorder %s6580_s15, %s6580_s15 }
0x1a6e   :  { %p6587_p7 = por %p6586_p6, %p6585_p5 }
0x1a70   :  { %p6588_p8 = pnand %p6587_p7, %p6581_p4 }
0x1a72   :  { %6591 = shalt.err (!%p6588_p8)
}
0x1a73   :  { %s6592_s19 = scalar_lea.hbm %s8261_s6, 64 }
0x1a74   :  { %p6593_p9 = scmp.ne.s32.totalorder %s8261_s6, %s6592_s19  ;;  %p6596_p10 = scmp.lt.u32.totalorder %s6592_s19, %s8261_s6 }
0x1a76   :  { %p6598_p11 = pnand %p6596_p10, %p6593_p9 }
0x1a78   :  { %6601 = shalt.err (!%p6598_p11)
}
0x1a79   :  { %s6709_s11 = smov 32   ;;  %v5864_v63 = vld [vmem:[#allocation8 + $0x28] sm:$0xf]  ;;  %vm6092_vm14 = vcmp.lt.s32.totalorder %v225_v11, 512 }
0x1a7a   :  { %6131 = dma.vmem_to_hbm [thread:$0]  %s6126_s9, 64, %s8261_s6, [#allocation12], %s6709_s11, %s6709_s11, %s6675_s28   ;;  %v5869_v60 = vrot.slane %v5864_v63, %v6873_v12  ;;  %v5877_v20 = vrot.slane %v5864_v63, %v7717_v3  ;;  %v5873_v30 = vrot.slane %v5864_v63, %v6876_v16  ;;  %v5881_v58 = vrot.slane %v5864_v63, %v7704_v53 }
0x1a7b   :  { %s6710_s6 = smov [#allocation14]  }
0x1a7c   :  { %s6137_s28 = sshll.u32 %s6710_s6, 4  ;;  %s6138_s28 = int_to_ptr.vmem [resolvable:$true] %s6137_s28 }
0x1a7d   :  { %s6602_s24 = scalar_lea.vmem %s6138_s28, 128  ;;  %p6607_p13 = scmp.lt.s32.totalorder %s6138_s28, %s6138_s28 }
0x1a7e   :  { %p6603_p12 = scmp.ne.s32.totalorder %s6138_s28, %s6602_s24  ;;  %p6608_p0 = scmp.lt.s32.totalorder %s6602_s24, %s6602_s24 }
0x1a80   :  { %p6609_p1 = por %p6608_p0, %p6607_p13 }
0x1a82   :  { %p6610_p2 = pnand %p6609_p1, %p6603_p12 }
0x1b24   :  { %v5961_v41 = vpop.f32.mrb[40].mxu1  ;;  %v6043_v0 = vpop.f32.mrb[48].mxu0 }
0x1b25   :  { %v6321_v59 = vadd.f32 %v5961_v41, %v5869_v60  ;;  %v6323_v26 = vadd.f32 %v6043_v0, %v5877_v20  ;;  %v5963_v61 = vpop.f32.mrb[41].mxu1  ;;  %v6045_v29 = vpop.f32.mrb[49].mxu0 }
0x1b26   :  { %v6322_v35 = vadd.f32 %v5963_v61, %v5873_v30  ;;  %v6324_v56 = vadd.f32 %v6045_v29, %v5881_v58  ;;  %v5965_v43 = vpop.f32.mrb[42].mxu1  ;;  %v6047_v22 = vpop.f32.mrb[50].mxu0 }
0x1b27   :  { %v6050_v10 = vmax.f32 %v6321_v59, 0.0  ;;  %v6052_v46 = vmax.f32 %v6323_v26, 0.0  ;;  %v5966_v45 = vpop.f32.mrb[43].mxu1  ;;  %v6048_v12 = vpop.f32.mrb[51].mxu0 }
0x1b28   :  { %v6051_v27 = vmax.f32 %v6322_v35, 0.0  ;;  %v6053_v3 = vmax.f32 %v6324_v56, 0.0 }
0x1b2a   :  { %v6058_v48 = vcombine.low %v6050_v10, %v6051_v27  ;;  %v6059_v16 = vcombine.low %v6052_v46, %v6053_v3 }
0x1b2c   :  { %v6066_v53 = vrot.slane %v6058_v48, %v8062_v25  ;;  %v6073_v50 = vrot.slane %v6059_v16, %v8062_v25 }
0x1b2e   :  { %v6074_v31 = vcombine.low %v6066_v53, %v6073_v50  ;;  %v6075_v15 = vcombine.high %v6066_v53, %v6073_v50 }
0x1b30   :  { %v6082_v14 = vrot.slane %v6074_v31, %v8062_v25  ;;  %v6089_v47 = vrot.slane %v6075_v15, %v8062_v25 }
0x1b32   :  { %6094 = vst.msk [vmem:[#allocation14] sm:$0xf] %vm6092_vm14, %v6082_v14  ;;  %6095 = vst.msk [vmem:[#allocation14 + $0x4] sm:$0xf] %vm6092_vm14, %v6089_v47 }
0x1b33   :  { %6613 = shalt.err (!%p6610_p2)
}
0x1b34   :  { %s6614_s26 = scalar_lea.hbm %s8262_s7, 128 }
0x1b35   :  { %p6615_p3 = scmp.ne.s32.totalorder %s8262_s7, %s6614_s26  ;;  %p6618_p4 = scmp.lt.u32.totalorder %s6614_s26, %s8262_s7 }
0x1b37   :  { %p6620_p5 = pnand %p6618_p4, %p6615_p3 }
0x1b39   :  { %6623 = shalt.err (!%p6620_p5)
}
0x1b3a   :  { %6143 = dma.vmem_to_hbm [thread:$0]  %s6138_s28, 128, %s8262_s7, [#allocation15], %s6676_s29, %s6676_s29, %s6678_s10  }
0x1b3b   :  { %6664 = dma.done.wait [#allocation7], 256  }
0x1b3c   :  { %6665 = vsyncadd [#allocation7], 4294967040 }
0x1b3d   :  { %6666 = dma.done.wait [#allocation12], 192  }
0x1b3e   :  { %6667 = vsyncadd [#allocation12], 4294967104 }
0x1b3f   :  { %6668 = dma.done.wait [#allocation15], 128  }
0x1b40   :  { %6669 = vsyncadd [#allocation15], 4294967168 }
0x1b41   :  { %6156 = vsyncpa [#allocation6], 1 }
0x1b42   :  { %6157 = vsyncpa [#allocation9], 1 }
0x1b43   :  { %6158 = vsyncpa [#allocation7], 1 }
0x1b44   :  { %6159 = vsyncpa [#allocation12], 1 }
0x1b45   :  { %6160 = vsyncpa [#allocation15], 1 }
0x1b46   :  { %6161 = vsyncmov [#allocation4] }
0x1b49   :  { %s6162_s2 = vpop.sfrf %6161 }
0x1b4a   :  { %p6277_p6 = scmp.ne.s32.totalorder %s6162_s2, 0 }
0x1b4c   :  { %6166 = shalt.err (%p6277_p6)  }
0x1b4d   :  { %6168 = vsyncmov [#allocation4 + $0x1] }
0x1b50   :  { %s6169_s5 = vpop.sfrf %6168 }
0x1b51   :  { %p6278_p7 = scmp.ne.s32.totalorder %s6169_s5, 0 }
0x1b53   :  { %6173 = shalt.err (%p6278_p7)  }

</bundles_post_ra>
